<compile_context>
chip_gen: v7x
topology: tpu7x:2x2x1
jax: 0.10.0
libtpu: 0.0.40
codegen_flags: <defaults>
</compile_context>

<pallas_src>
import functools

import jax
import jax.numpy as jnp
from jax.experimental import pallas as pl
from jax.experimental.pallas import tpu as pltpu


def _round_up(x, m):
    return ((x + m - 1) // m) * m


def _pad_channels(c):
    # Lane-dense (multiple of 128) only when wide enough for the padding tax
    # to be worth it; otherwise keep (roughly) the true channel count and
    # accept masked stores instead of 8x HBM writeback waste.
    return _round_up(c, 128) if c >= 64 else _round_up(c, 8)


# ---------------------------------------------------------------------------
# Pallas kernel: fused concat + double (conv3x3 stride1 pad1 + bias + ReLU)
# ---------------------------------------------------------------------------
def _fused_concat_double_conv_kernel(up_ref, skip_ref, w1_ref, b1_ref, w2_ref,
                                     b2_ref, o_ref, xpad_ref, h1pad_ref,
                                     *, H, W, C0, CS, C1P, C2P):
    """One batch element of cat([up, skip], C) -> unetConv2 (no batchnorm).

    up_ref   : (1, H, W, C0)        bf16 upsampled inputs0 (NHWC)
    skip_ref : (1, H, W, CS)        f32  skip connection    (NHWC)
    w1_ref   : (9, C0+CS, C1P)      bf16 layer-1 per-tap weights (k = 3*dy+dx)
    b1_ref   : (1, C1P)             f32  layer-1 bias
    w2_ref   : (9, C1P, C2P)        bf16 layer-2 per-tap weights
    b2_ref   : (1, C2P)             f32  layer-2 bias
    o_ref    : (1, H, W, C2P)       bf16 output
    xpad_ref : (H+2, W+2, C0+CS)    scratch: spatially padded layer-1 input
    h1pad_ref: (H+2, W+2, C1P)      scratch: spatially padded layer-1 output
    """
    CIN = C0 + CS

    def _zero_halo(ref):
        c = ref.shape[-1]
        dt = ref.dtype
        ref[0:1, :, :] = jnp.zeros((1, W + 2, c), dt)
        ref[H + 1:H + 2, :, :] = jnp.zeros((1, W + 2, c), dt)
        ref[:, 0:1, :] = jnp.zeros((H + 2, 1, c), dt)
        ref[:, W + 1:W + 2, :] = jnp.zeros((H + 2, 1, c), dt)

    # Zero only the 1-pixel halo every step; the interior is fully overwritten
    # below, so this stays correct under any megacore sharding of the grid.
    _zero_halo(xpad_ref)
    _zero_halo(h1pad_ref)

    # Fused channel concat: [upsampled inputs0 | skip] into the padded input.
    xpad_ref[1:H + 1, 1:W + 1, 0:C0] = up_ref[0]
    xpad_ref[1:H + 1, 1:W + 1, C0:CIN] = skip_ref[0].astype(xpad_ref.dtype)

    # ---- layer 1: conv3x3(pad=1) + bias + ReLU as 9 accumulating matmuls ----
    acc = jnp.zeros((H * W, C1P), jnp.float32)
    for k in range(9):
        dy, dx = k // 3, k % 3
        lhs = xpad_ref[dy:dy + H, dx:dx + W, :].reshape(H * W, CIN)
        acc = acc + jnp.dot(lhs, w1_ref[k], preferred_element_type=jnp.float32)
    h1 = jnp.maximum(acc + b1_ref[...], 0.0)
    h1pad_ref[1:H + 1, 1:W + 1, :] = (
        h1.reshape(H, W, C1P).astype(h1pad_ref.dtype))

    # ---- layer 2: same structure, K = C1P per tap ---------------------------
    acc = jnp.zeros((H * W, C2P), jnp.float32)
    for k in range(9):
        dy, dx = k // 3, k % 3
        lhs = h1pad_ref[dy:dy + H, dx:dx + W, :].reshape(H * W, C1P)
        acc = acc + jnp.dot(lhs, w2_ref[k], preferred_element_type=jnp.float32)
    h2 = jnp.maximum(acc + b2_ref[...], 0.0)
    o_ref[...] = h2.reshape(1, H, W, C2P).astype(o_ref.dtype)


# ---------------------------------------------------------------------------
# Weight packing, VMEM budget, cost estimate
# ---------------------------------------------------------------------------
def _pack_tap_weight(w_oihw, cin_p, cout_p):
    """(Cout, Cin, 3, 3) -> (9, cin_p, cout_p), tap index k = 3*dy + dx."""
    cout, cin, kh, kw = w_oihw.shape
    w = jnp.transpose(w_oihw, (2, 3, 1, 0)).reshape(kh * kw, cin, cout)
    return jnp.pad(w, ((0, 0), (0, cin_p - cin), (0, cout_p - cout)))


def _kernel_vmem_bytes(H, W, C0, CS, C1P, C2P):
    """Estimate of the kernel's VMEM footprint (scratch + 2x pipelined blocks
    + compiler-managed temporaries)."""
    cin = C0 + CS
    bf16, f32 = 2, 4
    scratch = (H + 2) * (W + 2) * (cin + C1P) * bf16
    blocks = 2 * (H * W * C0 * bf16 + H * W * CS * f32
                  + 9 * cin * C1P * bf16 + 9 * C1P * C2P * bf16
                  + (C1P + C2P) * f32 + H * W * C2P * bf16)
    temps = (H * W * (C1P + C2P) * f32
             + 2 * H * W * max(cin, C1P) * bf16
             + H * W * max(C1P, C2P) * f32)
    return scratch + blocks + temps


def _vmem_limit_bytes(estimate):
    try:
        cap = int(pltpu.get_tpu_info().vmem_capacity_bytes)
    except Exception:
        cap = 64 * 1024 * 1024        # conservative: v7x per-TensorCore VMEM
    limit = int(1.5 * estimate) + (8 << 20)
    limit = max(limit, 16 << 20)
    return min(limit, (cap * 3) // 4, 100 << 20)


# ---------------------------------------------------------------------------
# Fused concat + unetConv2 (is_batchnorm=False) via pallas_call
# ---------------------------------------------------------------------------
def fused_upconcat_double_conv(up_nhwc, skip_nhwc, params,
                               *, compute_dtype=jnp.bfloat16):
    """cat([up, skip], C) -> 2 x (conv3x3 + bias + ReLU).  NHWC in, NHWC bf16 out."""
    w1, b1, w2, b2 = params
    N, H, W, C0 = up_nhwc.shape
    Ns, Hs, Ws, CS = skip_nhwc.shape
    assert (Ns, Hs, Ws) == (N, H, W)
    cin = C0 + CS
    cout1, cout2 = w1.shape[0], w2.shape[0]
    assert w1.shape[1] == cin and w2.shape[1] == cout1

    C1P = _pad_channels(cout1)
    C2P = _pad_channels(cout2)

    w1m = _pack_tap_weight(w1, cin, C1P).astype(compute_dtype)    # (9, cin, C1P)
    b1v = jnp.pad(b1, (0, C1P - cout1)).reshape(1, C1P).astype(jnp.float32)
    w2m = _pack_tap_weight(w2, C1P, C2P).astype(compute_dtype)    # (9, C1P, C2P)
    b2v = jnp.pad(b2, (0, C2P - cout2)).reshape(1, C2P).astype(jnp.float32)

    kernel = functools.partial(_fused_concat_double_conv_kernel,
                               H=H, W=W, C0=C0, CS=CS, C1P=C1P, C2P=C2P)

    flops = 2 * N * H * W * 9 * (cin * C1P + C1P * C2P)
    bytes_accessed = (N * H * W * (C0 * 2 + CS * 4 + C2P * 2)
                      + 9 * cin * C1P * 2 + 9 * C1P * C2P * 2
                      + (C1P + C2P) * 4)

    out_p = pl.pallas_call(
        kernel,
        out_shape=jax.ShapeDtypeStruct((N, H, W, C2P), compute_dtype),
        grid_spec=pltpu.PrefetchScalarGridSpec(
            num_scalar_prefetch=0,
            grid=(N,),
            in_specs=[
                pl.BlockSpec((1, H, W, C0), lambda n: (n, 0, 0, 0)),
                pl.BlockSpec((1, H, W, CS), lambda n: (n, 0, 0, 0)),
                pl.BlockSpec((9, cin, C1P), lambda n: (0, 0, 0)),
                pl.BlockSpec((1, C1P), lambda n: (0, 0)),
                pl.BlockSpec((9, C1P, C2P), lambda n: (0, 0, 0)),
                pl.BlockSpec((1, C2P), lambda n: (0, 0)),
            ],
            out_specs=pl.BlockSpec((1, H, W, C2P), lambda n: (n, 0, 0, 0)),
            scratch_shapes=[
                pltpu.VMEM((H + 2, W + 2, cin), compute_dtype),
                pltpu.VMEM((H + 2, W + 2, C1P), compute_dtype),
            ]),
        compiler_params=pltpu.CompilerParams(
            dimension_semantics=("parallel",),
            vmem_limit_bytes=_vmem_limit_bytes(
                _kernel_vmem_bytes(H, W, C0, CS, C1P, C2P))),
        cost_estimate=pl.CostEstimate(flops=int(flops), transcendentals=0,
                                      bytes_accessed=int(bytes_accessed)),
    )(up_nhwc.astype(compute_dtype), skip_nhwc, w1m, b1v, w2m, b2v)

    return out_p[..., :cout2] if C2P != cout2 else out_p


# ---------------------------------------------------------------------------
# Wrapper: UpsamplingBilinear2d(scale=2, align_corners=True) + fused block
# ---------------------------------------------------------------------------
def _bilinear_matrix(n_in, n_out):
    """Interpolation matrix matching nn.UpsamplingBilinear2d (align_corners=True)."""
    if n_in == 1:
        return jnp.ones((n_out, 1), jnp.float32)
    s = jnp.arange(n_out, dtype=jnp.float32) * (n_in - 1) / (n_out - 1)
    i0 = jnp.clip(jnp.floor(s).astype(jnp.int32), 0, n_in - 2)
    frac = s - i0.astype(jnp.float32)
    rows = jnp.arange(n_out)
    a = jnp.zeros((n_out, n_in), jnp.float32)
    a = a.at[rows, i0].add(1.0 - frac)
    a = a.at[rows, i0 + 1].add(frac)
    return a


def _bilinear_upsample_2x(x_nhwc):
    _, h0, w0, _ = x_nhwc.shape
    ah = _bilinear_matrix(h0, 2 * h0)
    aw = _bilinear_matrix(w0, 2 * w0)
    y = jnp.einsum("Hh,nhwc->nHwc", ah, x_nhwc)
    y = jnp.einsum("Ww,nhwc->nhWc", aw, y)
    return y


def unet_up_origin_forward(inputs0_nchw, skip_nchw, params):
    """unetUp_origin.forward (is_deconv=False, n_concat=2). NCHW in, NCHW bf16 out."""
    x0 = jnp.transpose(inputs0_nchw, (0, 2, 3, 1))
    sk = jnp.transpose(skip_nchw, (0, 2, 3, 1))
    up = _bilinear_upsample_2x(x0).astype(jnp.bfloat16)   # see TODO: fuse into kernel
    y = fused_upconcat_double_conv(up, sk, params)         # Pallas fused kernel
    return jnp.transpose(y, (0, 3, 1, 2))


# ---------------------------------------------------------------------------
# Pure-JAX reference + params
# ---------------------------------------------------------------------------
def _conv3x3_relu_ref(x_nhwc, w_oihw, b):
    w_hwio = jnp.transpose(w_oihw, (2, 3, 1, 0))
    y = jax.lax.conv_general_dilated(
        x_nhwc, w_hwio, window_strides=(1, 1), padding=((1, 1), (1, 1)),
        dimension_numbers=("NHWC", "HWIO", "NHWC"),
        precision=jax.lax.Precision.HIGHEST)
    return jnp.maximum(y + b, 0.0)


def unet_up_origin_reference(inputs0_nchw, skip_nchw, params):
    w1, b1, w2, b2 = params
    x0 = jnp.transpose(inputs0_nchw, (0, 2, 3, 1))
    sk = jnp.transpose(skip_nchw, (0, 2, 3, 1))
    x = jnp.concatenate([_bilinear_upsample_2x(x0), sk], axis=-1)
    x = _conv3x3_relu_ref(x, w1, b1)
    x = _conv3x3_relu_ref(x, w2, b2)
    return jnp.transpose(x, (0, 3, 1, 2))


def make_unet_up_params(key, in_size, out_size, ks=3):
    """Deterministic kaiming-style init for the two conv layers (no BN)."""
    k1w, k1b, k2w, k2b = jax.random.split(key, 4)

    def kaiming(k, cout, cin):
        std = (2.0 / (cin * ks * ks)) ** 0.5
        return std * jax.random.normal(k, (cout, cin, ks, ks), jnp.float32)

    w1 = kaiming(k1w, out_size, in_size)
    b1 = 0.01 * jax.random.normal(k1b, (out_size,), jnp.float32)
    w2 = kaiming(k2w, out_size, out_size)
    b2 = 0.01 * jax.random.normal(k2b, (out_size,), jnp.float32)
    return (w1, b1, w2, b2)


if __name__ == "__main__":
    key = jax.random.PRNGKey(0)
    k0, k1, kp = jax.random.split(key, 3)

    # inputs0: low-res feature map; skip: high-res skip connection.
    N, C0, H0, W0 = 2, 4, 8, 8
    CS = 4
    in_size, out_size = C0 + CS, 16           # unetUp_origin(in_size=8, out_size=16)

    inputs0 = jax.random.normal(k0, (N, C0, H0, W0), jnp.float32)
    skip = jax.random.normal(k1, (N, CS, 2 * H0, 2 * W0), jnp.float32)
    params = make_unet_up_params(kp, in_size, out_size)

    fwd = jax.jit(unet_up_origin_forward)
    out = jax.block_until_ready(fwd(inputs0, skip, params))

    assert out.shape == (N, out_size, 2 * H0, 2 * W0), out.shape
    assert bool(jnp.all(out >= 0))             # ReLU output is non-negative

    ref = unet_up_origin_reference(inputs0, skip, params)
    err = float(jnp.max(jnp.abs(out.astype(jnp.float32) - ref)))
    tol = 5e-2 * max(1.0, float(jnp.max(jnp.abs(ref))))   # bf16 matmul/store tol
    assert err < tol, f"max abs error {err} (tol {tol})"

    print("KERNEL_OK")
</pallas_src>

<mosaic_0001>
module attributes {stable_mosaic.version = 11 : i64} {
  func.func private @main(%arg0: i32) attributes {dimension_semantics = [#tpu.dimension_semantics<core_parallel>], iteration_bounds = array<i64: 2>, tpu.core_type = #tpu.core_type<sc_scalar_subcore>, window_params = []} {
    return
  }
}

module attributes {stable_mosaic.version = 11 : i64} {
  func.func private @main(%arg0: i32) attributes {dimension_semantics = [#tpu.dimension_semantics<core_parallel>], iteration_bounds = array<i64: 2>, tpu.core_type = #tpu.core_type<sc_scalar_subcore>, window_params = []} {
    return
  }
}

module attributes {stable_mosaic.version = 11 : i64} {
  func.func @_fused_concat_double_conv_kernel(%arg0: i32, %arg1: memref<1x16x16x4xbf16, #tpu.memory_space<vmem>>, %arg2: memref<1x16x16x4xf32, #tpu.memory_space<vmem>>, %arg3: memref<9x8x16xbf16, #tpu.memory_space<vmem>>, %arg4: memref<1x16xf32, #tpu.memory_space<vmem>>, %arg5: memref<9x16x16xbf16, #tpu.memory_space<vmem>>, %arg6: memref<1x16xf32, #tpu.memory_space<vmem>>, %arg7: memref<1x16x16x16xbf16, #tpu.memory_space<vmem>>, %arg8: memref<18x18x8xbf16, #tpu.memory_space<vmem>>, %arg9: memref<18x18x16xbf16, #tpu.memory_space<vmem>>) attributes {dimension_semantics = [#tpu.dimension_semantics<parallel>], iteration_bounds = array<i64: 2>, scalar_prefetch = 0 : i64, scratch_operands = 2 : i64, tpu.core_type = #tpu.core_type<tc>, window_params = [{transform_indices = @transform_0, window_bounds = array<i64: 1, 16, 16, 4>}, {transform_indices = @transform_1, window_bounds = array<i64: 1, 16, 16, 4>}, {pipeline_mode = #tpu.pipeline_mode<synchronous>, transform_indices = @transform_2, window_bounds = array<i64: 9, 8, 16>}, {pipeline_mode = #tpu.pipeline_mode<synchronous>, transform_indices = @transform_3, window_bounds = array<i64: 1, 16>}, {pipeline_mode = #tpu.pipeline_mode<synchronous>, transform_indices = @transform_4, window_bounds = array<i64: 9, 16, 16>}, {pipeline_mode = #tpu.pipeline_mode<synchronous>, transform_indices = @transform_5, window_bounds = array<i64: 1, 16>}, {transform_indices = @transform_6, window_bounds = array<i64: 1, 16, 16, 16>}]} {
    %cst = arith.constant 0.000000e+00 : bf16
    %0 = vector.broadcast %cst : bf16 to vector<1x18x8xbf16>
    %c0 = arith.constant 0 : index
    %c0_0 = arith.constant 0 : index
    %c0_1 = arith.constant 0 : index
    %1 = vector.load %arg8[%c0, %c0_0, %c0_1] : memref<18x18x8xbf16, #tpu.memory_space<vmem>>, vector<1x18x8xbf16>
    tpu.vector_store %arg8[%c0, %c0_0, %c0_1], %0 {strides = array<i32>} : memref<18x18x8xbf16, #tpu.memory_space<vmem>>, vector<1x18x8xbf16>,
    %cst_2 = arith.constant 0.000000e+00 : bf16
    %2 = vector.broadcast %cst_2 : bf16 to vector<1x18x8xbf16>
    %c17 = arith.constant 17 : index
    %c0_3 = arith.constant 0 : index
    %c0_4 = arith.constant 0 : index
    %3 = vector.load %arg8[%c17, %c0_3, %c0_4] : memref<18x18x8xbf16, #tpu.memory_space<vmem>>, vector<1x18x8xbf16>
    tpu.vector_store %arg8[%c17, %c0_3, %c0_4], %2 {strides = array<i32>} : memref<18x18x8xbf16, #tpu.memory_space<vmem>>, vector<1x18x8xbf16>,
    %cst_5 = arith.constant 0.000000e+00 : bf16
    %4 = vector.broadcast %cst_5 : bf16 to vector<18x1x8xbf16>
    %c0_6 = arith.constant 0 : index
    %c0_7 = arith.constant 0 : index
    %c0_8 = arith.constant 0 : index
    %5 = vector.load %arg8[%c0_6, %c0_7, %c0_8] : memref<18x18x8xbf16, #tpu.memory_space<vmem>>, vector<18x1x8xbf16>
    tpu.vector_store %arg8[%c0_6, %c0_7, %c0_8], %4 {strides = array<i32>} : memref<18x18x8xbf16, #tpu.memory_space<vmem>>, vector<18x1x8xbf16>,
    %cst_9 = arith.constant 0.000000e+00 : bf16
    %6 = vector.broadcast %cst_9 : bf16 to vector<18x1x8xbf16>
    %c0_10 = arith.constant 0 : index
    %c17_11 = arith.constant 17 : index
    %c0_12 = arith.constant 0 : index
    %7 = vector.load %arg8[%c0_10, %c17_11, %c0_12] : memref<18x18x8xbf16, #tpu.memory_space<vmem>>, vector<18x1x8xbf16>
    tpu.vector_store %arg8[%c0_10, %c17_11, %c0_12], %6 {strides = array<i32>} : memref<18x18x8xbf16, #tpu.memory_space<vmem>>, vector<18x1x8xbf16>,
    %cst_13 = arith.constant 0.000000e+00 : bf16
    %8 = vector.broadcast %cst_13 : bf16 to vector<1x18x16xbf16>
    %c0_14 = arith.constant 0 : index
    %c0_15 = arith.constant 0 : index
    %c0_16 = arith.constant 0 : index
    %9 = vector.load %arg9[%c0_14, %c0_15, %c0_16] : memref<18x18x16xbf16, #tpu.memory_space<vmem>>, vector<1x18x16xbf16>
    tpu.vector_store %arg9[%c0_14, %c0_15, %c0_16], %8 {strides = array<i32>} : memref<18x18x16xbf16, #tpu.memory_space<vmem>>, vector<1x18x16xbf16>,
    %cst_17 = arith.constant 0.000000e+00 : bf16
    %10 = vector.broadcast %cst_17 : bf16 to vector<1x18x16xbf16>
    %c17_18 = arith.constant 17 : index
    %c0_19 = arith.constant 0 : index
    %c0_20 = arith.constant 0 : index
    %11 = vector.load %arg9[%c17_18, %c0_19, %c0_20] : memref<18x18x16xbf16, #tpu.memory_space<vmem>>, vector<1x18x16xbf16>
    tpu.vector_store %arg9[%c17_18, %c0_19, %c0_20], %10 {strides = array<i32>} : memref<18x18x16xbf16, #tpu.memory_space<vmem>>, vector<1x18x16xbf16>,
    %cst_21 = arith.constant 0.000000e+00 : bf16
    %12 = vector.broadcast %cst_21 : bf16 to vector<18x1x16xbf16>
    %c0_22 = arith.constant 0 : index
    %c0_23 = arith.constant 0 : index
    %c0_24 = arith.constant 0 : index
    %13 = vector.load %arg9[%c0_22, %c0_23, %c0_24] : memref<18x18x16xbf16, #tpu.memory_space<vmem>>, vector<18x1x16xbf16>
    tpu.vector_store %arg9[%c0_22, %c0_23, %c0_24], %12 {strides = array<i32>} : memref<18x18x16xbf16, #tpu.memory_space<vmem>>, vector<18x1x16xbf16>,
    %cst_25 = arith.constant 0.000000e+00 : bf16
    %14 = vector.broadcast %cst_25 : bf16 to vector<18x1x16xbf16>
    %c0_26 = arith.constant 0 : index
    %c17_27 = arith.constant 17 : index
    %c0_28 = arith.constant 0 : index
    %15 = vector.load %arg9[%c0_26, %c17_27, %c0_28] : memref<18x18x16xbf16, #tpu.memory_space<vmem>>, vector<18x1x16xbf16>
    tpu.vector_store %arg9[%c0_26, %c17_27, %c0_28], %14 {strides = array<i32>} : memref<18x18x16xbf16, #tpu.memory_space<vmem>>, vector<18x1x16xbf16>,
    %c0_29 = arith.constant 0 : index
    %c0_30 = arith.constant 0 : index
    %c0_31 = arith.constant 0 : index
    %c0_32 = arith.constant 0 : index
    %16 = vector.load %arg1[%c0_29, %c0_30, %c0_31, %c0_32] : memref<1x16x16x4xbf16, #tpu.memory_space<vmem>>, vector<1x16x16x4xbf16>
    %17 = vector.shape_cast %16 : vector<1x16x16x4xbf16> to vector<16x16x4xbf16>
    %c1 = arith.constant 1 : index
    %c1_33 = arith.constant 1 : index
    %c0_34 = arith.constant 0 : index
    %18 = vector.load %arg8[%c1, %c1_33, %c0_34] : memref<18x18x8xbf16, #tpu.memory_space<vmem>>, vector<16x16x4xbf16>
    tpu.vector_store %arg8[%c1, %c1_33, %c0_34], %17 {strides = array<i32>} : memref<18x18x8xbf16, #tpu.memory_space<vmem>>, vector<16x16x4xbf16>,
    %c0_35 = arith.constant 0 : index
    %c0_36 = arith.constant 0 : index
    %c0_37 = arith.constant 0 : index
    %c0_38 = arith.constant 0 : index
    %19 = vector.load %arg2[%c0_35, %c0_36, %c0_37, %c0_38] : memref<1x16x16x4xf32, #tpu.memory_space<vmem>>, vector<1x16x16x4xf32>
    %20 = vector.shape_cast %19 : vector<1x16x16x4xf32> to vector<16x16x4xf32>
    %21 = arith.truncf %20 : vector<16x16x4xf32> to vector<16x16x4xbf16>
    %c1_39 = arith.constant 1 : index
    %c1_40 = arith.constant 1 : index
    %c4 = arith.constant 4 : index
    %22 = vector.load %arg8[%c1_39, %c1_40, %c4] : memref<18x18x8xbf16, #tpu.memory_space<vmem>>, vector<16x16x4xbf16>
    tpu.vector_store %arg8[%c1_39, %c1_40, %c4], %21 {strides = array<i32>} : memref<18x18x8xbf16, #tpu.memory_space<vmem>>, vector<16x16x4xbf16>,
    %cst_41 = arith.constant 0.000000e+00 : f32
    %23 = vector.broadcast %cst_41 : f32 to vector<256x16xf32>
    %c0_42 = arith.constant 0 : index
    %c0_43 = arith.constant 0 : index
    %c0_44 = arith.constant 0 : index
    %24 = vector.load %arg8[%c0_42, %c0_43, %c0_44] : memref<18x18x8xbf16, #tpu.memory_space<vmem>>, vector<16x16x8xbf16>
    %25 = vector.shape_cast %24 : vector<16x16x8xbf16> to vector<256x8xbf16>
    %c0_45 = arith.constant 0 : index
    %c0_46 = arith.constant 0 : index
    %c0_47 = arith.constant 0 : index
    %26 = vector.load %arg3[%c0_45, %c0_46, %c0_47] : memref<9x8x16xbf16, #tpu.memory_space<vmem>>, vector<1x8x16xbf16>
    %27 = vector.shape_cast %26 : vector<1x8x16xbf16> to vector<8x16xbf16>
    %cst_48 = arith.constant dense<0.000000e+00> : vector<256x16xf32>
    %28 = tpu.matmul %25, %27, %cst_48 {dimension_numbers = #tpu.dot_dimension_numbers<[1], [0], [0], [1], [0, 0, 1, 1], [], []>} : vector<256x8xbf16>, vector<8x16xbf16>, vector<256x16xf32> -> vector<256x16xf32>
    %29 = arith.addf %23, %28 : vector<256x16xf32>
    %c0_49 = arith.constant 0 : index
    %c1_50 = arith.constant 1 : index
    %c0_51 = arith.constant 0 : index
    %30 = vector.load %arg8[%c0_49, %c1_50, %c0_51] : memref<18x18x8xbf16, #tpu.memory_space<vmem>>, vector<16x16x8xbf16>
    %31 = vector.shape_cast %30 : vector<16x16x8xbf16> to vector<256x8xbf16>
    %c1_52 = arith.constant 1 : index
    %c0_53 = arith.constant 0 : index
    %c0_54 = arith.constant 0 : index
    %32 = vector.load %arg3[%c1_52, %c0_53, %c0_54] : memref<9x8x16xbf16, #tpu.memory_space<vmem>>, vector<1x8x16xbf16>
    %33 = vector.shape_cast %32 : vector<1x8x16xbf16> to vector<8x16xbf16>
    %cst_55 = arith.constant dense<0.000000e+00> : vector<256x16xf32>
    %34 = tpu.matmul %31, %33, %cst_55 {dimension_numbers = #tpu.dot_dimension_numbers<[1], [0], [0], [1], [0, 0, 1, 1], [], []>} : vector<256x8xbf16>, vector<8x16xbf16>, vector<256x16xf32> -> vector<256x16xf32>
    %35 = arith.addf %29, %34 : vector<256x16xf32>
    %c0_56 = arith.constant 0 : index
    %c2 = arith.constant 2 : index
    %c0_57 = arith.constant 0 : index
    %36 = vector.load %arg8[%c0_56, %c2, %c0_57] : memref<18x18x8xbf16, #tpu.memory_space<vmem>>, vector<16x16x8xbf16>
    %37 = vector.shape_cast %36 : vector<16x16x8xbf16> to vector<256x8xbf16>
    %c2_58 = arith.constant 2 : index
    %c0_59 = arith.constant 0 : index
    %c0_60 = arith.constant 0 : index
    %38 = vector.load %arg3[%c2_58, %c0_59, %c0_60] : memref<9x8x16xbf16, #tpu.memory_space<vmem>>, vector<1x8x16xbf16>
    %39 = vector.shape_cast %38 : vector<1x8x16xbf16> to vector<8x16xbf16>
    %cst_61 = arith.constant dense<0.000000e+00> : vector<256x16xf32>
    %40 = tpu.matmul %37, %39, %cst_61 {dimension_numbers = #tpu.dot_dimension_numbers<[1], [0], [0], [1], [0, 0, 1, 1], [], []>} : vector<256x8xbf16>, vector<8x16xbf16>, vector<256x16xf32> -> vector<256x16xf32>
    %41 = arith.addf %35, %40 : vector<256x16xf32>
    %c1_62 = arith.constant 1 : index
    %c0_63 = arith.constant 0 : index
    %c0_64 = arith.constant 0 : index
    %42 = vector.load %arg8[%c1_62, %c0_63, %c0_64] : memref<18x18x8xbf16, #tpu.memory_space<vmem>>, vector<16x16x8xbf16>
    %43 = vector.shape_cast %42 : vector<16x16x8xbf16> to vector<256x8xbf16>
    %c3 = arith.constant 3 : index
    %c0_65 = arith.constant 0 : index
    %c0_66 = arith.constant 0 : index
    %44 = vector.load %arg3[%c3, %c0_65, %c0_66] : memref<9x8x16xbf16, #tpu.memory_space<vmem>>, vector<1x8x16xbf16>
    %45 = vector.shape_cast %44 : vector<1x8x16xbf16> to vector<8x16xbf16>
    %cst_67 = arith.constant dense<0.000000e+00> : vector<256x16xf32>
    %46 = tpu.matmul %43, %45, %cst_67 {dimension_numbers = #tpu.dot_dimension_numbers<[1], [0], [0], [1], [0, 0, 1, 1], [], []>} : vector<256x8xbf16>, vector<8x16xbf16>, vector<256x16xf32> -> vector<256x16xf32>
    %47 = arith.addf %41, %46 : vector<256x16xf32>
    %c1_68 = arith.constant 1 : index
    %c1_69 = arith.constant 1 : index
    %c0_70 = arith.constant 0 : index
    %48 = vector.load %arg8[%c1_68, %c1_69, %c0_70] : memref<18x18x8xbf16, #tpu.memory_space<vmem>>, vector<16x16x8xbf16>
    %49 = vector.shape_cast %48 : vector<16x16x8xbf16> to vector<256x8xbf16>
    %c4_71 = arith.constant 4 : index
    %c0_72 = arith.constant 0 : index
    %c0_73 = arith.constant 0 : index
    %50 = vector.load %arg3[%c4_71, %c0_72, %c0_73] : memref<9x8x16xbf16, #tpu.memory_space<vmem>>, vector<1x8x16xbf16>
    %51 = vector.shape_cast %50 : vector<1x8x16xbf16> to vector<8x16xbf16>
    %cst_74 = arith.constant dense<0.000000e+00> : vector<256x16xf32>
    %52 = tpu.matmul %49, %51, %cst_74 {dimension_numbers = #tpu.dot_dimension_numbers<[1], [0], [0], [1], [0, 0, 1, 1], [], []>} : vector<256x8xbf16>, vector<8x16xbf16>, vector<256x16xf32> -> vector<256x16xf32>
    %53 = arith.addf %47, %52 : vector<256x16xf32>
    %c1_75 = arith.constant 1 : index
    %c2_76 = arith.constant 2 : index
    %c0_77 = arith.constant 0 : index
    %54 = vector.load %arg8[%c1_75, %c2_76, %c0_77] : memref<18x18x8xbf16, #tpu.memory_space<vmem>>, vector<16x16x8xbf16>
    %55 = vector.shape_cast %54 : vector<16x16x8xbf16> to vector<256x8xbf16>
    %c5 = arith.constant 5 : index
    %c0_78 = arith.constant 0 : index
    %c0_79 = arith.constant 0 : index
    %56 = vector.load %arg3[%c5, %c0_78, %c0_79] : memref<9x8x16xbf16, #tpu.memory_space<vmem>>, vector<1x8x16xbf16>
    %57 = vector.shape_cast %56 : vector<1x8x16xbf16> to vector<8x16xbf16>
    %cst_80 = arith.constant dense<0.000000e+00> : vector<256x16xf32>
    %58 = tpu.matmul %55, %57, %cst_80 {dimension_numbers = #tpu.dot_dimension_numbers<[1], [0], [0], [1], [0, 0, 1, 1], [], []>} : vector<256x8xbf16>, vector<8x16xbf16>, vector<256x16xf32> -> vector<256x16xf32>
    %59 = arith.addf %53, %58 : vector<256x16xf32>
    %c2_81 = arith.constant 2 : index
    %c0_82 = arith.constant 0 : index
    %c0_83 = arith.constant 0 : index
    %60 = vector.load %arg8[%c2_81, %c0_82, %c0_83] : memref<18x18x8xbf16, #tpu.memory_space<vmem>>, vector<16x16x8xbf16>
    %61 = vector.shape_cast %60 : vector<16x16x8xbf16> to vector<256x8xbf16>
    %c6 = arith.constant 6 : index
    %c0_84 = arith.constant 0 : index
    %c0_85 = arith.constant 0 : index
    %62 = vector.load %arg3[%c6, %c0_84, %c0_85] : memref<9x8x16xbf16, #tpu.memory_space<vmem>>, vector<1x8x16xbf16>
    %63 = vector.shape_cast %62 : vector<1x8x16xbf16> to vector<8x16xbf16>
    %cst_86 = arith.constant dense<0.000000e+00> : vector<256x16xf32>
    %64 = tpu.matmul %61, %63, %cst_86 {dimension_numbers = #tpu.dot_dimension_numbers<[1], [0], [0], [1], [0, 0, 1, 1], [], []>} : vector<256x8xbf16>, vector<8x16xbf16>, vector<256x16xf32> -> vector<256x16xf32>
    %65 = arith.addf %59, %64 : vector<256x16xf32>
    %c2_87 = arith.constant 2 : index
    %c1_88 = arith.constant 1 : index
    %c0_89 = arith.constant 0 : index
    %66 = vector.load %arg8[%c2_87, %c1_88, %c0_89] : memref<18x18x8xbf16, #tpu.memory_space<vmem>>, vector<16x16x8xbf16>
    %67 = vector.shape_cast %66 : vector<16x16x8xbf16> to vector<256x8xbf16>
    %c7 = arith.constant 7 : index
    %c0_90 = arith.constant 0 : index
    %c0_91 = arith.constant 0 : index
    %68 = vector.load %arg3[%c7, %c0_90, %c0_91] : memref<9x8x16xbf16, #tpu.memory_space<vmem>>, vector<1x8x16xbf16>
    %69 = vector.shape_cast %68 : vector<1x8x16xbf16> to vector<8x16xbf16>
    %cst_92 = arith.constant dense<0.000000e+00> : vector<256x16xf32>
    %70 = tpu.matmul %67, %69, %cst_92 {dimension_numbers = #tpu.dot_dimension_numbers<[1], [0], [0], [1], [0, 0, 1, 1], [], []>} : vector<256x8xbf16>, vector<8x16xbf16>, vector<256x16xf32> -> vector<256x16xf32>
    %71 = arith.addf %65, %70 : vector<256x16xf32>
    %c2_93 = arith.constant 2 : index
    %c2_94 = arith.constant 2 : index
    %c0_95 = arith.constant 0 : index
    %72 = vector.load %arg8[%c2_93, %c2_94, %c0_95] : memref<18x18x8xbf16, #tpu.memory_space<vmem>>, vector<16x16x8xbf16>
    %73 = vector.shape_cast %72 : vector<16x16x8xbf16> to vector<256x8xbf16>
    %c8 = arith.constant 8 : index
    %c0_96 = arith.constant 0 : index
    %c0_97 = arith.constant 0 : index
    %74 = vector.load %arg3[%c8, %c0_96, %c0_97] : memref<9x8x16xbf16, #tpu.memory_space<vmem>>, vector<1x8x16xbf16>
    %75 = vector.shape_cast %74 : vector<1x8x16xbf16> to vector<8x16xbf16>
    %cst_98 = arith.constant dense<0.000000e+00> : vector<256x16xf32>
    %76 = tpu.matmul %73, %75, %cst_98 {dimension_numbers = #tpu.dot_dimension_numbers<[1], [0], [0], [1], [0, 0, 1, 1], [], []>} : vector<256x8xbf16>, vector<8x16xbf16>, vector<256x16xf32> -> vector<256x16xf32>
    %77 = arith.addf %71, %76 : vector<256x16xf32>
    %c0_99 = arith.constant 0 : index
    %c0_100 = arith.constant 0 : index
    %78 = vector.load %arg4[%c0_99, %c0_100] : memref<1x16xf32, #tpu.memory_space<vmem>>, vector<1x16xf32>
    %79 = vector.broadcast %78 : vector<1x16xf32> to vector<256x16xf32>
    %80 = arith.addf %77, %79 : vector<256x16xf32>
    %cst_101 = arith.constant 0.000000e+00 : f32
    %81 = vector.broadcast %cst_101 : f32 to vector<256x16xf32>
    %82 = arith.maximumf %80, %81 : vector<256x16xf32>
    %83 = vector.shape_cast %82 : vector<256x16xf32> to vector<16x16x16xf32>
    %84 = arith.truncf %83 : vector<16x16x16xf32> to vector<16x16x16xbf16>
    %c1_102 = arith.constant 1 : index
    %c1_103 = arith.constant 1 : index
    %c0_104 = arith.constant 0 : index
    %85 = vector.load %arg9[%c1_102, %c1_103, %c0_104] : memref<18x18x16xbf16, #tpu.memory_space<vmem>>, vector<16x16x16xbf16>
    tpu.vector_store %arg9[%c1_102, %c1_103, %c0_104], %84 {strides = array<i32>} : memref<18x18x16xbf16, #tpu.memory_space<vmem>>, vector<16x16x16xbf16>,
    %cst_105 = arith.constant 0.000000e+00 : f32
    %86 = vector.broadcast %cst_105 : f32 to vector<256x16xf32>
    %c0_106 = arith.constant 0 : index
    %c0_107 = arith.constant 0 : index
    %c0_108 = arith.constant 0 : index
    %87 = vector.load %arg9[%c0_106, %c0_107, %c0_108] : memref<18x18x16xbf16, #tpu.memory_space<vmem>>, vector<16x16x16xbf16>
    %88 = vector.shape_cast %87 : vector<16x16x16xbf16> to vector<256x16xbf16>
    %c0_109 = arith.constant 0 : index
    %c0_110 = arith.constant 0 : index
    %c0_111 = arith.constant 0 : index
    %89 = vector.load %arg5[%c0_109, %c0_110, %c0_111] : memref<9x16x16xbf16, #tpu.memory_space<vmem>>, vector<1x16x16xbf16>
    %90 = vector.shape_cast %89 : vector<1x16x16xbf16> to vector<16x16xbf16>
    %cst_112 = arith.constant dense<0.000000e+00> : vector<256x16xf32>
    %91 = tpu.matmul %88, %90, %cst_112 {dimension_numbers = #tpu.dot_dimension_numbers<[1], [0], [0], [1], [0, 0, 1, 1], [], []>} : vector<256x16xbf16>, vector<16x16xbf16>, vector<256x16xf32> -> vector<256x16xf32>
    %92 = arith.addf %86, %91 : vector<256x16xf32>
    %c0_113 = arith.constant 0 : index
    %c1_114 = arith.constant 1 : index
    %c0_115 = arith.constant 0 : index
    %93 = vector.load %arg9[%c0_113, %c1_114, %c0_115] : memref<18x18x16xbf16, #tpu.memory_space<vmem>>, vector<16x16x16xbf16>
    %94 = vector.shape_cast %93 : vector<16x16x16xbf16> to vector<256x16xbf16>
    %c1_116 = arith.constant 1 : index
    %c0_117 = arith.constant 0 : index
    %c0_118 = arith.constant 0 : index
    %95 = vector.load %arg5[%c1_116, %c0_117, %c0_118] : memref<9x16x16xbf16, #tpu.memory_space<vmem>>, vector<1x16x16xbf16>
    %96 = vector.shape_cast %95 : vector<1x16x16xbf16> to vector<16x16xbf16>
    %cst_119 = arith.constant dense<0.000000e+00> : vector<256x16xf32>
    %97 = tpu.matmul %94, %96, %cst_119 {dimension_numbers = #tpu.dot_dimension_numbers<[1], [0], [0], [1], [0, 0, 1, 1], [], []>} : vector<256x16xbf16>, vector<16x16xbf16>, vector<256x16xf32> -> vector<256x16xf32>
    %98 = arith.addf %92, %97 : vector<256x16xf32>
    %c0_120 = arith.constant 0 : index
    %c2_121 = arith.constant 2 : index
    %c0_122 = arith.constant 0 : index
    %99 = vector.load %arg9[%c0_120, %c2_121, %c0_122] : memref<18x18x16xbf16, #tpu.memory_space<vmem>>, vector<16x16x16xbf16>
    %100 = vector.shape_cast %99 : vector<16x16x16xbf16> to vector<256x16xbf16>
    %c2_123 = arith.constant 2 : index
    %c0_124 = arith.constant 0 : index
    %c0_125 = arith.constant 0 : index
    %101 = vector.load %arg5[%c2_123, %c0_124, %c0_125] : memref<9x16x16xbf16, #tpu.memory_space<vmem>>, vector<1x16x16xbf16>
    %102 = vector.shape_cast %101 : vector<1x16x16xbf16> to vector<16x16xbf16>
    %cst_126 = arith.constant dense<0.000000e+00> : vector<256x16xf32>
    %103 = tpu.matmul %100, %102, %cst_126 {dimension_numbers = #tpu.dot_dimension_numbers<[1], [0], [0], [1], [0, 0, 1, 1], [], []>} : vector<256x16xbf16>, vector<16x16xbf16>, vector<256x16xf32> -> vector<256x16xf32>
    %104 = arith.addf %98, %103 : vector<256x16xf32>
    %c1_127 = arith.constant 1 : index
    %c0_128 = arith.constant 0 : index
    %c0_129 = arith.constant 0 : index
    %105 = vector.load %arg9[%c1_127, %c0_128, %c0_129] : memref<18x18x16xbf16, #tpu.memory_space<vmem>>, vector<16x16x16xbf16>
    %106 = vector.shape_cast %105 : vector<16x16x16xbf16> to vector<256x16xbf16>
    %c3_130 = arith.constant 3 : index
    %c0_131 = arith.constant 0 : index
    %c0_132 = arith.constant 0 : index
    %107 = vector.load %arg5[%c3_130, %c0_131, %c0_132] : memref<9x16x16xbf16, #tpu.memory_space<vmem>>, vector<1x16x16xbf16>
    %108 = vector.shape_cast %107 : vector<1x16x16xbf16> to vector<16x16xbf16>
    %cst_133 = arith.constant dense<0.000000e+00> : vector<256x16xf32>
    %109 = tpu.matmul %106, %108, %cst_133 {dimension_numbers = #tpu.dot_dimension_numbers<[1], [0], [0], [1], [0, 0, 1, 1], [], []>} : vector<256x16xbf16>, vector<16x16xbf16>, vector<256x16xf32> -> vector<256x16xf32>
    %110 = arith.addf %104, %109 : vector<256x16xf32>
    %c1_134 = arith.constant 1 : index
    %c1_135 = arith.constant 1 : index
    %c0_136 = arith.constant 0 : index
    %111 = vector.load %arg9[%c1_134, %c1_135, %c0_136] : memref<18x18x16xbf16, #tpu.memory_space<vmem>>, vector<16x16x16xbf16>
    %112 = vector.shape_cast %111 : vector<16x16x16xbf16> to vector<256x16xbf16>
    %c4_137 = arith.constant 4 : index
    %c0_138 = arith.constant 0 : index
    %c0_139 = arith.constant 0 : index
    %113 = vector.load %arg5[%c4_137, %c0_138, %c0_139] : memref<9x16x16xbf16, #tpu.memory_space<vmem>>, vector<1x16x16xbf16>
    %114 = vector.shape_cast %113 : vector<1x16x16xbf16> to vector<16x16xbf16>
    %cst_140 = arith.constant dense<0.000000e+00> : vector<256x16xf32>
    %115 = tpu.matmul %112, %114, %cst_140 {dimension_numbers = #tpu.dot_dimension_numbers<[1], [0], [0], [1], [0, 0, 1, 1], [], []>} : vector<256x16xbf16>, vector<16x16xbf16>, vector<256x16xf32> -> vector<256x16xf32>
    %116 = arith.addf %110, %115 : vector<256x16xf32>
    %c1_141 = arith.constant 1 : index
    %c2_142 = arith.constant 2 : index
    %c0_143 = arith.constant 0 : index
    %117 = vector.load %arg9[%c1_141, %c2_142, %c0_143] : memref<18x18x16xbf16, #tpu.memory_space<vmem>>, vector<16x16x16xbf16>
    %118 = vector.shape_cast %117 : vector<16x16x16xbf16> to vector<256x16xbf16>
    %c5_144 = arith.constant 5 : index
    %c0_145 = arith.constant 0 : index
    %c0_146 = arith.constant 0 : index
    %119 = vector.load %arg5[%c5_144, %c0_145, %c0_146] : memref<9x16x16xbf16, #tpu.memory_space<vmem>>, vector<1x16x16xbf16>
    %120 = vector.shape_cast %119 : vector<1x16x16xbf16> to vector<16x16xbf16>
    %cst_147 = arith.constant dense<0.000000e+00> : vector<256x16xf32>
    %121 = tpu.matmul %118, %120, %cst_147 {dimension_numbers = #tpu.dot_dimension_numbers<[1], [0], [0], [1], [0, 0, 1, 1], [], []>} : vector<256x16xbf16>, vector<16x16xbf16>, vector<256x16xf32> -> vector<256x16xf32>
    %122 = arith.addf %116, %121 : vector<256x16xf32>
    %c2_148 = arith.constant 2 : index
    %c0_149 = arith.constant 0 : index
    %c0_150 = arith.constant 0 : index
    %123 = vector.load %arg9[%c2_148, %c0_149, %c0_150] : memref<18x18x16xbf16, #tpu.memory_space<vmem>>, vector<16x16x16xbf16>
    %124 = vector.shape_cast %123 : vector<16x16x16xbf16> to vector<256x16xbf16>
    %c6_151 = arith.constant 6 : index
    %c0_152 = arith.constant 0 : index
    %c0_153 = arith.constant 0 : index
    %125 = vector.load %arg5[%c6_151, %c0_152, %c0_153] : memref<9x16x16xbf16, #tpu.memory_space<vmem>>, vector<1x16x16xbf16>
    %126 = vector.shape_cast %125 : vector<1x16x16xbf16> to vector<16x16xbf16>
    %cst_154 = arith.constant dense<0.000000e+00> : vector<256x16xf32>
    %127 = tpu.matmul %124, %126, %cst_154 {dimension_numbers = #tpu.dot_dimension_numbers<[1], [0], [0], [1], [0, 0, 1, 1], [], []>} : vector<256x16xbf16>, vector<16x16xbf16>, vector<256x16xf32> -> vector<256x16xf32>
    %128 = arith.addf %122, %127 : vector<256x16xf32>
    %c2_155 = arith.constant 2 : index
    %c1_156 = arith.constant 1 : index
    %c0_157 = arith.constant 0 : index
    %129 = vector.load %arg9[%c2_155, %c1_156, %c0_157] : memref<18x18x16xbf16, #tpu.memory_space<vmem>>, vector<16x16x16xbf16>
    %130 = vector.shape_cast %129 : vector<16x16x16xbf16> to vector<256x16xbf16>
    %c7_158 = arith.constant 7 : index
    %c0_159 = arith.constant 0 : index
    %c0_160 = arith.constant 0 : index
    %131 = vector.load %arg5[%c7_158, %c0_159, %c0_160] : memref<9x16x16xbf16, #tpu.memory_space<vmem>>, vector<1x16x16xbf16>
    %132 = vector.shape_cast %131 : vector<1x16x16xbf16> to vector<16x16xbf16>
    %cst_161 = arith.constant dense<0.000000e+00> : vector<256x16xf32>
    %133 = tpu.matmul %130, %132, %cst_161 {dimension_numbers = #tpu.dot_dimension_numbers<[1], [0], [0], [1], [0, 0, 1, 1], [], []>} : vector<256x16xbf16>, vector<16x16xbf16>, vector<256x16xf32> -> vector<256x16xf32>
    %134 = arith.addf %128, %133 : vector<256x16xf32>
    %c2_162 = arith.constant 2 : index
    %c2_163 = arith.constant 2 : index
    %c0_164 = arith.constant 0 : index
    %135 = vector.load %arg9[%c2_162, %c2_163, %c0_164] : memref<18x18x16xbf16, #tpu.memory_space<vmem>>, vector<16x16x16xbf16>
    %136 = vector.shape_cast %135 : vector<16x16x16xbf16> to vector<256x16xbf16>
    %c8_165 = arith.constant 8 : index
    %c0_166 = arith.constant 0 : index
    %c0_167 = arith.constant 0 : index
    %137 = vector.load %arg5[%c8_165, %c0_166, %c0_167] : memref<9x16x16xbf16, #tpu.memory_space<vmem>>, vector<1x16x16xbf16>
    %138 = vector.shape_cast %137 : vector<1x16x16xbf16> to vector<16x16xbf16>
    %cst_168 = arith.constant dense<0.000000e+00> : vector<256x16xf32>
    %139 = tpu.matmul %136, %138, %cst_168 {dimension_numbers = #tpu.dot_dimension_numbers<[1], [0], [0], [1], [0, 0, 1, 1], [], []>} : vector<256x16xbf16>, vector<16x16xbf16>, vector<256x16xf32> -> vector<256x16xf32>
    %140 = arith.addf %134, %139 : vector<256x16xf32>
    %c0_169 = arith.constant 0 : index
    %c0_170 = arith.constant 0 : index
    %141 = vector.load %arg6[%c0_169, %c0_170] : memref<1x16xf32, #tpu.memory_space<vmem>>, vector<1x16xf32>
    %142 = vector.broadcast %141 : vector<1x16xf32> to vector<256x16xf32>
    %143 = arith.addf %140, %142 : vector<256x16xf32>
    %cst_171 = arith.constant 0.000000e+00 : f32
    %144 = vector.broadcast %cst_171 : f32 to vector<256x16xf32>
    %145 = arith.maximumf %143, %144 : vector<256x16xf32>
    %146 = vector.shape_cast %145 : vector<256x16xf32> to vector<1x16x16x16xf32>
    %147 = arith.truncf %146 : vector<1x16x16x16xf32> to vector<1x16x16x16xbf16>
    %c0_172 = arith.constant 0 : index
    %c0_173 = arith.constant 0 : index
    %c0_174 = arith.constant 0 : index
    %c0_175 = arith.constant 0 : index
    %148 = vector.load %arg7[%c0_172, %c0_173, %c0_174, %c0_175] : memref<1x16x16x16xbf16, #tpu.memory_space<vmem>>, vector<1x16x16x16xbf16>
    tpu.vector_store %arg7[%c0_172, %c0_173, %c0_174, %c0_175], %147 {strides = array<i32>} : memref<1x16x16x16xbf16, #tpu.memory_space<vmem>>, vector<1x16x16x16xbf16>,
    return
  }
  func.func @transform_0(%arg0: i32) -> (i32, i32, i32, i32) {
    %c0_i32 = arith.constant 0 : i32
    %c0_i32_0 = arith.constant 0 : i32
    %c0_i32_1 = arith.constant 0 : i32
    %c0_i32_2 = arith.constant 0 : i32
    return %arg0, %c0_i32, %c0_i32_0, %c0_i32_1 : i32, i32, i32, i32
  }
  func.func @transform_1(%arg0: i32) -> (i32, i32, i32, i32) {
    %c0_i32 = arith.constant 0 : i32
    %c0_i32_0 = arith.constant 0 : i32
    %c0_i32_1 = arith.constant 0 : i32
    %c0_i32_2 = arith.constant 0 : i32
    return %arg0, %c0_i32, %c0_i32_0, %c0_i32_1 : i32, i32, i32, i32
  }
  func.func @transform_2(%arg0: i32) -> (i32, i32, i32) {
    %c0_i32 = arith.constant 0 : i32
    %c0_i32_0 = arith.constant 0 : i32
    %c0_i32_1 = arith.constant 0 : i32
    %c0_i32_2 = arith.constant 0 : i32
    return %c0_i32, %c0_i32_0, %c0_i32_1 : i32, i32, i32
  }
  func.func @transform_3(%arg0: i32) -> (i32, i32) {
    %c0_i32 = arith.constant 0 : i32
    %c0_i32_0 = arith.constant 0 : i32
    %c0_i32_1 = arith.constant 0 : i32
    return %c0_i32, %c0_i32_0 : i32, i32
  }
  func.func @transform_4(%arg0: i32) -> (i32, i32, i32) {
    %c0_i32 = arith.constant 0 : i32
    %c0_i32_0 = arith.constant 0 : i32
    %c0_i32_1 = arith.constant 0 : i32
    %c0_i32_2 = arith.constant 0 : i32
    return %c0_i32, %c0_i32_0, %c0_i32_1 : i32, i32, i32
  }
  func.func @transform_5(%arg0: i32) -> (i32, i32) {
    %c0_i32 = arith.constant 0 : i32
    %c0_i32_0 = arith.constant 0 : i32
    %c0_i32_1 = arith.constant 0 : i32
    return %c0_i32, %c0_i32_0 : i32, i32
  }
  func.func @transform_6(%arg0: i32) -> (i32, i32, i32, i32) {
    %c0_i32 = arith.constant 0 : i32
    %c0_i32_0 = arith.constant 0 : i32
    %c0_i32_1 = arith.constant 0 : i32
    %c0_i32_2 = arith.constant 0 : i32
    return %arg0, %c0_i32, %c0_i32_0, %c0_i32_1 : i32, i32, i32, i32
  }
}

</mosaic_0001>

<bundles_post_ra>
// kernel: unet_up_origin_forward.1
= control target key start
LH: loop header
LB: loop body
LE: loop exit
PB: predicated region body
PF: predicated region fallthrough
CT: control target
= control target key end

     0   :  { %s14227_s21 = smov 0   ;;  %s18684_s0 = inlined_call_operand.vmem [shape: bf16[2,16,16,4], index: 0, kind: input, shape index: {}]   ;;  %s18685_s1 = inlined_call_operand.vmem [shape: f32[2,16,16,4], index: 1, kind: input, shape index: {}]   ;;  %s18686_s2 = inlined_call_operand.vmem [shape: bf16[9,8,16], index: 2, kind: input, shape index: {}]   ;;  %s18687_s3 = inlined_call_operand.vmem [shape: f32[1,16], index: 3, kind: input, shape index: {}]   ;;  %s18688_s4 = inlined_call_operand.vmem [shape: bf16[9,16,16], index: 4, kind: input, shape index: {}]   ;;  %s18689_s5 = inlined_call_operand.vmem [shape: f32[1,16], index: 5, kind: input, shape index: {}]   ;;  %s18690_s6 = inlined_call_operand.vmem [shape: bf16[2,16,16,16], index: 6, kind: output, shape index: {}]  }
   0x1 LB: > { %s11693_s22 = sadd.s32 4294967295, %s14188_s21   ;;  %p11697_p0 = scmp.ge.s32.totalorder %s14188_s21, 1  ;;  %s14188_s21 = sphi %s14227_s21, %s16_s21  }
   0x2   : > { %p222_p1 = scmp.lt.s32.totalorder %s14188_s21, 3 }
   0x4   : > { %p223_p2 = pnand %p11697_p0, %p222_p1 }
   0x6   : > { %226 = sbr.rel (%p223_p2) target bundleno = 1810 (0x712), region = 44 }
   0xd   : > { %p257_p3 = scmp.lt.s32.totalorder %s11693_s22, 1  ;;  %vm276_vm0 = vcmask 57344   ;;  %vm18693_vm1 = vsmask.f32 7938  ;;  %v344_v0 = vld [vmem:[#allocation2 + $0x14] sm:$0x1] }
   0xe   : > { %vm283_vm2 = vsmask.f32 256  ;;  %vm14239_vm3 = vmand %vm276_vm0, %vm18693_vm1  ;;  %v18872_v1 = vmov 0  ;;  %v288_v2 = vld [vmem:[#allocation2 + $0xc] sm:$0x1]  ;;  %vm273_vm4 = vcmask 60416  }
   0xf   : > { %s19334_s22 = smov (!%p257_p3, %s11693_s22), 1  ;;  %v18873_v1 = vsel %vm14239_vm3, 4294967295, %v18872_v1  ;;  %v345_v3 = vsel %vm14239_vm3, 0, %v344_v0  ;;  %v291_v4 = vld [vmem:[#allocation2 + $0x18] sm:$0x1]  ;;  %vm14255_vm5 = vmand %vm276_vm0, %vm283_vm2  ;;  %v18875_v8 = vmov 0 }
  0x10   : > { %18874 = vst [vmem:[#allocation4_spill] sm:$0xff] %v18873_v1  ;;  %v350_v5 = vld [vmem:[#allocation2 + $0x2c] sm:$0x1]  ;;  %s12510_s23 = sshll.u32 %s19334_s22, 8  ;;  %346 = vst [vmem:[#allocation2 + $0x14] sm:$0x1] %v345_v3 }
  0x11   : > { %v351_v6 = vsel %vm14239_vm3, 0, %v350_v5  ;;  %v294_v7 = vld [vmem:[#allocation2 + $0x24] sm:$0x1]  ;;  %s14251_s26 = scalar_lea.vmem %s18685_s1, %s12510_s23  ;;  %v18876_v8 = vsel %vm14255_vm5, 4294967295, %v18875_v8  ;;  %v347_v9 = vld [vmem:[#allocation2 + $0x20] sm:$0x1] }
  0x12   : > { %18877 = vst [vmem:[#allocation5_spill] sm:$0xff] %v18876_v8  ;;  %352 = vst [vmem:[#allocation2 + $0x2c] sm:$0x1] %v351_v6  ;;  %v297_v10 = vld [vmem:[#allocation2 + $0x30] sm:$0x1]  ;;  %v18691_v11 = vmov 0  }
  0x13   : > { %274 = vst.msk [vmem:[#allocation2] sm:$0xf] %vm273_vm4, %v18691_v11  ;;  %275 = vst.msk [vmem:[#allocation2 + $0x4] sm:$0xf] %vm273_vm4, %v18691_v11  ;;  %v988_v12 = vld [vmem:[%s14251_s26 + $0x8] sm:$0xff]  ;;  %v987_v13 = vld [vmem:[%s14251_s26] sm:$0xff] }
  0x14   : > { %277 = vst.msk [vmem:[#allocation2 + $0x8] sm:$0x1] %vm276_vm0, %v18691_v11  ;;  %281 = vst.msk [vmem:[#allocation2 + $0xd4] sm:$0x1] %vm276_vm0, %v18691_v11  ;;  %v989_v14 = vld [vmem:[%s14251_s26 + $0x10] sm:$0xff]  ;;  %v289_v15 = vsel %vm14255_vm5, 0, %v288_v2  ;;  %v12513_v18 = vpack.c.bf16 %v988_v12, %v988_v12  ;;  %v12512_v19 = vpack.c.bf16 %v987_v13, %v987_v13 }
  0x15   : > { %279 = vst.msk [vmem:[#allocation2 + $0xcc] sm:$0xf] %vm273_vm4, %v18691_v11  ;;  %280 = vst.msk [vmem:[#allocation2 + $0xd0] sm:$0xf] %vm273_vm4, %v18691_v11  ;;  %v292_v16 = vsel %vm14255_vm5, 0, %v291_v4  ;;  %v295_v17 = vsel %vm14255_vm5, 0, %v294_v7  ;;  %v12514_v20 = vpack.c.bf16 %v989_v14, %v989_v14 }
  0x16   : > { %v992_v21 = vld [vmem:[%s14251_s26 + $0x28] sm:$0xff]  ;;  %v991_v22 = vld [vmem:[%s14251_s26 + $0x20] sm:$0xff]  ;;  %v990_v23 = vld [vmem:[%s14251_s26 + $0x18] sm:$0xff]  ;;  %290 = vst [vmem:[#allocation2 + $0xc] sm:$0x1] %v289_v15  ;;  %v348_v24 = vsel %vm14239_vm3, 0, %v347_v9 }
  0x17   : > { %293 = vst [vmem:[#allocation2 + $0x18] sm:$0x1] %v292_v16  ;;  %296 = vst [vmem:[#allocation2 + $0x24] sm:$0x1] %v295_v17  ;;  %v12517_v25 = vpack.c.bf16 %v992_v21, %v992_v21  ;;  %v12516_v26 = vpack.c.bf16 %v991_v22, %v991_v22  ;;  %v12515_v27 = vpack.c.bf16 %v990_v23, %v990_v23  ;;  %v298_v28 = vsel %vm14255_vm5, 0, %v297_v10  ;;  %v993_v42 = vld [vmem:[%s14251_s26 + $0x30] sm:$0xff] }
  0x18   : > { %349 = vst [vmem:[#allocation2 + $0x20] sm:$0x1] %v348_v24  ;;  %v1124_v29 = vshrl.u32 %v12513_v18, 16  ;;  %v1116_v30 = vshrl.u32 %v12512_v19, 16  ;;  %v1119_v31 = vshll.u32 %v12512_v19, 16  ;;  %v1133_v32 = vshrl.u32 %v12514_v20, 16 }
  0x19   : > { %299 = vst [vmem:[#allocation2 + $0x30] sm:$0x1] %v298_v28  ;;  %v1158_v33 = vshrl.u32 %v12517_v25, 16  ;;  %v1150_v34 = vshrl.u32 %v12516_v26, 16  ;;  %v1136_v37 = vshll.u32 %v12514_v20, 16  ;;  %v1141_v38 = vshrl.u32 %v12515_v27, 16 }
  0x1a   : > { %v1126_v35 = vrot.slane %v1124_v29, 7  ;;  %v1118_v36 = vrot.slane %v1116_v30, 7  ;;  %v1127_v39 = vshll.u32 %v12513_v18, 16  ;;  %v1135_v40 = vrot.slane %v1133_v32, 7  ;;  %v995_v47 = vld [vmem:[%s14251_s26 + $0x40] sm:$0xff]  ;;  %v994_v50 = vld [vmem:[%s14251_s26 + $0x38] sm:$0xff] }
  0x1b   : > { %v1160_v41 = vrot.slane %v1158_v33, 7  ;;  %v1152_v45 = vrot.slane %v1150_v34, 7  ;;  %v1153_v46 = vshll.u32 %v12516_v26, 16  ;;  %vm547_vm6 = vsmask.f32 4368  ;;  %v996_v51 = vld [vmem:[%s14251_s26 + $0x48] sm:$0xff] }
  0x1c   : > { %v1131_v43 = vrot.slane %v1126_v35, 4  ;;  %v1121_v44 = vor.u32 %v1119_v31, %v1118_v36  ;;  %v14285_v48 = vrot.slane %v1141_v38, 7  ;;  %v1144_v49 = vshll.u32 %v12515_v27, 16  ;;  %s14191_s27 = smov 4   ;;  %vm14293_vm7 = vmor %vm283_vm2, %vm547_vm6  ;;  %v997_v63 = vld [vmem:[%s14251_s26 + $0x50] sm:$0xff]  ;;  %v999_v13 = vld [vmem:[%s14251_s26 + $0x60] sm:$0xff] }
  0x1d   : > { %v1138_v52 = vor.u32 %v1136_v37, %v1135_v40  ;;  %v1165_v53 = vrot.slane %v1160_v41, 4  ;;  %v12518_v54 = vpack.c.bf16 %v993_v42, %v993_v42  ;;  %v1129_v55 = vor.u32 %v1127_v39, %v1126_v35  ;;  %v998_v18 = vld [vmem:[%s14251_s26 + $0x58] sm:$0xff]  ;;  %v1000_v19 = vld [vmem:[%s14251_s26 + $0x68] sm:$0xff]  ;;  %v1001_v24 = vld [vmem:[%s14251_s26 + $0x70] sm:$0xff]  ;;  %s12509_s28 = sshll.u32 %s19334_s22, 7 }
  0x1e   : > { %1391 = vrot.lane.b32.xlu1 %v1131_v43, %s14191_s27  ;;  %1387 = vrot.lane.b32.xlu0 %v1121_v44, %s14191_s27  ;;  %v1122_v56 = vrot.slane %v1118_v36, 4  ;;  %v1161_v57 = vshll.u32 %v12517_v25, 16  ;;  %v12520_v58 = vpack.c.bf16 %v995_v47, %v995_v47  ;;  %v1155_v59 = vor.u32 %v1153_v46, %v1152_v45  ;;  %v1003_v25 = vld [vmem:[%s14251_s26 + $0x80] sm:$0xff]  ;;  %v1002_v42 = vld [vmem:[%s14251_s26 + $0x78] sm:$0xff]  ;;  %s14418_s7 = scalar_lea.vmem %s18684_s0, %s12509_s28  ;;  %s18586_s10 = scalar_lea.vmem %s18690_s6, %s12509_s28 }
  0x1f   : > { %v18878_v60 = vmov 0  ;;  %v12519_v61 = vpack.c.bf16 %v994_v50, %v994_v50  ;;  %v12521_v62 = vpack.c.bf16 %v996_v51, %v996_v51  ;;  %v1139_v0 = vrot.slane %v1135_v40, 4  ;;  %v523_v11 = vld [vmem:[%s14418_s7 + $0x20] sm:$0xf] }
  0x20   : > { %v18879_v60 = vsel %vm14293_vm7, 4294967295, %v18878_v60  ;;  %v1146_v2 = vor.u32 %v1144_v49, %v14285_v48  ;;  %v1167_v3 = vshrl.u32 %v12518_v54, 16  ;;  %v1156_v4 = vrot.slane %v1152_v45, 4 }
  0x21   : > { %18880 = vst [vmem:[#allocation6_spill] sm:$0xff] %v18879_v60  ;;  %v1163_v5 = vor.u32 %v1161_v57, %v1160_v41  ;;  %v1184_v6 = vshrl.u32 %v12520_v58, 16  ;;  %v1175_v7 = vshrl.u32 %v12519_v61, 16  ;;  %v1192_v9 = vshrl.u32 %v12521_v62, 16 }
  0x22   : > { %1393 = vrot.lane.b32.xlu1 %v1138_v52, %s14191_s27  ;;  %1403 = vrot.lane.b32.xlu0 %v1165_v53, %s14191_s27  ;;  %v1130_v10 = vsel %vm14293_vm7, %v1122_v56, %v1129_v55  ;;  %v12522_v12 = vpack.c.bf16 %v997_v63, %v997_v63  ;;  %v1148_v14 = vrot.slane %v14285_v48, 4  ;;  %v1170_v15 = vshll.u32 %v12518_v54, 16 }
  0x23   : > { %v14305_v16 = vrot.slane %v1175_v7, 7  ;;  %v1178_v17 = vshll.u32 %v12519_v61, 16  ;;  %v1169_v20 = vrot.slane %v1167_v3, 7  ;;  %v14309_v21 = vrot.slane %v1192_v9, 7  ;;  %v1007_v3 = vld [vmem:[%s14251_s26 + $0xa0] sm:$0xff]  ;;  %v1006_v9 = vld [vmem:[%s14251_s26 + $0x98] sm:$0xff] }
  0x24   : > { %v1195_v22 = vshll.u32 %v12521_v62, 16  ;;  %v1201_v23 = vshrl.u32 %v12522_v12, 16  ;;  %v1147_v26 = vsel %vm14293_vm7, %v1139_v0, %v1146_v2  ;;  %v1164_v27 = vsel %vm14293_vm7, %v1156_v4, %v1163_v5  ;;  %v1005_v2 = vld [vmem:[%s14251_s26 + $0x90] sm:$0xff] }
  0x25   : > { %v1186_v28 = vrot.slane %v1184_v6, 7  ;;  %v1187_v29 = vshll.u32 %v12520_v58, 16  ;;  %v1173_v30 = vrot.slane %v1169_v20, 4  ;;  %v12524_v31 = vpack.c.bf16 %v999_v13, %v999_v13 }
  0x26   : > { %1399 = vrot.lane.b32.xlu1 %v1155_v59, %s14191_s27  ;;  %1389 = vrot.lane.b32.xlu0 %v1130_v10, %s14191_s27  ;;  %v12523_v32 = vpack.c.bf16 %v998_v18, %v998_v18  ;;  %v12525_v33 = vpack.c.bf16 %v1000_v19, %v1000_v19  ;;  %v1180_v34 = vor.u32 %v1178_v17, %v14305_v16  ;;  %v14325_v39 = vrot.slane %v1201_v23, 7  ;;  %v1004_v59 = vld [vmem:[%s14251_s26 + $0x88] sm:$0xff] }
  0x27   : > { %v1190_v35 = vrot.slane %v1186_v28, 4  ;;  %v14320_v36 = vpack.c.bf16 %v1001_v24, %v1001_v24  ;;  %v14322_v37 = vpack.c.bf16 %v1003_v25, %v1003_v25  ;;  %v1197_v38 = vor.u32 %v1195_v22, %v14309_v21  ;;  %v1008_v10 = vld [vmem:[%s14251_s26 + $0xa8] sm:$0xff] }
  0x28   : > { %v1204_v40 = vshll.u32 %v12522_v12, 16  ;;  %v1218_v41 = vshrl.u32 %v12524_v31, 16  ;;  %v1172_v43 = vor.u32 %v1170_v15, %v1169_v20  ;;  %v1189_v44 = vor.u32 %v1187_v29, %v1186_v28 }
  0x29   : > { %v1209_v45 = vshrl.u32 %v12523_v32, 16  ;;  %v1226_v46 = vshrl.u32 %v12525_v33, 16  ;;  %v1182_v47 = vrot.slane %v14305_v16, 4  ;;  %v1199_v48 = vrot.slane %v14309_v21, 4 }
  0x2a   : > { %1397 = vrot.lane.b32.xlu1 %v1148_v14, %s14191_s27  ;;  %1395 = vrot.lane.b32.xlu0 %v1147_v26, %s14191_s27  ;;  %v1220_v49 = vrot.slane %v1218_v41, 7  ;;  %v1221_v50 = vshll.u32 %v12524_v31, 16  ;;  %v1181_v51 = vsel %vm14293_vm7, %v1173_v30, %v1180_v34  ;;  %v1235_v52 = vshrl.u32 %v14320_v36, 16  ;;  %v1009_v41 = vld [vmem:[%s14251_s26 + $0xb0] sm:$0xff] }
  0x2b   : > { %v1252_v53 = vshrl.u32 %v14322_v37, 16  ;;  %v12527_v54 = vpack.c.bf16 %v1002_v42, %v1002_v42  ;;  %v1198_v55 = vsel %vm14293_vm7, %v1190_v35, %v1197_v38  ;;  %v14339_v56 = vor.u32 %v1204_v40, %v14325_v39 }
  0x2c   : > { %v14341_v57 = vrot.slane %v1209_v45, 7  ;;  %v1212_v58 = vshll.u32 %v12523_v32, 16  ;;  %v1207_v61 = vrot.slane %v14325_v39, 4  ;;  %v14347_v62 = vrot.slane %v1226_v46, 7  ;;  %v1011_v46 = vld [vmem:[%s14251_s26 + $0xc0] sm:$0xff] }
  0x2d   : > { %v1229_v63 = vshll.u32 %v12525_v33, 16  ;;  %v1238_v0 = vshll.u32 %v14320_v36, 16  ;;  %v14352_v4 = vor.u32 %v1221_v50, %v1220_v49  ;;  %v1224_v5 = vrot.slane %v1220_v49, 4 }
  0x2e   : > { %1405 = vrot.lane.b32.xlu1 %v1172_v43, %s14191_s27  ;;  %1401 = vrot.lane.b32.xlu0 %v1164_v27, %s14191_s27  ;;  %v1255_v6 = vshll.u32 %v14322_v37, 16  ;;  %v1243_v7 = vshrl.u32 %v12527_v54, 16  ;;  %v1237_v12 = vrot.slane %v1235_v52, 7  ;;  %v1254_v13 = vrot.slane %v1252_v53, 7  ;;  %v1012_v53 = vld [vmem:[%s14251_s26 + $0xc8] sm:$0xff] }
  0x2f   : > { %v1246_v14 = vshll.u32 %v12527_v54, 16  ;;  %v12529_v15 = vpack.c.bf16 %v1004_v59, %v1004_v59  ;;  %v1214_v16 = vor.u32 %v1212_v58, %v14341_v57  ;;  %v12530_v18 = vpack.c.bf16 %v1005_v2, %v1005_v2 }
  0x30   : > { %v14358_v17 = vrot.slane %v1243_v7, 7  ;;  %v12532_v19 = vpack.c.bf16 %v1007_v3, %v1007_v3  ;;  %v1231_v20 = vor.u32 %v1229_v63, %v14347_v62  ;;  %v12531_v23 = vpack.c.bf16 %v1006_v9, %v1006_v9  ;;  %v1013_v3 = vld [vmem:[%s14251_s26 + $0xd0] sm:$0xff] }
  0x31   : > { %v1260_v22 = vshrl.u32 %v12529_v15, 16  ;;  %v12533_v24 = vpack.c.bf16 %v1008_v10, %v1008_v10  ;;  %v1216_v25 = vrot.slane %v14341_v57, 4  ;;  %v1241_v26 = vrot.slane %v1237_v12, 4 }
  0x32   : > { %1411 = vrot.lane.b32.xlu1 %v1189_v44, %s14191_s27  ;;  %1407 = vrot.lane.b32.xlu0 %v1181_v51, %s14191_s27  ;;  %v1263_v27 = vshll.u32 %v12529_v15, 16  ;;  %v1269_v28 = vshrl.u32 %v12530_v18, 16  ;;  %v1248_v29 = vor.u32 %v1246_v14, %v14358_v17  ;;  %v1286_v31 = vshrl.u32 %v12532_v19, 16 }
  0x33   : > { %v14365_v30 = vrot.slane %v1260_v22, 7  ;;  %v1277_v32 = vshrl.u32 %v12531_v23, 16  ;;  %v14367_v33 = vor.u32 %v1238_v0, %v1237_v12  ;;  %v1233_v34 = vrot.slane %v14347_v62, 4  ;;  %v1015_v12 = vld [vmem:[%s14251_s26 + $0xe0] sm:$0xff] }
  0x34   : > { %v14370_v35 = vor.u32 %v1255_v6, %v1254_v13  ;;  %v1294_v36 = vshrl.u32 %v12533_v24, 16  ;;  %v1215_v37 = vsel %vm14293_vm7, %v1207_v61, %v1214_v16  ;;  %v14378_v38 = vsel %vm14293_vm7, %v1224_v5, %v1231_v20 }
  0x35   : > { %v1271_v39 = vrot.slane %v1269_v28, 7  ;;  %v1272_v40 = vshll.u32 %v12530_v18, 16  ;;  %v1258_v42 = vrot.slane %v1254_v13, 4  ;;  %v1265_v43 = vor.u32 %v1263_v27, %v14365_v30  ;;  %v1014_v13 = vld [vmem:[%s14251_s26 + $0xd8] sm:$0xff] }
  0x36   : > { %1409 = vrot.lane.b32.xlu1 %v1182_v47, %s14191_s27  ;;  %1413 = vrot.lane.b32.xlu0 %v1198_v55, %s14191_s27  ;;  %v14382_v44 = vrot.slane %v1286_v31, 7  ;;  %v1289_v45 = vshll.u32 %v12532_v19, 16  ;;  %v1010_v47 = vld [vmem:[%s14251_s26 + $0xb8] sm:$0xff]  ;;  %v14388_v49 = vsel %vm14293_vm7, %v1241_v26, %v1248_v29  ;;  %v1250_v50 = vrot.slane %v14358_v17, 4  ;;  %v14426_v19 = vld [vmem:[%s14418_s7 + $0x4] sm:$0xf] }
  0x37   : > { %v14391_v51 = vrot.slane %v1277_v32, 7  ;;  %v1280_v52 = vshll.u32 %v12531_v23, 16  ;;  %v1267_v54 = vrot.slane %v14365_v30, 4  ;;  %v14396_v55 = vrot.slane %v1294_v36, 7 }
  0x38   : > { %v1297_v58 = vshll.u32 %v12533_v24, 16  ;;  %v12534_v59 = vpack.c.bf16 %v1009_v41, %v1009_v41  ;;  %v14403_v61 = vor.u32 %v1272_v40, %v1271_v39  ;;  %v1275_v63 = vrot.slane %v1271_v39, 4  ;;  %v515_v39 = vld [vmem:[%s14418_s7] sm:$0xf] }
  0x39   : > { %v12536_v0 = vpack.c.bf16 %v1011_v46, %v1011_v46  ;;  %v12535_v2 = vpack.c.bf16 %v1010_v47, %v1010_v47  ;;  %v14408_v5 = vsel %vm14293_vm7, %v1258_v42, %v1265_v43  ;;  %v14411_v6 = vor.u32 %v1289_v45, %v14382_v44  ;;  %v517_v43 = vld [vmem:[%s14418_s7 + $0x8] sm:$0xf] }
  0x3a   : > { %1417 = vrot.lane.b32.xlu1 %v14339_v56, %s14191_s27  ;;  %1415 = vrot.lane.b32.xlu0 %v1199_v48, %s14191_s27  ;;  %v1303_v56 = vshrl.u32 %v12534_v59, 16  ;;  %v12537_v7 = vpack.c.bf16 %v1012_v53, %v1012_v53  ;;  %vm877_vm8 = vcmask 24576   ;;  %v1282_v21 = vor.u32 %v1280_v52, %v14391_v51 }
  0x3b   : > { %v1320_v48 = vshrl.u32 %v12536_v0, 16  ;;  %v1311_v9 = vshrl.u32 %v12535_v2, 16  ;;  %v1314_v10 = vshll.u32 %v12535_v2, 16  ;;  %v1292_v14 = vrot.slane %v14382_v44, 4  ;;  %v879_v2 = vld [vmem:[#allocation2 + $0x14] sm:$0x1]  ;;  %vm14493_vm10 = vmand %vm877_vm8, %vm283_vm2 }
  0x3c   : > { %v1299_v15 = vor.u32 %v1297_v58, %v14396_v55  ;;  %v1328_v16 = vshrl.u32 %v12537_v7, 16  ;;  %v12538_v18 = vpack.c.bf16 %v1013_v3, %v1013_v3  ;;  %vm870_vm9 = vcmask 27648  }
  0x3d   : > { %v1305_v20 = vrot.slane %v1303_v56, 7  ;;  %v1306_v22 = vshll.u32 %v12534_v59, 16  ;;  %v14431_v23 = vrot.slane %v1311_v9, 7  ;;  %v1331_v24 = vshll.u32 %v12537_v7, 16  ;;  %v519_v56 = vld [vmem:[%s14418_s7 + $0x10] sm:$0xf]  ;;  %vm14503_vm11 = vmand %vm870_vm9, %vm18693_vm1 }
  0x3e   : > { %1423 = vrot.lane.b32.xlu1 %v14352_v4, %s14191_s27  ;;  %1419 = vrot.lane.b32.xlu0 %v1215_v37, %s14191_s27  ;;  %v1322_v26 = vrot.slane %v1320_v48, 7  ;;  %v1323_v27 = vshll.u32 %v12536_v0, 16  ;;  %v14433_v28 = vrot.slane %v1328_v16, 7  ;;  %v1337_v29 = vshrl.u32 %v12538_v18, 16  ;;  %v1016_v0 = vld [vmem:[%s14251_s26 + $0xe8] sm:$0xff] }
  0x3f   : > { %v1309_v31 = vrot.slane %v1305_v20, 4  ;;  %v1316_v32 = vor.u32 %v1314_v10, %v14431_v23  ;;  %v14436_v36 = vpack.c.bf16 %v1015_v12, %v1015_v12  ;;  %v558_v4 = vshrl.u32 %v14426_v19, 16  ;;  %v886_v59 = vld [vmem:[#allocation2 + $0x20] sm:$0x1] }
  0x40   : > { %v14442_v37 = vsel %vm14293_vm7, %v1275_v63, %v1282_v21  ;;  %v1284_v40 = vrot.slane %v14391_v51, 4  ;;  %v1301_v41 = vrot.slane %v14396_v55, 4  ;;  %v14446_v42 = vpack.c.bf16 %v1014_v13, %v1014_v13 }
  0x41   : > { %v1326_v44 = vrot.slane %v1322_v26, 4  ;;  %v1333_v45 = vor.u32 %v1331_v24, %v14433_v28  ;;  %v14455_v46 = vrot.slane %v1337_v29, 7  ;;  %v1340_v47 = vshll.u32 %v12538_v18, 16 }
  0x42   : > { %1421 = vrot.lane.b32.xlu1 %v1216_v25, %s14191_s27  ;;  %1425 = vrot.lane.b32.xlu0 %v14378_v38, %s14191_s27  ;;  %v14459_v52 = vsel %vm14293_vm7, %v1292_v14, %v1299_v15  ;;  %v14461_v53 = vor.u32 %v1306_v22, %v1305_v20  ;;  %v14463_v58 = vor.u32 %v1323_v27, %v1322_v26  ;;  %v1318_v57 = vrot.slane %v14431_v23, 4  ;;  %v14467_v25 = vld [vmem:[%s14418_s7 + $0x14] sm:$0xf]  ;;  %v882_v20 = vld [vmem:[#allocation2 + $0x18] sm:$0xf] }
  0x43   : > { %v14471_v38 = vsel %vm14293_vm7, %v1309_v31, %v1316_v32  ;;  %v1354_v63 = vshrl.u32 %v14436_v36, 16  ;;  %v560_v3 = vrot.slane %v558_v4, 7  ;;  %v1345_v7 = vshrl.u32 %v14446_v42, 16  ;;  %v518_v31 = vld [vmem:[%s14418_s7 + $0xc] sm:$0xf] }
  0x44   : > { %v550_v21 = vshrl.u32 %v515_v39, 16  ;;  %v553_v48 = vshll.u32 %v515_v39, 16  ;;  %v567_v9 = vshrl.u32 %v517_v43, 16  ;;  %v14485_v10 = vsel %vm14293_vm7, %v1326_v44, %v1333_v45  ;;  %v521_v45 = vld [vmem:[%s14418_s7 + $0x18] sm:$0xf] }
  0x45   : > { %v14488_v12 = vor.u32 %v1340_v47, %v14455_v46  ;;  %v1357_v13 = vshll.u32 %v14436_v36, 16  ;;  %v18881_v14 = vmov 0  ;;  %v570_v15 = vshll.u32 %v517_v43, 16  ;;  %v893_v43 = vld [vmem:[#allocation2 + $0x2c] sm:$0x1] }
  0x46   : > { %1429 = vrot.lane.b32.xlu1 %v14367_v33, %s14191_s27  ;;  %1427 = vrot.lane.b32.xlu0 %v1233_v34, %s14191_s27  ;;  %v18882_v14 = vsel %vm14493_vm10, 4294967295, %v18881_v14  ;;  %v872_v33 = vld [vmem:[#allocation2 + $0xc] sm:$0xf]  ;;  %v1343_v62 = vrot.slane %v14455_v46, 4  ;;  %v14498_v34 = vpack.c.bf16 %v1016_v0, %v1016_v0  ;;  %v565_v16 = vrot.slane %v560_v3, 4 }
  0x47   : > { %18883 = vst [vmem:[#allocation7_spill] sm:$0xff] %v18882_v14  ;;  %v552_v18 = vrot.slane %v550_v21, 7  ;;  %v1348_v22 = vshll.u32 %v14446_v42, 16  ;;  %v18884_v24 = vmov 0  ;;  %v14507_v26 = vrot.slane %v567_v9, 7 }
  0x48   : > { %v18885_v24 = vsel %vm14503_vm11, 4294967295, %v18884_v24  ;;  %v592_v27 = vshrl.u32 %v14467_v25, 16  ;;  %v584_v29 = vshrl.u32 %v519_v56, 16  ;;  %v14511_v32 = vrot.slane %v1345_v7, 7  ;;  %v889_v42 = vld [vmem:[#allocation2 + $0x24] sm:$0xf] }
  0x49   : > { %18886 = vst [vmem:[#allocation8_spill] sm:$0xff] %v18885_v24  ;;  %v880_v4 = vsel %vm14493_vm10, %v565_v16, %v879_v2  ;;  %v555_v39 = vor.u32 %v553_v48, %v552_v18  ;;  %v587_v44 = vshll.u32 %v519_v56, 16  ;;  %v14520_v47 = vrot.slane %v1354_v63, 7  ;;  %v300_v9 = vld [vmem:[#allocation2 + $0x3c] sm:$0x1] }
  0x4a   : > { %1435 = vrot.lane.b32.xlu1 %v14370_v35, %s14191_s27  ;;  %1431 = vrot.lane.b32.xlu0 %v14388_v49, %s14191_s27  ;;  %881 = vst [vmem:[#allocation2 + $0x14] sm:$0x1] %v880_v4  ;;  %v572_v0 = vor.u32 %v570_v15, %v14507_v26  ;;  %v594_v7 = vrot.slane %v592_v27, 7  ;;  %v586_v2 = vrot.slane %v584_v29, 7  ;;  %v1362_v21 = vshrl.u32 %v14498_v34, 16 }
  0x4b   : > { %v873_v56 = vsel %vm14503_vm11, %v555_v39, %v872_v33  ;;  %v556_v48 = vrot.slane %v552_v18, 4  ;;  %v561_v35 = vshll.u32 %v14426_v19, 16  ;;  %v575_v4 = vshrl.u32 %v518_v31, 16  ;;  %v522_v15 = vld [vmem:[%s14418_s7 + $0x1c] sm:$0xf] }
  0x4c   : > { %874 = vst [vmem:[#allocation2 + $0xc] sm:$0xf] %v873_v56  ;;  %v883_v49 = vsel %vm14503_vm11, %v572_v0, %v882_v20  ;;  %v599_v63 = vrot.slane %v594_v7, 4  ;;  %v589_v16 = vor.u32 %v587_v44, %v586_v2  ;;  %v14532_v27 = vor.u32 %v1348_v22, %v14511_v32  ;;  %v11736_v0 = vld [vmem:[%s18686_s2 + $0x4] sm:$0xf] }
  0x4d   : > { %884 = vst [vmem:[#allocation2 + $0x18] sm:$0xf] %v883_v49  ;;  %v563_v29 = vor.u32 %v561_v35, %v560_v3  ;;  %v573_v33 = vrot.slane %v14507_v26, 4  ;;  %v578_v18 = vshll.u32 %v518_v31, 16  ;;  %v577_v22 = vrot.slane %v575_v4, 7 }
  0x4e   : > { %1433 = vrot.lane.b32.xlu1 %v1250_v50, %s14191_s27  ;;  %1437 = vrot.lane.b32.xlu0 %v14408_v5, %s14191_s27  ;;  %v894_v19 = vsel %vm14493_vm10, %v599_v63, %v893_v43  ;;  %v890_v20 = vsel %vm14503_vm11, %v589_v16, %v889_v42  ;;  %v601_v39 = vshrl.u32 %v521_v45, 16  ;;  %v896_v26 = vld [vmem:[#allocation2 + $0x30] sm:$0xf]  ;;  %v604_v17 = vshll.u32 %v521_v45, 16  ;;  %v353_v56 = vld [vmem:[#allocation2 + $0x38] sm:$0x1] }
  0x4f   : > { %895 = vst [vmem:[#allocation2 + $0x2c] sm:$0x1] %v894_v19  ;;  %891 = vst [vmem:[#allocation2 + $0x24] sm:$0xf] %v890_v20  ;;  %v564_v3 = vsel %vm14293_vm7, %v556_v48, %v563_v29  ;;  %v590_v50 = vrot.slane %v586_v2, 4  ;;  %v595_v31 = vshll.u32 %v14467_v25, 16  ;;  %v580_v43 = vor.u32 %v578_v18, %v577_v22 }
  0x50   : > { %876 = vst.msk [vmem:[#allocation2 + $0x10] sm:$0xf] %vm870_vm9, %v564_v3  ;;  %v582_v5 = vrot.slane %v577_v22, 4  ;;  %v603_v44 = vrot.slane %v601_v39, 7  ;;  %v301_v42 = vsel %vm14255_vm5, 0, %v300_v9  ;;  %v618_v35 = vshrl.u32 %v523_v11, 16 }
  0x51   : > { %v597_v48 = vor.u32 %v595_v31, %v594_v7  ;;  %302 = vst [vmem:[#allocation2 + $0x3c] sm:$0x1] %v301_v42  ;;  %v621_v45 = vshll.u32 %v523_v11, 16  ;;  %v609_v2 = vshrl.u32 %v522_v15, 16  ;;  %v524_v49 = vld [vmem:[%s14418_s7 + $0x24] sm:$0xf]  ;;  %v581_v9 = vsel %vm14293_vm7, %v573_v33, %v580_v43 }
  0x52   : > { %1441 = vrot.lane.b32.xlu1 %v14403_v61, %s14191_s27  ;;  %1439 = vrot.lane.b32.xlu0 %v1267_v54, %s14191_s27  ;;  %v887_v25 = vsel %vm14493_vm10, %v582_v5, %v886_v59  ;;  %v606_v63 = vor.u32 %v604_v17, %v603_v44  ;;  %v607_v7 = vrot.slane %v603_v44, 4  ;;  %v285_v16 = vld [vmem:[#allocation2] sm:$0x1]  ;;  %885 = vst.msk [vmem:[#allocation2 + $0x1c] sm:$0xf] %vm870_vm9, %v581_v9  ;;  %v620_v61 = vrot.slane %v618_v35, 7 }
  0x53   : > { %888 = vst [vmem:[#allocation2 + $0x20] sm:$0x1] %v887_v25  ;;  %v598_v11 = vsel %vm14293_vm7, %v590_v50, %v597_v48  ;;  %v14566_v4 = vrot.slane %v609_v2, 7  ;;  %v612_v30 = vshll.u32 %v522_v15, 16  ;;  %v341_v54 = vld [vmem:[#allocation2 + $0x8] sm:$0x1]  ;;  %v14654_v36 = vsel %vm14293_vm7, %v1343_v62, %v14532_v27 }
  0x54   : > { %v897_v59 = vsel %vm14503_vm11, %v606_v63, %v896_v26  ;;  %892 = vst.msk [vmem:[#allocation2 + $0x28] sm:$0xf] %vm870_vm9, %v598_v11  ;;  %vm2183_vm12 = vcmask 1043456   ;;  %v354_v29 = vsel %vm14239_vm3, 0, %v353_v56  ;;  %v626_v33 = vshrl.u32 %v524_v49, 16 }
  0x55   : > { %v14573_v18 = vld [vmem:[#allocation2 + $0x4] sm:$0xf]  ;;  %v1352_v19 = vrot.slane %v14511_v32, 4  ;;  %v1360_v20 = vrot.slane %v14520_v47, 4  ;;  %898 = vst [vmem:[#allocation2 + $0x30] sm:$0xf] %v897_v59  ;;  %v623_v15 = vor.u32 %v621_v45, %v620_v61  ;;  %v614_v22 = vor.u32 %v612_v30, %v14566_v4  ;;  %14038 = vmatprep.subr.msk.bf16.mxu0 %vm2183_vm12, %v11736_v0 }
  0x56   : > { %355 = vst [vmem:[#allocation2 + $0x38] sm:$0x1] %v354_v29  ;;  %v303_v39 = vld [vmem:[#allocation2 + $0x48] sm:$0x1]  ;;  %1447 = vrot.lane.b32.xlu1 %v14411_v6, %s14191_s27  ;;  %1443 = vrot.lane.b32.xlu0 %v14442_v37, %s14191_s27  ;;  %v14588_v26 = vrot.slane %v1362_v21, 7  ;;  %v624_v17 = vrot.slane %v620_v61, 4  ;;  %v14639_v30 = vor.u32 %v1357_v13, %v14520_v47 }
  0x57   : > { %v14580_v3 = vld [vmem:[%s14418_s7 + $0x28] sm:$0xf]  ;;  %v14590_v50 = vrot.slane %v626_v33, 7  ;;  %v629_v31 = vshll.u32 %v524_v49, 16  ;;  %v356_v5 = vld [vmem:[#allocation2 + $0x44] sm:$0x1]  ;;  %v615_v6 = vsel %vm14293_vm7, %v607_v7, %v614_v22 }
  0x58   : > { %v14595_v43 = vld [vmem:[%s18686_s2] sm:$0xf]  ;;  %v2185_v44 = vsel %vm2183_vm12, %v11736_v0, 0  ;;  %v286_v37 = vsel %vm14255_vm5, 0, %v285_v16  ;;  %v342_v21 = vsel %vm14239_vm3, 0, %v341_v54  ;;  %v1365_v56 = vshll.u32 %v14498_v34, 16 }
  0x59   : > { %v306_v42 = vld [vmem:[#allocation2 + $0x54] sm:$0x1]  ;;  %v1369_v48 = vrot.slane %v14588_v26, 4  ;;  %v903_v35 = vld [vmem:[#allocation2 + $0x3c] sm:$0xf]  ;;  %v631_v45 = vor.u32 %v629_v31, %v14590_v50  ;;  %12915 = vmatpush3.bf16.msra.mxu0 %v2185_v44  ;;  %v1710_v0 = vshll.u32 %v14573_v18, 16 }
  0x5a   : > { %899 = vst.msk [vmem:[#allocation2 + $0x34] sm:$0xf] %vm870_vm9, %v615_v6  ;;  %287 = vst [vmem:[#allocation2] sm:$0x1] %v286_v37  ;;  %v904_v2 = vsel %vm14503_vm11, %v623_v15, %v903_v35  ;;  %v616_v49 = vrot.slane %v14566_v4, 4  ;;  %v633_v34 = vrot.slane %v14590_v50, 4  ;;  %14039 = vmatprep.subr.msk.bf16.mxu0 %vm2183_vm12, %v14595_v43  ;;  %1445 = vrot.lane.b32.xlu1 %v1284_v40, %s14191_s27 }
  0x5b   : > { %343 = vst [vmem:[#allocation2 + $0x8] sm:$0x1] %v342_v21  ;;  %v1714_v25 = vshrl.u32 %v14573_v18, 16  ;;  %v527_v9 = vld [vmem:[%s14418_s7 + $0x30] sm:$0xf]  ;;  %1449 = vrot.lane.b32.xlu0 %v14459_v52, %s14191_s27  ;;  %v632_v63 = vsel %vm14293_vm7, %v624_v17, %v631_v45  ;;  %v14624_v7 = vrot.slane %v1710_v0, 5 }
  0x5c   : > { %905 = vst [vmem:[#allocation2 + $0x3c] sm:$0xf] %v904_v2  ;;  %v304_v16 = vsel %vm14255_vm5, 0, %v303_v39  ;;  %v635_v11 = vshrl.u32 %v14580_v3, 16  ;;  %v526_v61 = vld [vmem:[%s14418_s7 + $0x2c] sm:$0xf] }
  0x5d   : > { %906 = vst.msk [vmem:[#allocation2 + $0x40] sm:$0xf] %vm870_vm9, %v632_v63  ;;  %v1716_v4 = vrot.slane %v1714_v25, 4  ;;  %305 = vst [vmem:[#allocation2 + $0x48] sm:$0x1] %v304_v16  ;;  %v638_v51 = vshll.u32 %v14580_v3, 16 }
  0x5e   : > { %v357_v40 = vsel %vm14239_vm3, 0, %v356_v5  ;;  %v307_v52 = vsel %vm14255_vm5, 0, %v306_v42  ;;  %v900_v54 = vld [vmem:[#allocation2 + $0x38] sm:$0x1]  ;;  %vm1697_vm13 = vsmask.f32 3328  ;;  %1453 = vrot.lane.b32.xlu1 %v14461_v53, %s14191_s27  ;;  %v14660_v53 = vor.u32 %v1365_v56, %v14588_v26 }
  0x5f   : > { %v637_v59 = vrot.slane %v635_v11, 7  ;;  %358 = vst [vmem:[#allocation2 + $0x44] sm:$0x1] %v357_v40  ;;  %308 = vst [vmem:[#allocation2 + $0x54] sm:$0x1] %v307_v52  ;;  %v652_v29 = vshrl.u32 %v527_v9, 16  ;;  %v901_v15 = vsel %vm14493_vm10, %v616_v49, %v900_v54  ;;  %v1717_v22 = vor.u32 %v1716_v4, %v14624_v7  ;;  %1451 = vrot.lane.b32.xlu0 %v1301_v41, %s14191_s27 }
  0x60   : > { %v359_v33 = vld [vmem:[#allocation2 + $0x50] sm:$0x1]  ;;  %v655_v39 = vshll.u32 %v527_v9, 16  ;;  %v643_v3 = vshrl.u32 %v526_v61, 16  ;;  %902 = vst [vmem:[#allocation2 + $0x38] sm:$0x1] %v901_v15 }
  0x61   : > { %vm1698_vm14 = vsmask.f32 7440  ;;  %v14656_v13 = vrot.slane %v652_v29, 7  ;;  %v646_v17 = vshll.u32 %v526_v61, 16  ;;  %v528_v31 = vld [vmem:[%s14418_s7 + $0x34] sm:$0xf]  ;;  %v640_v41 = vor.u32 %v638_v51, %v637_v59 }
  0x62   : > { %v14662_v5 = vld [vmem:[#allocation2] sm:$0xf]  ;;  %v1681_v55 = vld [vmem:[#allocation2 + $0x8] sm:$0x1]  ;;  %v641_v46 = vrot.slane %v637_v59, 4  ;;  %v14664_v6 = vrot.slane %v643_v3, 7  ;;  %1459 = vrot.lane.b32.xlu1 %v14463_v58, %s14191_s27  ;;  %vm14684_vm15 = vmor %vm1697_vm13, %vm1698_vm14 }
  0x63   : > { %v1701_v62 = vshrl.u32 %v14662_v5, 16  ;;  %v1704_v27 = vshll.u32 %v14662_v5, 16  ;;  %v1718_v44 = vrot.slane %v1717_v22, 4  ;;  %v1720_v37 = vshll.u32 %v1681_v55, 16  ;;  %v309_v21 = vld [vmem:[#allocation2 + $0x60] sm:$0x1]  ;;  %1455 = vrot.lane.b32.xlu0 %v14471_v38, %s14191_s27 }
  0x64   : > { %v529_v42 = vld [vmem:[%s14418_s7 + $0x38] sm:$0xf]  ;;  %v657_v35 = vor.u32 %v655_v39, %v14656_v13  ;;  %v648_v56 = vor.u32 %v646_v17, %v14664_v6  ;;  %v650_v45 = vrot.slane %v14664_v6, 4  ;;  %v360_v0 = vsel %vm14239_vm3, 0, %v359_v33  ;;  %v362_v2 = vld [vmem:[#allocation2 + $0x5c] sm:$0x1] }
  0x65   : > { %v312_v49 = vld [vmem:[#allocation2 + $0x6c] sm:$0x1]  ;;  %v14675_v25 = vld [vmem:[%s14418_s7 + $0x40] sm:$0xf]  ;;  %v1703_v9 = vrot.slane %v1701_v62, 4  ;;  %v1706_v63 = vrot.slane %v1704_v27, 5 }
  0x66   : > { %v1722_v16 = vrot.slane %v1720_v37, 5  ;;  %v910_v11 = vld [vmem:[#allocation2 + $0x48] sm:$0xf]  ;;  %361 = vst [vmem:[#allocation2 + $0x50] sm:$0x1] %v360_v0  ;;  %v658_v61 = vrot.slane %v14656_v13, 4  ;;  %v649_v38 = vsel %vm14293_vm7, %v641_v46, %v648_v56  ;;  %1457 = vrot.lane.b32.xlu1 %v1318_v57, %s14191_s27 }
  0x67   : > { %v911_v58 = vsel %vm14503_vm11, %v640_v41, %v910_v11  ;;  %v907_v51 = vld [vmem:[#allocation2 + $0x44] sm:$0x1]  ;;  %v917_v40 = vld [vmem:[#allocation2 + $0x54] sm:$0xf]  ;;  %v660_v52 = vshrl.u32 %v528_v31, 16  ;;  %v663_v54 = vshll.u32 %v528_v31, 16  ;;  %v1707_v59 = vor.u32 %v1706_v63, %v1703_v9  ;;  %1461 = vrot.lane.b32.xlu0 %v14485_v10, %s14191_s27 }
  0x68   : > { %v1723_v29 = vsel %vm14684_vm15, %v1718_v44, %v1722_v16  ;;  %912 = vst [vmem:[#allocation2 + $0x48] sm:$0xf] %v911_v58  ;;  %v908_v33 = vsel %vm14493_vm10, %v633_v34, %v907_v51  ;;  %v918_v15 = vsel %vm14503_vm11, %v657_v35, %v917_v40  ;;  %913 = vst.msk [vmem:[#allocation2 + $0x4c] sm:$0xf] %vm870_vm9, %v649_v38  ;;  %v530_v22 = vld [vmem:[%s14418_s7 + $0x3c] sm:$0xf] }
  0x69   : > { %909 = vst [vmem:[#allocation2 + $0x44] sm:$0x1] %v908_v33  ;;  %919 = vst [vmem:[#allocation2 + $0x54] sm:$0xf] %v918_v15  ;;  %v14702_v39 = vrot.slane %v660_v52, 7  ;;  %v310_v3 = vsel %vm14255_vm5, 0, %v309_v21  ;;  %v14732_v35 = vsel %vm14293_vm7, %v1360_v20, %v14660_v53 }
  0x6a   : > { %v669_v13 = vshrl.u32 %v529_v42, 16  ;;  %v672_v17 = vshll.u32 %v529_v42, 16  ;;  %v365_v50 = vld [vmem:[#allocation2 + $0x68] sm:$0x1]  ;;  %v1708_v34 = vrot.slane %v1707_v59, 4  ;;  %v363_v31 = vsel %vm14239_vm3, 0, %v362_v2  ;;  %1465 = vrot.lane.b32.xlu1 %v14488_v12, %s14191_s27 }
  0x6b   : > { %311 = vst [vmem:[#allocation2 + $0x60] sm:$0x1] %v310_v3  ;;  %v313_v55 = vsel %vm14255_vm5, 0, %v312_v49  ;;  %v686_v41 = vshrl.u32 %v14675_v25, 16  ;;  %v532_v46 = vld [vmem:[%s14418_s7 + $0x44] sm:$0xf]  ;;  %v665_v62 = vor.u32 %v663_v54, %v14702_v39 }
  0x6c   : > { %vm2134_vm0 = vcmask 64512   ;;  %v671_v23 = vrot.slane %v669_v13, 7  ;;  %364 = vst [vmem:[#allocation2 + $0x5c] sm:$0x1] %v363_v31  ;;  %314 = vst [vmem:[#allocation2 + $0x6c] sm:$0x1] %v313_v55  ;;  %v1713_v27 = vsel %vm14684_vm15, %v1708_v34, %v14624_v7 }
  0x6d   : > { %v689_v57 = vshll.u32 %v14675_v25, 16  ;;  %v315_v10 = vld [vmem:[#allocation2 + $0x78] sm:$0x1]  ;;  %v14722_v44 = vrot.slane %v686_v41, 7  ;;  %v677_v37 = vshrl.u32 %v530_v22, 16  ;;  %v680_v21 = vshll.u32 %v530_v22, 16 }
  0x6e   : > { %v14725_v42 = vld [vmem:[%s14418_s7 + $0x48] sm:$0xf]  ;;  %v11737_v56 = vcombine.low %v1713_v27, %v1723_v29  ;;  %v914_v0 = vld [vmem:[#allocation2 + $0x50] sm:$0x1]  ;;  %v666_v2 = vsel %vm14293_vm7, %v658_v61, %v665_v62  ;;  %v674_v7 = vor.u32 %v672_v17, %v671_v23  ;;  %v368_v49 = vld [vmem:[#allocation2 + $0x74] sm:$0x1]  ;;  %1471 = vrot.lane.b32.xlu1 %v14639_v30, %s14191_s27 }
  0x6f   : > { %v318_v25 = vld [vmem:[#allocation2 + $0x84] sm:$0x1]  ;;  %v18889_v9 = vrot.slane %v14433_v28, 4  ;;  %v915_v47 = vsel %vm14493_vm10, %v650_v45, %v914_v0  ;;  %920 = vst.msk [vmem:[#allocation2 + $0x58] sm:$0xf] %vm870_vm9, %v666_v2  ;;  %v675_v20 = vrot.slane %v671_v23, 4  ;;  %v691_v12 = vor.u32 %v689_v57, %v14722_v44 }
  0x70   : > { %v14746_v53 = vrot.slane %v677_v37, 7  ;;  %v366_v63 = vsel %vm14239_vm3, 0, %v365_v50  ;;  %v535_v16 = vld [vmem:[%s14418_s7 + $0x50] sm:$0xf]  ;;  %12916 = vmatprep.mubr.msk.bf16.mxu0 %vm2134_vm0, %v11737_v56  ;;  %916 = vst [vmem:[#allocation2 + $0x50] sm:$0x1] %v915_v47 }
  0x71   : > { %1463 = vrot.lane.b32.xlu0 %v18889_v9, %s14191_s27  ;;  %v667_v28 = vrot.slane %v14702_v39, 4  ;;  %367 = vst [vmem:[#allocation2 + $0x68] sm:$0x1] %v366_v63  ;;  %v694_v6 = vshrl.u32 %v532_v46, 16  ;;  %v697_v45 = vshll.u32 %v532_v46, 16  ;;  %v692_v51 = vrot.slane %v14722_v44, 4 }
  0x72   : > { %v534_v11 = vld [vmem:[%s14418_s7 + $0x4c] sm:$0xf]  ;;  %v682_v61 = vor.u32 %v680_v21, %v14746_v53  ;;  %v684_v58 = vrot.slane %v14746_v53, 4  ;;  %v316_v40 = vsel %vm14255_vm5, 0, %v315_v10  ;;  %v371_v38 = vld [vmem:[#allocation2 + $0x80] sm:$0x1]  ;;  %1469 = vrot.lane.b32.xlu1 %v1352_v19, %s14191_s27 }
  0x73   : > { %v536_v52 = vld [vmem:[%s14418_s7 + $0x54] sm:$0xf]  ;;  %v924_v54 = vld [vmem:[#allocation2 + $0x60] sm:$0xf]  ;;  %v14761_v59 = vrot.slane %v694_v6, 7  ;;  %v703_v29 = vshrl.u32 %v14725_v42, 16 }
  0x74   : > { %317 = vst [vmem:[#allocation2 + $0x78] sm:$0x1] %v316_v40  ;;  %v706_v33 = vshll.u32 %v14725_v42, 16  ;;  %v369_v15 = vsel %vm14239_vm3, 0, %v368_v49  ;;  %v925_v22 = vsel %vm14503_vm11, %v674_v7, %v924_v54  ;;  %v921_v39 = vld [vmem:[#allocation2 + $0x5c] sm:$0x1]  ;;  %v683_v13 = vsel %vm14293_vm7, %v675_v20, %v682_v61 }
  0x75   : > { %1467 = vrot.lane.b32.xlu0 %v14654_v36, %s14191_s27  ;;  %v931_v3 = vld [vmem:[#allocation2 + $0x6c] sm:$0xf]  ;;  %370 = vst [vmem:[#allocation2 + $0x74] sm:$0x1] %v369_v15  ;;  %v319_v17 = vsel %vm14255_vm5, 0, %v318_v25  ;;  %v720_v50 = vshrl.u32 %v535_v16, 16  ;;  %v922_v30 = vsel %vm14493_vm10, %v667_v28, %v921_v39  ;;  %v699_v34 = vor.u32 %v697_v45, %v14761_v59 }
  0x76   : > { %926 = vst [vmem:[#allocation2 + $0x60] sm:$0xf] %v925_v22  ;;  %v932_v36 = vsel %vm14503_vm11, %v691_v12, %v931_v3  ;;  %927 = vst.msk [vmem:[#allocation2 + $0x64] sm:$0xf] %vm870_vm9, %v683_v13  ;;  %v701_v31 = vrot.slane %v14761_v59, 4  ;;  %v705_v55 = vrot.slane %v703_v29, 7 }
  0x77   : > { %320 = vst [vmem:[#allocation2 + $0x84] sm:$0x1] %v319_v17  ;;  %923 = vst [vmem:[#allocation2 + $0x5c] sm:$0x1] %v922_v30  ;;  %v722_v41 = vrot.slane %v720_v50, 7  ;;  %v723_v46 = vshll.u32 %v535_v16, 16  ;;  %v700_v57 = vsel %vm14293_vm7, %v692_v51, %v699_v34 }
  0x78   : > { %933 = vst [vmem:[#allocation2 + $0x6c] sm:$0xf] %v932_v36  ;;  %v711_v62 = vshrl.u32 %v534_v11, 16  ;;  %v321_v23 = vld [vmem:[#allocation2 + $0x90] sm:$0x1]  ;;  %v714_v10 = vshll.u32 %v534_v11, 16  ;;  %v708_v56 = vor.u32 %v706_v33, %v705_v55 }
  0x79   : > { %v372_v27 = vsel %vm14239_vm3, 0, %v371_v38  ;;  %v728_v44 = vshrl.u32 %v536_v52, 16  ;;  %v537_v37 = vld [vmem:[%s14418_s7 + $0x58] sm:$0xf]  ;;  %v374_v21 = vld [vmem:[#allocation2 + $0x8c] sm:$0x1]  ;;  %1473 = vrot.lane.b32.xlu0 %v14732_v35, %s14191_s27  ;;  %v725_v0 = vor.u32 %v723_v46, %v722_v41 }
  0x7a   : > { %v928_v42 = vld [vmem:[#allocation2 + $0x68] sm:$0x1]  ;;  %934 = vst.msk [vmem:[#allocation2 + $0x70] sm:$0xf] %vm870_vm9, %v700_v57  ;;  %v709_v2 = vrot.slane %v705_v55, 4  ;;  %v713_v7 = vrot.slane %v711_v62, 7 }
  0x7b   : > { %373 = vst [vmem:[#allocation2 + $0x80] sm:$0x1] %v372_v27  ;;  %v324_v49 = vld [vmem:[#allocation2 + $0x9c] sm:$0x1]  ;;  %v929_v25 = vsel %vm14493_vm10, %v684_v58, %v928_v42  ;;  %v726_v9 = vrot.slane %v722_v41, 4  ;;  %v14797_v47 = vrot.slane %v728_v44, 7 }
  0x7c   : > { %v731_v32 = vshll.u32 %v536_v52, 16  ;;  %v539_v19 = vld [vmem:[%s14418_s7 + $0x60] sm:$0xf]  ;;  %930 = vst [vmem:[#allocation2 + $0x68] sm:$0x1] %v929_v25  ;;  %v716_v20 = vor.u32 %v714_v10, %v713_v7  ;;  %v322_v53 = vsel %vm14255_vm5, 0, %v321_v23 }
  0x7d   : > { %v938_v35 = vld [vmem:[#allocation2 + $0x78] sm:$0xf]  ;;  %v737_v63 = vshrl.u32 %v537_v37, 16  ;;  %v935_v12 = vld [vmem:[#allocation2 + $0x74] sm:$0x1]  ;;  %v718_v6 = vrot.slane %v713_v7, 4  ;;  %1475 = vrot.lane.b32.xlu0 %v1369_v48, %s14191_s27 }
  0x7e   : > { %v377_v16 = vld [vmem:[#allocation2 + $0x98] sm:$0x1]  ;;  %v939_v28 = vsel %vm14503_vm11, %v708_v56, %v938_v35  ;;  %v733_v45 = vor.u32 %v731_v32, %v14797_v47  ;;  %323 = vst [vmem:[#allocation2 + $0x90] sm:$0x1] %v322_v53  ;;  %v740_v11 = vshll.u32 %v537_v37, 16  ;;  %v936_v58 = vsel %vm14493_vm10, %v701_v31, %v935_v12 }
  0x7f   : > { %v538_v61 = vld [vmem:[%s14418_s7 + $0x5c] sm:$0xf]  ;;  %940 = vst [vmem:[#allocation2 + $0x78] sm:$0xf] %v939_v28  ;;  %v945_v51 = vld [vmem:[#allocation2 + $0x84] sm:$0xf]  ;;  %v717_v40 = vsel %vm14293_vm7, %v709_v2, %v716_v20 }
  0x80   : > { %v739_v38 = vrot.slane %v737_v63, 7  ;;  %v375_v52 = vsel %vm14239_vm3, 0, %v374_v21  ;;  %v540_v54 = vld [vmem:[%s14418_s7 + $0x64] sm:$0xf]  ;;  %937 = vst [vmem:[#allocation2 + $0x74] sm:$0x1] %v936_v58  ;;  %v946_v59 = vsel %vm14503_vm11, %v725_v0, %v945_v51  ;;  %v734_v26 = vsel %vm14293_vm7, %v726_v9, %v733_v45 }
  0x81   : > { %941 = vst.msk [vmem:[#allocation2 + $0x7c] sm:$0xf] %vm870_vm9, %v717_v40  ;;  %376 = vst [vmem:[#allocation2 + $0x8c] sm:$0x1] %v375_v52  ;;  %v325_v48 = vsel %vm14255_vm5, 0, %v324_v49  ;;  %v754_v29 = vshrl.u32 %v539_v19, 16 }
  0x82   : > { %v327_v33 = vld [vmem:[#allocation2 + $0xa8] sm:$0x1]  ;;  %v380_v15 = vld [vmem:[#allocation2 + $0xa4] sm:$0x1]  ;;  %947 = vst [vmem:[#allocation2 + $0x84] sm:$0xf] %v946_v59  ;;  %v742_v22 = vor.u32 %v740_v11, %v739_v38 }
  0x83   : > { %948 = vst.msk [vmem:[#allocation2 + $0x88] sm:$0xf] %vm870_vm9, %v734_v26  ;;  %326 = vst [vmem:[#allocation2 + $0x9c] sm:$0x1] %v325_v48  ;;  %v757_v39 = vshll.u32 %v539_v19, 16  ;;  %v743_v3 = vrot.slane %v739_v38, 4 }
  0x84   : > { %v745_v13 = vshrl.u32 %v538_v61, 16  ;;  %v541_v17 = vld [vmem:[%s14418_s7 + $0x68] sm:$0xf]  ;;  %v942_v50 = vld [vmem:[#allocation2 + $0x80] sm:$0x1]  ;;  %v756_v30 = vrot.slane %v754_v29, 7 }
  0x85   : > { %v748_v36 = vshll.u32 %v538_v61, 16  ;;  %v378_v34 = vsel %vm14239_vm3, 0, %v377_v16  ;;  %v762_v31 = vshrl.u32 %v540_v54, 16  ;;  %v943_v55 = vsel %vm14493_vm10, %v718_v6, %v942_v50  ;;  %v330_v23 = vld [vmem:[#allocation2 + $0xb4] sm:$0x1] }
  0x86   : > { %v747_v41 = vrot.slane %v745_v13, 7  ;;  %379 = vst [vmem:[#allocation2 + $0x98] sm:$0x1] %v378_v34  ;;  %v765_v46 = vshll.u32 %v540_v54, 16  ;;  %v328_v62 = vsel %vm14255_vm5, 0, %v327_v33  ;;  %v735_v57 = vrot.slane %v14797_v47, 4 }
  0x87   : > { %944 = vst [vmem:[#allocation2 + $0x80] sm:$0x1] %v943_v55  ;;  %v760_v10 = vrot.slane %v756_v30, 4  ;;  %v764_v27 = vrot.slane %v762_v31, 7  ;;  %329 = vst [vmem:[#allocation2 + $0xa8] sm:$0x1] %v328_v62  ;;  %v759_v42 = vor.u32 %v757_v39, %v756_v30 }
  0x88   : > { %v771_v44 = vshrl.u32 %v541_v17, 16  ;;  %v543_v37 = vld [vmem:[%s14418_s7 + $0x70] sm:$0xf]  ;;  %v750_v56 = vor.u32 %v748_v36, %v747_v41  ;;  %v774_v0 = vshll.u32 %v541_v17, 16  ;;  %v381_v2 = vsel %vm14239_vm3, 0, %v380_v15 }
  0x89   : > { %v952_v21 = vld [vmem:[#allocation2 + $0x90] sm:$0xf]  ;;  %v767_v25 = vor.u32 %v765_v46, %v764_v27  ;;  %382 = vst [vmem:[#allocation2 + $0xa4] sm:$0x1] %v381_v2  ;;  %v542_v47 = vld [vmem:[%s14418_s7 + $0x6c] sm:$0xf] }
  0x8a   : > { %v383_v7 = vld [vmem:[#allocation2 + $0xb0] sm:$0x1]  ;;  %v953_v49 = vsel %vm14503_vm11, %v742_v22, %v952_v21  ;;  %v773_v9 = vrot.slane %v771_v44, 7  ;;  %v544_v32 = vld [vmem:[%s14418_s7 + $0x74] sm:$0xf]  ;;  %v751_v35 = vsel %vm14293_vm7, %v743_v3, %v750_v56  ;;  %v752_v20 = vrot.slane %v747_v41, 4 }
  0x8b   : > { %954 = vst [vmem:[#allocation2 + $0x90] sm:$0xf] %v953_v49  ;;  %v949_v19 = vld [vmem:[#allocation2 + $0x8c] sm:$0x1]  ;;  %v331_v53 = vsel %vm14255_vm5, 0, %v330_v23  ;;  %v788_v63 = vshrl.u32 %v543_v37, 16  ;;  %v768_v12 = vsel %vm14293_vm7, %v760_v10, %v767_v25 }
  0x8c   : > { %v950_v16 = vsel %vm14493_vm10, %v735_v57, %v949_v19  ;;  %v959_v28 = vld [vmem:[#allocation2 + $0x9c] sm:$0xf]  ;;  %955 = vst.msk [vmem:[#allocation2 + $0x94] sm:$0xf] %vm870_vm9, %v751_v35  ;;  %v776_v6 = vor.u32 %v774_v0, %v773_v9  ;;  %332 = vst [vmem:[#allocation2 + $0xb4] sm:$0x1] %v331_v53 }
  0x8d   : > { %v791_v45 = vshll.u32 %v543_v37, 16  ;;  %951 = vst [vmem:[#allocation2 + $0x8c] sm:$0x1] %v950_v16  ;;  %v960_v11 = vsel %vm14503_vm11, %v759_v42, %v959_v28  ;;  %v769_v61 = vrot.slane %v764_v27, 4  ;;  %962 = vst.msk [vmem:[#allocation2 + $0xa0] sm:$0xf] %vm870_vm9, %v768_v12 }
  0x8e   : > { %v790_v58 = vrot.slane %v788_v63, 7  ;;  %v779_v51 = vshrl.u32 %v542_v47, 16  ;;  %v386_v40 = vld [vmem:[#allocation2 + $0xbc] sm:$0x1]  ;;  %961 = vst [vmem:[#allocation2 + $0x9c] sm:$0xf] %v960_v11 }
  0x8f   : > { %v956_v38 = vld [vmem:[#allocation2 + $0x98] sm:$0x1]  ;;  %v782_v52 = vshll.u32 %v542_v47, 16  ;;  %v384_v54 = vsel %vm14239_vm3, 0, %v383_v7  ;;  %v796_v59 = vshrl.u32 %v544_v32, 16  ;;  %v799_v26 = vshll.u32 %v544_v32, 16 }
  0x90   : > { %v957_v48 = vsel %vm14493_vm10, %v752_v20, %v956_v38  ;;  %v966_v29 = vld [vmem:[#allocation2 + $0xa8] sm:$0xf]  ;;  %v793_v33 = vor.u32 %v791_v45, %v790_v58  ;;  %v777_v15 = vrot.slane %v773_v9, 4  ;;  %v781_v22 = vrot.slane %v779_v51, 7  ;;  %385 = vst [vmem:[#allocation2 + $0xb0] sm:$0x1] %v384_v54  ;;  %v1392_v0 = vpop.permute.xlu1 %1391  ;;  %v1388_v2 = vpop.permute.xlu0 %1387 }
  0x91   : > { %958 = vst [vmem:[#allocation2 + $0x98] sm:$0x1] %v957_v48  ;;  %v967_v39 = vsel %vm14503_vm11, %v776_v6, %v966_v29  ;;  %v794_v3 = vrot.slane %v790_v58, 4  ;;  %v798_v13 = vrot.slane %v796_v59, 7  ;;  %v387_v17 = vsel %vm14239_vm3, 0, %v386_v40 }
  0x92   : > { %968 = vst [vmem:[#allocation2 + $0xa8] sm:$0xf] %v967_v39  ;;  %v963_v50 = vld [vmem:[#allocation2 + $0xa4] sm:$0x1]  ;;  %v784_v30 = vor.u32 %v782_v52, %v781_v22  ;;  %388 = vst [vmem:[#allocation2 + $0xbc] sm:$0x1] %v387_v17 }
  0x93   : > { %v964_v36 = vsel %vm14493_vm10, %v769_v61, %v963_v50  ;;  %v801_v34 = vor.u32 %v799_v26, %v798_v13  ;;  %v973_v31 = vld [vmem:[#allocation2 + $0xb4] sm:$0xf]  ;;  %v786_v41 = vrot.slane %v781_v22, 4  ;;  %v803_v23 = vrot.slane %v798_v13, 4  ;;  %v1533_v56 = vld [vmem:[#allocation2 + $0xc] sm:$0xf] }
  0x94   : > { %965 = vst [vmem:[#allocation2 + $0xa4] sm:$0x1] %v964_v36  ;;  %v785_v55 = vsel %vm14293_vm7, %v777_v15, %v784_v30  ;;  %v974_v46 = vsel %vm14503_vm11, %v793_v33, %v973_v31  ;;  %vm1538_vm4 = vcmask 57376   ;;  %vm1531_vm6 = vcmask 60448   ;;  %v1540_v21 = vld [vmem:[#allocation2 + $0x14] sm:$0x1]  ;;  %v1394_v47 = vpop.permute.xlu1 %1393  ;;  %v1404_v32 = vpop.permute.xlu0 %1403 }
  0x95   : > { %969 = vst.msk [vmem:[#allocation2 + $0xac] sm:$0xf] %vm870_vm9, %v785_v55  ;;  %v802_v62 = vsel %vm14293_vm7, %v794_v3, %v801_v34  ;;  %975 = vst [vmem:[#allocation2 + $0xb4] sm:$0xf] %v974_v46  ;;  %v18890_v37 = vmov 0  ;;  %v18893_v42 = vmov 0 }
  0x96   : > { %976 = vst.msk [vmem:[#allocation2 + $0xb8] sm:$0xf] %vm870_vm9, %v802_v62  ;;  %vm14874_vm8 = vmand %vm1538_vm4, %vm283_vm2  ;;  %v1543_v25 = vld [vmem:[#allocation2 + $0x18] sm:$0xf]  ;;  %v1554_v9 = vld [vmem:[#allocation2 + $0x2c] sm:$0x1] }
  0x97   : > { %v970_v57 = vld [vmem:[#allocation2 + $0xb0] sm:$0x1]  ;;  %v18891_v37 = vsel %vm14874_vm8, 4294967295, %v18890_v37  ;;  %vm14880_vm13 = vmand %vm1531_vm6, %vm18693_vm1  ;;  %v1541_v7 = vsel %vm14874_vm8, %v1392_v0, %v1540_v21  ;;  %v1555_v35 = vsel %vm14874_vm8, %v1404_v32, %v1554_v9  ;;  %v1550_v20 = vld [vmem:[#allocation2 + $0x24] sm:$0xf]  ;;  %v14911_v33 = vsel %vm2183_vm12, %v14595_v43, 0 }
  0x98   : > { %v971_v10 = vsel %vm14493_vm10, %v786_v41, %v970_v57  ;;  %18892 = vst [vmem:[#allocation9_spill] sm:$0xff] %v18891_v37  ;;  %v18894_v42 = vsel %vm14880_vm13, 4294967295, %v18893_v42  ;;  %v1534_v49 = vsel %vm14880_vm13, %v1388_v2, %v1533_v56  ;;  %1542 = vst [vmem:[#allocation2 + $0x14] sm:$0x1] %v1541_v7  ;;  %v1544_v19 = vsel %vm14880_vm13, %v1394_v47, %v1543_v25  ;;  %v1400_v53 = vpop.permute.xlu1 %1399  ;;  %v1390_v63 = vpop.permute.xlu0 %1389  ;;  %v1547_v12 = vld [vmem:[#allocation2 + $0x20] sm:$0x1] }
  0x99   : > { %972 = vst [vmem:[#allocation2 + $0xb0] sm:$0x1] %v971_v10  ;;  %v977_v27 = vld [vmem:[#allocation2 + $0xbc] sm:$0x1]  ;;  %18895 = vst [vmem:[#allocation10_spill] sm:$0xff] %v18894_v42  ;;  %v1551_v16 = vsel %vm14880_vm13, %v1400_v53, %v1550_v20  ;;  %vm2688_vm14 = vcmask 1042432  }
  0x9a   : > { %v978_v44 = vsel %vm14493_vm10, %v803_v23, %v977_v27  ;;  %1535 = vst [vmem:[#allocation2 + $0xc] sm:$0xf] %v1534_v49  ;;  %1545 = vst [vmem:[#allocation2 + $0x18] sm:$0xf] %v1544_v19  ;;  %v1557_v54 = vld [vmem:[#allocation2 + $0x30] sm:$0xf] }
  0x9b   : > { %979 = vst [vmem:[#allocation2 + $0xbc] sm:$0x1] %v978_v44  ;;  %1556 = vst [vmem:[#allocation2 + $0x2c] sm:$0x1] %v1555_v35  ;;  %vm2689_vm4 = vcmask 1046532  }
  0x9c   : > { %1537 = vst.msk [vmem:[#allocation2 + $0x10] sm:$0xf] %vm1531_vm6, %v1390_v63  ;;  %1552 = vst [vmem:[#allocation2 + $0x24] sm:$0xf] %v1551_v16  ;;  %v1398_v61 = vpop.permute.xlu1 %1397  ;;  %v1396_v58 = vpop.permute.xlu0 %1395  ;;  %v1564_v13 = vld [vmem:[#allocation2 + $0x3c] sm:$0xf] }
  0x9d   : > { %v1548_v52 = vsel %vm14874_vm8, %v1398_v61, %v1547_v12  ;;  %1546 = vst.msk [vmem:[#allocation2 + $0x1c] sm:$0xf] %vm1531_vm6, %v1396_v58  ;;  %vm14934_vm1 = vmor %vm2688_vm14, %vm2689_vm4  ;;  %v1561_v12 = vld [vmem:[#allocation2 + $0x38] sm:$0x1]  ;;  %v1627_v60 = vld [vmem:[#allocation2 + $0xa8] sm:$0xf] }
  0x9e   : > { %1549 = vst [vmem:[#allocation2 + $0x20] sm:$0x1] %v1548_v52 }
  0x9f   : > { %v14899_v11 = vld [vmem:[#allocation2 + $0x14] sm:$0x1] }
  0xa0   : > { %v1744_v26 = vshll.u32 %v14899_v11, 16  ;;  %v2703_v15 = vrot.slane %v14899_v11, 5  ;;  %v1406_v39 = vpop.permute.xlu1 %1405  ;;  %v1402_v3 = vpop.permute.xlu0 %1401 }
  0xa1   : > { %v14895_v28 = vld [vmem:[#allocation2 + $0xc] sm:$0xf]  ;;  %v14904_v59 = vld [vmem:[#allocation2 + $0x18] sm:$0xf]  ;;  %v1558_v43 = vsel %vm14880_vm13, %v1406_v39, %v1557_v54  ;;  %1553 = vst.msk [vmem:[#allocation2 + $0x28] sm:$0xf] %vm1531_vm6, %v1402_v3 }
  0xa2   : > { %v1725_v6 = vshrl.u32 %v14895_v28, 16  ;;  %v1728_v45 = vshll.u32 %v14895_v28, 16  ;;  %v2641_v38 = vld [vmem:[#allocation2 + $0xc] sm:$0xe]  ;;  %v1749_v48 = vshrl.u32 %v14904_v59, 16  ;;  %v1752_v29 = vshll.u32 %v14904_v59, 16 }
  0xa3   : > { %v11802_v22 = vrot.slane %v2641_v38, 9  ;;  %v14914_v17 = vld [vmem:[#allocation2 + $0x10] sm:$0xf]  ;;  %v14916_v34 = vld [vmem:[#allocation2 + $0x2c] sm:$0x1]  ;;  %v1746_v23 = vrot.slane %v1744_v26, 5 }
  0xa4   : > { %v1727_v51 = vrot.slane %v1725_v6, 4  ;;  %v1730_v40 = vrot.slane %v1728_v45, 5  ;;  %v1751_v30 = vrot.slane %v1749_v48, 4  ;;  %v1754_v36 = vrot.slane %v1752_v29, 5  ;;  %v14926_v62 = vld [vmem:[#allocation2 + $0x24] sm:$0xf]  ;;  %v1412_v7 = vpop.permute.xlu1 %1411  ;;  %v1408_v49 = vpop.permute.xlu0 %1407 }
  0xa5   : > { %v1734_v55 = vshll.u32 %v14914_v17, 16  ;;  %v1738_v41 = vshrl.u32 %v14914_v17, 16  ;;  %v2700_v46 = vrot.slane %v14914_v17, 5  ;;  %1559 = vst [vmem:[#allocation2 + $0x30] sm:$0xf] %v1558_v43  ;;  %v1773_v57 = vshrl.u32 %v14926_v62, 16 }
  0xa6   : > { %v1731_v50 = vor.u32 %v1730_v40, %v1727_v51  ;;  %v1776_v10 = vshll.u32 %v14926_v62, 16  ;;  %v1755_v0 = vor.u32 %v1754_v36, %v1751_v30  ;;  %v14938_v9 = vld [vmem:[#allocation2 + $0x1c] sm:$0xf]  ;;  %v1792_v19 = vshll.u32 %v14916_v34, 16  ;;  %1560 = vst.msk [vmem:[#allocation2 + $0x34] sm:$0xf] %vm1531_vm6, %v1408_v49 }
  0xa7   : > { %v1736_v21 = vrot.slane %v1734_v55, 5  ;;  %v1740_v56 = vrot.slane %v1738_v41, 4  ;;  %v2702_v2 = vrot.slane %v2700_v46, 4  ;;  %v1775_v47 = vrot.slane %v1773_v57, 4  ;;  %v14944_v53 = vld [vmem:[#allocation2 + $0x20] sm:$0x1] }
  0xa8   : > { %v1732_v25 = vrot.slane %v1731_v50, 4  ;;  %v1778_v32 = vrot.slane %v1776_v10, 5  ;;  %v1565_v35 = vsel %vm14880_vm13, %v1412_v7, %v1564_v13  ;;  %v1758_v63 = vshll.u32 %v14938_v9, 16  ;;  %v1410_v52 = vpop.permute.xlu1 %1409  ;;  %v1414_v54 = vpop.permute.xlu0 %1413  ;;  %v1571_v26 = vld [vmem:[#allocation2 + $0x48] sm:$0xf] }
  0xa9   : > { %v1741_v20 = vor.u32 %v1740_v56, %v1736_v21  ;;  %v14949_v16 = vsel %vm14934_vm1, %v11802_v22, %v2700_v46  ;;  %1566 = vst [vmem:[#allocation2 + $0x3c] sm:$0xf] %v1565_v35  ;;  %v1762_v6 = vshrl.u32 %v14938_v9, 16  ;;  %v1768_v45 = vshll.u32 %v14944_v53, 16  ;;  %v14961_v39 = vld [vmem:[#allocation2 + $0x28] sm:$0xf] }
  0xaa   : > { %18898 = vst [vmem:[#allocation11_spill] sm:$0xff] %v14949_v16  ;;  %v1779_v11 = vor.u32 %v1778_v32, %v1775_v47  ;;  %v1756_v51 = vrot.slane %v1755_v0, 4  ;;  %v1760_v40 = vrot.slane %v1758_v63, 5  ;;  %v14957_v38 = vsel %vm14934_vm1, %v2702_v2, %v2703_v15  ;;  %1567 = vst.msk [vmem:[#allocation2 + $0x40] sm:$0xf] %vm1531_vm6, %v1414_v54 }
  0xab   : > { %v1742_v58 = vrot.slane %v1741_v20, 4  ;;  %18899 = vst [vmem:[#allocation12_spill] sm:$0xff] %v14957_v38  ;;  %v1737_v48 = vsel %vm14684_vm15, %v1732_v25, %v1736_v21  ;;  %v1764_v29 = vrot.slane %v1762_v6, 4  ;;  %v1770_v22 = vrot.slane %v1768_v45, 5  ;;  %v1568_v15 = vld [vmem:[#allocation2 + $0x44] sm:$0x1] }
  0xac   : > { %v1562_v13 = vsel %vm14874_vm8, %v1410_v52, %v1561_v12  ;;  %v1780_v30 = vrot.slane %v1779_v11, 4  ;;  %v1782_v36 = vshll.u32 %v14961_v39, 16  ;;  %v14971_v43 = vld [vmem:[#allocation2 + $0x30] sm:$0xf]  ;;  %v1786_v46 = vshrl.u32 %v14961_v39, 16  ;;  %v1418_v2 = vpop.permute.xlu1 %1417  ;;  %v1416_v7 = vpop.permute.xlu0 %1415 }
  0xad   : > { %v1747_v50 = vsel %vm14684_vm15, %v1742_v58, %v1746_v23  ;;  %1563 = vst [vmem:[#allocation2 + $0x38] sm:$0x1] %v1562_v13  ;;  %v1765_v41 = vor.u32 %v1764_v29, %v1760_v40  ;;  %v1797_v57 = vshrl.u32 %v14971_v43, 16  ;;  %v1794_v21 = vrot.slane %v1792_v19, 5  ;;  %v14979_v23 = vld [vmem:[%s18686_s2 + $0x8] sm:$0xf] }
  0xae   : > { %v11738_v55 = vcombine.low %v1737_v48, %v1747_v50  ;;  %v1784_v10 = vrot.slane %v1782_v36, 5  ;;  %v1800_v56 = vshll.u32 %v14971_v43, 16  ;;  %v1761_v49 = vsel %vm14684_vm15, %v1756_v51, %v1760_v40  ;;  %v14986_v32 = vld [vmem:[#allocation2 + $0x34] sm:$0xf]  ;;  %v1575_v13 = vld [vmem:[#allocation2 + $0x50] sm:$0x1] }
  0xaf   : > { %v1766_v25 = vrot.slane %v1765_v41, 4  ;;  %v1788_v47 = vrot.slane %v1786_v46, 4  ;;  %v1799_v19 = vrot.slane %v1797_v57, 4  ;;  %v1572_v35 = vsel %vm14880_vm13, %v1418_v2, %v1571_v26  ;;  %v1578_v63 = vld [vmem:[#allocation2 + $0x54] sm:$0xf] }
  0xb0   : > { %12917 = vmatmul.mubr.msk.bf16.vlgmr.msra.gmra.mrb[0].mxu0 %vm2134_vm0, %v11738_v55  ;;  %v1569_v20 = vsel %vm14874_vm8, %v1416_v7, %v1568_v15  ;;  %v1785_v12 = vsel %vm14684_vm15, %v1780_v30, %v1784_v10  ;;  %v1802_v6 = vrot.slane %v1800_v56, 5  ;;  %v14994_v45 = vld [vmem:[#allocation2 + $0x3c] sm:$0xf]  ;;  %1573 = vst [vmem:[#allocation2 + $0x48] sm:$0xf] %v1572_v35  ;;  %v1806_v51 = vshll.u32 %v14986_v32, 16  ;;  %v1420_v29 = vpop.permute.xlu0 %1419 }
  0xb1   : > { %12949 = vmatpush3.bf16.msra.mxu0 %v14911_v33  ;;  %1570 = vst [vmem:[#allocation2 + $0x44] sm:$0x1] %v1569_v20  ;;  %v1771_v11 = vsel %vm14684_vm15, %v1766_v25, %v1770_v22  ;;  %v1789_v58 = vor.u32 %v1788_v47, %v1784_v10  ;;  %v1810_v40 = vshrl.u32 %v14986_v32, 16  ;;  %v1821_v26 = vshrl.u32 %v14994_v45, 16  ;;  %v1424_v33 = vpop.permute.xlu1 %1423  ;;  %v15005_v30 = vld [vmem:[#allocation2 + $0x40] sm:$0xf] }
  0xb2   : > { %14040 = vmatprep.subr.msk.bf16.mxu0 %vm2183_vm12, %v14979_v23  ;;  %v11739_v52 = vcombine.low %v1761_v49, %v1771_v11  ;;  %v1803_v54 = vor.u32 %v1802_v6, %v1799_v19  ;;  %v1824_v48 = vshll.u32 %v14994_v45, 16  ;;  %v1808_v50 = vrot.slane %v1806_v51, 5  ;;  %1574 = vst.msk [vmem:[#allocation2 + $0x4c] sm:$0xf] %vm1531_vm6, %v1420_v29  ;;  %v1017_v25 = vld [vmem:[%s14251_s26 + $0xf0] sm:$0xff] }
  0xb3   : > { %v1790_v15 = vrot.slane %v1789_v58, 4  ;;  %v1812_v22 = vrot.slane %v1810_v40, 4  ;;  %v1579_v55 = vsel %vm14880_vm13, %v1424_v33, %v1578_v63  ;;  %v1823_v57 = vrot.slane %v1821_v26, 4  ;;  %v1585_v11 = vld [vmem:[#allocation2 + $0x60] sm:$0xf] }
  0xb4   : > { %12920 = vmatprep.mubr.msk.bf16.mxu0 %vm2134_vm0, %v11739_v52  ;;  %v15013_v41 = vld [vmem:[#allocation2 + $0x38] sm:$0x1]  ;;  %v1804_v46 = vrot.slane %v1803_v54, 4  ;;  %v1826_v10 = vrot.slane %v1824_v48, 5  ;;  %1580 = vst [vmem:[#allocation2 + $0x54] sm:$0xf] %v1579_v55  ;;  %v1426_v6 = vpop.permute.xlu0 %1425  ;;  %v12542_v33 = vpack.c.bf16 %v1017_v25, %v1017_v25 }
  0xb5   : > { %v1795_v56 = vsel %vm14684_vm15, %v1790_v15, %v1794_v21  ;;  %v1813_v2 = vor.u32 %v1812_v22, %v1808_v50  ;;  %v1816_v7 = vshll.u32 %v15013_v41, 16  ;;  %v1830_v49 = vshll.u32 %v15005_v30, 16  ;;  %v1422_v63 = vpop.permute.xlu1 %1421  ;;  %1581 = vst.msk [vmem:[#allocation2 + $0x58] sm:$0xf] %vm1531_vm6, %v1426_v6  ;;  %v1582_v29 = vld [vmem:[#allocation2 + $0x5c] sm:$0x1] }
  0xb6   : > { %v11740_v47 = vcombine.low %v1785_v12, %v1795_v56  ;;  %v1809_v19 = vsel %vm14684_vm15, %v1804_v46, %v1808_v50  ;;  %v1827_v35 = vor.u32 %v1826_v10, %v1823_v57  ;;  %v1834_v20 = vshrl.u32 %v15005_v30, 16  ;;  %v15134_v14 = vld [vmem:[#allocation2 + $0x24] sm:$0xe] }
  0xb7   : > { %v1814_v58 = vrot.slane %v1813_v2, 4  ;;  %v1818_v51 = vrot.slane %v1816_v7, 5  ;;  %v1832_v40 = vrot.slane %v1830_v49, 5  ;;  %v1576_v52 = vsel %vm14874_vm8, %v1422_v63, %v1575_v13  ;;  %v15031_v48 = vld [vmem:[#allocation2 + $0x48] sm:$0xf] }
  0xb8   : > { %12921 = vmatmul.mubr.msk.bf16.gmra.mrb[4].mxu0 %vm2134_vm0, %v11740_v47  ;;  %v15029_v12 = vld [vmem:[#allocation2 + $0x44] sm:$0x1]  ;;  %v1828_v54 = vrot.slane %v1827_v35, 4  ;;  %v1836_v26 = vrot.slane %v1834_v20, 4  ;;  %1577 = vst [vmem:[#allocation2 + $0x50] sm:$0x1] %v1576_v52  ;;  %v1428_v2 = vpop.permute.xlu0 %1427 }
  0xb9   : > { %v1819_v15 = vsel %vm14684_vm15, %v1814_v58, %v1818_v51  ;;  %v1840_v50 = vshll.u32 %v15029_v12, 16  ;;  %v1845_v13 = vshrl.u32 %v15031_v48, 16  ;;  %v1848_v22 = vshll.u32 %v15031_v48, 16  ;;  %v1430_v56 = vpop.permute.xlu1 %1429  ;;  %v15040_v49 = vld [vmem:[#allocation2 + $0x4c] sm:$0xf] }
  0xba   : > { %v11741_v55 = vcombine.low %v1809_v19, %v1819_v15  ;;  %v1833_v46 = vsel %vm14684_vm15, %v1828_v54, %v1832_v40  ;;  %v1837_v57 = vor.u32 %v1836_v26, %v1832_v40  ;;  %v1371_v10 = vshrl.u32 %v12542_v33, 16  ;;  %v1592_v51 = vld [vmem:[#allocation2 + $0x6c] sm:$0xf] }
  0xbb   : > { %v1842_v7 = vrot.slane %v1840_v50, 5  ;;  %v1847_v25 = vrot.slane %v1845_v13, 4  ;;  %v1850_v47 = vrot.slane %v1848_v22, 5  ;;  %v1374_v35 = vshll.u32 %v12542_v33, 16  ;;  %v15048_v58 = vld [vmem:[#allocation2 + $0x54] sm:$0xf] }
  0xbc   : > { %v1586_v20 = vsel %vm14880_vm13, %v1430_v56, %v1585_v11  ;;  %v1583_v63 = vsel %vm14874_vm8, %v1428_v2, %v1582_v29  ;;  %12924 = vmatprep.mubr.msk.bf16.mxu0 %vm2134_vm0, %v11741_v55  ;;  %v1838_v19 = vrot.slane %v1837_v57, 4  ;;  %v1854_v6 = vshll.u32 %v15040_v49, 16  ;;  %v15059_v50 = vld [vmem:[#allocation2 + $0x18] sm:$0xe]  ;;  %v1432_v22 = vpop.permute.xlu0 %1431  ;;  %v1589_v57 = vld [vmem:[#allocation2 + $0x68] sm:$0x1] }
  0xbd   : > { %1587 = vst [vmem:[#allocation2 + $0x60] sm:$0xf] %v1586_v20  ;;  %1584 = vst [vmem:[#allocation2 + $0x5c] sm:$0x1] %v1583_v63  ;;  %v1851_v40 = vor.u32 %v1850_v47, %v1847_v25  ;;  %v1858_v52 = vshrl.u32 %v15040_v49, 16  ;;  %v1869_v54 = vshrl.u32 %v15048_v58, 16  ;;  %v1436_v13 = vpop.permute.xlu1 %1435 }
  0xbe   : > { %v1872_v11 = vshll.u32 %v15048_v58, 16  ;;  %v1843_v26 = vsel %vm14684_vm15, %v1838_v19, %v1842_v7  ;;  %v1856_v33 = vrot.slane %v1854_v6, 5  ;;  %v15057_v15 = vrot.slane %v1371_v10, 7  ;;  %v15061_v25 = vld [vmem:[#allocation2 + $0x58] sm:$0xf] }
  0xbf   : > { %v11742_v55 = vcombine.low %v1833_v46, %v1843_v26  ;;  %v1852_v56 = vrot.slane %v1851_v40, 4  ;;  %v1860_v2 = vrot.slane %v1858_v52, 4  ;;  %v1871_v47 = vrot.slane %v1869_v54, 4  ;;  %1588 = vst.msk [vmem:[#allocation2 + $0x64] sm:$0xf] %vm1531_vm6, %v1432_v22  ;;  %v1018_v6 = vld [vmem:[%s14251_s26 + $0xf8] sm:$0xff] }
  0xc0   : > { %v1593_v7 = vsel %vm14880_vm13, %v1436_v13, %v1592_v51  ;;  %v15066_v20 = vld [vmem:[#allocation2 + $0x50] sm:$0x1]  ;;  %v1874_v10 = vrot.slane %v1872_v11, 5  ;;  %v1878_v63 = vshll.u32 %v15061_v25, 16  ;;  %v1882_v19 = vshrl.u32 %v15061_v25, 16  ;;  %v1438_v3 = vpop.permute.xlu0 %1437 }
  0xc1   : > { %1594 = vst [vmem:[#allocation2 + $0x6c] sm:$0xf] %v1593_v7  ;;  %12925 = vmatmul.mubr.msk.bf16.gmra.mrb[8].mxu0 %vm2134_vm0, %v11742_v55  ;;  %v1861_v46 = vor.u32 %v1860_v2, %v1856_v33  ;;  %v1864_v40 = vshll.u32 %v15066_v20, 16  ;;  %v15075_v52 = vsel %vm2183_vm12, %v14979_v23, 0  ;;  %v1376_v13 = vor.u32 %v1374_v35, %v15057_v15  ;;  %v1434_v22 = vpop.permute.xlu1 %1433  ;;  %v1599_v7 = vld [vmem:[#allocation2 + $0x78] sm:$0xf] }
  0xc2   : > { %v1875_v54 = vor.u32 %v1874_v10, %v1871_v47  ;;  %v1880_v11 = vrot.slane %v1878_v63, 5  ;;  %v1884_v26 = vrot.slane %v1882_v19, 4  ;;  %v15080_v2 = vpack.c.bf16 %v1018_v6, %v1018_v6  ;;  %1595 = vst.msk [vmem:[#allocation2 + $0x70] sm:$0xf] %vm1531_vm6, %v1438_v3  ;;  %v1596_v6 = vld [vmem:[#allocation2 + $0x74] sm:$0x1] }
  0xc3   : > { %v1862_v29 = vrot.slane %v1861_v46, 4  ;;  %v1866_v55 = vrot.slane %v1864_v40, 5  ;;  %v1590_v23 = vsel %vm14874_vm8, %v1434_v22, %v1589_v57  ;;  %v1857_v47 = vsel %vm14684_vm15, %v1852_v56, %v1856_v33  ;;  %1477 = vrot.lane.b32.xlu1 %v1376_v13, %s14191_s27 }
  0xc4   : > { %v15088_v10 = vld [vmem:[#allocation2 + $0x5c] sm:$0x1]  ;;  %v1876_v35 = vrot.slane %v1875_v54, 4  ;;  %v1885_v63 = vor.u32 %v1884_v26, %v1880_v11  ;;  %v15090_v19 = vld [vmem:[#allocation2 + $0x60] sm:$0xf]  ;;  %v1379_v26 = vshrl.u32 %v15080_v2, 16  ;;  %v1440_v13 = vpop.permute.xlu0 %1439 }
  0xc5   : > { %1591 = vst [vmem:[#allocation2 + $0x68] sm:$0x1] %v1590_v23  ;;  %v1867_v46 = vsel %vm14684_vm15, %v1862_v29, %v1866_v55  ;;  %v1888_v57 = vshll.u32 %v15088_v10, 16  ;;  %v1893_v3 = vshrl.u32 %v15090_v19, 16  ;;  %v1896_v40 = vshll.u32 %v15090_v19, 16  ;;  %v1442_v22 = vpop.permute.xlu1 %1441 }
  0xc6   : > { %v11743_v33 = vcombine.low %v1857_v47, %v1867_v46  ;;  %v1881_v56 = vsel %vm14684_vm15, %v1876_v35, %v1880_v11  ;;  %v1886_v54 = vrot.slane %v1885_v63, 4  ;;  %v15101_v51 = vld [vmem:[#allocation2 + $0x64] sm:$0xf]  ;;  %v1382_v55 = vshll.u32 %v15080_v2, 16 }
  0xc7   : > { %v1890_v23 = vrot.slane %v1888_v57, 5  ;;  %v1895_v36 = vrot.slane %v1893_v3, 4  ;;  %v1898_v29 = vrot.slane %v1896_v40, 5  ;;  %v1600_v0 = vsel %vm14880_vm13, %v1442_v22, %v1599_v7  ;;  %v1606_v46 = vld [vmem:[#allocation2 + $0x84] sm:$0xf] }
  0xc8   : > { %v1597_v47 = vsel %vm14874_vm8, %v1440_v13, %v1596_v6  ;;  %12928 = vmatprep.mubr.msk.bf16.mxu0 %vm2134_vm0, %v11743_v33  ;;  %v1902_v11 = vshll.u32 %v15101_v51, 16  ;;  %v1906_v35 = vshrl.u32 %v15101_v51, 16  ;;  %v15111_v63 = vld [vmem:[#allocation2 + $0x6c] sm:$0xf]  ;;  %1601 = vst [vmem:[#allocation2 + $0x78] sm:$0xf] %v1600_v0  ;;  %v1444_v61 = vpop.permute.xlu0 %1443 }
  0xc9   : > { %18900 = vst [vmem:[#allocation13_spill] sm:$0xff] %v15111_v63  ;;  %1598 = vst [vmem:[#allocation2 + $0x74] sm:$0x1] %v1597_v47  ;;  %v1891_v2 = vsel %vm14684_vm15, %v1886_v54, %v1890_v23  ;;  %v1899_v57 = vor.u32 %v1898_v29, %v1895_v36  ;;  %v1917_v7 = vshrl.u32 %v15111_v63, 16  ;;  %v1920_v3 = vshll.u32 %v15111_v63, 16  ;;  %v1448_v13 = vpop.permute.xlu1 %1447 }
  0xca   : > { %v11744_v6 = vcombine.low %v1881_v56, %v1891_v2  ;;  %v1904_v40 = vrot.slane %v1902_v11, 5  ;;  %v1908_v33 = vrot.slane %v1906_v35, 4  ;;  %v15119_v27 = vld [vmem:[#allocation2 + $0x70] sm:$0xf]  ;;  %v1377_v31 = vrot.slane %v15057_v15, 4 }
  0xcb   : > { %v1919_v0 = vrot.slane %v1917_v7, 4  ;;  %v1922_v47 = vrot.slane %v1920_v3, 5  ;;  %v1381_v54 = vrot.slane %v1379_v26, 7  ;;  %v1607_v36 = vsel %vm14880_vm13, %v1448_v13, %v1606_v46  ;;  %1602 = vst.msk [vmem:[#allocation2 + $0x7c] sm:$0xf] %vm1531_vm6, %v1444_v61 }
  0xcc   : > { %12929 = vmatmul.mubr.msk.bf16.gmra.mrb[12].mxu0 %vm2134_vm0, %v11744_v6  ;;  %v15126_v56 = vld [vmem:[#allocation2 + $0x68] sm:$0x1]  ;;  %v1909_v23 = vor.u32 %v1908_v33, %v1904_v40  ;;  %v1926_v29 = vshll.u32 %v15119_v27, 16  ;;  %v1930_v11 = vshrl.u32 %v15119_v27, 16  ;;  %1608 = vst [vmem:[#allocation2 + $0x84] sm:$0xf] %v1607_v36 }
  0xcd   : > { %v1603_v35 = vld [vmem:[#allocation2 + $0x80] sm:$0x1]  ;;  %v1900_v2 = vrot.slane %v1899_v57, 4  ;;  %v1912_v15 = vshll.u32 %v15126_v56, 16  ;;  %v1923_v26 = vor.u32 %v1922_v47, %v1919_v0  ;;  %v1384_v6 = vor.u32 %v1382_v55, %v1381_v54  ;;  %v1446_v13 = vpop.permute.xlu1 %1445  ;;  %v1450_v22 = vpop.permute.xlu0 %1449  ;;  %v1613_v33 = vld [vmem:[#allocation2 + $0x90] sm:$0xf] }
  0xce   : > { %v1910_v7 = vrot.slane %v1909_v23, 4  ;;  %v1928_v61 = vrot.slane %v1926_v29, 5  ;;  %v1932_v3 = vrot.slane %v1930_v11, 4  ;;  %v1386_v16 = vrot.slane %v1381_v54, 4  ;;  %1609 = vst.msk [vmem:[#allocation2 + $0x88] sm:$0xf] %vm1531_vm6, %v1450_v22 }
  0xcf   : > { %v1914_v21 = vrot.slane %v1912_v15, 5  ;;  %v1924_v38 = vrot.slane %v1923_v26, 4  ;;  %v18697_v36 = vrot.slane %v14938_v9, 5  ;;  %v1604_v57 = vsel %vm14874_vm8, %v1446_v13, %v1603_v35  ;;  %v15141_v23 = vld [vmem:[#allocation2 + $0x78] sm:$0xf] }
  0xd0   : > { %v15139_v0 = vld [vmem:[#allocation2 + $0x74] sm:$0x1]  ;;  %v1933_v47 = vor.u32 %v1932_v3, %v1928_v61  ;;  %18901 = vst [vmem:[#allocation14_spill] sm:$0xff] %v15141_v23  ;;  %v1385_v55 = vsel %vm14293_vm7, %v1377_v31, %v1384_v6  ;;  %1605 = vst [vmem:[#allocation2 + $0x80] sm:$0x1] %v1604_v57  ;;  %v1905_v11 = vsel %vm14684_vm15, %v1900_v2, %v1904_v40  ;;  %v1941_v15 = vshrl.u32 %v15141_v23, 16 }
  0xd1   : > { %v1610_v54 = vld [vmem:[#allocation2 + $0x8c] sm:$0x1]  ;;  %v1915_v35 = vsel %vm14684_vm15, %v1910_v7, %v1914_v21  ;;  %v1936_v22 = vshll.u32 %v15139_v0, 16  ;;  %1479 = vrot.lane.b32.xlu0 %v1385_v55, %s14191_s27  ;;  %1481 = vrot.lane.b32.xlu1 %v1386_v16, %s14191_s27  ;;  %v1944_v3 = vshll.u32 %v15141_v23, 16  ;;  %v1454_v13 = vpop.permute.xlu1 %1453  ;;  %v1452_v57 = vpop.permute.xlu0 %1451  ;;  %v1929_v40 = vsel %vm14684_vm15, %v1924_v38, %v1928_v61  ;;  %v2647_v63 = vld [vmem:[#allocation2 + $0x54] sm:$0xe] }
  0xd2   : > { %v11745_v26 = vcombine.low %v1905_v11, %v1915_v35  ;;  %v1934_v31 = vrot.slane %v1933_v47, 4  ;;  %v15158_v2 = vld [vmem:[#allocation2 + $0x7c] sm:$0xf]  ;;  %v1943_v7 = vrot.slane %v1941_v15, 4  ;;  %v2709_v55 = vrot.slane %v18697_v36, 4 }
  0xd3   : > { %v1938_v21 = vrot.slane %v1936_v22, 5  ;;  %v1614_v16 = vsel %vm14880_vm13, %v1454_v13, %v1613_v33  ;;  %v1611_v47 = vsel %vm14874_vm8, %v1452_v57, %v1610_v54  ;;  %v1620_v11 = vld [vmem:[#allocation2 + $0x9c] sm:$0xf]  ;;  %v1946_v35 = vrot.slane %v1944_v3, 5  ;;  %v15168_v38 = vld [vmem:[#allocation2 + $0x84] sm:$0xf] }
  0xd4   : > { %12932 = vmatprep.mubr.msk.bf16.mxu0 %vm2134_vm0, %v11745_v26  ;;  %v1950_v46 = vshll.u32 %v15158_v2, 16  ;;  %18902 = vst [vmem:[#allocation15_spill] sm:$0xff] %v15168_v38  ;;  %1615 = vst [vmem:[#allocation2 + $0x90] sm:$0xf] %v1614_v16  ;;  %v1954_v22 = vshrl.u32 %v15158_v2, 16  ;;  %v1965_v33 = vshrl.u32 %v15168_v38, 16 }
  0xd5   : > { %1612 = vst [vmem:[#allocation2 + $0x8c] sm:$0x1] %v1611_v47  ;;  %v1939_v61 = vsel %vm14684_vm15, %v1934_v31, %v1938_v21  ;;  %v1968_v15 = vshll.u32 %v15168_v38, 16  ;;  %v1947_v13 = vor.u32 %v1946_v35, %v1943_v7  ;;  %v1460_v57 = vpop.permute.xlu1 %1459  ;;  %v1456_v29 = vpop.permute.xlu0 %1455  ;;  %v15177_v16 = vld [vmem:[#allocation2 + $0x88] sm:$0xf]  ;;  %v2710_v31 = vrot.slane %v14944_v53, 5 }
  0xd6   : > { %v11746_v54 = vcombine.low %v1929_v40, %v1939_v61  ;;  %v1952_v26 = vrot.slane %v1950_v46, 5  ;;  %v1956_v6 = vrot.slane %v1954_v22, 4  ;;  %v1967_v47 = vrot.slane %v1965_v33, 4  ;;  %1616 = vst.msk [vmem:[#allocation2 + $0x94] sm:$0xf] %vm1531_vm6, %v1456_v29 }
  0xd7   : > { %v1970_v36 = vrot.slane %v1968_v15, 5  ;;  %v1621_v21 = vsel %vm14880_vm13, %v1460_v57, %v1620_v11  ;;  %v15184_v46 = vld [vmem:[#allocation2 + $0x80] sm:$0x1]  ;;  %v1948_v40 = vrot.slane %v1947_v13, 4  ;;  %v1974_v7 = vshll.u32 %v15177_v16, 16 }
  0xd8   : > { %12933 = vmatmul.mubr.msk.bf16.gmra.mrb[16].mxu0 %vm2134_vm0, %v11746_v54  ;;  %v1978_v35 = vshrl.u32 %v15177_v16, 16  ;;  %1622 = vst [vmem:[#allocation2 + $0x9c] sm:$0xf] %v1621_v21  ;;  %v1617_v61 = vld [vmem:[#allocation2 + $0x98] sm:$0x1]  ;;  %v1957_v22 = vor.u32 %v1956_v6, %v1952_v26  ;;  %v1960_v33 = vshll.u32 %v15184_v46, 16  ;;  %v15203_v11 = vsel %vm14934_vm1, %v2709_v55, %v2710_v31 }
  0xd9   : > { %v1971_v53 = vor.u32 %v1970_v36, %v1967_v47  ;;  %v1953_v29 = vsel %vm14684_vm15, %v1948_v40, %v1952_v26  ;;  %v1976_v15 = vrot.slane %v1974_v7, 5  ;;  %v18903_v13 = vrot.slane %v14938_v9, 5  ;;  %v1458_v6 = vpop.permute.xlu1 %1457  ;;  %v1462_v3 = vpop.permute.xlu0 %1461  ;;  %18906 = vst [vmem:[#allocation17_spill] sm:$0xff] %v15203_v11  ;;  %v15205_v26 = vld [vmem:[#allocation2 + $0x30] sm:$0xe] }
  0xda   : > { %v1980_v54 = vrot.slane %v1978_v35, 4  ;;  %v18904_v57 = vrot.slane %v15059_v50, 9  ;;  %v1958_v36 = vrot.slane %v1957_v22, 4  ;;  %v1962_v47 = vrot.slane %v1960_v33, 5  ;;  %1623 = vst.msk [vmem:[#allocation2 + $0xa0] sm:$0xf] %vm1531_vm6, %v1462_v3 }
  0xdb   : > { %v1972_v24 = vrot.slane %v1971_v53, 4  ;;  %v1618_v40 = vsel %vm14874_vm8, %v1458_v6, %v1617_v61  ;;  %v15212_v35 = vld [vmem:[#allocation2 + $0x90] sm:$0xf]  ;;  %v2714_v33 = vrot.slane %v14961_v39, 5  ;;  %v1624_v55 = vld [vmem:[#allocation2 + $0xa4] sm:$0x1] }
  0xdc   : > { %v15199_v21 = vsel %vm14934_vm1, %v18904_v57, %v18903_v13  ;;  %v15210_v50 = vld [vmem:[#allocation2 + $0x8c] sm:$0x1]  ;;  %v1981_v7 = vor.u32 %v1980_v54, %v1976_v15  ;;  %18907 = vst [vmem:[#allocation18_spill] sm:$0xff] %v15212_v35  ;;  %1619 = vst [vmem:[#allocation2 + $0x98] sm:$0x1] %v1618_v40  ;;  %v1963_v31 = vsel %vm14684_vm15, %v1958_v36, %v1962_v47  ;;  %v1989_v53 = vshrl.u32 %v15212_v35, 16 }
  0xdd   : > { %18905 = vst [vmem:[#allocation16_spill] sm:$0xff] %v15199_v21  ;;  %v1977_v61 = vsel %vm14684_vm15, %v1972_v24, %v1976_v15  ;;  %v1984_v3 = vshll.u32 %v15210_v50, 16  ;;  %v11747_v54 = vcombine.low %v1953_v29, %v1963_v31  ;;  %v1992_v57 = vshll.u32 %v15212_v35, 16  ;;  %v1466_v22 = vpop.permute.xlu1 %1465  ;;  %v15230_v47 = vld [vmem:[#allocation2 + $0x94] sm:$0xf] }
  0xde   : > { %v1982_v13 = vrot.slane %v1981_v7, 4  ;;  %v18908_v6 = vrot.slane %v15134_v14, 9  ;;  %v1991_v24 = vrot.slane %v1989_v53, 4  ;;  %v2716_v15 = vrot.slane %v2714_v33, 4  ;;  %v1634_v14 = vld [vmem:[#allocation2 + $0xb4] sm:$0xf] }
  0xdf   : > { %v1986_v36 = vrot.slane %v1984_v3, 5  ;;  %v1628_v29 = vsel %vm14880_vm13, %v1466_v22, %v1627_v60  ;;  %12936 = vmatprep.mubr.msk.bf16.mxu0 %vm2134_vm0, %v11747_v54  ;;  %v1994_v31 = vrot.slane %v1992_v57, 5  ;;  %v15239_v1 = vld [vmem:[#allocation2 + $0x9c] sm:$0xf]  ;;  %v2002_v3 = vshrl.u32 %v15230_v47, 16 }
  0xe0   : > { %v15228_v40 = vsel %vm14934_vm1, %v18908_v6, %v2714_v33  ;;  %v1998_v6 = vshll.u32 %v15230_v47, 16  ;;  %18910 = vst [vmem:[#allocation20_spill] sm:$0xff] %v15239_v1  ;;  %1629 = vst [vmem:[#allocation2 + $0xa8] sm:$0xf] %v1628_v29  ;;  %v2013_v60 = vshrl.u32 %v15239_v1, 16  ;;  %v2016_v22 = vshll.u32 %v15239_v1, 16 }
  0xe1   : > { %18909 = vst [vmem:[#allocation19_spill] sm:$0xff] %v15228_v40  ;;  %v1987_v33 = vsel %vm14684_vm15, %v1982_v13, %v1986_v36  ;;  %v1472_v57 = vpop.permute.xlu1 %1471  ;;  %v1631_v38 = vld [vmem:[#allocation2 + $0xb0] sm:$0x1]  ;;  %v2004_v29 = vrot.slane %v2002_v3, 4  ;;  %v18911_v36 = vrot.slane %v14916_v34, 5  ;;  %v2721_v42 = vrot.slane %v14986_v32, 5 }
  0xe2   : > { %v2000_v53 = vrot.slane %v1998_v6, 5  ;;  %v2015_v8 = vrot.slane %v2013_v60, 4  ;;  %v2018_v13 = vrot.slane %v2016_v22, 5  ;;  %v18914_v60 = vrot.slane %v15205_v26, 9 }
  0xe3   : > { %v1464_v11 = vpop.permute.xlu0 %1463  ;;  %v15254_v23 = vsel %vm14934_vm1, %v2716_v15, %v18911_v36  ;;  %v2731_v35 = vrot.slane %v15029_v12, 5 }
  0xe4   : > { %v1625_v7 = vsel %vm14874_vm8, %v1464_v11, %v1624_v55  ;;  %v11748_v11 = vcombine.low %v1977_v61, %v1987_v33  ;;  %v1995_v55 = vor.u32 %v1994_v31, %v1991_v24  ;;  %18912 = vst [vmem:[#allocation21_spill] sm:$0xff] %v15254_v23  ;;  %v1635_v61 = vsel %vm14880_vm13, %v1472_v57, %v1634_v14  ;;  %v15260_v24 = vld [vmem:[#allocation2 + $0x98] sm:$0x1]  ;;  %v2645_v14 = vld [vmem:[#allocation2 + $0x3c] sm:$0xe] }
  0xe5   : > { %1626 = vst [vmem:[#allocation2 + $0xa4] sm:$0x1] %v1625_v7  ;;  %v15248_v7 = vld [vmem:[#allocation2 + $0xa0] sm:$0xf]  ;;  %1636 = vst [vmem:[#allocation2 + $0xb4] sm:$0xf] %v1635_v61  ;;  %v2005_v34 = vor.u32 %v2004_v29, %v2000_v53  ;;  %v2019_v15 = vor.u32 %v2018_v13, %v2015_v8  ;;  %v1470_v57 = vpop.permute.xlu1 %1469 }
  0xe6   : > { %12937 = vmatmul.mubr.msk.bf16.gmra.mrb[20].mxu0 %vm2134_vm0, %v11748_v11  ;;  %v1996_v31 = vrot.slane %v1995_v55, 4  ;;  %v2022_v6 = vshll.u32 %v15248_v7, 16  ;;  %v2026_v33 = vshrl.u32 %v15248_v7, 16  ;;  %v2008_v3 = vshll.u32 %v15260_v24, 16  ;;  %v1638_v55 = vld [vmem:[#allocation2 + $0xbc] sm:$0x1] }
  0xe7   : > { %v1468_v21 = vpop.permute.xlu0 %1467  ;;  %v2006_v54 = vrot.slane %v2005_v34, 4  ;;  %v2020_v29 = vrot.slane %v2019_v15, 4  ;;  %v1632_v8 = vsel %vm14874_vm8, %v1470_v57, %v1631_v38 }
  0xe8   : > { %1630 = vst.msk [vmem:[#allocation2 + $0xac] sm:$0xf] %vm1531_vm6, %v1468_v21  ;;  %v2001_v21 = vsel %vm14684_vm15, %v1996_v31, %v2000_v53  ;;  %v2024_v22 = vrot.slane %v2022_v6, 5  ;;  %v2028_v11 = vrot.slane %v2026_v33, 4  ;;  %v2010_v61 = vrot.slane %v2008_v3, 5 }
  0xe9   : > { %v15277_v31 = vld [vmem:[#allocation2 + $0xa8] sm:$0xf]  ;;  %v2724_v6 = vrot.slane %v15013_v41, 5  ;;  %v11806_v33 = vrot.slane %v2645_v14, 9  ;;  %1633 = vst [vmem:[#allocation2 + $0xb0] sm:$0x1] %v1632_v8  ;;  %v15291_v41 = vsel %vm14934_vm1, %v18914_v60, %v2721_v42 }
  0xea   : > { %v2029_v53 = vor.u32 %v2028_v11, %v2024_v22  ;;  %18913 = vst [vmem:[#allocation22_spill] sm:$0xff] %v15277_v31  ;;  %v2011_v34 = vsel %vm14684_vm15, %v2006_v54, %v2010_v61  ;;  %v2025_v3 = vsel %vm14684_vm15, %v2020_v29, %v2024_v22  ;;  %v2037_v15 = vshrl.u32 %v15277_v31, 16 }
  0xeb   : > { %v1474_v36 = vpop.permute.xlu0 %1473  ;;  %v11749_v57 = vcombine.low %v2001_v21, %v2011_v34  ;;  %v2040_v11 = vshll.u32 %v15277_v31, 16  ;;  %v2723_v22 = vrot.slane %v2721_v42, 4  ;;  %v2728_v29 = vrot.slane %v15005_v30, 5 }
  0xec   : > { %1637 = vst.msk [vmem:[#allocation2 + $0xb8] sm:$0xf] %vm1531_vm6, %v1474_v36  ;;  %v15275_v13 = vld [vmem:[#allocation2 + $0xa4] sm:$0x1]  ;;  %v2030_v36 = vrot.slane %v2029_v53, 4  ;;  %v2039_v61 = vrot.slane %v2037_v15, 4 }
  0xed   : > { %v2032_v38 = vshll.u32 %v15275_v13, 16  ;;  %12940 = vmatprep.mubr.msk.bf16.mxu0 %vm2134_vm0, %v11749_v57  ;;  %v2042_v53 = vrot.slane %v2040_v11, 5  ;;  %v15301_v60 = vld [vmem:[#allocation2 + $0xb4] sm:$0xf]  ;;  %v2730_v31 = vrot.slane %v2728_v29, 4 }
  0xee   : > { %18915 = vst [vmem:[#allocation23_spill] sm:$0xff] %v15301_v60  ;;  %v2061_v42 = vshrl.u32 %v15301_v60, 16  ;;  %v2064_v15 = vshll.u32 %v15301_v60, 16  ;;  %v2735_v60 = vrot.slane %v15040_v49, 5 }
  0xef   : > { %v1476_v14 = vpop.permute.xlu0 %1475  ;;  %v2034_v8 = vrot.slane %v2032_v38, 5  ;;  %v15293_v54 = vld [vmem:[#allocation2 + $0xac] sm:$0xf]  ;;  %v2043_v57 = vor.u32 %v2042_v53, %v2039_v61  ;;  %v15343_v12 = vsel %vm14934_vm1, %v2730_v31, %v2731_v35  ;;  %v2745_v35 = vrot.slane %v15088_v10, 5  ;;  %v2651_v10 = vld [vmem:[#allocation2 + $0x84] sm:$0xe] }
  0xf0   : > { %v1639_v21 = vsel %vm14874_vm8, %v1476_v14, %v1638_v55  ;;  %v2046_v26 = vshll.u32 %v15293_v54, 16  ;;  %v2050_v34 = vshrl.u32 %v15293_v54, 16  ;;  %v2063_v37 = vrot.slane %v2061_v42, 4 }
  0xf1   : > { %1640 = vst [vmem:[#allocation2 + $0xbc] sm:$0x1] %v1639_v21  ;;  %v2035_v38 = vsel %vm14684_vm15, %v2030_v36, %v2034_v8  ;;  %v2066_v1 = vrot.slane %v2064_v15, 5  ;;  %v15313_v21 = vsel %vm14934_vm1, %v2723_v22, %v2724_v6  ;;  %v15317_v36 = vsel %vm14934_vm1, %v11806_v33, %v2728_v29  ;;  %v15320_v8 = vld [vmem:[#allocation2 + $0xb0] sm:$0x1] }
  0xf2   : > { %v11750_v14 = vcombine.low %v2025_v3, %v2035_v38  ;;  %v2048_v11 = vrot.slane %v2046_v26, 5  ;;  %v2052_v23 = vrot.slane %v2050_v34, 4  ;;  %v2044_v3 = vrot.slane %v2043_v57, 4  ;;  %v2646_v22 = vld [vmem:[#allocation2 + $0x48] sm:$0xe] }
  0xf3   : > { %v15309_v40 = vld [vmem:[#allocation2 + $0xb8] sm:$0xf]  ;;  %v2056_v34 = vshll.u32 %v15320_v8, 16  ;;  %v2067_v38 = vor.u32 %v2066_v1, %v2063_v37  ;;  %v11807_v6 = vrot.slane %v2646_v22, 9  ;;  %v2738_v33 = vrot.slane %v15066_v20, 5 }
  0xf4   : > { %12941 = vmatmul.mubr.msk.bf16.gmra.mrb[24].mxu0 %vm2134_vm0, %v11750_v14  ;;  %v2053_v61 = vor.u32 %v2052_v23, %v2048_v11  ;;  %v2070_v53 = vshll.u32 %v15309_v40, 16  ;;  %v2074_v26 = vshrl.u32 %v15309_v40, 16  ;;  %v2049_v42 = vsel %vm14684_vm15, %v2044_v3, %v2048_v11  ;;  %v2648_v29 = vld [vmem:[#allocation2 + $0x60] sm:$0xe] }
  0xf5   : > { %v2058_v57 = vrot.slane %v2056_v34, 5  ;;  %v2068_v55 = vrot.slane %v2067_v38, 4  ;;  %v11823_v34 = vcombine.low %v15317_v36, %v15343_v12  ;;  %v15349_v20 = vsel %vm14934_vm1, %v11807_v6, %v2735_v60 }
  0xf6   : > { %v2054_v15 = vrot.slane %v2053_v61, 4  ;;  %v2072_v14 = vrot.slane %v2070_v53, 5  ;;  %v2076_v23 = vrot.slane %v2074_v26, 4  ;;  %v2737_v22 = vrot.slane %v2735_v60, 4 }
  0xf7   : > { %v11809_v31 = vrot.slane %v2648_v29, 9 }
  0xf8   : > { %v15332_v1 = vld [vmem:[#allocation2 + $0xbc] sm:$0x1]  ;;  %v2077_v37 = vor.u32 %v2076_v23, %v2072_v14  ;;  %v2059_v11 = vsel %vm14684_vm15, %v2054_v15, %v2058_v57  ;;  %v2073_v3 = vsel %vm14684_vm15, %v2068_v55, %v2072_v14  ;;  %v11808_v15 = vrot.slane %v2647_v63, 9  ;;  %v2649_v23 = vld [vmem:[#allocation2 + $0x6c] sm:$0xe] }
  0xf9   : > { %v2080_v61 = vshll.u32 %v15332_v1, 16  ;;  %v11751_v53 = vcombine.low %v2049_v42, %v2059_v11  ;;  %v2742_v55 = vrot.slane %v15061_v25, 5  ;;  %v2749_v42 = vrot.slane %v15101_v51, 5 }
  0xfa   : > { %v2078_v26 = vrot.slane %v2077_v37, 4  ;;  %v2752_v14 = vrot.slane %v15126_v56, 5  ;;  %v15360_v6 = vsel %vm14934_vm1, %v2737_v22, %v2738_v33  ;;  %v2650_v37 = vld [vmem:[#allocation2 + $0x78] sm:$0xe]  ;;  %v2759_v22 = vrot.slane %v15139_v0, 5 }
  0xfb   : > { %v2082_v38 = vrot.slane %v2080_v61, 5  ;;  %12944 = vmatprep.mubr.msk.bf16.mxu0 %vm2134_vm0, %v11751_v53  ;;  %v15364_v63 = vsel %vm14934_vm1, %v11808_v15, %v2742_v55  ;;  %v2744_v60 = vrot.slane %v2742_v55, 4  ;;  %v11824_v61 = vcombine.low %v15349_v20, %v15360_v6  ;;  %v2652_v53 = vld [vmem:[#allocation2 + $0x90] sm:$0xe]  ;;  %v2655_v0 = vld [vmem:[#allocation2 + $0xb4] sm:$0xe] }
  0xfc   : > { %v15370_v56 = vsel %vm14934_vm1, %v11809_v31, %v2749_v42  ;;  %v2751_v29 = vrot.slane %v2749_v42, 4  ;;  %v11811_v55 = vrot.slane %v2650_v37, 9  ;;  %v2763_v31 = vrot.slane %v15158_v2, 5 }
  0xfd   : > { %v2083_v57 = vsel %vm14684_vm15, %v2078_v26, %v2082_v38  ;;  %v15374_v33 = vsel %vm14934_vm1, %v2744_v60, %v2745_v35  ;;  %v11810_v26 = vrot.slane %v2649_v23, 9  ;;  %v2756_v38 = vrot.slane %v15119_v27, 5 }
  0xfe   : > { %v11752_v11 = vcombine.low %v2073_v3, %v2083_v57  ;;  %v15383_v15 = vsel %vm14934_vm1, %v2751_v29, %v2752_v14  ;;  %v18916_v35 = vcombine.low %v14662_v5, %v14573_v18  ;;  %v2766_v57 = vrot.slane %v15184_v46, 5  ;;  %v2653_v14 = vld [vmem:[#allocation2 + $0x9c] sm:$0xe]  ;;  %v2654_v5 = vld [vmem:[#allocation2 + $0xa8] sm:$0xe] }
  0xff   : > { %v15394_v42 = vsel %vm14934_vm1, %v11810_v26, %v2756_v38  ;;  %v2758_v23 = vrot.slane %v2756_v38, 4  ;;  %v15399_v60 = vsel %vm14934_vm1, %v11811_v55, %v2763_v31  ;;  %v2765_v37 = vrot.slane %v2763_v31, 4  ;;  %v4190_v3 = vld [vmem:[#allocation2 + $0x78] sm:$0xe] }
 0x100   : > { %12945 = vmatmul.mubr.msk.bf16.gmra.mrb[28].mxu0 %vm2134_vm0, %v11752_v11  ;;  %v11812_v11 = vrot.slane %v2651_v10, 9  ;;  %v2770_v18 = vrot.slane %v15177_v16, 5  ;;  %v2773_v26 = vrot.slane %v15210_v50, 5  ;;  %v2777_v38 = vrot.slane %v15230_v47, 5 }
 0x101   : > { %12950 = vmatprep.mubr.msk.bf16.mxu0 %vm2134_vm0, %v18916_v35  ;;  %v15404_v29 = vsel %vm14934_vm1, %v2758_v23, %v2759_v22  ;;  %v11813_v35 = vrot.slane %v2652_v53, 9  ;;  %v15412_v55 = vsel %vm14934_vm1, %v2765_v37, %v2766_v57  ;;  %v15421_v22 = vld [vmem:[%s18686_s2 + $0xc] sm:$0xf]  ;;  %v2780_v57 = vrot.slane %v15260_v24, 5 }
 0x102   : > { %v15416_v10 = vsel %vm14934_vm1, %v11812_v11, %v2770_v18  ;;  %v2772_v31 = vrot.slane %v2770_v18, 4  ;;  %v2779_v23 = vrot.slane %v2777_v38, 4  ;;  %v11814_v11 = vrot.slane %v2653_v14, 9 }
 0x103   : > { %v15427_v53 = vsel %vm14934_vm1, %v11813_v35, %v2777_v38  ;;  %v2784_v18 = vrot.slane %v15248_v7, 5  ;;  %v2787_v46 = vrot.slane %v15275_v13, 5  ;;  %v11815_v38 = vrot.slane %v2654_v5, 9 }
 0x104   : > { %v15432_v37 = vsel %vm14934_vm1, %v2772_v31, %v2773_v26  ;;  %v15440_v35 = vsel %vm14934_vm1, %v2779_v23, %v2780_v57  ;;  %v2791_v24 = vrot.slane %v15293_v54, 5  ;;  %v18917_v26 = vcombine.low %v14895_v28, %v14914_v17 }
 0x105   : > { %v2786_v13 = vrot.slane %v2784_v18, 4  ;;  %v2794_v31 = vrot.slane %v15320_v8, 5  ;;  %v18918_v23 = vcombine.low %v14904_v59, %v14938_v9  ;;  %v11816_v57 = vrot.slane %v2655_v0, 9 }
 0x106   : > { %v2793_v5 = vrot.slane %v2791_v24, 4  ;;  %v2798_v50 = vrot.slane %v15309_v40, 5  ;;  %v15460_v28 = vsel %vm14934_vm1, %v11814_v11, %v2784_v18  ;;  %v15471_v9 = vsel %vm14934_vm1, %v11815_v38, %v2791_v24  ;;  %v4188_v11 = vld [vmem:[#allocation2 + $0x60] sm:$0xe] }
 0x107   : > { %v15464_v17 = vsel %vm14934_vm1, %v2786_v13, %v2787_v46  ;;  %v18919_v38 = vcombine.low %v14926_v62, %v14961_v39  ;;  %v18920_v24 = vcombine.low %v14971_v43, %v14986_v32  ;;  %v18923_v62 = vcombine.low %v15048_v58, %v15061_v25  ;;  %v18925_v43 = vld [vmem:[#allocation13_spill] sm:$0xff] }
 0x108   : > { %12951 = vmatmul.mubr.msk.bf16.vlgmr.msra.gmra.mrb[0].mxu0 %vm2134_vm0, %v18917_v26  ;;  %v15475_v8 = vsel %vm14934_vm1, %v2793_v5, %v2794_v31  ;;  %v2800_v0 = vrot.slane %v2798_v50, 4  ;;  %v15481_v46 = vsel %vm14934_vm1, %v11816_v57, %v2798_v50  ;;  %v18921_v50 = vcombine.low %v14994_v45, %v15005_v30  ;;  %v18927_v45 = vld [vmem:[#allocation14_spill] sm:$0xff]  ;;  %v546_v5 = vld [vmem:[%s14418_s7 + $0x7c] sm:$0xf] }
 0x109   : > { %12983 = vmatpush3.bf16.msra.mxu0 %v15075_v52  ;;  %12954 = vmatprep.mubr.msk.bf16.mxu0 %vm2134_vm0, %v18918_v23  ;;  %v2801_v52 = vrot.slane %v15332_v1, 5  ;;  %v18922_v26 = vcombine.low %v15031_v48, %v15040_v49  ;;  %v18924_v39 = vcombine.low %v15090_v19, %v15101_v51  ;;  %v18926_v32 = vcombine.low %v18925_v43, %v15119_v27  ;;  %v333_v48 = vld [vmem:[#allocation2 + $0xc0] sm:$0x1]  ;;  %v545_v49 = vld [vmem:[%s14418_s7 + $0x78] sm:$0xf]  ;;  %v18930_v23 = vld [vmem:[#allocation15_spill] sm:$0xff] }
 0x10a   : > { %14041 = vmatprep.subr.msk.bf16.mxu0 %vm2183_vm12, %v15421_v22  ;;  %v18928_v30 = vcombine.low %v18927_v45, %v15158_v2  ;;  %v334_v25 = vsel %vm14255_vm5, 0, %v333_v48  ;;  %v805_v13 = vshrl.u32 %v545_v49, 16  ;;  %v808_v51 = vshll.u32 %v545_v49, 16  ;;  %v18932_v57 = vld [vmem:[#allocation18_spill] sm:$0xff]  ;;  %v14144_v48 = vld [vmem:[#allocation2 + $0x8] sm:$0x1] }
 0x10b   : > { %v15485_v1 = vsel %vm14934_vm1, %v2800_v0, %v2801_v52  ;;  %335 = vst [vmem:[#allocation2 + $0xc0] sm:$0x1] %v334_v25  ;;  %v18931_v27 = vcombine.low %v18930_v23, %v15177_v16  ;;  %v18933_v2 = vcombine.low %v18932_v57, %v15230_v47  ;;  %v813_v52 = vshrl.u32 %v546_v5, 16  ;;  %v2640_v43 = vld [vmem:[#allocation2] sm:$0xe] }
 0x10c   : > { %v807_v19 = vrot.slane %v805_v13, 7  ;;  %v816_v0 = vshll.u32 %v546_v5, 16  ;;  %v2696_v49 = vrot.slane %v14144_v48, 5  ;;  %v11801_v25 = vrot.slane %v2640_v43, 9  ;;  %v18937_v5 = vld [vmem:[#allocation20_spill] sm:$0xff] }
 0x10d   : > { %v18938_v57 = vcombine.low %v18937_v5, %v15248_v7  ;;  %v11923_v36 = vrot.slane %v4188_v11, 9 }
 0x10e   : > { %v810_v31 = vor.u32 %v808_v51, %v807_v19  ;;  %v811_v45 = vrot.slane %v807_v19, 4  ;;  %v18939_v19 = vld [vmem:[#allocation22_spill] sm:$0xff] }
 0x10f   : > { %v4191_v51 = vld [vmem:[#allocation2 + $0x84] sm:$0xe] }
 0x110   : > { %12955 = vmatmul.mubr.msk.bf16.gmra.mrb[4].mxu0 %vm2134_vm0, %v18919_v38  ;;  %v389_v38 = vld [vmem:[#allocation2 + $0xc8] sm:$0x1] }
 0x111   : > { %12958 = vmatprep.mubr.msk.bf16.mxu0 %vm2134_vm0, %v18920_v24  ;;  %v14143_v24 = vld [vmem:[#allocation2 + $0x4] sm:$0xf] }
 0x118   : > { %12959 = vmatmul.mubr.msk.bf16.gmra.mrb[8].mxu0 %vm2134_vm0, %v18921_v50  ;;  %v2693_v50 = vrot.slane %v14143_v24, 5 }
 0x119   : > { %12962 = vmatprep.mubr.msk.bf16.mxu0 %vm2134_vm0, %v18922_v26  ;;  %v980_v26 = vld [vmem:[#allocation2 + $0xc0] sm:$0xf] }
 0x11a   : > { %v981_v16 = vsel %vm14503_vm11, %v810_v31, %v980_v26  ;;  %v2695_v13 = vrot.slane %v2693_v50, 4  ;;  %v18940_v31 = vcombine.low %v18939_v19, %v15293_v54  ;;  %v18943_v54 = vld [vmem:[#allocation23_spill] sm:$0xff]  ;;  %v15595_v26 = vld [vmem:[#allocation2 + $0x38] sm:$0x1]  ;;  %vm7299_vm11 = vcmask 130048  }
 0x11b   : > { %982 = vst [vmem:[#allocation2 + $0xc0] sm:$0xf] %v981_v16  ;;  %v18944_v16 = vcombine.low %v18943_v54, %v15309_v40  ;;  %v15583_v19 = vld [vmem:[#allocation2 + $0x2c] sm:$0x1]  ;;  %v4185_v54 = vld [vmem:[#allocation2 + $0x3c] sm:$0xe] }
 0x11c   : > { %v11920_v40 = vrot.slane %v4185_v54, 9 }
 0x120   : > { %12963 = vmatmul.mubr.msk.bf16.gmra.mrb[12].mxu0 %vm2134_vm0, %v18923_v62  ;;  %v15687_v62 = vld [vmem:[#allocation2 + $0x8c] sm:$0x1] }
 0x121   : > { %12966 = vmatprep.mubr.msk.bf16.mxu0 %vm2134_vm0, %v18924_v39  ;;  %v390_v39 = vsel %vm14239_vm3, 0, %v389_v38 }
 0x122   : > { %391 = vst [vmem:[#allocation2 + $0xc8] sm:$0x1] %v390_v39  ;;  %v1641_v24 = vld [vmem:[#allocation2 + $0xc0] sm:$0xf]  ;;  %v4184_v39 = vld [vmem:[#allocation2 + $0x30] sm:$0xe] }
 0x128   : > { %12967 = vmatmul.mubr.msk.bf16.gmra.mrb[16].mxu0 %vm2134_vm0, %v18926_v32 }
 0x129   : > { %12970 = vmatprep.mubr.msk.bf16.mxu0 %vm2134_vm0, %v18928_v30  ;;  %v815_v30 = vrot.slane %v813_v52, 7  ;;  %v2697_v52 = vsel %vm14934_vm1, %v2695_v13, %v2696_v49  ;;  %v984_v38 = vld [vmem:[#allocation2 + $0xc8] sm:$0x1] }
 0x12a   : > { %v18945_v49 = vld [vmem:[#allocation11_spill] sm:$0xff] }
 0x12b   : > { %v818_v47 = vor.u32 %v816_v0, %v815_v30 }
 0x12d   : > { %v819_v23 = vsel %vm14293_vm7, %v811_v45, %v818_v47  ;;  %v3260_v45 = vsel %vm2183_vm12, %v15421_v22, 0  ;;  %v18950_v22 = vld [vmem:[#allocation17_spill] sm:$0xff] }
 0x12e   : > { %983 = vst.msk [vmem:[#allocation2 + $0xc4] sm:$0xf] %vm870_vm9, %v819_v23 }
 0x130   : > { %12971 = vmatmul.mubr.msk.bf16.gmra.mrb[20].mxu0 %vm2134_vm0, %v18931_v27  ;;  %v820_v27 = vrot.slane %v815_v30, 4  ;;  %v15566_v30 = vld [vmem:[%s18686_s2 + $0x10] sm:$0xf] }
 0x131   : > { %12974 = vmatprep.mubr.msk.bf16.mxu0 %vm2134_vm0, %v18933_v2  ;;  %v2694_v2 = vsel %vm14934_vm1, %v11801_v25, %v2693_v50  ;;  %v18946_v25 = vld [vmem:[#allocation12_spill] sm:$0xff] }
 0x132   : > { %v985_v7 = vsel %vm14493_vm10, %v820_v27, %v984_v38  ;;  %v11818_v32 = vcombine.low %v2694_v2, %v2697_v52  ;;  %v18947_v13 = vcombine.low %v18945_v49, %v18946_v25  ;;  %v18949_v27 = vld [vmem:[#allocation16_spill] sm:$0xff]  ;;  %v18953_v2 = vld [vmem:[#allocation21_spill] sm:$0xff]  ;;  %v4183_v38 = vld [vmem:[#allocation2 + $0x24] sm:$0xe]  ;;  %v4271_v25 = vrot.slane %v15595_v26, 5 }
 0x133   : > { %986 = vst [vmem:[#allocation2 + $0xc8] sm:$0x1] %v985_v7  ;;  %v18951_v5 = vcombine.low %v18949_v27, %v18950_v22  ;;  %v4187_v22 = vld [vmem:[#allocation2 + $0x54] sm:$0xe] }
 0x135   : > { %v1478_v0 = vpop.permute.xlu1 %1477 }
 0x136   : > { %v1642_v43 = vsel %vm14880_vm13, %v1478_v0, %v1641_v24  ;;  %v15589_v0 = vld [vmem:[#allocation2 + $0x34] sm:$0xf]  ;;  %v18955_v24 = vcombine.low %v15291_v41, %v15313_v21  ;;  %v4264_v41 = vrot.slane %v15583_v19, 5  ;;  %v11919_v21 = vrot.slane %v4184_v39, 9  ;;  %v15629_v39 = vld [vmem:[#allocation2 + $0x68] sm:$0x1] }
 0x137   : > { %1643 = vst [vmem:[#allocation2 + $0xc0] sm:$0xf] %v1642_v43  ;;  %v15598_v43 = vld [vmem:[#allocation2 + $0x40] sm:$0xf]  ;;  %v4268_v49 = vrot.slane %v15589_v0, 5  ;;  %v4299_v14 = vrot.slane %v15629_v39, 5 }
 0x138   : > { %12975 = vmatmul.mubr.msk.bf16.gmra.mrb[24].mxu0 %vm2134_vm0, %v18938_v57  ;;  %v15581_v57 = vld [vmem:[#allocation2 + $0x28] sm:$0xf] }
 0x139   : > { %12978 = vmatprep.mubr.msk.bf16.mxu0 %vm2134_vm0, %v18940_v31  ;;  %v18952_v31 = vld [vmem:[#allocation19_spill] sm:$0xff]  ;;  %v4261_v7 = vrot.slane %v15581_v57, 5 }
 0x13a   : > { %v1645_v50 = vld [vmem:[#allocation2 + $0xc8] sm:$0x1]  ;;  %v18954_v52 = vcombine.low %v18952_v31, %v18953_v2  ;;  %v15615_v31 = vld [vmem:[#allocation2 + $0x64] sm:$0xf] }
 0x13b   : > { %v4296_v59 = vrot.slane %v15615_v31, 5 }
 0x140   : > { %12979 = vmatmul.mubr.msk.bf16.gmra.mrb[28].mxu0 %vm2134_vm0, %v18944_v16  ;;  %v15602_v16 = vld [vmem:[#allocation2 + $0x4c] sm:$0xf] }
 0x141   : > { %12984 = vmatprep.mubr.msk.bf16.mxu0 %vm2134_vm0, %v11818_v32  ;;  %v15600_v32 = vld [vmem:[#allocation2 + $0x44] sm:$0x1] }
 0x142   : > { %v4278_v27 = vrot.slane %v15600_v32, 5 }
 0x143   : > { %v1480_v47 = vpop.permute.xlu0 %1479  ;;  %v1482_v48 = vpop.permute.xlu1 %1481 }
 0x144   : > { %1644 = vst.msk [vmem:[#allocation2 + $0xc4] sm:$0xf] %vm1531_vm6, %v1480_v47  ;;  %v1646_v23 = vsel %vm14874_vm8, %v1482_v48, %v1645_v50  ;;  %v15604_v50 = vld [vmem:[#allocation2 + $0x50] sm:$0x1]  ;;  %v4263_v47 = vrot.slane %v4261_v7, 4 }
 0x145   : > { %1647 = vst [vmem:[#allocation2 + $0xc8] sm:$0x1] %v1646_v23  ;;  %v15606_v48 = vld [vmem:[#allocation2 + $0x58] sm:$0xf]  ;;  %v4275_v23 = vrot.slane %v15598_v43, 5 }
 0x147   : > { %v15635_v18 = vsel %vm14934_vm1, %v11920_v40, %v4275_v23  ;;  %v11922_v40 = vrot.slane %v4187_v22, 9  ;;  %v15663_v22 = vld [vmem:[#allocation2 + $0x7c] sm:$0xf] }
 0x148   : > { %12985 = vmatmul.mubr.msk.bf16.vlgmr.msra.gmra.mrb[0].mxu0 %vm2134_vm0, %v18947_v13  ;;  %v4186_v13 = vld [vmem:[#allocation2 + $0x48] sm:$0xe]  ;;  %18959 = vst [vmem:[#allocation18_spill] sm:$0xff] %v15635_v18  ;;  %v18969_v18 = vcombine.low %v15364_v63, %v15374_v33  ;;  %v15735_v63 = vld [vmem:[#allocation2 + $0xac] sm:$0xf] }
 0x149   : > { %13017 = vmatpush3.bf16.msra.mxu0 %v3260_v45  ;;  %12988 = vmatprep.mubr.msk.bf16.mxu0 %vm2134_vm0, %v18951_v5  ;;  %v11918_v45 = vrot.slane %v4183_v38, 9  ;;  %v15613_v5 = vld [vmem:[#allocation2 + $0x5c] sm:$0x1]  ;;  %v15627_v38 = vsel %vm14934_vm1, %v11919_v21, %v4268_v49  ;;  %v4282_v21 = vrot.slane %v15602_v16, 5  ;;  %v15737_v33 = vld [vmem:[#allocation2 + $0xb0] sm:$0x1] }
 0x14a   : > { %14042 = vmatprep.subr.msk.bf16.mxu0 %vm2183_vm12, %v15566_v30  ;;  %18958 = vst [vmem:[#allocation15_spill] sm:$0xff] %v15627_v38  ;;  %18972 = vst [vmem:[#allocation17_spill] sm:$0xff] %v15737_v33 }
 0x14b   : > { %v15619_v2 = vsel %vm14934_vm1, %v11918_v45, %v4261_v7  ;;  %v4277_v7 = vrot.slane %v4275_v23, 4  ;;  %v11921_v45 = vrot.slane %v4186_v13, 9  ;;  %v15653_v13 = vld [vmem:[#allocation2 + $0x74] sm:$0x1]  ;;  %v4189_v23 = vld [vmem:[#allocation2 + $0x6c] sm:$0xe] }
 0x14c   : > { %18956 = vst [vmem:[#allocation13_spill] sm:$0xff] %v15619_v2  ;;  %v4306_v11 = vrot.slane %v15653_v13, 5 }
 0x14d   : > { %v15659_v12 = vsel %vm14934_vm1, %v4277_v7, %v4278_v27  ;;  %v15671_v6 = vsel %vm14934_vm1, %v11921_v45, %v4282_v21  ;;  %v15673_v27 = vld [vmem:[#allocation2 + $0x88] sm:$0xf]  ;;  %v11924_v45 = vrot.slane %v4189_v23, 9  ;;  %v4298_v23 = vrot.slane %v4296_v59, 4 }
 0x14e   : > { %18961 = vst [vmem:[#allocation20_spill] sm:$0xff] %v15659_v12  ;;  %18962 = vst [vmem:[#allocation22_spill] sm:$0xff] %v15671_v6  ;;  %v15709_v6 = vld [vmem:[#allocation2 + $0xa0] sm:$0xf] }
 0x150   : > { %12989 = vmatmul.mubr.msk.bf16.gmra.mrb[4].mxu0 %vm2134_vm0, %v18954_v52  ;;  %v15623_v52 = vsel %vm14934_vm1, %v4263_v47, %v4264_v41  ;;  %v15641_v47 = vld [vmem:[#allocation2 + $0x70] sm:$0xf] }
 0x151   : > { %12992 = vmatprep.mubr.msk.bf16.mxu0 %vm2134_vm0, %v18955_v24  ;;  %18957 = vst [vmem:[#allocation14_spill] sm:$0xff] %v15623_v52  ;;  %v4270_v24 = vrot.slane %v4268_v49, 4  ;;  %v4285_v49 = vrot.slane %v15604_v50, 5 }
 0x153   : > { %v15645_v41 = vsel %vm14934_vm1, %v4270_v24, %v4271_v25  ;;  %v4292_v25 = vrot.slane %v15613_v5, 5  ;;  %v15665_v24 = vld [vmem:[#allocation2 + $0x80] sm:$0x1] }
 0x154   : > { %18960 = vst [vmem:[#allocation8_spill] sm:$0xff] %v15645_v41 }
 0x158   : > { %12993 = vmatmul.mubr.msk.bf16.gmra.mrb[8].mxu0 %vm2134_vm0, %v11823_v34  ;;  %v4289_v34 = vrot.slane %v15606_v48, 5 }
 0x159   : > { %12996 = vmatprep.mubr.msk.bf16.mxu0 %vm2134_vm0, %v11824_v61  ;;  %v4284_v61 = vrot.slane %v4282_v21, 4  ;;  %v4303_v21 = vrot.slane %v15641_v47, 5 }
 0x15a   : > { %v15677_v7 = vsel %vm14934_vm1, %v11922_v40, %v4289_v34  ;;  %v4291_v54 = vrot.slane %v4289_v34, 4  ;;  %v15689_v40 = vld [vmem:[#allocation2 + $0x94] sm:$0xf]  ;;  %v11925_v34 = vrot.slane %v4190_v3, 9 }
 0x15b   : > { %18963 = vst [vmem:[#allocation7_spill] sm:$0xff] %v15677_v7  ;;  %v15683_v20 = vsel %vm14934_vm1, %v4284_v61, %v4285_v49  ;;  %v15699_v49 = vsel %vm14934_vm1, %v11923_v36, %v4296_v59  ;;  %v15701_v61 = vld [vmem:[#allocation2 + $0x98] sm:$0x1]  ;;  %v15707_v41 = vsel %vm14934_vm1, %v11924_v45, %v4303_v21  ;;  %v4305_v38 = vrot.slane %v4303_v21, 4  ;;  %v15721_v45 = vld [vmem:[#allocation2 + $0xa4] sm:$0x1] }
 0x15c   : > { %18964 = vst [vmem:[#allocation10_spill] sm:$0xff] %v15683_v20  ;;  %v15695_v12 = vsel %vm14934_vm1, %v4291_v54, %v4292_v25  ;;  %18966 = vst [vmem:[#allocation11_spill] sm:$0xff] %v15699_v49  ;;  %v4192_v20 = vld [vmem:[#allocation2 + $0x90] sm:$0xe]  ;;  %v15713_v54 = vsel %vm14934_vm1, %v4298_v23, %v4299_v14  ;;  %v4310_v59 = vrot.slane %v15663_v22, 5  ;;  %v4313_v36 = vrot.slane %v15665_v24, 5 }
 0x15d   : > { %18965 = vst [vmem:[#allocation23_spill] sm:$0xff] %v15695_v12  ;;  %18967 = vst [vmem:[#allocation12_spill] sm:$0xff] %v15707_v41  ;;  %v11926_v25 = vrot.slane %v4191_v51, 9  ;;  %v15727_v21 = vsel %vm14934_vm1, %v4305_v38, %v4306_v11  ;;  %v4317_v14 = vrot.slane %v15673_v27, 5  ;;  %v4320_v23 = vrot.slane %v15687_v62, 5 }
 0x15e   : > { %18968 = vst [vmem:[#allocation9_spill] sm:$0xff] %v15713_v54  ;;  %18970 = vst [vmem:[#allocation16_spill] sm:$0xff] %v15727_v21  ;;  %v4193_v12 = vld [vmem:[#allocation2 + $0x9c] sm:$0xe]  ;;  %v18971_v51 = vcombine.low %v15370_v56, %v15383_v15  ;;  %v15743_v38 = vsel %vm14934_vm1, %v11925_v34, %v4310_v59  ;;  %v4312_v11 = vrot.slane %v4310_v59, 4  ;;  %v11927_v3 = vrot.slane %v4192_v20, 9 }
 0x15f   : > { %18973 = vst [vmem:[#allocation19_spill] sm:$0xff] %v15743_v38  ;;  %v15747_v54 = vsel %vm14934_vm1, %v11926_v25, %v4317_v14  ;;  %v4319_v56 = vrot.slane %v4317_v14, 4  ;;  %v4324_v15 = vrot.slane %v15689_v40, 5  ;;  %v4194_v49 = vld [vmem:[#allocation2 + $0xa8] sm:$0xe]  ;;  %v4331_v34 = vrot.slane %v15709_v6, 5 }
 0x160   : > { %12997 = vmatmul.mubr.msk.bf16.gmra.mrb[12].mxu0 %vm2134_vm0, %v18969_v18  ;;  %18974 = vst [vmem:[#allocation21_spill] sm:$0xff] %v15747_v54  ;;  %v15753_v7 = vsel %vm14934_vm1, %v4312_v11, %v4313_v36  ;;  %v11928_v18 = vrot.slane %v4193_v12, 9  ;;  %v4334_v59 = vrot.slane %v15721_v45, 5  ;;  %v4195_v20 = vld [vmem:[#allocation2 + $0xb4] sm:$0xe]  ;;  %v11929_v58 = vrot.slane %v4194_v49, 9 }
 0x161   : > { %13000 = vmatprep.mubr.msk.bf16.mxu0 %vm2134_vm0, %v18971_v51  ;;  %v4327_v51 = vrot.slane %v15701_v61, 5  ;;  %18975 = vst [vmem:[#allocation24_spill] sm:$0xff] %v15753_v7  ;;  %v15757_v21 = vld [vmem:[#allocation2 + $0xb8] sm:$0xf]  ;;  %v15759_v25 = vld [vmem:[#allocation2 + $0xbc] sm:$0x1]  ;;  %v15765_v41 = vsel %vm14934_vm1, %v4319_v56, %v4320_v23  ;;  %v15769_v36 = vsel %vm14934_vm1, %v11927_v3, %v4324_v15 }
 0x162   : > { %18976 = vst [vmem:[#allocation25_spill] sm:$0xff] %v15757_v21  ;;  %18977 = vst [vmem:[#allocation26_spill] sm:$0xff] %v15759_v25  ;;  %v4326_v12 = vrot.slane %v4324_v15, 4  ;;  %v15775_v52 = vsel %vm14934_vm1, %v11928_v18, %v4331_v34  ;;  %v4333_v2 = vrot.slane %v4331_v34, 4  ;;  %v4338_v23 = vrot.slane %v15735_v63, 5  ;;  %v14067_v34 = vld [vmem:[#allocation2 + $0x54] sm:$0xff]  }
 0x163   : > { %18978 = vst [vmem:[#allocation27_spill] sm:$0xff] %v15765_v41  ;;  %18979 = vst [vmem:[#allocation28_spill] sm:$0xff] %v15769_v36  ;;  %v4341_v56 = vrot.slane %v15737_v33, 5  ;;  %v11930_v3 = vrot.slane %v4195_v20, 9  ;;  %v4345_v18 = vrot.slane %v15757_v21, 5  ;;  %v4348_v49 = vrot.slane %v15759_v25, 5 }
 0x164   : > { %18980 = vst [vmem:[#allocation29_spill] sm:$0xff] %v15775_v52  ;;  %v15779_v14 = vsel %vm14934_vm1, %v4326_v12, %v4327_v51  ;;  %v15787_v11 = vsel %vm14934_vm1, %v4333_v2, %v4334_v59  ;;  %v18983_v51 = vcombine.low %v15394_v42, %v15404_v29  ;;  %v4340_v20 = vrot.slane %v4338_v23, 4  ;;  %v14069_v7 = vld [vmem:[#allocation2 + $0x6c] sm:$0xff]   ;;  %v15980_v25 = vld [vmem:[#allocation2 + $0x58] sm:$0xf] }
 0x165   : > { %18981 = vst [vmem:[#allocation30_spill] sm:$0xff] %v15779_v14  ;;  %18982 = vst [vmem:[#allocation31_spill] sm:$0xff] %v15787_v11  ;;  %v18984_v12 = vcombine.low %v15399_v60, %v15412_v55  ;;  %v4347_v2 = vrot.slane %v4345_v18, 4  ;;  %v15803_v59 = vsel %vm14934_vm1, %v11929_v58, %v4338_v23  ;;  %v15813_v29 = vsel %vm14934_vm1, %v11930_v3, %v4345_v18  ;;  %v14061_v18 = vld [vmem:[#allocation2 + $0xc] sm:$0xff]   ;;  %v15876_v11 = vld [vmem:[#allocation2 + $0x20] sm:$0x1] }
 0x166   : > { %18985 = vst [vmem:[#allocation32_spill] sm:$0xff] %v15803_v59  ;;  %v15807_v15 = vsel %vm14934_vm1, %v4340_v20, %v4341_v56  ;;  %18987 = vst [vmem:[#allocation34_spill] sm:$0xff] %v15813_v29  ;;  %v18989_v58 = vcombine.low %v15416_v10, %v15432_v37  ;;  %v18990_v23 = vcombine.low %v15427_v53, %v15440_v35  ;;  %v14062_v53 = vld [vmem:[#allocation2 + $0x18] sm:$0xff]   ;;  %v3986_v37 = vsel %vm2183_vm12, %v15566_v30, 0  ;;  %v14063_v35 = vld [vmem:[#allocation2 + $0x24] sm:$0xff]  }
 0x167   : > { %18986 = vst [vmem:[#allocation33_spill] sm:$0xff] %v15807_v15  ;;  %v15817_v60 = vsel %vm14934_vm1, %v4347_v2, %v4348_v49  ;;  %v18991_v56 = vcombine.low %v15460_v28, %v15464_v17  ;;  %v18992_v3 = vcombine.low %v15471_v9, %v15475_v8  ;;  %v18993_v10 = vcombine.low %v15481_v46, %v15485_v1  ;;  %v15847_v28 = vld [vmem:[%s18686_s2 + $0x14] sm:$0xf]  ;;  %v3455_v9 = vld [vmem:[#allocation2 + $0xc] sm:$0xf]  ;;  %v14065_v8 = vld [vmem:[#allocation2 + $0x3c] sm:$0xff]  }
 0x168   : > { %13001 = vmatmul.mubr.msk.bf16.gmra.mrb[16].mxu0 %vm2134_vm0, %v18983_v51  ;;  %18988 = vst [vmem:[#allocation35_spill] sm:$0xff] %v15817_v60  ;;  %v14064_v17 = vld [vmem:[#allocation2 + $0x30] sm:$0xff]   ;;  %v15856_v1 = vld [vmem:[#allocation2 + $0x1c] sm:$0xf]  ;;  %v3504_v30 = vshrl.u32 %v3455_v9, 16  ;;  %v3507_v49 = vshll.u32 %v3455_v9, 16 }
 0x169   : > { %13004 = vmatprep.mubr.msk.bf16.mxu0 %vm2134_vm0, %v18984_v12  ;;  %v15853_v46 = vld [vmem:[#allocation2 + $0x10] sm:$0xf]  ;;  %18995 = vst [vmem:[#allocation37_spill] sm:$0xff] %v15856_v1  ;;  %v3458_v12 = vld [vmem:[#allocation2 + $0x18] sm:$0xf]  ;;  %v3537_v2 = vshll.u32 %v15856_v1, 16 }
 0x16a   : > { %18994 = vst [vmem:[#allocation36_spill] sm:$0xff] %v15853_v46  ;;  %v3513_v51 = vshll.u32 %v15853_v46, 16  ;;  %v3517_v20 = vshrl.u32 %v15853_v46, 16  ;;  %18997 = vst [vmem:[#allocation39_spill] sm:$0xff] %v15876_v11  ;;  %v3547_v52 = vshll.u32 %v15876_v11, 16  ;;  %v3613_v54 = vshrl.u32 %v15598_v43, 16 }
 0x16b   : > { %v15867_v60 = vrot.slane %v3537_v2, 5  ;;  %v3470_v11 = vld [vmem:[#allocation2 + $0x48] sm:$0xf]  ;;  %v14073_v46 = vld [vmem:[#allocation2 + $0x9c] sm:$0xff]   ;;  %19008 = vst [vmem:[#allocation50_spill] sm:$0xff] %v15980_v25 }
 0x16c   : > { %v15865_v9 = vrot.slane %v3513_v51, 5  ;;  %v5038_v33 = vld [vmem:[#allocation2 + $0x88] sm:$0xf] }
 0x170   : > { %13005 = vmatmul.mubr.msk.bf16.gmra.mrb[20].mxu0 %vm2134_vm0, %v18989_v58  ;;  %v3541_v58 = vshrl.u32 %v15856_v1, 16 }
 0x171   : > { %13008 = vmatprep.mubr.msk.bf16.mxu0 %vm2134_vm0, %v18990_v23  ;;  %v3461_v23 = vld [vmem:[#allocation2 + $0x24] sm:$0xf] }
 0x172   : > { %v3552_v55 = vshrl.u32 %v3461_v23, 16  ;;  %v3555_v42 = vshll.u32 %v3461_v23, 16  ;;  %v3543_v29 = vrot.slane %v3541_v58, 4 }
 0x174   : > { %v3554_v2 = vrot.slane %v3552_v55, 4  ;;  %v3557_v58 = vrot.slane %v3555_v42, 5 }
 0x176   : > { %v3558_v41 = vor.u32 %v3557_v58, %v3554_v2 }
 0x178   : > { %13009 = vmatmul.mubr.msk.bf16.gmra.mrb[24].mxu0 %vm2134_vm0, %v18991_v56  ;;  %v3561_v56 = vshll.u32 %v15581_v57, 16 }
 0x179   : > { %13012 = vmatprep.mubr.msk.bf16.mxu0 %vm2134_vm0, %v18992_v3  ;;  %v3565_v3 = vshrl.u32 %v15581_v57, 16  ;;  %v15872_v57 = vld [vmem:[#allocation2 + $0x14] sm:$0x1] }
 0x17a   : > { %v15869_v15 = vrot.slane %v3561_v56, 5  ;;  %18996 = vst [vmem:[#allocation38_spill] sm:$0xff] %v15872_v57  ;;  %v3467_v56 = vld [vmem:[#allocation2 + $0x3c] sm:$0xf] }
 0x17b   : > { %v3567_v59 = vrot.slane %v3565_v3, 4  ;;  %v3523_v3 = vshll.u32 %v15872_v57, 16  ;;  %v3600_v55 = vshrl.u32 %v3467_v56, 16  ;;  %v3603_v42 = vshll.u32 %v3467_v56, 16  ;;  %v5740_v57 = vld [vmem:[#allocation2 + $0x48] sm:$0xe] }
 0x17d   : > { %v3602_v58 = vrot.slane %v3600_v55, 4  ;;  %v3605_v56 = vrot.slane %v3603_v42, 5  ;;  %v14071_v55 = vld [vmem:[#allocation2 + $0x84] sm:$0xff]  }
 0x180   : > { %13013 = vmatmul.mubr.msk.bf16.gmra.mrb[28].mxu0 %vm2134_vm0, %v18993_v10  ;;  %v3509_v10 = vrot.slane %v3507_v49, 5 }
 0x181   : > { %13018 = vmatprep.mubr.msk.bf16.mxu0 %vm2134_vm0, %v14061_v18  ;;  %v3506_v18 = vrot.slane %v3504_v30, 4 }
 0x188   : > { %13019 = vmatmul.mubr.msk.bf16.vlgmr.msra.gmra.mrb[0].mxu0 %vm2134_vm0, %v14062_v53  ;;  %v3528_v53 = vshrl.u32 %v3458_v12, 16 }
 0x189   : > { %13051 = vmatpush3.bf16.msra.mxu0 %v3986_v37  ;;  %13022 = vmatprep.mubr.msk.bf16.mxu0 %vm2134_vm0, %v14063_v35  ;;  %v3531_v37 = vshll.u32 %v3458_v12, 16  ;;  %v3464_v35 = vld [vmem:[#allocation2 + $0x30] sm:$0xf] }
 0x18a   : > { %14043 = vmatprep.subr.msk.bf16.mxu0 %vm2183_vm12, %v15847_v28  ;;  %v3576_v30 = vshrl.u32 %v3464_v35, 16  ;;  %v3579_v49 = vshll.u32 %v3464_v35, 16  ;;  %v3530_v51 = vrot.slane %v3528_v53, 4  ;;  %v3568_v35 = vor.u32 %v3567_v59, %v15869_v15 }
 0x18b   : > { %v3533_v12 = vrot.slane %v3531_v37, 5  ;;  %v3585_v53 = vshll.u32 %v15589_v0, 16  ;;  %v3571_v37 = vshll.u32 %v15583_v19, 16 }
 0x18c   : > { %v3578_v14 = vrot.slane %v3576_v30, 4  ;;  %v3569_v38 = vrot.slane %v3568_v35, 4  ;;  %v3595_v35 = vshll.u32 %v15595_v26, 16 }
 0x18d   : > { %v3573_v2 = vrot.slane %v3571_v37, 5  ;;  %v15909_v37 = vld [vmem:[#allocation2 + $0x1c] sm:$0xf] }
 0x18e   : > { %18998 = vst [vmem:[#allocation40_spill] sm:$0xff] %v15909_v37 }
 0x190   : > { %13023 = vmatmul.mubr.msk.bf16.gmra.mrb[4].mxu0 %vm2134_vm0, %v14064_v17  ;;  %v14066_v17 = vld [vmem:[#allocation2 + $0x48] sm:$0xff]  }
 0x191   : > { %13026 = vmatprep.mubr.msk.bf16.mxu0 %vm2134_vm0, %v14065_v8  ;;  %v3519_v8 = vrot.slane %v3517_v20, 4  ;;  %v3510_v20 = vor.u32 %v3509_v10, %v3506_v18  ;;  %v3589_v18 = vshrl.u32 %v15589_v0, 16  ;;  %v3534_v10 = vor.u32 %v3533_v12, %v3530_v51 }
 0x192   : > { %v3525_v0 = vrot.slane %v3523_v3, 5  ;;  %v15888_v12 = vrot.slane %v3585_v53, 5  ;;  %v3624_v53 = vshrl.u32 %v3470_v11, 16 }
 0x193   : > { %v3520_v23 = vor.u32 %v3519_v8, %v15865_v9  ;;  %v14068_v8 = vld [vmem:[#allocation2 + $0x60] sm:$0xff]   ;;  %v3511_v59 = vrot.slane %v3510_v20, 4  ;;  %v3591_v19 = vrot.slane %v3589_v18, 4  ;;  %v3559_v20 = vrot.slane %v3558_v41, 4 }
 0x194   : > { %v3619_v41 = vshll.u32 %v15600_v32, 16  ;;  %v3633_v32 = vshll.u32 %v15602_v16, 16 }
 0x195   : > { %v3521_v36 = vrot.slane %v3520_v23, 4  ;;  %v3535_v23 = vrot.slane %v3534_v10, 4  ;;  %v3606_v10 = vor.u32 %v3605_v56, %v3602_v58  ;;  %v3564_v26 = vsel %vm14684_vm15, %v3559_v20, %v15869_v15  ;;  %v5736_v15 = vld [vmem:[#allocation2 + $0x18] sm:$0xe]  ;;  %v15945_v58 = vld [vmem:[#allocation2 + $0x34] sm:$0xf] }
 0x196   : > { %19002 = vst [vmem:[#allocation44_spill] sm:$0xff] %v15945_v58  ;;  %v15947_v56 = vld [vmem:[#allocation2 + $0x38] sm:$0x1]  ;;  %v5802_v20 = vrot.slane %v15909_v37, 5  ;;  %v5816_v37 = vrot.slane %v15945_v58, 5 }
 0x197   : > { %19003 = vst [vmem:[#allocation45_spill] sm:$0xff] %v15947_v56  ;;  %v5819_v1 = vrot.slane %v15947_v56, 5  ;;  %v5027_v56 = vld [vmem:[#allocation2 + $0x5c] sm:$0x1] }
 0x198   : > { %13027 = vmatmul.mubr.msk.bf16.gmra.mrb[8].mxu0 %vm2134_vm0, %v14066_v17  ;;  %v3544_v17 = vor.u32 %v3543_v29, %v15867_v60  ;;  %v3609_v29 = vshll.u32 %v15598_v43, 16  ;;  %v3526_v43 = vsel %vm14684_vm15, %v3521_v36, %v3525_v0  ;;  %v3592_v36 = vor.u32 %v3591_v19, %v15888_v12  ;;  %v15932_v0 = vld [vmem:[#allocation2 + $0x2c] sm:$0x1] }
 0x199   : > { %13030 = vmatprep.mubr.msk.bf16.mxu0 %vm2134_vm0, %v14067_v34  ;;  %v3581_v34 = vrot.slane %v3579_v49, 5  ;;  %v3549_v49 = vrot.slane %v3547_v52, 5  ;;  %19001 = vst [vmem:[#allocation43_spill] sm:$0xff] %v15932_v0 }
 0x19a   : > { %v3545_v30 = vrot.slane %v3544_v17, 4  ;;  %v15893_v52 = vrot.slane %v3609_v29, 5  ;;  %v3615_v17 = vrot.slane %v3613_v54, 4  ;;  %v14070_v54 = vld [vmem:[#allocation2 + $0x78] sm:$0xff]   ;;  %v15921_v29 = vld [vmem:[#allocation2 + $0x20] sm:$0x1] }
 0x19b   : > { %v3582_v51 = vor.u32 %v3581_v34, %v3578_v14  ;;  %v3516_v14 = vsel %vm14684_vm15, %v3511_v59, %v15865_v9  ;;  %v3627_v9 = vshll.u32 %v3470_v11, 16  ;;  %18999 = vst [vmem:[#allocation41_spill] sm:$0xff] %v15921_v29  ;;  %v15923_v11 = vld [vmem:[#allocation2 + $0x28] sm:$0xf]  ;;  %v15939_v19 = vrot.slane %v3592_v36, 4 }
 0x19c   : > { %v3550_v3 = vsel %vm14684_vm15, %v3545_v30, %v3549_v49  ;;  %v15907_v18 = vcombine.low %v3516_v14, %v3526_v43  ;;  %v3616_v42 = vor.u32 %v3615_v17, %v15893_v52  ;;  %19000 = vst [vmem:[#allocation42_spill] sm:$0xff] %v15923_v11  ;;  %v15929_v49 = vrot.slane %v3595_v35, 5  ;;  %v5737_v14 = vld [vmem:[#allocation2 + $0x24] sm:$0xe] }
 0x19d   : > { %v15903_v34 = vrot.slane %v3582_v51, 4  ;;  %v15952_v43 = vrot.slane %v3627_v9, 5  ;;  %v5805_v17 = vrot.slane %v15921_v29, 5  ;;  %v12031_v35 = vrot.slane %v5736_v15, 9  ;;  %v15965_v9 = vld [vmem:[#allocation2 + $0x40] sm:$0xf] }
 0x19e   : > { %v5809_v36 = vrot.slane %v15923_v11, 5  ;;  %19004 = vst [vmem:[#allocation46_spill] sm:$0xff] %v15965_v9  ;;  %v5024_v51 = vld [vmem:[#allocation2 + $0x50] sm:$0x1]  ;;  %v12032_v15 = vrot.slane %v5737_v14, 9 }
 0x19f   : > { %v14072_v11 = vld [vmem:[#allocation2 + $0x90] sm:$0xff]   ;;  %v5833_v58 = vrot.slane %v5024_v51, 5  ;;  %v5743_v51 = vld [vmem:[#allocation2 + $0x6c] sm:$0xe] }
 0x1a0   : > { %13031 = vmatmul.mubr.msk.bf16.gmra.mrb[12].mxu0 %vm2134_vm0, %v14068_v8  ;;  %v15919_v8 = vld [vmem:[#allocation2 + $0x54] sm:$0xf]  ;;  %v5811_v29 = vrot.slane %v5809_v36, 4  ;;  %v15986_v14 = vsel %vm14934_vm1, %v12032_v15, %v5809_v36  ;;  %v5030_v36 = vld [vmem:[#allocation2 + $0x68] sm:$0x1] }
 0x1a1   : > { %13034 = vmatprep.mubr.msk.bf16.mxu0 %vm2134_vm0, %v14069_v7  ;;  %v3574_v7 = vsel %vm14684_vm15, %v3569_v38, %v3573_v2  ;;  %v3540_v38 = vsel %vm14684_vm15, %v3535_v23, %v15867_v60  ;;  %v3637_v60 = vshrl.u32 %v15602_v16, 16  ;;  %v15941_v23 = vrot.slane %v3619_v41, 5  ;;  %v5738_v41 = vld [vmem:[#allocation2 + $0x30] sm:$0xe]  ;;  %19009 = vst [vmem:[#allocation51_spill] sm:$0xff] %v15986_v14 }
 0x1a2   : > { %v15925_v59 = vcombine.low %v3540_v38, %v3550_v3  ;;  %v15927_v30 = vcombine.low %v3564_v26, %v3574_v7  ;;  %v15943_v2 = vrot.slane %v3624_v53, 4  ;;  %v15950_v16 = vrot.slane %v3606_v10, 4  ;;  %v15967_v38 = vld [vmem:[#allocation2 + $0x4c] sm:$0xf]  ;;  %v5032_v14 = vld [vmem:[#allocation2 + $0x70] sm:$0xf] }
 0x1a3   : > { %v15956_v3 = vrot.slane %v3616_v42, 4  ;;  %v15958_v7 = vrot.slane %v3633_v32, 5  ;;  %v15961_v53 = vrot.slane %v3637_v60, 4  ;;  %19005 = vst [vmem:[#allocation47_spill] sm:$0xff] %v15967_v38  ;;  %v5804_v26 = vrot.slane %v5802_v20, 4 }
 0x1a4   : > { %v5739_v42 = vld [vmem:[#allocation2 + $0x3c] sm:$0xe]  ;;  %v15971_v32 = vsel %vm14934_vm1, %v12031_v35, %v5802_v20  ;;  %v5812_v60 = vrot.slane %v15932_v0, 5  ;;  %v12033_v10 = vrot.slane %v5738_v41, 9  ;;  %v5741_v41 = vld [vmem:[#allocation2 + $0x54] sm:$0xe] }
 0x1a5   : > { %19006 = vst [vmem:[#allocation48_spill] sm:$0xff] %v15971_v32  ;;  %v12034_v35 = vrot.slane %v5739_v42, 9  ;;  %v5029_v0 = vld [vmem:[#allocation2 + $0x64] sm:$0xf]  ;;  %v12035_v42 = vrot.slane %v5740_v57, 9 }
 0x1a6   : > { %v15997_v20 = vsel %vm14934_vm1, %v12033_v10, %v5816_v37  ;;  %v5837_v10 = vrot.slane %v15980_v25, 5  ;;  %v5035_v32 = vld [vmem:[#allocation2 + $0x7c] sm:$0xf] }
 0x1a7   : > { %19011 = vst [vmem:[#allocation53_spill] sm:$0xff] %v15997_v20  ;;  %v5744_v20 = vld [vmem:[#allocation2 + $0x78] sm:$0xe] }
 0x1a8   : > { %13035 = vmatmul.mubr.msk.bf16.gmra.mrb[16].mxu0 %vm2134_vm0, %v14070_v54  ;;  %v15976_v54 = vsel %vm14934_vm1, %v5804_v26, %v5805_v17  ;;  %v15990_v17 = vsel %vm14934_vm1, %v5811_v29, %v5812_v60  ;;  %v5823_v29 = vrot.slane %v15965_v9, 5  ;;  %v5830_v60 = vrot.slane %v15967_v38, 5 }
 0x1a9   : > { %13038 = vmatprep.mubr.msk.bf16.mxu0 %vm2134_vm0, %v14071_v55  ;;  %v5021_v55 = vld [vmem:[#allocation2 + $0x44] sm:$0x1]  ;;  %19007 = vst [vmem:[#allocation49_spill] sm:$0xff] %v15976_v54  ;;  %19010 = vst [vmem:[#allocation52_spill] sm:$0xff] %v15990_v17  ;;  %v5818_v54 = vrot.slane %v5816_v37, 4  ;;  %v12036_v17 = vrot.slane %v5741_v41, 9 }
 0x1aa   : > { %v5826_v15 = vrot.slane %v5021_v55, 5  ;;  %v5742_v37 = vld [vmem:[#allocation2 + $0x60] sm:$0xe]  ;;  %v16014_v55 = vsel %vm14934_vm1, %v12034_v35, %v5823_v29  ;;  %v5832_v41 = vrot.slane %v5830_v60, 4  ;;  %v5839_v38 = vrot.slane %v5837_v10, 4 }
 0x1ab   : > { %v16005_v26 = vsel %vm14934_vm1, %v5818_v54, %v5819_v1  ;;  %19013 = vst [vmem:[#allocation55_spill] sm:$0xff] %v16014_v55  ;;  %v16018_v1 = vsel %vm14934_vm1, %v12035_v42, %v5830_v60  ;;  %v5036_v54 = vld [vmem:[#allocation2 + $0x80] sm:$0x1]  ;;  %v16022_v25 = vsel %vm14934_vm1, %v12036_v17, %v5837_v10  ;;  %v5840_v9 = vrot.slane %v5027_v56, 5  ;;  %v5745_v10 = vld [vmem:[#allocation2 + $0x84] sm:$0xe] }
 0x1ac   : > { %19012 = vst [vmem:[#allocation54_spill] sm:$0xff] %v16005_v26  ;;  %19014 = vst [vmem:[#allocation56_spill] sm:$0xff] %v16018_v1  ;;  %v12037_v35 = vrot.slane %v5742_v37, 9  ;;  %v5844_v26 = vrot.slane %v5029_v0, 5  ;;  %v16032_v60 = vsel %vm14934_vm1, %v5832_v41, %v5833_v58  ;;  %v12038_v56 = vrot.slane %v5743_v51, 9 }
 0x1ad   : > { %19015 = vst [vmem:[#allocation57_spill] sm:$0xff] %v16022_v25  ;;  %19017 = vst [vmem:[#allocation59_spill] sm:$0xff] %v16032_v60  ;;  %v16036_v17 = vsel %vm14934_vm1, %v5839_v38, %v5840_v9  ;;  %v16038_v37 = vld [vmem:[#allocation2 + $0xc8] sm:$0x1]  ;;  %v5039_v42 = vld [vmem:[#allocation2 + $0x8c] sm:$0x1] }
 0x1ae   : > { %19018 = vst [vmem:[#allocation60_spill] sm:$0xff] %v16036_v17  ;;  %19019 = vst [vmem:[#allocation61_spill] sm:$0xff] %v16038_v37  ;;  %v16046_v58 = vsel %vm14934_vm1, %v12037_v35, %v5844_v26  ;;  %v5846_v41 = vrot.slane %v5844_v26, 4  ;;  %v5851_v9 = vrot.slane %v5032_v14, 5  ;;  %v12039_v51 = vrot.slane %v5744_v20, 9 }
 0x1af   : > { %19020 = vst [vmem:[#allocation62_spill] sm:$0xff] %v16046_v58  ;;  %v16050_v55 = vld [vmem:[#allocation2 + $0xc4] sm:$0xf]  ;;  %v12040_v17 = vrot.slane %v5745_v10, 9  ;;  %v5865_v25 = vrot.slane %v5038_v33, 5 }
 0x1b0   : > { %13039 = vmatmul.mubr.msk.bf16.gmra.mrb[20].mxu0 %vm2134_vm0, %v14072_v11  ;;  %v16008_v11 = vld [vmem:[#allocation2 + $0x74] sm:$0x1]  ;;  %19021 = vst [vmem:[#allocation63_spill] sm:$0xff] %v16050_v55  ;;  %v4196_v26 = vld [vmem:[#allocation2 + $0xc0] sm:$0xe]  ;;  %v4352_v14 = vrot.slane %v16050_v55, 5  ;;  %v16063_v35 = vsel %vm14934_vm1, %v12038_v56, %v5851_v9 }
 0x1b1   : > { %13042 = vmatprep.mubr.msk.bf16.mxu0 %vm2134_vm0, %v14073_v46  ;;  %v5825_v46 = vrot.slane %v5823_v29, 4  ;;  %v5847_v29 = vrot.slane %v5030_v36, 5  ;;  %v5854_v38 = vrot.slane %v16008_v11, 5  ;;  %v5861_v36 = vrot.slane %v5036_v54, 5  ;;  %v5041_v20 = vld [vmem:[#allocation2 + $0x94] sm:$0xf] }
 0x1b2   : > { %v4355_v11 = vrot.slane %v16038_v37, 5  ;;  %19023 = vst [vmem:[#allocation65_spill] sm:$0xff] %v16063_v35  ;;  %v5042_v54 = vld [vmem:[#allocation2 + $0x98] sm:$0x1]  ;;  %v5853_v10 = vrot.slane %v5851_v9, 4  ;;  %v16071_v1 = vsel %vm14934_vm1, %v12040_v17, %v5865_v25  ;;  %v14076_v58 = vld [vmem:[#allocation2 + $0xc0] sm:$0xff]  }
 0x1b3   : > { %v16026_v57 = vsel %vm14934_vm1, %v5825_v46, %v5826_v15  ;;  %v14074_v15 = vld [vmem:[#allocation2 + $0xa8] sm:$0xff]   ;;  %v14075_v46 = vld [vmem:[#allocation2 + $0xb4] sm:$0xff]   ;;  %v16054_v0 = vsel %vm14934_vm1, %v5846_v41, %v5847_v29  ;;  %v5746_v29 = vld [vmem:[#allocation2 + $0x90] sm:$0xe]  ;;  %v4354_v41 = vrot.slane %v4352_v14, 4 }
 0x1b4   : > { %19016 = vst [vmem:[#allocation58_spill] sm:$0xff] %v16026_v57  ;;  %v5858_v57 = vrot.slane %v5035_v32, 5  ;;  %19022 = vst [vmem:[#allocation64_spill] sm:$0xff] %v16054_v0  ;;  %v5044_v60 = vld [vmem:[#allocation2 + $0xa0] sm:$0xf]  ;;  %v5867_v32 = vrot.slane %v5865_v25, 4  ;;  %v16079_v9 = vsel %vm14934_vm1, %v5853_v10, %v5854_v38 }
 0x1b5   : > { %v5868_v0 = vrot.slane %v5039_v42, 5  ;;  %19025 = vst [vmem:[#allocation67_spill] sm:$0xff] %v16079_v9  ;;  %v5747_v37 = vld [vmem:[#allocation2 + $0x9c] sm:$0xe]  ;;  %v16087_v25 = vsel %vm14934_vm1, %v4354_v41, %v4355_v11  ;;  %v5047_v42 = vld [vmem:[#allocation2 + $0xac] sm:$0xf] }
 0x1b6   : > { %v16067_v33 = vsel %vm14934_vm1, %v12039_v51, %v5858_v57  ;;  %v12041_v51 = vrot.slane %v5746_v29, 9  ;;  %v5048_v17 = vld [vmem:[#allocation2 + $0xb0] sm:$0x1]  ;;  %v5050_v10 = vld [vmem:[#allocation2 + $0xb8] sm:$0xf]  ;;  %v5875_v41 = vrot.slane %v5042_v54, 5 }
 0x1b7   : > { %19024 = vst [vmem:[#allocation66_spill] sm:$0xff] %v16067_v33  ;;  %v16095_v38 = vsel %vm14934_vm1, %v5867_v32, %v5868_v0  ;;  %v5749_v55 = vld [vmem:[#allocation2 + $0xb4] sm:$0xe]  ;;  %v5051_v9 = vld [vmem:[#allocation2 + $0xbc] sm:$0x1]  ;;  %v12042_v35 = vrot.slane %v5747_v37, 9 }
 0x1b8   : > { %13043 = vmatmul.mubr.msk.bf16.gmra.mrb[24].mxu0 %vm2134_vm0, %v14074_v15  ;;  %v11931_v15 = vrot.slane %v4196_v26, 9  ;;  %v5045_v26 = vld [vmem:[#allocation2 + $0xa4] sm:$0x1]  ;;  %19027 = vst [vmem:[#allocation69_spill] sm:$0xff] %v16095_v38  ;;  %v5886_v33 = vrot.slane %v5047_v42, 5  ;;  %v5889_v21 = vrot.slane %v5048_v17, 5 }
 0x1b9   : > { %13046 = vmatprep.mubr.msk.bf16.mxu0 %vm2134_vm0, %v14075_v46  ;;  %v5860_v46 = vrot.slane %v5858_v57, 4  ;;  %v3661_v11 = vshrl.u32 %v15606_v48, 16  ;;  %v12044_v54 = vrot.slane %v5749_v55, 9  ;;  %v5893_v29 = vrot.slane %v5050_v10, 5  ;;  %v3476_v38 = vld [vmem:[#allocation2 + $0x60] sm:$0xf] }
 0x1ba   : > { %v16075_v56 = vsel %vm14934_vm1, %v11931_v15, %v4352_v14  ;;  %v3657_v14 = vshll.u32 %v15606_v48, 16  ;;  %v5879_v15 = vrot.slane %v5044_v60, 5 }
 0x1bb   : > { %v16083_v57 = vsel %vm14934_vm1, %v5860_v46, %v5861_v36  ;;  %v5748_v36 = vld [vmem:[#allocation2 + $0xa8] sm:$0xe]  ;;  %v5872_v46 = vrot.slane %v5041_v20, 5  ;;  %v5895_v55 = vrot.slane %v5893_v29, 4  ;;  %v3663_v10 = vrot.slane %v3661_v11, 4 }
 0x1bc   : > { %19026 = vst [vmem:[#allocation68_spill] sm:$0xff] %v16083_v57  ;;  %v5882_v57 = vrot.slane %v5045_v26, 5  ;;  %v12043_v32 = vrot.slane %v5748_v36, 9  ;;  %v5881_v20 = vrot.slane %v5879_v15, 4  ;;  %v5896_v26 = vrot.slane %v5051_v9, 5 }
 0x1bd   : > { %v5874_v0 = vrot.slane %v5872_v46, 4  ;;  %v16108_v37 = vsel %vm14934_vm1, %v12041_v51, %v5872_v46  ;;  %v16118_v48 = vsel %vm14934_vm1, %v12042_v35, %v5879_v15  ;;  %v16124_v51 = vrot.slane %v3657_v14, 5 }
 0x1be   : > { %v16130_v9 = vsel %vm14934_vm1, %v12043_v32, %v5886_v33  ;;  %v3672_v35 = vshrl.u32 %v3476_v38, 16  ;;  %v16144_v14 = vsel %vm14934_vm1, %v5895_v55, %v5896_v26  ;;  %v3675_v46 = vshll.u32 %v3476_v38, 16 }
 0x1bf   : > { %v16112_v60 = vsel %vm14934_vm1, %v5874_v0, %v5875_v41  ;;  %v3598_v41 = vsel %vm14684_vm15, %v15939_v19, %v15929_v49  ;;  %v19028_v0 = vshrl.u32 %v15919_v8, 16  ;;  %v3681_v38 = vshll.u32 %v15615_v31, 16  ;;  %v3479_v19 = vld [vmem:[#allocation2 + $0x6c] sm:$0xf] }
 0x1c0   : > { %13047 = vmatmul.mubr.msk.bf16.gmra.mrb[28].mxu0 %vm2134_vm0, %v14076_v58  ;;  %v5888_v58 = vrot.slane %v5886_v33, 4  ;;  %v12058_v42 = vcombine.low %v16108_v37, %v16112_v60  ;;  %v4456_v33 = vsel %vm2183_vm12, %v15847_v28, 0  ;;  %v16163_v28 = vld [vmem:[%s18686_s2 + $0x18] sm:$0xf]  ;;  %v3685_v49 = vshrl.u32 %v15615_v31, 16 }
 0x1c1   : > { %13052 = vmatprep.mubr.msk.bf16.mxu0 %vm2134_vm0, %v15907_v18  ;;  %v16122_v18 = vsel %vm14934_vm1, %v5881_v20, %v5882_v57  ;;  %v16140_v57 = vsel %vm14934_vm1, %v12044_v54, %v5893_v29  ;;  %v3640_v29 = vor.u32 %v15961_v53, %v15958_v7  ;;  %v3650_v32 = vrot.slane %v19028_v0, 4  ;;  %v409_v37 = vld [vmem:[#allocation3 + $0xc] sm:$0x1] }
 0x1c2   : > { %v12059_v17 = vcombine.low %v16118_v48, %v16122_v18  ;;  %v16134_v36 = vsel %vm14934_vm1, %v5888_v58, %v5889_v21  ;;  %v19029_v20 = vshll.u32 %v15919_v8, 16  ;;  %v3705_v53 = vshll.u32 %v15641_v47, 16  ;;  %v3485_v21 = vld [vmem:[#allocation2 + $0x84] sm:$0xf]  ;;  %v467_v48 = vld [vmem:[#allocation3 + $0x20] sm:$0x1] }
 0x1c3   : > { %v12060_v15 = vcombine.low %v16130_v9, %v16134_v36  ;;  %v3709_v11 = vshrl.u32 %v15641_v47, 16  ;;  %v3612_v8 = vsel %vm14684_vm15, %v15950_v16, %v15893_v52  ;;  %v3630_v31 = vor.u32 %v15952_v43, %v15943_v2  ;;  %v418_v36 = vld [vmem:[#allocation3 + $0x30] sm:$0x1] }
 0x1c4   : > { %v3653_v54 = vrot.slane %v19029_v20, 5  ;;  %v19030_v58 = vshll.u32 %v15604_v50, 16  ;;  %v3664_v26 = vor.u32 %v3663_v10, %v16124_v51  ;;  %v3674_v55 = vrot.slane %v3672_v35, 4 }
 0x1c5   : > { %v3641_v52 = vrot.slane %v3640_v29, 4  ;;  %v3696_v0 = vshrl.u32 %v3479_v19, 16  ;;  %v3699_v20 = vshll.u32 %v3479_v19, 16  ;;  %v16191_v2 = vrot.slane %v3705_v53, 5  ;;  %v3482_v19 = vld [vmem:[#allocation2 + $0x78] sm:$0xf] }
 0x1c6   : > { %v3645_v47 = vrot.slane %v19030_v58, 5  ;;  %v3654_v16 = vor.u32 %v3653_v54, %v3650_v32  ;;  %v3711_v50 = vrot.slane %v3709_v11, 4  ;;  %v3729_v10 = vshll.u32 %v15663_v22, 16 }
 0x1c7   : > { %v3631_v29 = vrot.slane %v3630_v31, 4  ;;  %v3665_v32 = vrot.slane %v3664_v26, 4  ;;  %v3691_v53 = vshll.u32 %v15629_v39, 16  ;;  %v3698_v11 = vrot.slane %v3696_v0, 4 }
 0x1c8   : > { %13053 = vmatmul.mubr.msk.bf16.vlgmr.msra.gmra.mrb[0].mxu0 %vm2134_vm0, %v15925_v59  ;;  %v3622_v59 = vsel %vm14684_vm15, %v15956_v3, %v15941_v23  ;;  %v16189_v23 = vrot.slane %v3681_v38, 5  ;;  %v3687_v3 = vrot.slane %v3685_v49, 4  ;;  %v3646_v49 = vsel %vm14684_vm15, %v3641_v52, %v3645_v47 }
 0x1c9   : > { %13085 = vmatpush3.bf16.msra.mxu0 %v4456_v33  ;;  %13056 = vmatprep.mubr.msk.bf16.mxu0 %vm2134_vm0, %v15927_v30  ;;  %v3667_v30 = vshll.u32 %v15613_v5, 16  ;;  %v3677_v33 = vrot.slane %v3675_v46, 5  ;;  %v19031_v5 = vsel %vm14684_vm15, %v15903_v34, %v15888_v12  ;;  %v11888_v35 = vcombine.low %v3612_v8, %v3622_v59 }
 0x1ca   : > { %14044 = vmatprep.subr.msk.bf16.mxu0 %vm2183_vm12, %v16163_v28  ;;  %v11887_v43 = vcombine.low %v19031_v5, %v3598_v41  ;;  %v3733_v46 = vshrl.u32 %v15663_v22, 16  ;;  %v3701_v58 = vrot.slane %v3699_v20, 5  ;;  %v3655_v12 = vrot.slane %v3654_v16, 4 }
 0x1cb   : > { %v3669_v54 = vrot.slane %v3667_v30, 5  ;;  %v3678_v38 = vor.u32 %v3677_v33, %v3674_v55  ;;  %v3688_v34 = vor.u32 %v3687_v3, %v16189_v23  ;;  %v3712_v22 = vor.u32 %v3711_v50, %v16191_v2 }
 0x1cc   : > { %v3715_v41 = vshll.u32 %v15653_v13, 16  ;;  %v3720_v8 = vshrl.u32 %v3482_v19, 16  ;;  %v3723_v59 = vshll.u32 %v3482_v19, 16  ;;  %v16208_v31 = vrot.slane %v3729_v10, 5 }
 0x1cd   : > { %v3735_v47 = vrot.slane %v3733_v46, 4  ;;  %v3670_v39 = vsel %vm14684_vm15, %v3665_v32, %v3669_v54  ;;  %v3679_v26 = vrot.slane %v3678_v38, 4  ;;  %v3744_v30 = vshrl.u32 %v3485_v21, 16 }
 0x1ce   : > { %v3747_v55 = vshll.u32 %v3485_v21, 16  ;;  %v3693_v33 = vrot.slane %v3691_v53, 5  ;;  %v3702_v52 = vor.u32 %v3701_v58, %v3698_v11  ;;  %v3753_v16 = vshll.u32 %v15673_v27, 16  ;;  %v3488_v53 = vld [vmem:[#allocation2 + $0x90] sm:$0xf] }
 0x1cf   : > { %v3757_v0 = vshrl.u32 %v15673_v27, 16  ;;  %v3689_v13 = vrot.slane %v3688_v34, 4  ;;  %v3713_v20 = vrot.slane %v3712_v22, 4  ;;  %v3717_v3 = vrot.slane %v3715_v41, 5  ;;  %v3491_v22 = vld [vmem:[#allocation2 + $0x9c] sm:$0xf] }
 0x1d0   : > { %13057 = vmatmul.mubr.msk.bf16.gmra.mrb[4].mxu0 %vm2134_vm0, %v11887_v43  ;;  %v3739_v50 = vshll.u32 %v15665_v24, 16  ;;  %v3636_v5 = vsel %vm14684_vm15, %v3631_v29, %v15958_v7  ;;  %v3722_v43 = vrot.slane %v3720_v8, 4  ;;  %v3736_v10 = vor.u32 %v3735_v47, %v16208_v31 }
 0x1d1   : > { %13060 = vmatprep.mubr.msk.bf16.mxu0 %vm2134_vm0, %v11888_v35  ;;  %v3725_v35 = vrot.slane %v3723_v59, 5  ;;  %v11889_v21 = vcombine.low %v3636_v5, %v3646_v49  ;;  %v3660_v46 = vsel %vm14684_vm15, %v3655_v12, %v16124_v51  ;;  %v3746_v32 = vrot.slane %v3744_v30, 4 }
 0x1d2   : > { %v3749_v27 = vrot.slane %v3747_v55, 5  ;;  %v11890_v54 = vcombine.low %v3660_v46, %v3670_v39  ;;  %v3703_v38 = vrot.slane %v3702_v52, 4  ;;  %v16222_v19 = vrot.slane %v3753_v16, 5 }
 0x1d3   : > { %v3759_v24 = vrot.slane %v3757_v0, 4  ;;  %v3684_v7 = vsel %vm14684_vm15, %v3679_v26, %v16189_v23  ;;  %v3694_v29 = vsel %vm14684_vm15, %v3689_v13, %v3693_v33  ;;  %v3718_v49 = vsel %vm14684_vm15, %v3713_v20, %v3717_v3 }
 0x1d4   : > { %v3741_v51 = vrot.slane %v3739_v50, 5  ;;  %v3726_v11 = vor.u32 %v3725_v35, %v3722_v43  ;;  %v3737_v58 = vrot.slane %v3736_v10, 4  ;;  %v3777_v12 = vshll.u32 %v15689_v40, 16 }
 0x1d5   : > { %v3781_v34 = vshrl.u32 %v15689_v40, 16  ;;  %v3750_v41 = vor.u32 %v3749_v27, %v3746_v32  ;;  %v3763_v23 = vshll.u32 %v15687_v62, 16  ;;  %v3801_v8 = vshll.u32 %v15709_v6, 16 }
 0x1d6   : > { %v3805_v59 = vshrl.u32 %v15709_v6, 16  ;;  %v3708_v47 = vsel %vm14684_vm15, %v3703_v38, %v16191_v2  ;;  %v3760_v39 = vor.u32 %v3759_v24, %v16222_v19  ;;  %v3768_v26 = vshrl.u32 %v3488_v53, 16 }
 0x1d7   : > { %v3771_v30 = vshll.u32 %v3488_v53, 16  ;;  %v11891_v55 = vcombine.low %v3684_v7, %v3694_v29  ;;  %v11892_v33 = vcombine.low %v3708_v47, %v3718_v49  ;;  %v3792_v52 = vshrl.u32 %v3491_v22, 16  ;;  %v3497_v53 = vld [vmem:[#allocation2 + $0xb4] sm:$0xf] }
 0x1d8   : > { %13061 = vmatmul.mubr.msk.bf16.gmra.mrb[8].mxu0 %vm2134_vm0, %v11889_v21  ;;  %v3795_v40 = vshll.u32 %v3491_v22, 16  ;;  %v3727_v16 = vrot.slane %v3726_v11, 4  ;;  %v3742_v62 = vsel %vm14684_vm15, %v3737_v58, %v3741_v51  ;;  %v16244_v0 = vrot.slane %v3777_v12, 5 }
 0x1d9   : > { %13064 = vmatprep.mubr.msk.bf16.mxu0 %vm2134_vm0, %v11890_v54  ;;  %v3783_v13 = vrot.slane %v3781_v34, 4  ;;  %v3751_v6 = vrot.slane %v3750_v41, 4  ;;  %v3765_v20 = vrot.slane %v3763_v23, 5  ;;  %v3803_v3 = vrot.slane %v3801_v8, 5  ;;  %v3494_v54 = vld [vmem:[#allocation2 + $0xa8] sm:$0xf] }
 0x1da   : > { %v3807_v50 = vrot.slane %v3805_v59, 4  ;;  %v3761_v2 = vrot.slane %v3760_v39, 4  ;;  %v3770_v5 = vrot.slane %v3768_v26, 4  ;;  %v3773_v43 = vrot.slane %v3771_v30, 5 }
 0x1db   : > { %v3787_v35 = vshll.u32 %v15701_v61, 16  ;;  %v3794_v10 = vrot.slane %v3792_v52, 4  ;;  %v3797_v21 = vrot.slane %v3795_v40, 5  ;;  %v3732_v46 = vsel %vm14684_vm15, %v3727_v16, %v16208_v31  ;;  %v3500_v52 = vld [vmem:[#allocation2 + $0xc0] sm:$0xf] }
 0x1dc   : > { %v3784_v32 = vor.u32 %v3783_v13, %v16244_v0  ;;  %v3811_v27 = vshll.u32 %v15721_v45, 16  ;;  %v3825_v38 = vshll.u32 %v15735_v63, 16  ;;  %v11893_v24 = vcombine.low %v3732_v46, %v3742_v62  ;;  %v19032_v45 = vld [vmem:[#allocation25_spill] sm:$0xff] }
 0x1dd   : > { %v3808_v7 = vor.u32 %v3807_v50, %v3803_v3  ;;  %v3829_v61 = vshrl.u32 %v15735_v63, 16  ;;  %v3756_v29 = vsel %vm14684_vm15, %v3751_v6, %v16222_v19  ;;  %v3766_v49 = vsel %vm14684_vm15, %v3761_v2, %v3765_v20  ;;  %v19033_v13 = vld [vmem:[#allocation17_spill] sm:$0xff] }
 0x1de   : > { %v3774_v51 = vor.u32 %v3773_v43, %v3770_v5  ;;  %v3789_v31 = vrot.slane %v3787_v35, 5  ;;  %v3798_v11 = vor.u32 %v3797_v21, %v3794_v10  ;;  %v3816_v58 = vshrl.u32 %v3494_v54, 16  ;;  %v19034_v10 = vld [vmem:[#allocation63_spill] sm:$0xff] }
 0x1df   : > { %v3849_v12 = vshll.u32 %v19032_v45, 16  ;;  %v3853_v34 = vshrl.u32 %v19032_v45, 16  ;;  %v3785_v22 = vrot.slane %v3784_v32, 4  ;;  %v3813_v41 = vrot.slane %v3811_v27, 5 }
 0x1e0   : > { %13065 = vmatmul.mubr.msk.bf16.gmra.mrb[12].mxu0 %vm2134_vm0, %v11891_v55  ;;  %v3819_v23 = vshll.u32 %v3494_v54, 16  ;;  %v3827_v63 = vrot.slane %v3825_v38, 5  ;;  %v3809_v8 = vrot.slane %v3808_v7, 4  ;;  %v3831_v59 = vrot.slane %v3829_v61, 4  ;;  %v19035_v54 = vld [vmem:[#allocation26_spill] sm:$0xff] }
 0x1e1   : > { %13068 = vmatprep.mubr.msk.bf16.mxu0 %vm2134_vm0, %v11892_v33  ;;  %v3840_v47 = vshrl.u32 %v3497_v53, 16  ;;  %v3843_v19 = vshll.u32 %v3497_v53, 16  ;;  %v11894_v39 = vcombine.low %v3756_v29, %v3766_v49  ;;  %v3775_v26 = vrot.slane %v3774_v51, 4 }
 0x1e2   : > { %v3799_v30 = vrot.slane %v3798_v11, 4  ;;  %v3851_v55 = vrot.slane %v3849_v12, 5  ;;  %v3855_v33 = vrot.slane %v3853_v34, 4  ;;  %v3790_v40 = vsel %vm14684_vm15, %v3785_v22, %v3789_v31 }
 0x1e3   : > { %v3818_v16 = vrot.slane %v3816_v58, 4  ;;  %v3821_v62 = vrot.slane %v3819_v23, 5  ;;  %v3835_v6 = vshll.u32 %v19033_v13, 16  ;;  %v3814_v20 = vsel %vm14684_vm15, %v3809_v8, %v3813_v41  ;;  %v19036_v8 = vld [vmem:[#allocation61_spill] sm:$0xff] }
 0x1e4   : > { %v3832_v50 = vor.u32 %v3831_v59, %v3827_v63  ;;  %v3842_v2 = vrot.slane %v3840_v47, 4  ;;  %v3845_v5 = vrot.slane %v3843_v19, 5  ;;  %v3864_v43 = vshrl.u32 %v3500_v52, 16  ;;  %v19037_v19 = vld [vmem:[#allocation36_spill] sm:$0xff] }
 0x1e5   : > { %v3867_v35 = vshll.u32 %v3500_v52, 16  ;;  %v3873_v21 = vshll.u32 %v19034_v10, 16  ;;  %v3877_v46 = vshrl.u32 %v19034_v10, 16  ;;  %v3780_v32 = vsel %vm14684_vm15, %v3775_v26, %v16244_v0 }
 0x1e6   : > { %v3856_v27 = vor.u32 %v3855_v33, %v3851_v55  ;;  %v3859_v38 = vshll.u32 %v19035_v54, 16  ;;  %v3804_v7 = vsel %vm14684_vm15, %v3799_v30, %v3803_v3  ;;  %v3822_v61 = vor.u32 %v3821_v62, %v3818_v16 }
 0x1e7   : > { %v11896_v29 = vcombine.low %v3804_v7, %v3814_v20  ;;  %v3833_v49 = vrot.slane %v3832_v50, 4  ;;  %v3837_v51 = vrot.slane %v3835_v6, 5  ;;  %v3846_v31 = vor.u32 %v3845_v5, %v3842_v2  ;;  %v4181_v6 = vld [vmem:[#allocation2 + $0xc] sm:$0xe]  ;;  %v336_v20 = vld [vmem:[#allocation2 + $0xcc] sm:$0x1] }
 0x1e8   : > { %13069 = vmatmul.mubr.msk.bf16.gmra.mrb[16].mxu0 %vm2134_vm0, %v11893_v24  ;;  %v11895_v24 = vcombine.low %v3780_v32, %v3790_v40  ;;  %v3866_v53 = vrot.slane %v3864_v43, 4  ;;  %v3869_v11 = vrot.slane %v3867_v35, 5  ;;  %v3875_v58 = vrot.slane %v3873_v21, 5  ;;  %v19038_v50 = vld [vmem:[#allocation38_spill] sm:$0xff]  ;;  %v19040_v35 = vld [vmem:[#allocation37_spill] sm:$0xff]  ;;  %v19069_v5 = vld [vmem:[#allocation28_spill] sm:$0xff] }
 0x1e9   : > { %13072 = vmatprep.mubr.msk.bf16.mxu0 %vm2134_vm0, %v11894_v39  ;;  %v3879_v45 = vrot.slane %v3877_v46, 4  ;;  %v3857_v12 = vrot.slane %v3856_v27, 4  ;;  %v3861_v0 = vrot.slane %v3859_v38, 5  ;;  %v3823_v34 = vrot.slane %v3822_v61, 4  ;;  %v4182_v61 = vld [vmem:[#allocation2 + $0x18] sm:$0xe] }
 0x1ea   : > { %v3847_v22 = vrot.slane %v3846_v31, 4  ;;  %v3838_v3 = vsel %vm14684_vm15, %v3833_v49, %v3837_v51  ;;  %v3870_v41 = vor.u32 %v3869_v11, %v3866_v53  ;;  %v3883_v59 = vshll.u32 %v19036_v8, 16  ;;  %v11998_v11 = vld [vmem:[%s18686_s2 + $0x1c] sm:$0xf]  ;;  %v19052_v8 = vld [vmem:[#allocation10_spill] sm:$0xff] }
 0x1eb   : > { %v3880_v23 = vor.u32 %v3879_v45, %v3875_v58  ;;  %v3862_v47 = vsel %vm14684_vm15, %v3857_v12, %v3861_v0  ;;  %v4247_v39 = vrot.slane %v19037_v19, 5  ;;  %v3828_v26 = vsel %vm14684_vm15, %v3823_v34, %v3827_v63  ;;  %v19043_v45 = vld [vmem:[#allocation14_spill] sm:$0xff]  ;;  %v19045_v0 = vld [vmem:[#allocation15_spill] sm:$0xff]  ;;  %v19046_v34 = vld [vmem:[#allocation8_spill] sm:$0xff] }
 0x1ec   : > { %v11897_v30 = vcombine.low %v3828_v26, %v3838_v3  ;;  %v3852_v33 = vsel %vm14684_vm15, %v3847_v22, %v3851_v55  ;;  %v3871_v40 = vrot.slane %v3870_v41, 4  ;;  %v3885_v62 = vrot.slane %v3883_v59, 5  ;;  %v19049_v3 = vld [vmem:[#allocation20_spill] sm:$0xff]  ;;  %v19055_v19 = vld [vmem:[#allocation23_spill] sm:$0xff] }
 0x1ed   : > { %v11898_v52 = vcombine.low %v3852_v33, %v3862_v47  ;;  %v3881_v16 = vrot.slane %v3880_v23, 4  ;;  %v4249_v13 = vrot.slane %v4247_v39, 4  ;;  %v4250_v2 = vrot.slane %v19038_v50, 5  ;;  %v19051_v23 = vld [vmem:[#allocation22_spill] sm:$0xff]  ;;  %v19054_v47 = vld [vmem:[#allocation7_spill] sm:$0xff] }
 0x1ee   : > { %v337_v63 = vsel %vm14255_vm5, 0, %v336_v20  ;;  %v3876_v43 = vsel %vm14684_vm15, %v3871_v40, %v3875_v58  ;;  %v4254_v10 = vrot.slane %v19040_v35, 5  ;;  %v11916_v21 = vrot.slane %v4181_v6, 9  ;;  %v19042_v58 = vld [vmem:[#allocation13_spill] sm:$0xff]  ;;  %v19057_v26 = vld [vmem:[#allocation11_spill] sm:$0xff]  ;;  %v19061_v40 = vld [vmem:[#allocation16_spill] sm:$0xff] }
 0x1ef   : > { %v3886_v55 = vsel %vm14684_vm15, %v3881_v16, %v3885_v62  ;;  %338 = vst [vmem:[#allocation2 + $0xcc] sm:$0x1] %v337_v63  ;;  %v4251_v46 = vsel %vm14934_vm1, %v4249_v13, %v4250_v2  ;;  %v4815_v53 = vsel %vm2183_vm12, %v16163_v28, 0  ;;  %v19044_v12 = vcombine.low %v19042_v58, %v19043_v45  ;;  %v19048_v28 = vld [vmem:[#allocation18_spill] sm:$0xff]  ;;  %v19063_v62 = vld [vmem:[#allocation19_spill] sm:$0xff]  ;;  %v19064_v13 = vld [vmem:[#allocation24_spill] sm:$0xff] }
 0x1f0   : > { %13073 = vmatmul.mubr.msk.bf16.gmra.mrb[20].mxu0 %vm2134_vm0, %v11895_v24  ;;  %v11899_v32 = vcombine.low %v3876_v43, %v3886_v55  ;;  %v4248_v27 = vsel %vm14934_vm1, %v11916_v21, %v4247_v39  ;;  %v4256_v38 = vrot.slane %v4254_v10, 4  ;;  %v19041_v24 = vld [vmem:[#allocation39_spill] sm:$0xff]  ;;  %v19047_v22 = vcombine.low %v19045_v0, %v19046_v34  ;;  %v19066_v20 = vld [vmem:[#allocation21_spill] sm:$0xff]  ;;  %v19070_v63 = vld [vmem:[#allocation30_spill] sm:$0xff] }
 0x1f1   : > { %13076 = vmatprep.mubr.msk.bf16.mxu0 %vm2134_vm0, %v11896_v29  ;;  %v11933_v54 = vcombine.low %v4248_v27, %v4251_v46  ;;  %v4257_v7 = vrot.slane %v19041_v24, 5  ;;  %v11917_v29 = vrot.slane %v4182_v61, 9  ;;  %v19050_v41 = vcombine.low %v19048_v28, %v19049_v3  ;;  %v19067_v50 = vld [vmem:[#allocation27_spill] sm:$0xff]  ;;  %v19072_v55 = vld [vmem:[#allocation29_spill] sm:$0xff]  ;;  %v19075_v21 = vld [vmem:[#allocation32_spill] sm:$0xff] }
 0x1f2   : > { %v19053_v59 = vcombine.low %v19051_v23, %v19052_v8  ;;  %v19056_v39 = vcombine.low %v19054_v47, %v19055_v19  ;;  %v19065_v6 = vcombine.low %v19063_v62, %v19064_v13  ;;  %v19068_v2 = vcombine.low %v19066_v20, %v19067_v50  ;;  %v19073_v35 = vld [vmem:[#allocation31_spill] sm:$0xff]  ;;  %v19076_v46 = vld [vmem:[#allocation33_spill] sm:$0xff]  ;;  %v19078_v27 = vld [vmem:[#allocation34_spill] sm:$0xff] }
 0x1f3   : > { %v4258_v49 = vsel %vm14934_vm1, %v4256_v38, %v4257_v7  ;;  %v4255_v51 = vsel %vm14934_vm1, %v11917_v29, %v4254_v10  ;;  %v19071_v43 = vcombine.low %v19069_v5, %v19070_v63  ;;  %v19074_v10 = vcombine.low %v19072_v55, %v19073_v35  ;;  %v392_v24 = vld [vmem:[#allocation2 + $0xd4] sm:$0x1]  ;;  %v14077_v29 = vld [vmem:[#allocation2 + $0x18] sm:$0xff]   ;;  %v5750_v58 = vld [vmem:[#allocation2 + $0xc0] sm:$0xe] }
 0x1f4   : > { %v11934_v31 = vcombine.low %v4255_v51, %v4258_v49  ;;  %v393_v61 = vsel %vm14239_vm3, 0, %v392_v24  ;;  %v19082_v49 = vcombine.low %v16075_v56, %v16087_v25  ;;  %v16377_v51 = vld [vmem:[#allocation2 + $0xc4] sm:$0xf]  ;;  %v12045_v45 = vrot.slane %v5750_v58, 9  ;;  %v14079_v28 = vld [vmem:[#allocation2 + $0x30] sm:$0xff]   ;;  %v14081_v23 = vld [vmem:[#allocation2 + $0x48] sm:$0xff]  }
 0x1f5   : > { %394 = vst [vmem:[#allocation2 + $0xd4] sm:$0x1] %v393_v61  ;;  %v14078_v34 = vld [vmem:[#allocation2 + $0x24] sm:$0xff]   ;;  %v16387_v56 = vld [vmem:[%s18686_s2 + $0x20] sm:$0xf]  ;;  %v14082_v8 = vld [vmem:[#allocation2 + $0x54] sm:$0xff]  }
 0x1f6   : > { %v14084_v47 = vld [vmem:[#allocation2 + $0x6c] sm:$0xff]   ;;  %v14085_v19 = vld [vmem:[#allocation2 + $0x78] sm:$0xff]   ;;  %v14086_v62 = vld [vmem:[#allocation2 + $0x84] sm:$0xff]   ;;  %vm395_vm3 = vcmask 125952   ;;  %vm398_vm5 = vcmask 122880  }
 0x1f7   : > { %v14087_v20 = vld [vmem:[#allocation2 + $0x90] sm:$0xff]   ;;  %v19084_v5 = vld [vmem:[#allocation42_spill] sm:$0xff]  ;;  %vm16486_vm9 = vmand %vm398_vm5, %vm283_vm2  ;;  %vm19126_vm2 = vsmask.f32 7938 }
 0x1f8   : > { %13077 = vmatmul.mubr.msk.bf16.gmra.mrb[24].mxu0 %vm2134_vm0, %v11897_v30  ;;  %v19058_v30 = vld [vmem:[#allocation9_spill] sm:$0xff]  ;;  %v5092_v63 = vshll.u32 %v19084_v5, 16  ;;  %v410_v60 = vsel %vm16486_vm9, 0, %v409_v37  ;;  %vm16697_vm10 = vmand %vm398_vm5, %vm19126_vm2 }
 0x1f9   : > { %13080 = vmatprep.mubr.msk.bf16.mxu0 %vm2134_vm0, %v11898_v52  ;;  %v19059_v33 = vcombine.low %v19057_v26, %v19058_v30  ;;  %v19060_v52 = vld [vmem:[#allocation12_spill] sm:$0xff]  ;;  %411 = vst [vmem:[#allocation3 + $0xc] sm:$0x1] %v410_v60  ;;  %v468_v18 = vsel %vm16697_vm10, 0, %v467_v48  ;;  %v439_v48 = vld [vmem:[#allocation3 + $0x84] sm:$0x1] }
 0x1fa   : > { %v19062_v16 = vcombine.low %v19060_v52, %v19061_v40  ;;  %v19083_v26 = vld [vmem:[#allocation40_spill] sm:$0xff]  ;;  %v5013_v52 = vld [vmem:[#allocation2 + $0x24] sm:$0xf]  ;;  %469 = vst [vmem:[#allocation3 + $0x20] sm:$0x1] %v468_v18 }
 0x1fb   : > { %v5068_v30 = vshll.u32 %v19083_v26, 16  ;;  %v5083_v50 = vshrl.u32 %v5013_v52, 16  ;;  %v497_v18 = vld [vmem:[#allocation3 + $0x98] sm:$0x1] }
 0x1fd   : > { %v5070_v13 = vrot.slane %v5068_v30, 5 }
 0x200   : > { %13081 = vmatmul.mubr.msk.bf16.gmra.mrb[28].mxu0 %vm2134_vm0, %v11899_v32  ;;  %v19077_v32 = vcombine.low %v19075_v21, %v19076_v46  ;;  %v19085_v46 = vld [vmem:[#allocation41_spill] sm:$0xff] }
 0x201   : > { %13086 = vmatprep.mubr.msk.bf16.mxu0 %vm2134_vm0, %v11933_v54  ;;  %v19079_v54 = vld [vmem:[#allocation35_spill] sm:$0xff] }
 0x202   : > { %v19080_v38 = vcombine.low %v19078_v27, %v19079_v54  ;;  %v5085_v27 = vrot.slane %v5083_v50, 4 }
 0x208   : > { %13087 = vmatmul.mubr.msk.bf16.vlgmr.msra.gmra.mrb[0].mxu0 %vm2134_vm0, %v11934_v31  ;;  %v16379_v31 = vld [vmem:[#allocation2 + $0xc8] sm:$0x1] }
 0x209   : > { %13119 = vmatpush3.bf16.msra.mxu0 %v4815_v53  ;;  %13090 = vmatprep.mubr.msk.bf16.mxu0 %vm2134_vm0, %v19044_v12  ;;  %v5900_v53 = vrot.slane %v16377_v51, 5  ;;  %v5903_v0 = vrot.slane %v16379_v31, 5 }
 0x20a   : > { %14045 = vmatprep.subr.msk.bf16.mxu0 %vm2183_vm12, %v11998_v11 }
 0x20b   : > { %v5902_v12 = vrot.slane %v5900_v53, 4  ;;  %v16391_v25 = vsel %vm14934_vm1, %v12045_v45, %v5900_v53  ;;  %v14089_v53 = vld [vmem:[#allocation2 + $0xa8] sm:$0xff]  }
 0x20d   : > { %v16395_v3 = vsel %vm14934_vm1, %v5902_v12, %v5903_v0 }
 0x210   : > { %13091 = vmatmul.mubr.msk.bf16.gmra.mrb[4].mxu0 %vm2134_vm0, %v19047_v22  ;;  %v5541_v22 = vsel %vm2183_vm12, %v11998_v11, 0  ;;  %v14080_v11 = vld [vmem:[#allocation2 + $0x3c] sm:$0xff]  }
 0x211   : > { %13094 = vmatprep.mubr.msk.bf16.mxu0 %vm2134_vm0, %v19050_v41  ;;  %v12062_v41 = vcombine.low %v16391_v25, %v16395_v3  ;;  %v473_v25 = vld [vmem:[#allocation3 + $0x38] sm:$0x1] }
 0x212   : > { %v474_v3 = vsel %vm16697_vm10, 0, %v473_v25 }
 0x213   : > { %475 = vst [vmem:[#allocation3 + $0x38] sm:$0x1] %v474_v3 }
 0x218   : > { %13095 = vmatmul.mubr.msk.bf16.gmra.mrb[8].mxu0 %vm2134_vm0, %v19053_v59  ;;  %v14083_v59 = vld [vmem:[#allocation2 + $0x60] sm:$0xff]  }
 0x219   : > { %13098 = vmatprep.mubr.msk.bf16.mxu0 %vm2134_vm0, %v19056_v39  ;;  %v5010_v39 = vld [vmem:[#allocation2 + $0x18] sm:$0xf] }
 0x21a   : > { %v5059_v40 = vshrl.u32 %v5010_v39, 16 }
 0x21c   : > { %v5061_v55 = vrot.slane %v5059_v40, 4  ;;  %v5022_v40 = vld [vmem:[#allocation2 + $0x48] sm:$0xf] }
 0x220   : > { %13099 = vmatmul.mubr.msk.bf16.gmra.mrb[12].mxu0 %vm2134_vm0, %v19059_v33  ;;  %v5072_v33 = vshrl.u32 %v19083_v26, 16 }
 0x221   : > { %13102 = vmatprep.mubr.msk.bf16.mxu0 %vm2134_vm0, %v19062_v16  ;;  %v5062_v16 = vshll.u32 %v5010_v39, 16 }
 0x223   : > { %v5064_v35 = vrot.slane %v5062_v16, 5 }
 0x228   : > { %13103 = vmatmul.mubr.msk.bf16.gmra.mrb[16].mxu0 %vm2134_vm0, %v19065_v6  ;;  %v5074_v6 = vrot.slane %v5072_v33, 4  ;;  %v19088_v33 = vld [vmem:[#allocation45_spill] sm:$0xff] }
 0x229   : > { %13106 = vmatprep.mubr.msk.bf16.mxu0 %vm2134_vm0, %v19068_v2  ;;  %v5086_v2 = vshll.u32 %v5013_v52, 16  ;;  %v5126_v52 = vshll.u32 %v19088_v33, 16 }
 0x22a   : > { %v5075_v21 = vor.u32 %v5074_v6, %v5070_v13 }
 0x22b   : > { %v5088_v54 = vrot.slane %v5086_v2, 5 }
 0x22c   : > { %v5076_v58 = vrot.slane %v5075_v21, 4  ;;  %v5155_v21 = vshrl.u32 %v5022_v40, 16 }
 0x22d   : > { %v5089_v12 = vor.u32 %v5088_v54, %v5085_v27  ;;  %v16443_v54 = vrot.slane %v5126_v52, 5 }
 0x22f   : > { %v16426_v26 = vrot.slane %v5089_v12, 4  ;;  %v16457_v12 = vld [vmem:[#allocation2 + $0xd4] sm:$0x1] }
 0x230   : > { %13107 = vmatmul.mubr.msk.bf16.gmra.mrb[20].mxu0 %vm2134_vm0, %v19071_v43  ;;  %v5096_v43 = vshrl.u32 %v19084_v5, 16 }
 0x231   : > { %13110 = vmatprep.mubr.msk.bf16.mxu0 %vm2134_vm0, %v19074_v10  ;;  %v5016_v10 = vld [vmem:[#allocation2 + $0x30] sm:$0xf] }
 0x232   : > { %v5098_v24 = vrot.slane %v5096_v43, 4  ;;  %v5107_v7 = vshrl.u32 %v5016_v10, 16  ;;  %v5110_v61 = vshll.u32 %v5016_v10, 16 }
 0x238   : > { %13111 = vmatmul.mubr.msk.bf16.gmra.mrb[24].mxu0 %vm2134_vm0, %v19077_v32  ;;  %v5078_v32 = vshll.u32 %v19085_v46, 16  ;;  %v5158_v46 = vshll.u32 %v5022_v40, 16  ;;  %v14092_v40 = vld [vmem:[#allocation2 + $0xcc] sm:$0xff]  }
 0x239   : > { %13114 = vmatprep.mubr.msk.bf16.mxu0 %vm2134_vm0, %v19080_v38  ;;  %v16416_v38 = vrot.slane %v5092_v63, 5  ;;  %v19089_v63 = vld [vmem:[#allocation46_spill] sm:$0xff] }
 0x23a   : > { %v5080_v45 = vrot.slane %v5078_v32, 5  ;;  %v5140_v43 = vshll.u32 %v19089_v63, 16  ;;  %v5144_v10 = vshrl.u32 %v19089_v63, 16  ;;  %v14091_v32 = vld [vmem:[#allocation2 + $0xc0] sm:$0xff]  }
 0x23b   : > { %v5099_v0 = vor.u32 %v5098_v24, %v16416_v38  ;;  %v5095_v27 = vsel %vm14684_vm15, %v16426_v26, %v16416_v38 }
 0x23c   : > { %v5081_v39 = vsel %vm14684_vm15, %v5076_v58, %v5080_v45  ;;  %v16455_v45 = vld [vmem:[#allocation2 + $0xd0] sm:$0xf] }
 0x23d   : > { %v16428_v30 = vrot.slane %v5099_v0, 4 }
 0x240   : > { %13115 = vmatmul.mubr.msk.bf16.gmra.mrb[28].mxu0 %vm2134_vm0, %v19082_v49  ;;  %v14088_v49 = vld [vmem:[#allocation2 + $0x9c] sm:$0xff]  }
 0x241   : > { %13120 = vmatprep.mubr.msk.bf16.mxu0 %vm2134_vm0, %v14077_v29  ;;  %v5065_v29 = vor.u32 %v5064_v35, %v5061_v55  ;;  %v14090_v55 = vld [vmem:[#allocation2 + $0xb4] sm:$0xff]  }
 0x248   : > { %13121 = vmatmul.mubr.msk.bf16.vlgmr.msra.gmra.mrb[0].mxu0 %vm2134_vm0, %v14078_v34  ;;  %v5109_v34 = vrot.slane %v5107_v7, 4 }
 0x249   : > { %13153 = vmatpush3.bf16.msra.mxu0 %v5541_v22  ;;  %13124 = vmatprep.mubr.msk.bf16.mxu0 %vm2134_vm0, %v14079_v28  ;;  %v5112_v22 = vrot.slane %v5110_v61, 5  ;;  %v19086_v28 = vld [vmem:[#allocation44_spill] sm:$0xff] }
 0x24a   : > { %14046 = vmatprep.subr.msk.bf16.mxu0 %vm2183_vm12, %v16387_v56  ;;  %v5025_v61 = vld [vmem:[#allocation2 + $0x54] sm:$0xf] }
 0x24b   : > { %v5113_v16 = vor.u32 %v5112_v22, %v5109_v34  ;;  %v16460_v34 = vrot.slane %v5140_v43, 5  ;;  %v5751_v22 = vld [vmem:[#allocation2 + $0xcc] sm:$0xe]  ;;  %v5179_v33 = vshrl.u32 %v5025_v61, 16 }
 0x250   : > { %13125 = vmatmul.mubr.msk.bf16.gmra.mrb[4].mxu0 %vm2134_vm0, %v14080_v11  ;;  %v5116_v11 = vshll.u32 %v19086_v28, 16 }
 0x251   : > { %13128 = vmatprep.mubr.msk.bf16.mxu0 %vm2134_vm0, %v14081_v23  ;;  %v5120_v23 = vshrl.u32 %v19086_v28, 16  ;;  %v5907_v28 = vrot.slane %v16455_v45, 5 }
 0x253   : > { %v5122_v6 = vrot.slane %v5120_v23, 4  ;;  %v5146_v23 = vrot.slane %v5144_v10, 4  ;;  %v5909_v52 = vrot.slane %v5907_v28, 4 }
 0x258   : > { %13129 = vmatmul.mubr.msk.bf16.gmra.mrb[8].mxu0 %vm2134_vm0, %v14082_v8  ;;  %v5066_v8 = vrot.slane %v5065_v29, 4 }
 0x259   : > { %13132 = vmatprep.mubr.msk.bf16.mxu0 %vm2134_vm0, %v14083_v59  ;;  %v19087_v59 = vld [vmem:[#allocation43_spill] sm:$0xff] }
 0x25a   : > { %v5071_v50 = vsel %vm14684_vm15, %v5066_v8, %v5070_v13  ;;  %v19090_v13 = vld [vmem:[#allocation47_spill] sm:$0xff]  ;;  %v5157_v8 = vrot.slane %v5155_v21, 4 }
 0x25b   : > { %v11999_v35 = vcombine.low %v5071_v50, %v5081_v39  ;;  %v5164_v24 = vshll.u32 %v19090_v13, 16  ;;  %v5168_v7 = vshrl.u32 %v19090_v13, 16  ;;  %v19091_v50 = vld [vmem:[#allocation50_spill] sm:$0xff] }
 0x25c   : > { %v5192_v63 = vshrl.u32 %v19091_v50, 16 }
 0x25d   : > { %v16464_v39 = vrot.slane %v5164_v24, 5 }
 0x260   : > { %13133 = vmatmul.mubr.msk.bf16.gmra.mrb[12].mxu0 %vm2134_vm0, %v14084_v47  ;;  %v5102_v47 = vshll.u32 %v19087_v59, 16  ;;  %v5160_v59 = vrot.slane %v5158_v46, 5 }
 0x261   : > { %13136 = vmatprep.mubr.msk.bf16.mxu0 %vm2134_vm0, %v14085_v19  ;;  %v5019_v19 = vld [vmem:[#allocation2 + $0x3c] sm:$0xf] }
 0x262   : > { %v16435_v2 = vrot.slane %v5102_v47, 5  ;;  %v5134_v5 = vshll.u32 %v5019_v19, 16  ;;  %v5028_v47 = vld [vmem:[#allocation2 + $0x60] sm:$0xf]  ;;  %v5161_v24 = vor.u32 %v5160_v59, %v5157_v8  ;;  %v19092_v59 = vmov 0 }
 0x263   : > { %v5203_v43 = vshrl.u32 %v5028_v47, 16  ;;  %v19093_v59 = vsel %vm16486_vm9, 4294967295, %v19092_v59 }
 0x264   : > { %v5105_v29 = vsel %vm14684_vm15, %v16428_v30, %v16435_v2  ;;  %v5136_v0 = vrot.slane %v5134_v5, 5  ;;  %v5170_v30 = vrot.slane %v5168_v7, 4  ;;  %v5188_v2 = vshll.u32 %v19091_v50, 16  ;;  %19094 = vst [vmem:[#allocation25_spill] sm:$0xff] %v19093_v59 }
 0x265   : > { %v5162_v38 = vrot.slane %v5161_v24, 4 }
 0x266   : > { %v5171_v7 = vor.u32 %v5170_v30, %v16464_v39  ;;  %v19095_v30 = vmov 0  }
 0x267   : > { %396 = vst.msk [vmem:[#allocation3] sm:$0xf] %vm395_vm3, %v19095_v30  ;;  %397 = vst.msk [vmem:[#allocation3 + $0x4] sm:$0xf] %vm395_vm3, %v19095_v30 }
 0x268   : > { %13137 = vmatmul.mubr.msk.bf16.gmra.mrb[16].mxu0 %vm2134_vm0, %v14086_v62  ;;  %v16431_v62 = vrot.slane %v5116_v11, 5  ;;  %v5910_v11 = vrot.slane %v16457_v12, 5  ;;  %399 = vst.msk [vmem:[#allocation3 + $0x8] sm:$0x1] %vm398_vm5, %v19095_v30  ;;  %403 = vst.msk [vmem:[#allocation3 + $0xd4] sm:$0x1] %vm398_vm5, %v19095_v30 }
 0x269   : > { %13140 = vmatprep.mubr.msk.bf16.mxu0 %vm2134_vm0, %v14087_v20  ;;  %v5131_v20 = vshrl.u32 %v5019_v19, 16  ;;  %v12046_v19 = vrot.slane %v5751_v22, 9  ;;  %401 = vst.msk [vmem:[#allocation3 + $0xcc] sm:$0xf] %vm395_vm3, %v19095_v30  ;;  %402 = vst.msk [vmem:[#allocation3 + $0xd0] sm:$0xf] %vm395_vm3, %v19095_v30 }
 0x26a   : > { %v16474_v10 = vsel %vm14934_vm1, %v5909_v52, %v5910_v11  ;;  %v5172_v26 = vrot.slane %v5171_v7, 4 }
 0x26b   : > { %v5133_v58 = vrot.slane %v5131_v20, 4  ;;  %v5182_v20 = vshll.u32 %v5025_v61, 16  ;;  %v16469_v5 = vsel %vm14934_vm1, %v12046_v19, %v5907_v28  ;;  %v14146_v61 = vld [vmem:[#allocation2 + $0x50] sm:$0x1]  ;;  %v5181_v28 = vrot.slane %v5179_v33, 4 }
 0x26c   : > { %v12063_v13 = vcombine.low %v16469_v5, %v16474_v10  ;;  %v5174_v22 = vshll.u32 %v14146_v61, 16  ;;  %v16481_v19 = vrot.slane %v5188_v2, 5  ;;  %v424_v5 = vld [vmem:[#allocation3 + $0x48] sm:$0x1] }
 0x26d   : > { %v5137_v46 = vor.u32 %v5136_v0, %v5133_v58  ;;  %v5194_v58 = vrot.slane %v5192_v63, 4  ;;  %v5205_v0 = vrot.slane %v5203_v43, 4  ;;  %v5031_v63 = vld [vmem:[#allocation2 + $0x6c] sm:$0xf] }
 0x270   : > { %13141 = vmatmul.mubr.msk.bf16.gmra.mrb[20].mxu0 %vm2134_vm0, %v14088_v49  ;;  %v16452_v49 = vrot.slane %v5113_v16, 4  ;;  %v14145_v16 = vld [vmem:[#allocation2 + $0x44] sm:$0x1] }
 0x271   : > { %13144 = vmatprep.mubr.msk.bf16.mxu0 %vm2134_vm0, %v14089_v53  ;;  %v5123_v53 = vor.u32 %v5122_v6, %v16431_v62  ;;  %v5150_v6 = vshll.u32 %v14145_v16, 16 }
 0x272   : > { %v5119_v33 = vsel %vm14684_vm15, %v16452_v49, %v16431_v62  ;;  %v5195_v62 = vor.u32 %v5194_v58, %v16481_v19 }
 0x273   : > { %v5124_v21 = vrot.slane %v5123_v53, 4  ;;  %v412_v53 = vld [vmem:[#allocation3 + $0x18] sm:$0x1]  ;;  %v5152_v2 = vrot.slane %v5150_v6, 5 }
 0x274   : > { %v5196_v58 = vrot.slane %v5195_v62, 4  ;;  %v14152_v62 = vld [vmem:[#allocation2 + $0x74] sm:$0x1] }
 0x275   : > { %v5129_v16 = vsel %vm14684_vm15, %v5124_v21, %v16443_v54  ;;  %v5227_v21 = vshrl.u32 %v5031_v63, 16 }
 0x276   : > { %v12001_v6 = vcombine.low %v5119_v33, %v5129_v16  ;;  %v5034_v16 = vld [vmem:[#allocation2 + $0x78] sm:$0xf] }
 0x278   : > { %13145 = vmatmul.mubr.msk.bf16.gmra.mrb[24].mxu0 %vm2134_vm0, %v14090_v55  ;;  %v5206_v55 = vshll.u32 %v5028_v47, 16  ;;  %v5184_v47 = vrot.slane %v5182_v20, 5  ;;  %v5138_v20 = vrot.slane %v5137_v46, 4  ;;  %v5230_v46 = vshll.u32 %v5031_v63, 16 }
 0x279   : > { %13148 = vmatprep.mubr.msk.bf16.mxu0 %vm2134_vm0, %v14091_v32  ;;  %v5147_v32 = vor.u32 %v5146_v23, %v16460_v34  ;;  %v14147_v23 = vld [vmem:[#allocation2 + $0x64] sm:$0xf] }
 0x27a   : > { %v5208_v11 = vrot.slane %v5206_v55, 5  ;;  %v5212_v8 = vshll.u32 %v14147_v23, 16  ;;  %v5216_v52 = vshrl.u32 %v14147_v23, 16  ;;  %v5185_v55 = vor.u32 %v5184_v47, %v5181_v28 }
 0x27b   : > { %v5148_v50 = vrot.slane %v5147_v32, 4  ;;  %v14149_v32 = vld [vmem:[#allocation2 + $0x70] sm:$0xf]  ;;  %v5143_v7 = vsel %vm14684_vm15, %v5138_v20, %v16460_v34  ;;  %v5167_v34 = vsel %vm14684_vm15, %v5162_v38, %v16464_v39  ;;  %v5232_v33 = vrot.slane %v5230_v46, 5  ;;  %v14151_v20 = vld [vmem:[#allocation2 + $0x7c] sm:$0xf] }
 0x27c   : > { %v5209_v49 = vor.u32 %v5208_v11, %v5205_v0  ;;  %v16517_v61 = vrot.slane %v5212_v8, 5  ;;  %v5218_v54 = vrot.slane %v5216_v52, 4  ;;  %v5236_v23 = vshll.u32 %v14149_v32, 16  ;;  %v14150_v11 = vld [vmem:[#allocation2 + $0x68] sm:$0x1] }
 0x27d   : > { %v5240_v24 = vshrl.u32 %v14149_v32, 16  ;;  %v16532_v47 = vrot.slane %v5185_v55, 4  ;;  %v5222_v8 = vshll.u32 %v14150_v11, 16 }
 0x27e   : > { %v5210_v0 = vrot.slane %v5209_v49, 4  ;;  %v5219_v30 = vor.u32 %v5218_v54, %v16517_v61  ;;  %v16538_v52 = vrot.slane %v5236_v23, 5  ;;  %v5246_v49 = vshll.u32 %v14152_v62, 16 }
 0x27f   : > { %v5254_v54 = vshll.u32 %v5034_v16, 16 }
 0x280   : > { %13149 = vmatmul.mubr.msk.bf16.gmra.mrb[28].mxu0 %vm2134_vm0, %v14092_v40  ;;  %v413_v40 = vsel %vm16486_vm9, 0, %v412_v53  ;;  %v6011_v53 = vsel %vm2183_vm12, %v16387_v56, 0  ;;  %v5215_v38 = vsel %vm14684_vm15, %v5210_v0, %v16517_v61  ;;  %v5220_v46 = vrot.slane %v5219_v30, 4  ;;  %vm19130_vm12 = vmmov %vm19126_vm2 }
 0x281   : > { %13154 = vmatprep.mubr.msk.bf16.mxu0 %vm2134_vm0, %v11999_v35  ;;  %v12000_v35 = vcombine.low %v5095_v27, %v5105_v29  ;;  %414 = vst [vmem:[#allocation3 + $0x18] sm:$0x1] %v413_v40  ;;  %v5176_v27 = vrot.slane %v5174_v22, 5  ;;  %v14148_v29 = vld [vmem:[#allocation2 + $0x5c] sm:$0x1]  ;;  %v5153_v22 = vsel %vm14684_vm15, %v5148_v50, %v5152_v2  ;;  %v5242_v40 = vrot.slane %v5240_v24, 4 }
 0x282   : > { %v5198_v43 = vshll.u32 %v14148_v29, 16  ;;  %v5260_v50 = vshll.u32 %v14151_v20, 16  ;;  %v5264_v2 = vshrl.u32 %v14151_v20, 16  ;;  %v12002_v63 = vcombine.low %v5143_v7, %v5153_v22  ;;  %v14153_v7 = vld [vmem:[#allocation2 + $0x88] sm:$0xf] }
 0x283   : > { %v5177_v28 = vsel %vm14684_vm15, %v5172_v26, %v5176_v27  ;;  %v5191_v27 = vsel %vm14684_vm15, %v16532_v47, %v16481_v19  ;;  %v5224_v29 = vrot.slane %v5222_v8, 5  ;;  %v5284_v61 = vshll.u32 %v14153_v7, 16  ;;  %v14154_v47 = vld [vmem:[#allocation2 + $0x94] sm:$0xf] }
 0x284   : > { %v16529_v56 = vrot.slane %v5198_v43, 5  ;;  %v12003_v26 = vcombine.low %v5167_v34, %v5177_v28  ;;  %v5037_v43 = vld [vmem:[#allocation2 + $0x84] sm:$0xf]  ;;  %v16551_v19 = vrot.slane %v5260_v50, 5  ;;  %v5266_v32 = vrot.slane %v5264_v2, 4 }
 0x285   : > { %v5275_v23 = vshrl.u32 %v5037_v43, 16  ;;  %v5278_v24 = vshll.u32 %v5037_v43, 16  ;;  %v5288_v22 = vshrl.u32 %v14153_v7, 16  ;;  %v5312_v0 = vshrl.u32 %v14154_v47, 16 }
 0x286   : > { %v5201_v39 = vsel %vm14684_vm15, %v5196_v58, %v16529_v56  ;;  %v5308_v58 = vshll.u32 %v14154_v47, 16  ;;  %v5248_v8 = vrot.slane %v5246_v49, 5  ;;  %v5256_v30 = vrot.slane %v5254_v54, 5  ;;  %v5043_v49 = vld [vmem:[#allocation2 + $0x9c] sm:$0xf] }
 0x287   : > { %v5277_v50 = vrot.slane %v5275_v23, 4  ;;  %v5280_v2 = vrot.slane %v5278_v24, 5  ;;  %v5326_v47 = vshll.u32 %v5043_v49, 16 }
 0x288   : > { %13155 = vmatmul.mubr.msk.bf16.vlgmr.msra.gmra.mrb[0].mxu0 %vm2134_vm0, %v12000_v35  ;;  %v5229_v35 = vrot.slane %v5227_v21, 4  ;;  %v5040_v21 = vld [vmem:[#allocation2 + $0x90] sm:$0xf] }
 0x289   : > { %13187 = vmatpush3.bf16.msra.mxu0 %v6011_v53  ;;  %13158 = vmatprep.mubr.msk.bf16.mxu0 %vm2134_vm0, %v12001_v6  ;;  %v5251_v53 = vshrl.u32 %v5034_v16, 16  ;;  %v5243_v6 = vor.u32 %v5242_v40, %v16538_v52  ;;  %v5299_v28 = vshrl.u32 %v5040_v21, 16  ;;  %v5302_v56 = vshll.u32 %v5040_v21, 16  ;;  %v14155_v16 = vld [vmem:[#allocation2 + $0x80] sm:$0x1] }
 0x28a   : > { %v5233_v55 = vor.u32 %v5232_v33, %v5229_v35  ;;  %v5225_v35 = vsel %vm14684_vm15, %v5220_v46, %v5224_v29  ;;  %v5267_v40 = vor.u32 %v5266_v32, %v16551_v19  ;;  %v5270_v20 = vshll.u32 %v14155_v16, 16  ;;  %v14156_v32 = vld [vmem:[#allocation2 + $0x8c] sm:$0x1] }
 0x28b   : > { %v5253_v34 = vrot.slane %v5251_v53, 4  ;;  %v5244_v33 = vrot.slane %v5243_v6, 4  ;;  %v5301_v43 = vrot.slane %v5299_v28, 4  ;;  %v5304_v62 = vrot.slane %v5302_v56, 5  ;;  %v14159_v16 = vld [vmem:[#allocation2 + $0xac] sm:$0xf] }
 0x28c   : > { %v5234_v11 = vrot.slane %v5233_v55, 4  ;;  %v16560_v21 = vrot.slane %v5308_v58, 5  ;;  %v5314_v55 = vrot.slane %v5312_v0, 4  ;;  %v12004_v53 = vcombine.low %v5191_v27, %v5201_v39 }
 0x28d   : > { %v12005_v54 = vcombine.low %v5215_v38, %v5225_v35  ;;  %v5257_v7 = vor.u32 %v5256_v30, %v5253_v34  ;;  %v5249_v29 = vsel %vm14684_vm15, %v5244_v33, %v5248_v8  ;;  %v5268_v46 = vrot.slane %v5267_v40, 4  ;;  %v14158_v8 = vld [vmem:[#allocation2 + $0xa0] sm:$0xf]  ;;  %v5046_v35 = vld [vmem:[#allocation2 + $0xa8] sm:$0xf] }
 0x28e   : > { %v5272_v6 = vrot.slane %v5270_v20, 5  ;;  %v5294_v23 = vshll.u32 %v14156_v32, 16  ;;  %v5281_v24 = vor.u32 %v5280_v2, %v5277_v50  ;;  %v5323_v56 = vshrl.u32 %v5043_v49, 16 }
 0x28f   : > { %v5239_v27 = vsel %vm14684_vm15, %v5234_v11, %v16538_v52  ;;  %v5305_v39 = vor.u32 %v5304_v62, %v5301_v43  ;;  %v5315_v38 = vor.u32 %v5314_v55, %v16560_v21  ;;  %v5258_v0 = vrot.slane %v5257_v7, 4 }
 0x290   : > { %13159 = vmatmul.mubr.msk.bf16.gmra.mrb[4].mxu0 %vm2134_vm0, %v12002_v63  ;;  %v16558_v63 = vrot.slane %v5284_v61, 5  ;;  %v12006_v58 = vcombine.low %v5239_v27, %v5249_v29  ;;  %v5332_v34 = vshll.u32 %v14158_v8, 16  ;;  %v5336_v30 = vshrl.u32 %v14158_v8, 16 }
 0x291   : > { %13162 = vmatprep.mubr.msk.bf16.mxu0 %vm2134_vm0, %v12003_v26  ;;  %v5290_v26 = vrot.slane %v5288_v22, 4  ;;  %v14157_v22 = vld [vmem:[#allocation2 + $0x98] sm:$0x1]  ;;  %v5273_v33 = vsel %vm14684_vm15, %v5268_v46, %v5272_v6  ;;  %v5296_v40 = vrot.slane %v5294_v23, 5  ;;  %v5356_v20 = vshll.u32 %v14159_v16, 16 }
 0x292   : > { %v5318_v28 = vshll.u32 %v14157_v22, 16  ;;  %v5360_v50 = vshrl.u32 %v14159_v16, 16  ;;  %v5282_v2 = vrot.slane %v5281_v24, 4  ;;  %v5325_v11 = vrot.slane %v5323_v56, 4  ;;  %v5049_v23 = vld [vmem:[#allocation2 + $0xb4] sm:$0xf] }
 0x293   : > { %v5291_v61 = vor.u32 %v5290_v26, %v16558_v63  ;;  %v5306_v43 = vrot.slane %v5305_v39, 4  ;;  %v5316_v62 = vrot.slane %v5315_v38, 4  ;;  %v5328_v55 = vrot.slane %v5326_v47, 5  ;;  %v14160_v22 = vld [vmem:[#allocation2 + $0xa4] sm:$0x1] }
 0x294   : > { %v5320_v52 = vrot.slane %v5318_v28, 5  ;;  %v5347_v49 = vshrl.u32 %v5046_v35, 16  ;;  %v5338_v7 = vrot.slane %v5336_v30, 4  ;;  %v5350_v29 = vshll.u32 %v5046_v35, 16  ;;  %v5052_v38 = vld [vmem:[#allocation2 + $0xc0] sm:$0xf] }
 0x295   : > { %v5292_v26 = vrot.slane %v5291_v61, 4  ;;  %v16578_v6 = vrot.slane %v5356_v20, 5  ;;  %v5362_v32 = vrot.slane %v5360_v50, 4  ;;  %v5287_v24 = vsel %vm14684_vm15, %v5282_v2, %v16558_v63  ;;  %v14162_v35 = vld [vmem:[#allocation2 + $0xb8] sm:$0xf] }
 0x296   : > { %v5311_v28 = vsel %vm14684_vm15, %v5306_v43, %v16560_v21  ;;  %v5321_v56 = vsel %vm14684_vm15, %v5316_v62, %v5320_v52  ;;  %v5329_v27 = vor.u32 %v5328_v55, %v5325_v11  ;;  %v5349_v39 = vrot.slane %v5347_v49, 4 }
 0x297   : > { %v5297_v61 = vsel %vm14684_vm15, %v5292_v26, %v5296_v40  ;;  %v5352_v63 = vrot.slane %v5350_v29, 5  ;;  %v5371_v8 = vshrl.u32 %v5049_v23, 16  ;;  %v5374_v30 = vshll.u32 %v5049_v23, 16 }
 0x298   : > { %13163 = vmatmul.mubr.msk.bf16.gmra.mrb[8].mxu0 %vm2134_vm0, %v12004_v53  ;;  %v5263_v53 = vsel %vm14684_vm15, %v5258_v0, %v16551_v19  ;;  %v5342_v19 = vshll.u32 %v14160_v22, 16  ;;  %v5384_v40 = vshrl.u32 %v14162_v35, 16  ;;  %v5395_v16 = vshrl.u32 %v5052_v38, 16 }
 0x299   : > { %13166 = vmatprep.mubr.msk.bf16.mxu0 %vm2134_vm0, %v12005_v54  ;;  %v16576_v54 = vrot.slane %v5332_v34, 5  ;;  %v12007_v46 = vcombine.low %v5263_v53, %v5273_v33  ;;  %v5363_v34 = vor.u32 %v5362_v32, %v16578_v6  ;;  %v5380_v33 = vshll.u32 %v14162_v35, 16  ;;  %v5055_v53 = vld [vmem:[#allocation2 + $0xcc] sm:$0xf] }
 0x29a   : > { %v5398_v21 = vshll.u32 %v5052_v38, 16  ;;  %v5404_v20 = vshll.u32 %v16377_v51, 16  ;;  %v5408_v50 = vshrl.u32 %v16377_v51, 16  ;;  %v12008_v2 = vcombine.low %v5287_v24, %v5297_v61 }
 0x29b   : > { %v5339_v47 = vor.u32 %v5338_v7, %v16576_v54  ;;  %v12009_v26 = vcombine.low %v5311_v28, %v5321_v56  ;;  %v5330_v52 = vrot.slane %v5329_v27, 4  ;;  %v5344_v11 = vrot.slane %v5342_v19, 5 }
 0x29c   : > { %v5353_v62 = vor.u32 %v5352_v63, %v5349_v39  ;;  %v5373_v49 = vrot.slane %v5371_v8, 4  ;;  %v5364_v7 = vrot.slane %v5363_v34, 4  ;;  %v5376_v29 = vrot.slane %v5374_v30, 5  ;;  %v14163_v63 = vld [vmem:[#allocation2 + $0xbc] sm:$0x1] }
 0x29d   : > { %v5340_v43 = vrot.slane %v5339_v47, 4  ;;  %v5386_v32 = vrot.slane %v5384_v40, 4  ;;  %v5397_v23 = vrot.slane %v5395_v16, 4  ;;  %v5400_v22 = vrot.slane %v5398_v21, 5 }
 0x29e   : > { %v5406_v38 = vrot.slane %v5404_v20, 5  ;;  %v5419_v51 = vshrl.u32 %v5055_v53, 16  ;;  %v5422_v24 = vshll.u32 %v5055_v53, 16  ;;  %v5428_v61 = vshll.u32 %v16455_v45, 16 }
 0x29f   : > { %v5432_v19 = vshrl.u32 %v16455_v45, 16  ;;  %v5335_v28 = vsel %vm14684_vm15, %v5330_v52, %v16576_v54  ;;  %v5354_v56 = vrot.slane %v5353_v62, 4  ;;  %v5345_v27 = vsel %vm14684_vm15, %v5340_v43, %v5344_v11 }
 0x2a0   : > { %13167 = vmatmul.mubr.msk.bf16.gmra.mrb[12].mxu0 %vm2134_vm0, %v12006_v58  ;;  %v14161_v58 = vld [vmem:[#allocation2 + $0xb0] sm:$0x1]  ;;  %v5377_v39 = vor.u32 %v5376_v29, %v5373_v49  ;;  %v5401_v34 = vor.u32 %v5400_v22, %v5397_v23  ;;  %v5414_v35 = vshll.u32 %v16379_v31, 16  ;;  %v5421_v45 = vrot.slane %v5419_v51, 4 }
 0x2a1   : > { %13170 = vmatprep.mubr.msk.bf16.mxu0 %vm2134_vm0, %v12007_v46  ;;  %v5366_v0 = vshll.u32 %v14161_v58, 16  ;;  %v5382_v46 = vrot.slane %v5380_v33, 5  ;;  %v5410_v58 = vrot.slane %v5408_v50, 4  ;;  %v5424_v33 = vrot.slane %v5422_v24, 5  ;;  %v19096_v24 = vld [vmem:[#allocation48_spill] sm:$0xff] }
 0x2a2   : > { %v5430_v40 = vrot.slane %v5428_v61, 5  ;;  %v5434_v16 = vrot.slane %v5432_v19, 4  ;;  %v12010_v54 = vcombine.low %v5335_v28, %v5345_v27  ;;  %v5359_v21 = vsel %vm14684_vm15, %v5354_v56, %v16578_v6  ;;  %v19099_v19 = vld [vmem:[#allocation51_spill] sm:$0xff]  ;;  %v19100_v28 = vld [vmem:[#allocation52_spill] sm:$0xff]  ;;  %v19102_v27 = vld [vmem:[#allocation53_spill] sm:$0xff] }
 0x2a3   : > { %v5368_v55 = vrot.slane %v5366_v0, 5  ;;  %v5387_v47 = vor.u32 %v5386_v32, %v5382_v46  ;;  %v5390_v0 = vshll.u32 %v14163_v63, 16  ;;  %v5411_v30 = vor.u32 %v5410_v58, %v5406_v38  ;;  %v19105_v63 = vld [vmem:[#allocation55_spill] sm:$0xff] }
 0x2a4   : > { %v5416_v11 = vrot.slane %v5414_v35, 5  ;;  %v5378_v31 = vrot.slane %v5377_v39, 4  ;;  %v5425_v43 = vor.u32 %v5424_v33, %v5421_v45  ;;  %v5435_v62 = vor.u32 %v5434_v16, %v5430_v40  ;;  %v19103_v39 = vld [vmem:[#allocation54_spill] sm:$0xff]  ;;  %v19111_v45 = vld [vmem:[#allocation57_spill] sm:$0xff]  ;;  %v19112_v33 = vld [vmem:[#allocation60_spill] sm:$0xff] }
 0x2a5   : > { %v5369_v8 = vsel %vm14684_vm15, %v5364_v7, %v5368_v55  ;;  %v5388_v50 = vrot.slane %v5387_v47, 4  ;;  %v5412_v52 = vrot.slane %v5411_v30, 4  ;;  %v5438_v55 = vshll.u32 %v16457_v12, 16  ;;  %v19109_v30 = vld [vmem:[#allocation59_spill] sm:$0xff]  ;;  %v19114_v16 = vld [vmem:[#allocation62_spill] sm:$0xff] }
 0x2a6   : > { %v12011_v20 = vcombine.low %v5359_v21, %v5369_v8  ;;  %v5383_v7 = vsel %vm14684_vm15, %v5378_v31, %v5382_v46  ;;  %v5426_v29 = vrot.slane %v5425_v43, 4  ;;  %v5436_v32 = vrot.slane %v5435_v62, 4  ;;  %v19097_v46 = vld [vmem:[#allocation49_spill] sm:$0xff]  ;;  %v421_v62 = vld [vmem:[#allocation3 + $0x3c] sm:$0x1] }
 0x2a7   : > { %v5417_v53 = vsel %vm14684_vm15, %v5412_v52, %v5416_v11  ;;  %v5440_v23 = vrot.slane %v5438_v55, 5  ;;  %v19098_v61 = vcombine.low %v19096_v24, %v19097_v46  ;;  %v19101_v56 = vcombine.low %v19099_v19, %v19100_v28  ;;  %v19121_v52 = vld [vmem:[#allocation68_spill] sm:$0xff]  ;;  %v19123_v31 = vld [vmem:[#allocation69_spill] sm:$0xff]  ;;  %v433_v19 = vld [vmem:[#allocation3 + $0x6c] sm:$0x1] }
 0x2a8   : > { %13171 = vmatmul.mubr.msk.bf16.gmra.mrb[16].mxu0 %vm2134_vm0, %v12008_v2  ;;  %v5392_v2 = vrot.slane %v5390_v0, 5  ;;  %v5431_v12 = vsel %vm14684_vm15, %v5426_v29, %v5430_v40  ;;  %v19104_v47 = vcombine.low %v19102_v27, %v19103_v39  ;;  %v19106_v0 = vld [vmem:[#allocation58_spill] sm:$0xff]  ;;  %v19113_v40 = vcombine.low %v19111_v45, %v19112_v33  ;;  %v430_v29 = vld [vmem:[#allocation3 + $0x60] sm:$0x1]  ;;  %v436_v24 = vld [vmem:[#allocation3 + $0x78] sm:$0x1] }
 0x2a9   : > { %13174 = vmatprep.mubr.msk.bf16.mxu0 %vm2134_vm0, %v12009_v26  ;;  %v5402_v26 = vrot.slane %v5401_v34, 4  ;;  %v19107_v8 = vcombine.low %v19105_v63, %v19106_v0  ;;  %v19108_v34 = vld [vmem:[#allocation56_spill] sm:$0xff]  ;;  %v19124_v43 = vcombine.low %v16071_v1, %v19123_v31  ;;  %v19125_v1 = vcombine.low %v16140_v57, %v16144_v14  ;;  %v415_v57 = vld [vmem:[#allocation3 + $0x24] sm:$0x1]  ;;  %v491_v28 = vld [vmem:[#allocation3 + $0x80] sm:$0x1] }
 0x2aa   : > { %v5393_v49 = vsel %vm14684_vm15, %v5388_v50, %v5392_v2  ;;  %v19110_v35 = vcombine.low %v19108_v34, %v19109_v30  ;;  %v19118_v50 = vld [vmem:[#allocation67_spill] sm:$0xff]  ;;  %v416_v14 = vsel %vm16486_vm9, 0, %v415_v57  ;;  %v422_v55 = vsel %vm16486_vm9, 0, %v421_v62  ;;  %v461_v63 = vld [vmem:[#allocation3 + $0x8] sm:$0x1] }
 0x2ab   : > { %v5407_v6 = vsel %vm14684_vm15, %v5402_v26, %v5406_v38  ;;  %v12012_v22 = vcombine.low %v5383_v7, %v5393_v49  ;;  %v5441_v38 = vsel %vm14684_vm15, %v5436_v32, %v5440_v23  ;;  %v19120_v26 = vld [vmem:[#allocation66_spill] sm:$0xff]  ;;  %417 = vst [vmem:[#allocation3 + $0x24] sm:$0x1] %v416_v14  ;;  %v479_v49 = vld [vmem:[#allocation3 + $0x50] sm:$0x1]  ;;  %v431_v32 = vsel %vm16486_vm9, 0, %v430_v29 }
 0x2ac   : > { %v12013_v58 = vcombine.low %v5407_v6, %v5417_v53  ;;  %v12014_v51 = vcombine.low %v5431_v12, %v5441_v38  ;;  %v19122_v11 = vcombine.low %v19120_v26, %v19121_v52  ;;  %423 = vst [vmem:[#allocation3 + $0x3c] sm:$0x1] %v422_v55  ;;  %v480_v6 = vsel %vm16697_vm10, 0, %v479_v49  ;;  %v476_v53 = vld [vmem:[#allocation3 + $0x44] sm:$0x1]  ;;  %v16747_v33 = vld [vmem:[%s18688_s4] sm:$0xff]  }
 0x2ad   : > { %481 = vst [vmem:[#allocation3 + $0x50] sm:$0x1] %v480_v6  ;;  %v477_v7 = vsel %vm16697_vm10, 0, %v476_v53  ;;  %432 = vst [vmem:[#allocation3 + $0x60] sm:$0x1] %v431_v32  ;;  %v492_v27 = vsel %vm16697_vm10, 0, %v491_v28 }
 0x2ae   : > { %478 = vst [vmem:[#allocation3 + $0x44] sm:$0x1] %v477_v7  ;;  %v427_v23 = vld [vmem:[#allocation3 + $0x54] sm:$0x1]  ;;  %v482_v38 = vld [vmem:[#allocation3 + $0x5c] sm:$0x1] }
 0x2af   : > { %v483_v46 = vsel %vm16697_vm10, 0, %v482_v38  ;;  %493 = vst [vmem:[#allocation3 + $0x80] sm:$0x1] %v492_v27  ;;  %v488_v39 = vld [vmem:[#allocation3 + $0x74] sm:$0x1]  ;;  %v462_v34 = vsel %vm16697_vm10, 0, %v461_v63 }
 0x2b0   : > { %13175 = vmatmul.mubr.msk.bf16.gmra.mrb[20].mxu0 %vm2134_vm0, %v12010_v54  ;;  %v19115_v54 = vld [vmem:[#allocation64_spill] sm:$0xff]  ;;  %484 = vst [vmem:[#allocation3 + $0x5c] sm:$0x1] %v483_v46  ;;  %v489_v0 = vsel %vm16697_vm10, 0, %v488_v39  ;;  %v6809_v30 = vld [vmem:[#allocation3 + $0x4] sm:$0xf] }
 0x2b1   : > { %13178 = vmatprep.mubr.msk.bf16.mxu0 %vm2134_vm0, %v12011_v20  ;;  %v19116_v21 = vcombine.low %v19114_v16, %v19115_v54  ;;  %v19117_v20 = vld [vmem:[#allocation65_spill] sm:$0xff]  ;;  %490 = vst [vmem:[#allocation3 + $0x74] sm:$0x1] %v489_v0  ;;  %463 = vst [vmem:[#allocation3 + $0x8] sm:$0x1] %v462_v34  ;;  %v6872_v45 = vshrl.u32 %v6809_v30, 16 }
 0x2b2   : > { %v19119_v2 = vcombine.low %v19117_v20, %v19118_v50  ;;  %v503_v62 = vld [vmem:[#allocation3 + $0xb0] sm:$0x1]  ;;  %v500_v49 = vld [vmem:[#allocation3 + $0xa4] sm:$0x1]  ;;  %v454_v53 = vld [vmem:[#allocation3 + $0xc0] sm:$0x1] }
 0x2b3   : > { %v6874_v16 = vrot.slane %v6872_v45, 4  ;;  %v504_v55 = vsel %vm16697_vm10, 0, %v503_v62  ;;  %v501_v6 = vsel %vm16697_vm10, 0, %v500_v49  ;;  %v455_v7 = vsel %vm16486_vm9, 0, %v454_v53  ;;  %v451_v29 = vld [vmem:[#allocation3 + $0xb4] sm:$0x1] }
 0x2b4   : > { %505 = vst [vmem:[#allocation3 + $0xb0] sm:$0x1] %v504_v55  ;;  %502 = vst [vmem:[#allocation3 + $0xa4] sm:$0x1] %v501_v6  ;;  %v452_v32 = vsel %vm16486_vm9, 0, %v451_v29 }
 0x2b5   : > { %456 = vst [vmem:[#allocation3 + $0xc0] sm:$0x1] %v455_v7  ;;  %453 = vst [vmem:[#allocation3 + $0xb4] sm:$0x1] %v452_v32  ;;  %v16782_v38 = vld [vmem:[%s18687_s3] ss:$0 sm:$0xff] }
 0x2b8   : > { %13179 = vmatmul.mubr.msk.bf16.gmra.mrb[24].mxu0 %vm2134_vm0, %v12012_v22  ;;  %v485_v22 = vld [vmem:[#allocation3 + $0x68] sm:$0x1] }
 0x2b9   : > { %13182 = vmatprep.mubr.msk.bf16.mxu0 %vm2134_vm0, %v12013_v58  ;;  %v428_v58 = vsel %vm16486_vm9, 0, %v427_v23  ;;  %v486_v12 = vsel %vm16697_vm10, 0, %v485_v22  ;;  %v6842_v20 = vld [vmem:[#allocation3 + $0x8] sm:$0x1] }
 0x2ba   : > { %429 = vst [vmem:[#allocation3 + $0x54] sm:$0x1] %v428_v58  ;;  %487 = vst [vmem:[#allocation3 + $0x68] sm:$0x1] %v486_v12  ;;  %v6878_v26 = vshll.u32 %v6842_v20, 16 }
 0x2bb   : > { %v509_v23 = vld [vmem:[#allocation3 + $0xc8] sm:$0x1]  ;;  %v506_v58 = vld [vmem:[#allocation3 + $0xbc] sm:$0x1] }
 0x2bc   : > { %v510_v22 = vsel %vm16697_vm10, 0, %v509_v23  ;;  %v507_v12 = vsel %vm16697_vm10, 0, %v506_v58 }
 0x2bd   : > { %511 = vst [vmem:[#allocation3 + $0xc8] sm:$0x1] %v510_v22  ;;  %508 = vst [vmem:[#allocation3 + $0xbc] sm:$0x1] %v507_v12 }
 0x2c0   : > { %13183 = vmatmul.mubr.msk.bf16.gmra.mrb[28].mxu0 %vm2134_vm0, %v12014_v51  ;;  %v14093_v51 = vld [vmem:[%s18688_s4 + $0x8] sm:$0xff]  }
 0x2c1   : > { %13188 = vmatprep.mubr.msk.bf16.mxu0 %vm2134_vm0, %v19098_v61  ;;  %v437_v61 = vsel %vm16486_vm9, 0, %v436_v24  ;;  %13220 = vmatprep.subr.bf16.mxu1 %v14093_v51 }
 0x2c2   : > { %438 = vst [vmem:[#allocation3 + $0x78] sm:$0x1] %v437_v61  ;;  %13221 = vmatpush3.bf16.msra.mxu1 %v14093_v51 }
 0x2c3   : > { %13254 = vmatprep.subr.bf16.mxu1 %v16747_v33 }
 0x2c8   : > { %13189 = vmatmul.mubr.msk.bf16.vlgmr.msra.gmra.mrb[0].mxu0 %vm2134_vm0, %v19101_v56  ;;  %v434_v56 = vsel %vm16486_vm9, 0, %v433_v19 }
 0x2c9   : > { %13192 = vmatprep.mubr.msk.bf16.mxu0 %vm2134_vm0, %v19104_v47  ;;  %435 = vst [vmem:[#allocation3 + $0x6c] sm:$0x1] %v434_v56  ;;  %v406_v47 = vld [vmem:[#allocation3] sm:$0x1] }
 0x2d0   : > { %13193 = vmatmul.mubr.msk.bf16.gmra.mrb[4].mxu0 %vm2134_vm0, %v19107_v8  ;;  %v407_v8 = vsel %vm16486_vm9, 0, %v406_v47 }
 0x2d1   : > { %13196 = vmatprep.mubr.msk.bf16.mxu0 %vm2134_vm0, %v19110_v35  ;;  %408 = vst [vmem:[#allocation3] sm:$0x1] %v407_v8  ;;  %v6868_v35 = vshll.u32 %v6809_v30, 16 }
 0x2d8   : > { %13197 = vmatmul.mubr.msk.bf16.gmra.mrb[8].mxu0 %vm2134_vm0, %v19113_v40  ;;  %v6870_v40 = vrot.slane %v6868_v35, 5 }
 0x2d9   : > { %13200 = vmatprep.mubr.msk.bf16.mxu0 %vm2134_vm0, %v19116_v21  ;;  %v6808_v21 = vld [vmem:[#allocation3] sm:$0xf] }
 0x2da   : > { %v6875_v54 = vor.u32 %v6874_v16, %v6870_v40  ;;  %v6859_v50 = vshrl.u32 %v6808_v21, 16 }
 0x2dc   : > { %v6876_v52 = vrot.slane %v6875_v54, 4  ;;  %v6861_v31 = vrot.slane %v6859_v50, 4 }
 0x2e0   : > { %13201 = vmatmul.mubr.msk.bf16.gmra.mrb[12].mxu0 %vm2134_vm0, %v19119_v2  ;;  %v6862_v2 = vshll.u32 %v6808_v21, 16 }
 0x2e1   : > { %13204 = vmatprep.mubr.msk.bf16.mxu0 %vm2134_vm0, %v19122_v11  ;;  %v442_v11 = vld [vmem:[#allocation3 + $0x90] sm:$0x1] }
 0x2e2   : > { %v443_v37 = vsel %vm16486_vm9, 0, %v442_v11 }
 0x2e3   : > { %444 = vst [vmem:[#allocation3 + $0x90] sm:$0x1] %v443_v37 }
 0x2e8   : > { %13205 = vmatmul.mubr.msk.bf16.gmra.mrb[16].mxu0 %vm2134_vm0, %v19124_v43  ;;  %v6864_v43 = vrot.slane %v6862_v2, 5 }
 0x2e9   : > { %13208 = vmatprep.mubr.msk.bf16.mxu0 %vm2134_vm0, %v12058_v42  ;;  %v19127_v42 = vmov 0 }
 0x2ea   : > { %v19128_v42 = vsel %vm16697_vm10, 4294967295, %v19127_v42  ;;  %v6865_v60 = vor.u32 %v6864_v43, %v6861_v31  ;;  %v6703_v31 = vld [vmem:[#allocation3 + $0x18] sm:$0xf] }
 0x2eb   : > { %19129 = vst [vmem:[#allocation17_spill] sm:$0xff] %v19128_v42 }
 0x2f0   : > { %13209 = vmatmul.mubr.msk.bf16.gmra.mrb[20].mxu0 %vm2134_vm0, %v12059_v17  ;;  %v464_v17 = vld [vmem:[#allocation3 + $0x14] sm:$0x1] }
 0x2f1   : > { %13212 = vmatprep.mubr.msk.bf16.mxu0 %vm2134_vm0, %v12060_v15  ;;  %v465_v9 = vsel %vm16697_vm10, 0, %v464_v17  ;;  %v419_v15 = vsel %vm16486_vm9, 0, %v418_v36  ;;  %v440_v17 = vsel %vm16486_vm9, 0, %v439_v48  ;;  %v494_v36 = vld [vmem:[#allocation3 + $0x8c] sm:$0x1] }
 0x2f2   : > { %466 = vst [vmem:[#allocation3 + $0x14] sm:$0x1] %v465_v9  ;;  %420 = vst [vmem:[#allocation3 + $0x30] sm:$0x1] %v419_v15  ;;  %v498_v9 = vsel %vm16697_vm10, 0, %v497_v18  ;;  %v6866_v15 = vrot.slane %v6865_v60, 4 }
 0x2f3   : > { %441 = vst [vmem:[#allocation3 + $0x84] sm:$0x1] %v440_v17  ;;  %499 = vst [vmem:[#allocation3 + $0x98] sm:$0x1] %v498_v9  ;;  %v495_v14 = vsel %vm16697_vm10, 0, %v494_v36 }
 0x2f4   : > { %496 = vst [vmem:[#allocation3 + $0x8c] sm:$0x1] %v495_v14  ;;  %v6871_v25 = vsel %vm14684_vm15, %v6866_v15, %v6870_v40  ;;  %v6696_v9 = vld [vmem:[#allocation3 + $0xc] sm:$0xf] }
 0x2f8   : > { %13213 = vmatmul.mubr.msk.bf16.gmra.mrb[24].mxu0 %vm2134_vm0, %v19125_v1  ;;  %v6880_v1 = vrot.slane %v6878_v26, 5 }
 0x2f9   : > { %13216 = vmatprep.mubr.msk.bf16.mxu0 %vm2134_vm0, %v12062_v41  ;;  %v470_v41 = vld [vmem:[#allocation3 + $0x2c] sm:$0x1]  ;;  %v6700_v55 = vld [vmem:[#allocation3 + $0x14] sm:$0x1] }
 0x2fa   : > { %v471_v10 = vsel %vm16697_vm10, 0, %v470_v41  ;;  %v6881_v57 = vsel %vm14684_vm15, %v6876_v52, %v6880_v1  ;;  %v448_v41 = vld [vmem:[#allocation3 + $0xa8] sm:$0x1] }
 0x2fb   : > { %472 = vst [vmem:[#allocation3 + $0x2c] sm:$0x1] %v471_v10  ;;  %v12115_v3 = vcombine.low %v6871_v25, %v6881_v57  ;;  %v445_v10 = vld [vmem:[#allocation3 + $0x9c] sm:$0x1] }
 0x2fd   : > { %13222 = vmatprep.mubr.msk.bf16.mxu1 %vm7299_vm11, %v12115_v3  ;;  %v6707_v3 = vld [vmem:[#allocation3 + $0x20] sm:$0x1] }
 0x300   : > { %13217 = vmatmul.mubr.msk.bf16.gmra.mrb[28].mxu0 %vm2134_vm0, %v12063_v13  ;;  %v425_v13 = vsel %vm16486_vm9, 0, %v424_v5  ;;  %v449_v5 = vsel %vm16486_vm9, 0, %v448_v41  ;;  %vm16791_vm0 = vmand %vm395_vm3, %vm19130_vm12 }
 0x301   : > { %426 = vst [vmem:[#allocation3 + $0x48] sm:$0x1] %v425_v13  ;;  %450 = vst [vmem:[#allocation3 + $0xa8] sm:$0x1] %v449_v5  ;;  %v446_v13 = vsel %vm16486_vm9, 0, %v445_v10 }
 0x302   : > { %447 = vst [vmem:[#allocation3 + $0x9c] sm:$0x1] %v446_v13 }
 0x39b   : > { %v13190_v51 = vpop.f32.mrb[0].mxu0 }
 0x39c   : > { %v6215_v24 = vadd.f32 %v13190_v51, %v16782_v38  ;;  %v6047_v46 = vpop.f32.mrb[1].mxu0 }
 0x39d   : > { %v6213_v61 = vadd.f32 %v16782_v38, %v6047_v46  ;;  %v13191_v19 = vpop.f32.mrb[2].mxu0 }
 0x39e   : > { %v6247_v28 = vmax.f32 %v6215_v24, 0.0  ;;  %v6216_v56 = vadd.f32 %v13191_v19, %v16782_v38  ;;  %v6050_v27 = vpop.f32.mrb[3].mxu0 }
 0x39f   : > { %v6245_v39 = vmax.f32 %v6213_v61, 0.0  ;;  %v6214_v47 = vadd.f32 %v16782_v38, %v6050_v27 }
 0x3a0   : > { %v12546_v63 = vpack.c.bf16 %v6247_v28, %v6247_v28  ;;  %v6248_v0 = vmax.f32 %v6216_v56, 0.0 }
 0x3a1   : > { %v12544_v8 = vpack.c.bf16 %v6245_v39, %v6245_v39  ;;  %v6246_v34 = vmax.f32 %v6214_v47, 0.0  ;;  %v6717_v47 = vld [vmem:[#allocation3 + $0x30] sm:$0xf] }
 0x3a2   : > { %v6391_v30 = vshrl.u32 %v12546_v63, 16  ;;  %v12547_v35 = vpack.c.bf16 %v6248_v0, %v6248_v0  ;;  %v6394_v45 = vshll.u32 %v12546_v63, 16 }
 0x3a3   : > { %v6374_v40 = vshrl.u32 %v12544_v8, 16  ;;  %v6377_v16 = vshll.u32 %v12544_v8, 16  ;;  %v12545_v54 = vpack.c.bf16 %v6246_v34, %v6246_v34  ;;  %v13194_v21 = vpop.f32.mrb[4].mxu0 }
 0x3a4   : > { %v6393_v20 = vrot.slane %v6391_v30, 7  ;;  %v6399_v50 = vshrl.u32 %v12547_v35, 16  ;;  %v6402_v2 = vshll.u32 %v12547_v35, 16  ;;  %v6219_v26 = vadd.f32 %v13194_v21, %v16782_v38  ;;  %v6063_v52 = vpop.f32.mrb[5].mxu0 }
 0x3a5   : > { %v6376_v43 = vrot.slane %v6374_v40, 7  ;;  %v6382_v1 = vshrl.u32 %v12545_v54, 16  ;;  %v6385_v37 = vshll.u32 %v12545_v54, 16  ;;  %v6217_v60 = vadd.f32 %v16782_v38, %v6063_v52  ;;  %v13195_v48 = vpop.f32.mrb[6].mxu0 }
 0x3a6   : > { %v6396_v18 = vor.u32 %v6394_v45, %v6393_v20  ;;  %v6397_v17 = vrot.slane %v6393_v20, 4  ;;  %v6401_v36 = vrot.slane %v6399_v50, 7  ;;  %v6251_v15 = vmax.f32 %v6219_v26, 0.0  ;;  %v6066_v57 = vpop.f32.mrb[7].mxu0  ;;  %v6710_v45 = vld [vmem:[#allocation3 + $0x24] sm:$0xf] }
 0x3a7   : > { %v6379_v14 = vor.u32 %v6377_v16, %v6376_v43  ;;  %v6380_v25 = vrot.slane %v6376_v43, 4  ;;  %v6384_v41 = vrot.slane %v6382_v1, 7  ;;  %v6249_v5 = vmax.f32 %v6217_v60, 0.0 }
 0x3a8   : > { %v6704_v10 = vsel %vm16791_vm0, %v6396_v18, %v6703_v31  ;;  %v6404_v13 = vor.u32 %v6402_v2, %v6401_v36  ;;  %v6406_v62 = vrot.slane %v6401_v36, 4  ;;  %v12550_v49 = vpack.c.bf16 %v6251_v15, %v6251_v15  ;;  %v6721_v15 = vld [vmem:[#allocation3 + $0x38] sm:$0x1] }
 0x3a9   : > { %6705 = vst [vmem:[#allocation3 + $0x18] sm:$0xf] %v6704_v10  ;;  %v6697_v6 = vsel %vm16791_vm0, %v6379_v14, %v6696_v9  ;;  %v6387_v53 = vor.u32 %v6385_v37, %v6384_v41  ;;  %v6389_v7 = vrot.slane %v6384_v41, 4  ;;  %v12548_v29 = vpack.c.bf16 %v6249_v5, %v6249_v5 }
 0x3aa   : > { %6698 = vst [vmem:[#allocation3 + $0xc] sm:$0xf] %v6697_v6  ;;  %v6405_v23 = vsel %vm14293_vm7, %v6397_v17, %v6404_v13  ;;  %v6708_v22 = vsel %vm16486_vm9, %v6406_v62, %v6707_v3  ;;  %v6425_v58 = vshrl.u32 %v12550_v49, 16  ;;  %v6428_v24 = vshll.u32 %v12550_v49, 16 }
 0x3ab   : > { %6706 = vst.msk [vmem:[#allocation3 + $0x1c] sm:$0xf] %vm395_vm3, %v6405_v23  ;;  %6709 = vst [vmem:[#allocation3 + $0x20] sm:$0x1] %v6708_v22  ;;  %v6388_v12 = vsel %vm14293_vm7, %v6380_v25, %v6387_v53  ;;  %v6701_v51 = vsel %vm16486_vm9, %v6389_v7, %v6700_v55  ;;  %v6408_v46 = vshrl.u32 %v12548_v29, 16  ;;  %v13198_v61 = vpop.f32.mrb[8].mxu0  ;;  %v6220_v28 = vadd.f32 %v13195_v48, %v16782_v38 }
 0x3ac   : > { %6699 = vst.msk [vmem:[#allocation3 + $0x10] sm:$0xf] %vm395_vm3, %v6388_v12  ;;  %6702 = vst [vmem:[#allocation3 + $0x14] sm:$0x1] %v6701_v51  ;;  %v16810_v19 = vrot.slane %v6425_v58, 7  ;;  %v6218_v56 = vadd.f32 %v16782_v38, %v6066_v57  ;;  %v6223_v27 = vadd.f32 %v13198_v61, %v16782_v38  ;;  %v6079_v39 = vpop.f32.mrb[9].mxu0 }
 0x3ad   : > { %v6410_v63 = vrot.slane %v6408_v46, 7  ;;  %v6411_v0 = vshll.u32 %v12548_v29, 16  ;;  %v6221_v8 = vadd.f32 %v16782_v38, %v6079_v39  ;;  %v13199_v34 = vpop.f32.mrb[10].mxu0  ;;  %v6252_v40 = vmax.f32 %v6220_v28, 0.0  ;;  %v6714_v57 = vld [vmem:[#allocation3 + $0x2c] sm:$0x1] }
 0x3ae   : > { %v6430_v30 = vor.u32 %v6428_v24, %v16810_v19  ;;  %v6431_v35 = vrot.slane %v16810_v19, 4  ;;  %v6250_v16 = vmax.f32 %v6218_v56, 0.0  ;;  %v6082_v54 = vpop.f32.mrb[11].mxu0  ;;  %v6255_v50 = vmax.f32 %v6223_v27, 0.0  ;;  %v6731_v53 = vld [vmem:[#allocation3 + $0x48] sm:$0xf] }
 0x3af   : > { %v6413_v21 = vor.u32 %v6411_v0, %v6410_v63  ;;  %v6414_v20 = vrot.slane %v6410_v63, 4  ;;  %v6253_v2 = vmax.f32 %v6221_v8, 0.0  ;;  %v12551_v52 = vpack.c.bf16 %v6252_v40, %v6252_v40  ;;  %v6724_v46 = vld [vmem:[#allocation3 + $0x3c] sm:$0xf] }
 0x3b0   : > { %v6718_v26 = vsel %vm16791_vm0, %v6430_v30, %v6717_v47  ;;  %v12549_v31 = vpack.c.bf16 %v6250_v16, %v6250_v16  ;;  %v6224_v43 = vadd.f32 %v13199_v34, %v16782_v38  ;;  %v12554_v37 = vpack.c.bf16 %v6255_v50, %v6255_v50 }
 0x3b1   : > { %6719 = vst [vmem:[#allocation3 + $0x30] sm:$0xf] %v6718_v26  ;;  %v6711_v1 = vsel %vm16791_vm0, %v6413_v21, %v6710_v45  ;;  %v12552_v60 = vpack.c.bf16 %v6253_v2, %v6253_v2  ;;  %v6222_v48 = vadd.f32 %v16782_v38, %v6082_v54  ;;  %v6433_v18 = vshrl.u32 %v12551_v52, 16 }
 0x3b2   : > { %6712 = vst [vmem:[#allocation3 + $0x24] sm:$0xf] %v6711_v1  ;;  %v6436_v17 = vshll.u32 %v12551_v52, 16  ;;  %v6416_v9 = vshrl.u32 %v12549_v31, 16  ;;  %v6419_v36 = vshll.u32 %v12549_v31, 16  ;;  %v6459_v14 = vshrl.u32 %v12554_v37, 16 }
 0x3b3   : > { %v6462_v25 = vshll.u32 %v12554_v37, 16  ;;  %v6442_v3 = vshrl.u32 %v12552_v60, 16  ;;  %v6445_v41 = vshll.u32 %v12552_v60, 16  ;;  %v13202_v5 = vpop.f32.mrb[12].mxu0  ;;  %v6435_v10 = vrot.slane %v6433_v18, 7 }
 0x3b4   : > { %v6418_v13 = vrot.slane %v6416_v9, 7  ;;  %v6256_v62 = vmax.f32 %v6224_v43, 0.0  ;;  %v6254_v55 = vmax.f32 %v6222_v48, 0.0  ;;  %v6095_v49 = vpop.f32.mrb[13].mxu0  ;;  %v16824_v6 = vrot.slane %v6459_v14, 7 }
 0x3b5   : > { %v16826_v7 = vrot.slane %v6442_v3, 7  ;;  %v6227_v29 = vadd.f32 %v13202_v5, %v16782_v38  ;;  %v6225_v23 = vadd.f32 %v16782_v38, %v6095_v49  ;;  %v13203_v22 = vpop.f32.mrb[14].mxu0  ;;  %v6438_v58 = vor.u32 %v6436_v17, %v6435_v10  ;;  %v6735_v52 = vld [vmem:[#allocation3 + $0x50] sm:$0x1]  ;;  %v6728_v17 = vld [vmem:[#allocation3 + $0x44] sm:$0x1] }
 0x3b6   : > { %v6440_v12 = vrot.slane %v6435_v10, 4  ;;  %v6421_v51 = vor.u32 %v6419_v36, %v6418_v13  ;;  %v6423_v24 = vrot.slane %v6418_v13, 4  ;;  %v6098_v61 = vpop.f32.mrb[15].mxu0  ;;  %v6464_v19 = vor.u32 %v6462_v25, %v16824_v6 }
 0x3b7   : > { %v6465_v28 = vrot.slane %v16824_v6, 4  ;;  %v6447_v56 = vor.u32 %v6445_v41, %v16826_v7  ;;  %v6448_v27 = vrot.slane %v16826_v7, 4  ;;  %v6439_v39 = vsel %vm14293_vm7, %v6431_v35, %v6438_v58  ;;  %v6745_v58 = vld [vmem:[#allocation3 + $0x60] sm:$0xf] }
 0x3b8   : > { %v6722_v47 = vsel %vm16486_vm9, %v6440_v12, %v6721_v15  ;;  %v6422_v63 = vsel %vm14293_vm7, %v6414_v20, %v6421_v51  ;;  %v6715_v0 = vsel %vm16486_vm9, %v6423_v24, %v6714_v57  ;;  %6720 = vst.msk [vmem:[#allocation3 + $0x34] sm:$0xf] %vm395_vm3, %v6439_v39  ;;  %v6732_v8 = vsel %vm16791_vm0, %v6464_v19, %v6731_v53  ;;  %v6738_v12 = vld [vmem:[#allocation3 + $0x54] sm:$0xf]  ;;  %v6810_v19 = vld [vmem:[#allocation3 + $0xc] sm:$0xf] }
 0x3b9   : > { %6723 = vst [vmem:[#allocation3 + $0x38] sm:$0x1] %v6722_v47  ;;  %6713 = vst.msk [vmem:[#allocation3 + $0x28] sm:$0xf] %vm395_vm3, %v6422_v63  ;;  %v6725_v34 = vsel %vm16791_vm0, %v6447_v56, %v6724_v46  ;;  %v12555_v30 = vpack.c.bf16 %v6256_v62, %v6256_v62  ;;  %v12553_v35 = vpack.c.bf16 %v6254_v55, %v6254_v55  ;;  %v6259_v45 = vmax.f32 %v6227_v29, 0.0 }
 0x3ba   : > { %6716 = vst [vmem:[#allocation3 + $0x2c] sm:$0x1] %v6715_v0  ;;  %6733 = vst [vmem:[#allocation3 + $0x48] sm:$0xf] %v6732_v8  ;;  %v6257_v40 = vmax.f32 %v6225_v23, 0.0  ;;  %v6228_v16 = vadd.f32 %v13203_v22, %v16782_v38  ;;  %v6226_v54 = vadd.f32 %v16782_v38, %v6098_v61 }
 0x3bb   : > { %6726 = vst [vmem:[#allocation3 + $0x3c] sm:$0xf] %v6725_v34  ;;  %v6467_v21 = vshrl.u32 %v12555_v30, 16  ;;  %v6470_v20 = vshll.u32 %v12555_v30, 16  ;;  %v6450_v50 = vshrl.u32 %v12553_v35, 16  ;;  %v6453_v2 = vshll.u32 %v12553_v35, 16 }
 0x3bc   : > { %v13206_v26 = vpop.f32.mrb[16].mxu0  ;;  %v12558_v31 = vpack.c.bf16 %v6259_v45, %v6259_v45  ;;  %v12556_v43 = vpack.c.bf16 %v6257_v40, %v6257_v40  ;;  %v6260_v1 = vmax.f32 %v6228_v16, 0.0  ;;  %v6258_v37 = vmax.f32 %v6226_v54, 0.0  ;;  %v6749_v8 = vld [vmem:[#allocation3 + $0x68] sm:$0x1] }
 0x3bd   : > { %v6111_v60 = vpop.f32.mrb[17].mxu0  ;;  %v6469_v48 = vrot.slane %v6467_v21, 7  ;;  %v6452_v18 = vrot.slane %v6450_v50, 7  ;;  %v6231_v9 = vadd.f32 %v13206_v26, %v16782_v38  ;;  %v6742_v34 = vld [vmem:[#allocation3 + $0x5c] sm:$0x1] }
 0x3be   : > { %v6229_v36 = vadd.f32 %v16782_v38, %v6111_v60  ;;  %v13207_v15 = vpop.f32.mrb[18].mxu0  ;;  %v6493_v57 = vshrl.u32 %v12558_v31, 16  ;;  %v6496_v14 = vshll.u32 %v12558_v31, 16  ;;  %v6476_v25 = vshrl.u32 %v12556_v43, 16  ;;  %v6811_v26 = vld [vmem:[#allocation3 + $0x10] sm:$0xf] }
 0x3bf   : > { %v6479_v3 = vshll.u32 %v12556_v43, 16  ;;  %v6114_v41 = vpop.f32.mrb[19].mxu0  ;;  %v6472_v5 = vor.u32 %v6470_v20, %v6469_v48  ;;  %v6474_v10 = vrot.slane %v6469_v48, 4  ;;  %v6455_v13 = vor.u32 %v6453_v2, %v6452_v18 }
 0x3c0   : > { %v6457_v62 = vrot.slane %v6452_v18, 4  ;;  %v6495_v55 = vrot.slane %v6493_v57, 7  ;;  %v6478_v49 = vrot.slane %v6476_v25, 7  ;;  %v12559_v6 = vpack.c.bf16 %v6260_v1, %v6260_v1 }
 0x3c1   : > { %v12557_v53 = vpack.c.bf16 %v6258_v37, %v6258_v37  ;;  %v6473_v7 = vsel %vm14293_vm7, %v6465_v28, %v6472_v5  ;;  %v6736_v29 = vsel %vm16486_vm9, %v6474_v10, %v6735_v52  ;;  %v6456_v23 = vsel %vm14293_vm7, %v6448_v27, %v6455_v13 }
 0x3c2   : > { %v6729_v22 = vsel %vm16486_vm9, %v6457_v62, %v6728_v17  ;;  %6734 = vst.msk [vmem:[#allocation3 + $0x4c] sm:$0xf] %vm395_vm3, %v6473_v7  ;;  %6737 = vst [vmem:[#allocation3 + $0x50] sm:$0x1] %v6736_v29  ;;  %v6498_v51 = vor.u32 %v6496_v14, %v6495_v55  ;;  %v6499_v24 = vrot.slane %v6495_v55, 4  ;;  %v6481_v46 = vor.u32 %v6479_v3, %v6478_v49 }
 0x3c3   : > { %6727 = vst.msk [vmem:[#allocation3 + $0x40] sm:$0xf] %vm395_vm3, %v6456_v23  ;;  %6730 = vst [vmem:[#allocation3 + $0x44] sm:$0x1] %v6729_v22  ;;  %v6482_v61 = vrot.slane %v6478_v49, 4  ;;  %v6501_v28 = vshrl.u32 %v12559_v6, 16  ;;  %v6232_v54 = vadd.f32 %v13207_v15, %v16782_v38  ;;  %v6230_v21 = vadd.f32 %v16782_v38, %v6114_v41 }
 0x3c4   : > { %v6504_v56 = vshll.u32 %v12559_v6, 16  ;;  %v6484_v39 = vshrl.u32 %v12557_v53, 16  ;;  %v6487_v27 = vshll.u32 %v12557_v53, 16  ;;  %v16862_v47 = vpop.f32.mrb[20].mxu0  ;;  %v6746_v63 = vsel %vm16791_vm0, %v6498_v51, %v6745_v58  ;;  %v6759_v3 = vld [vmem:[#allocation3 + $0x78] sm:$0xf] }
 0x3c5   : > { %v6739_v0 = vsel %vm16791_vm0, %v6481_v46, %v6738_v12  ;;  %v6263_v30 = vmax.f32 %v6231_v9, 0.0  ;;  %v6261_v35 = vmax.f32 %v6229_v36, 0.0  ;;  %v16868_v45 = vpop.f32.mrb[21].mxu0  ;;  %6747 = vst [vmem:[#allocation3 + $0x60] sm:$0xf] %v6746_v63  ;;  %v6503_v40 = vrot.slane %v6501_v28, 7 }
 0x3c6   : > { %6740 = vst [vmem:[#allocation3 + $0x54] sm:$0xf] %v6739_v0  ;;  %v6486_v16 = vrot.slane %v6484_v39, 7  ;;  %v16872_v20 = vpop.f32.mrb[22].mxu0  ;;  %v6883_v52 = vshrl.u32 %v6810_v19, 16  ;;  %v6886_v31 = vshll.u32 %v6810_v19, 16 }
 0x3c7   : > { %v12562_v50 = vpack.c.bf16 %v6263_v30, %v6263_v30  ;;  %v12560_v2 = vpack.c.bf16 %v6261_v35, %v6261_v35  ;;  %v16874_v43 = vpop.f32.mrb[23].mxu0  ;;  %v6506_v1 = vor.u32 %v6504_v56, %v6503_v40  ;;  %v6508_v37 = vrot.slane %v6503_v40, 4  ;;  %v6752_v41 = vld [vmem:[#allocation3 + $0x6c] sm:$0xf]  ;;  %v6843_v55 = vld [vmem:[#allocation3 + $0x14] sm:$0x1] }
 0x3c8   : > { %v6489_v60 = vor.u32 %v6487_v27, %v6486_v16  ;;  %v6491_v48 = vrot.slane %v6486_v16, 4  ;;  %v6264_v13 = vmax.f32 %v6232_v54, 0.0  ;;  %v6262_v62 = vmax.f32 %v6230_v21, 0.0  ;;  %v6812_v58 = vld [vmem:[#allocation3 + $0x18] sm:$0xf] }
 0x3c9   : > { %v6527_v18 = vshrl.u32 %v12562_v50, 16  ;;  %v6530_v17 = vshll.u32 %v12562_v50, 16  ;;  %v6510_v9 = vshrl.u32 %v12560_v2, 16  ;;  %v6513_v36 = vshll.u32 %v12560_v2, 16  ;;  %v6813_v19 = vld [vmem:[#allocation3 + $0x1c] sm:$0xf] }
 0x3ca   : > { %v6507_v15 = vsel %vm14293_vm7, %v6499_v24, %v6506_v1  ;;  %v6750_v57 = vsel %vm16486_vm9, %v6508_v37, %v6749_v8  ;;  %v6490_v14 = vsel %vm14293_vm7, %v6482_v61, %v6489_v60  ;;  %v6743_v25 = vsel %vm16486_vm9, %v6491_v48, %v6742_v34  ;;  %v6763_v2 = vld [vmem:[#allocation3 + $0x80] sm:$0x1]  ;;  %v6756_v1 = vld [vmem:[#allocation3 + $0x74] sm:$0x1] }
 0x3cb   : > { %6748 = vst.msk [vmem:[#allocation3 + $0x64] sm:$0xf] %vm395_vm3, %v6507_v15  ;;  %6751 = vst [vmem:[#allocation3 + $0x68] sm:$0x1] %v6750_v57  ;;  %v6529_v5 = vrot.slane %v6527_v18, 7  ;;  %v6512_v10 = vrot.slane %v6510_v9, 7  ;;  %v12563_v51 = vpack.c.bf16 %v6264_v13, %v6264_v13  ;;  %v12561_v24 = vpack.c.bf16 %v6262_v62, %v6262_v62 }
 0x3cc   : > { %6741 = vst.msk [vmem:[#allocation3 + $0x58] sm:$0xf] %vm395_vm3, %v6490_v14  ;;  %6744 = vst [vmem:[#allocation3 + $0x5c] sm:$0x1] %v6743_v25  ;;  %v6885_v49 = vrot.slane %v6883_v52, 4  ;;  %v6888_v6 = vrot.slane %v6886_v31, 5 }
 0x3cd   : > { %v6892_v53 = vshll.u32 %v6811_v26, 16  ;;  %v6896_v7 = vshrl.u32 %v6811_v26, 16  ;;  %v16886_v29 = vpop.f32.mrb[24].mxu0  ;;  %v6532_v23 = vor.u32 %v6530_v17, %v6529_v5  ;;  %v6515_v22 = vor.u32 %v6513_v36, %v6512_v10  ;;  %v6844_v57 = vld [vmem:[#allocation3 + $0x20] sm:$0x1] }
 0x3ce   : > { %v16888_v12 = vpop.f32.mrb[25].mxu0  ;;  %v6889_v46 = vor.u32 %v6888_v6, %v6885_v49  ;;  %v6902_v63 = vshll.u32 %v6843_v55, 16  ;;  %v6533_v8 = vrot.slane %v6529_v5, 4  ;;  %v6516_v34 = vrot.slane %v6512_v10, 4  ;;  %v16904_v10 = vld [vmem:[#allocation3 + $0x24] sm:$0xf] }
 0x3cf   : > { %v6894_v61 = vrot.slane %v6892_v53, 5  ;;  %v16890_v28 = vpop.f32.mrb[26].mxu0  ;;  %v6760_v56 = vsel %vm16791_vm0, %v6532_v23, %v6759_v3  ;;  %v6753_v39 = vsel %vm16791_vm0, %v6515_v22, %v6752_v41  ;;  %v6898_v27 = vrot.slane %v6896_v7, 4 }
 0x3d0   : > { %v16896_v0 = vpop.f32.mrb[27].mxu0  ;;  %6761 = vst [vmem:[#allocation3 + $0x78] sm:$0xf] %v6760_v56  ;;  %6754 = vst [vmem:[#allocation3 + $0x6c] sm:$0xf] %v6753_v39  ;;  %v6535_v30 = vshrl.u32 %v12563_v51, 16  ;;  %v6236_v56 = vadd.f32 %v16872_v20, %v16782_v38 }
 0x3d1   : > { %v6518_v35 = vshrl.u32 %v12561_v24, 16  ;;  %v6538_v40 = vshll.u32 %v12563_v51, 16  ;;  %v6521_v16 = vshll.u32 %v12561_v24, 16  ;;  %v6890_v54 = vrot.slane %v6889_v46, 4  ;;  %v16925_v24 = vld [vmem:[%s18688_s4 + $0x10] sm:$0xff]  }
 0x3d2   : > { %v6899_v21 = vor.u32 %v6898_v27, %v6894_v61  ;;  %v6537_v50 = vrot.slane %v6535_v30, 7  ;;  %v6904_v52 = vrot.slane %v6902_v63, 5  ;;  %v6907_v31 = vshrl.u32 %v6812_v58, 16  ;;  %v16935_v39 = vld [vmem:[#allocation3 + $0x28] sm:$0xf] }
 0x3d3   : > { %v6520_v26 = vrot.slane %v6518_v35, 7  ;;  %v6895_v37 = vsel %vm14684_vm15, %v6890_v54, %v6894_v61  ;;  %v6910_v48 = vshll.u32 %v6812_v58, 16  ;;  %v6916_v18 = vshll.u32 %v6813_v19, 16  ;;  %v16900_v14 = vpop.f32.mrb[28].mxu0 }
 0x3d4   : > { %v6900_v60 = vrot.slane %v6899_v21, 4  ;;  %v6540_v17 = vor.u32 %v6538_v40, %v6537_v50  ;;  %v6542_v9 = vrot.slane %v6537_v50, 4  ;;  %v6909_v3 = vrot.slane %v6907_v31, 4  ;;  %v16906_v13 = vpop.f32.mrb[29].mxu0 }
 0x3d5   : > { %v6523_v36 = vor.u32 %v6521_v16, %v6520_v26  ;;  %v6525_v15 = vrot.slane %v6520_v26, 4  ;;  %v6912_v41 = vrot.slane %v6910_v48, 5  ;;  %v6918_v5 = vrot.slane %v6916_v18, 5  ;;  %v16916_v53 = vpop.f32.mrb[30].mxu0 }
 0x3d6   : > { %v6905_v25 = vsel %vm14684_vm15, %v6900_v60, %v6904_v52  ;;  %v6541_v62 = vsel %vm14293_vm7, %v6533_v8, %v6540_v17  ;;  %v6764_v55 = vsel %vm16486_vm9, %v6542_v9, %v6763_v2  ;;  %v6920_v22 = vshrl.u32 %v6813_v19, 16  ;;  %v16920_v51 = vpop.f32.mrb[31].mxu0  ;;  %v6773_v17 = vld [vmem:[#allocation3 + $0x90] sm:$0xf]  ;;  %v6766_v9 = vld [vmem:[#allocation3 + $0x84] sm:$0xf] }
 0x3d7   : > { %v6524_v49 = vsel %vm14293_vm7, %v6516_v34, %v6523_v36  ;;  %v6757_v6 = vsel %vm16486_vm9, %v6525_v15, %v6756_v1  ;;  %6762 = vst.msk [vmem:[#allocation3 + $0x7c] sm:$0xf] %vm395_vm3, %v6541_v62  ;;  %6765 = vst [vmem:[#allocation3 + $0x80] sm:$0x1] %v6764_v55  ;;  %v12116_v7 = vcombine.low %v6895_v37, %v6905_v25  ;;  %v6926_v58 = vshll.u32 %v6844_v57, 16 }
 0x3d8   : > { %6755 = vst.msk [vmem:[#allocation3 + $0x70] sm:$0xf] %vm395_vm3, %v6524_v49  ;;  %6758 = vst [vmem:[#allocation3 + $0x74] sm:$0x1] %v6757_v6  ;;  %v6913_v23 = vor.u32 %v6912_v41, %v6909_v3  ;;  %v6235_v46 = vadd.f32 %v16862_v47, %v16782_v38  ;;  %v6233_v61 = vadd.f32 %v16782_v38, %v16868_v45  ;;  %v6922_v63 = vrot.slane %v6920_v22, 4 }
 0x3d9   : > { %v6234_v19 = vadd.f32 %v16782_v38, %v16874_v43  ;;  %13223 = vmatmul.mubr.msk.bf16.vlgmr.msra.gmra.mrb[0].mxu1 %vm7299_vm11, %v12116_v7  ;;  %v6928_v8 = vrot.slane %v6926_v58, 5  ;;  %v6931_v34 = vshrl.u32 %v16904_v10, 16  ;;  %v6268_v45 = vmax.f32 %v6236_v56, 0.0  ;;  %v6770_v55 = vld [vmem:[#allocation3 + $0x8c] sm:$0x1] }
 0x3da   : > { %v6914_v27 = vrot.slane %v6913_v23, 4  ;;  %13255 = vmatpush3.bf16.msra.mxu1 %v16747_v33  ;;  %v6267_v47 = vmax.f32 %v6235_v46, 0.0  ;;  %v6265_v30 = vmax.f32 %v6233_v61, 0.0  ;;  %v6923_v40 = vor.u32 %v6922_v63, %v6918_v5  ;;  %v6845_v7 = vld [vmem:[#allocation3 + $0x2c] sm:$0x1] }
 0x3db   : > { %v6266_v35 = vmax.f32 %v6234_v19, 0.0  ;;  %v6933_v43 = vrot.slane %v6931_v34, 4  ;;  %v6934_v16 = vshll.u32 %v16904_v10, 16  ;;  %13288 = vmatprep.subr.bf16.mxu1 %v16925_v24  ;;  %v12567_v50 = vpack.c.bf16 %v6268_v45, %v6268_v45  ;;  %v16948_v58 = vld [vmem:[#allocation3 + $0x30] sm:$0xf] }
 0x3dc   : > { %v6919_v20 = vsel %vm14684_vm15, %v6914_v27, %v6918_v5  ;;  %v12566_v54 = vpack.c.bf16 %v6267_v47, %v6267_v47  ;;  %v12564_v21 = vpack.c.bf16 %v6265_v30, %v6265_v30  ;;  %v6924_v26 = vrot.slane %v6923_v40, 4  ;;  %v6777_v5 = vld [vmem:[#allocation3 + $0x98] sm:$0x1]  ;;  %v16951_v27 = vld [vmem:[#allocation3 + $0x34] sm:$0xf] }
 0x3dd   : > { %v12565_v2 = vpack.c.bf16 %v6266_v35, %v6266_v35  ;;  %v6936_v52 = vrot.slane %v6934_v16, 5  ;;  %v6940_v33 = vshll.u32 %v16935_v39, 16  ;;  %v6944_v31 = vshrl.u32 %v16935_v39, 16  ;;  %v6846_v40 = vld [vmem:[#allocation3 + $0x38] sm:$0x1] }
 0x3de   : > { %v6561_v1 = vshrl.u32 %v12566_v54, 16  ;;  %v6564_v37 = vshll.u32 %v12566_v54, 16  ;;  %v6544_v60 = vshrl.u32 %v12564_v21, 16  ;;  %v6547_v48 = vshll.u32 %v12564_v21, 16  ;;  %v17070_v11 = vld [vmem:[#allocation3 + $0x6c] sm:$0xf] }
 0x3df   : > { %v6929_v18 = vsel %vm14684_vm15, %v6924_v26, %v6928_v8  ;;  %v6569_v36 = vshrl.u32 %v12567_v50, 16  ;;  %v6572_v15 = vshll.u32 %v12567_v50, 16  ;;  %v6552_v57 = vshrl.u32 %v12565_v2, 16 }
 0x3e0   : > { %v12117_v25 = vcombine.low %v6919_v20, %v6929_v18  ;;  %v6563_v3 = vrot.slane %v6561_v1, 7  ;;  %v6546_v41 = vrot.slane %v6544_v60, 7  ;;  %v6555_v62 = vshll.u32 %v12565_v2, 16 }
 0x3e1   : > { %v6571_v49 = vrot.slane %v6569_v36, 7  ;;  %v6554_v6 = vrot.slane %v6552_v57, 7  ;;  %v6937_v23 = vor.u32 %v6936_v52, %v6933_v43  ;;  %v6942_v22 = vrot.slane %v6940_v33, 5 }
 0x3e2   : > { %13226 = vmatprep.mubr.msk.bf16.mxu1 %vm7299_vm11, %v12117_v25  ;;  %v6566_v46 = vor.u32 %v6564_v37, %v6563_v3  ;;  %v6567_v61 = vrot.slane %v6563_v3, 4  ;;  %v6549_v56 = vor.u32 %v6547_v48, %v6546_v41  ;;  %v6550_v19 = vrot.slane %v6546_v41, 4  ;;  %v16975_v25 = vld [vmem:[#allocation3 + $0x3c] sm:$0xf] }
 0x3e3   : > { %v6574_v63 = vor.u32 %v6572_v15, %v6571_v49  ;;  %v6576_v8 = vrot.slane %v6571_v49, 4  ;;  %v6557_v34 = vor.u32 %v6555_v62, %v6554_v6  ;;  %v6559_v47 = vrot.slane %v6554_v6, 4 }
 0x3e4   : > { %v6774_v30 = vsel %vm16791_vm0, %v6566_v46, %v6773_v17  ;;  %v6767_v45 = vsel %vm16791_vm0, %v6549_v56, %v6766_v9  ;;  %v6938_v35 = vrot.slane %v6937_v23, 4  ;;  %v6946_v20 = vrot.slane %v6944_v31, 4 }
 0x3e5   : > { %6775 = vst [vmem:[#allocation3 + $0x90] sm:$0xf] %v6774_v30  ;;  %6768 = vst [vmem:[#allocation3 + $0x84] sm:$0xf] %v6767_v45  ;;  %v6575_v43 = vsel %vm14293_vm7, %v6567_v61, %v6574_v63  ;;  %v6778_v16 = vsel %vm16486_vm9, %v6576_v8, %v6777_v5  ;;  %v6558_v54 = vsel %vm14293_vm7, %v6550_v19, %v6557_v34  ;;  %v6950_v26 = vshll.u32 %v6845_v7, 16 }
 0x3e6   : > { %v6771_v21 = vsel %vm16486_vm9, %v6559_v47, %v6770_v55  ;;  %6776 = vst.msk [vmem:[#allocation3 + $0x94] sm:$0xf] %vm395_vm3, %v6575_v43  ;;  %6779 = vst [vmem:[#allocation3 + $0x98] sm:$0x1] %v6778_v16  ;;  %v6943_v50 = vsel %vm14684_vm15, %v6938_v35, %v6942_v22  ;;  %v6947_v2 = vor.u32 %v6946_v20, %v6942_v22  ;;  %v6955_v52 = vshrl.u32 %v16948_v58, 16 }
 0x3e7   : > { %6769 = vst.msk [vmem:[#allocation3 + $0x88] sm:$0xf] %vm395_vm3, %v6558_v54  ;;  %6772 = vst [vmem:[#allocation3 + $0x8c] sm:$0x1] %v6771_v21  ;;  %v6958_v33 = vshll.u32 %v16948_v58, 16  ;;  %v6964_v31 = vshll.u32 %v16951_v27, 16  ;;  %v6239_v17 = vadd.f32 %v16886_v29, %v16782_v38  ;;  %v6237_v5 = vadd.f32 %v16782_v38, %v16888_v12 }
 0x3e8   : > { %v6968_v1 = vshrl.u32 %v16951_v27, 16  ;;  %v6974_v37 = vshll.u32 %v6846_v40, 16  ;;  %v6948_v60 = vrot.slane %v6947_v2, 4  ;;  %v6952_v48 = vrot.slane %v6950_v26, 5  ;;  %v16992_v45 = vld [vmem:[#allocation3 + $0x40] sm:$0xf] }
 0x3e9   : > { %v6957_v18 = vrot.slane %v6955_v52, 4  ;;  %v6960_v9 = vrot.slane %v6958_v33, 5  ;;  %v6966_v36 = vrot.slane %v6964_v31, 5  ;;  %v6271_v41 = vmax.f32 %v6239_v17, 0.0  ;;  %v6780_v54 = vld [vmem:[#allocation3 + $0x9c] sm:$0xf] }
 0x3ea   : > { %v6970_v15 = vrot.slane %v6968_v1, 4  ;;  %v6976_v57 = vrot.slane %v6974_v37, 5  ;;  %v6953_v3 = vsel %vm14684_vm15, %v6948_v60, %v6952_v48  ;;  %v6240_v62 = vadd.f32 %v16890_v28, %v16782_v38  ;;  %v6791_v1 = vld [vmem:[#allocation3 + $0xb0] sm:$0x1]  ;;  %v6784_v37 = vld [vmem:[#allocation3 + $0xa4] sm:$0x1] }
 0x3eb   : > { %v12118_v55 = vcombine.low %v6943_v50, %v6953_v3  ;;  %v6961_v49 = vor.u32 %v6960_v9, %v6957_v18  ;;  %v6238_v29 = vadd.f32 %v16782_v38, %v16896_v0  ;;  %v12570_v7 = vpack.c.bf16 %v6271_v41, %v6271_v41  ;;  %v6787_v0 = vld [vmem:[#allocation3 + $0xa8] sm:$0xf]  ;;  %v17001_v41 = vld [vmem:[#allocation3 + $0x44] sm:$0x1] }
 0x3ec   : > { %v6971_v6 = vor.u32 %v6970_v15, %v6966_v36  ;;  %v6269_v23 = vmax.f32 %v6237_v5, 0.0  ;;  %v6272_v22 = vmax.f32 %v6240_v62, 0.0  ;;  %v6979_v46 = vshrl.u32 %v16975_v25, 16 }
 0x3ed   : > { %13227 = vmatmul.mubr.msk.bf16.gmra.mrb[4].mxu1 %vm7299_vm11, %v12118_v55  ;;  %v6962_v61 = vrot.slane %v6961_v49, 4  ;;  %v6270_v19 = vmax.f32 %v6238_v29, 0.0  ;;  %v6982_v12 = vshll.u32 %v16975_v25, 16  ;;  %v6595_v63 = vshrl.u32 %v12570_v7, 16  ;;  %v17003_v29 = vld [vmem:[#allocation3 + $0x4c] sm:$0xf] }
 0x3ee   : > { %v6972_v56 = vrot.slane %v6971_v6, 4  ;;  %v6598_v28 = vshll.u32 %v12570_v7, 16  ;;  %v12568_v8 = vpack.c.bf16 %v6269_v23, %v6269_v23  ;;  %v12571_v34 = vpack.c.bf16 %v6272_v22, %v6272_v22  ;;  %v17005_v7 = vld [vmem:[#allocation3 + $0x50] sm:$0x1] }
 0x3ef   : > { %v6967_v47 = vsel %vm14684_vm15, %v6962_v61, %v6966_v36  ;;  %v12569_v30 = vpack.c.bf16 %v6270_v19, %v6270_v19  ;;  %v6981_v35 = vrot.slane %v6979_v46, 4  ;;  %v6597_v40 = vrot.slane %v6595_v63, 7  ;;  %v16997_v36 = vld [vmem:[#allocation3 + $0x48] sm:$0xf] }
 0x3f0   : > { %v6977_v38 = vsel %vm14684_vm15, %v6972_v56, %v6976_v57  ;;  %v6578_v43 = vshrl.u32 %v12568_v8, 16  ;;  %v6581_v16 = vshll.u32 %v12568_v8, 16  ;;  %v6603_v21 = vshrl.u32 %v12571_v34, 16 }
 0x3f1   : > { %v12119_v20 = vcombine.low %v6967_v47, %v6977_v38  ;;  %v6606_v50 = vshll.u32 %v12571_v34, 16  ;;  %v6586_v2 = vshrl.u32 %v12569_v30, 16  ;;  %v6589_v26 = vshll.u32 %v12569_v30, 16 }
 0x3f2   : > { %v6600_v52 = vor.u32 %v6598_v28, %v6597_v40  ;;  %v6601_v33 = vrot.slane %v6597_v40, 4  ;;  %v6580_v31 = vrot.slane %v6578_v43, 7  ;;  %v6984_v60 = vrot.slane %v6982_v12, 5 }
 0x3f3   : > { %13230 = vmatprep.mubr.msk.bf16.mxu1 %vm7299_vm11, %v12119_v20  ;;  %v6605_v48 = vrot.slane %v6603_v21, 7  ;;  %v6588_v18 = vrot.slane %v6586_v2, 7  ;;  %v6988_v17 = vshll.u32 %v16992_v45, 16  ;;  %v6992_v9 = vshrl.u32 %v16992_v45, 16 }
 0x3f4   : > { %v6788_v15 = vsel %vm16791_vm0, %v6600_v52, %v6787_v0  ;;  %v6583_v57 = vor.u32 %v6581_v16, %v6580_v31  ;;  %v6584_v3 = vrot.slane %v6580_v31, 4  ;;  %v6985_v5 = vor.u32 %v6984_v60, %v6981_v35  ;;  %v14164_v16 = vld [vmem:[%s18687_s3] ss:$0 sm:$0xff]  ;;  %v17031_v52 = vld [vmem:[#allocation3 + $0x54] sm:$0xf] }
 0x3f5   : > { %6789 = vst [vmem:[#allocation3 + $0xa8] sm:$0xf] %v6788_v15  ;;  %v6608_v62 = vor.u32 %v6606_v50, %v6605_v48  ;;  %v6610_v55 = vrot.slane %v6605_v48, 4  ;;  %v6591_v49 = vor.u32 %v6589_v26, %v6588_v18  ;;  %v6593_v6 = vrot.slane %v6588_v18, 4 }
 0x3f6   : > { %v6781_v23 = vsel %vm16791_vm0, %v6583_v57, %v6780_v54  ;;  %v6986_v22 = vrot.slane %v6985_v5, 4  ;;  %v6990_v46 = vrot.slane %v6988_v17, 5  ;;  %v6994_v61 = vrot.slane %v6992_v9, 4 }
 0x3f7   : > { %6782 = vst [vmem:[#allocation3 + $0x9c] sm:$0xf] %v6781_v23  ;;  %v6609_v56 = vsel %vm14293_vm7, %v6601_v33, %v6608_v62  ;;  %v6792_v19 = vsel %vm16486_vm9, %v6610_v55, %v6791_v1  ;;  %v6592_v12 = vsel %vm14293_vm7, %v6584_v3, %v6591_v49  ;;  %v6785_v63 = vsel %vm16486_vm9, %v6593_v6, %v6784_v37 }
 0x3f8   : > { %6790 = vst.msk [vmem:[#allocation3 + $0xac] sm:$0xf] %vm395_vm3, %v6609_v56  ;;  %6793 = vst [vmem:[#allocation3 + $0xb0] sm:$0x1] %v6792_v19  ;;  %v6991_v28 = vsel %vm14684_vm15, %v6986_v22, %v6990_v46  ;;  %v6995_v8 = vor.u32 %v6994_v61, %v6990_v46  ;;  %v6998_v34 = vshll.u32 %v17001_v41, 16  ;;  %v7003_v47 = vshrl.u32 %v16997_v36, 16 }
 0x3f9   : > { %6783 = vst.msk [vmem:[#allocation3 + $0xa0] sm:$0xf] %vm395_vm3, %v6592_v12  ;;  %6786 = vst [vmem:[#allocation3 + $0xa4] sm:$0x1] %v6785_v63  ;;  %v7006_v38 = vshll.u32 %v16997_v36, 16  ;;  %v7012_v0 = vshll.u32 %v17003_v29, 16  ;;  %v6243_v54 = vadd.f32 %v14164_v16, %v16900_v14  ;;  %v6241_v1 = vadd.f32 %v14164_v16, %v16906_v13 }
 0x3fa   : > { %v7016_v30 = vshrl.u32 %v17003_v29, 16  ;;  %v7022_v35 = vshll.u32 %v17005_v7, 16  ;;  %v6996_v20 = vrot.slane %v6995_v8, 4  ;;  %v7000_v40 = vrot.slane %v6998_v34, 5  ;;  %v6801_v22 = vld [vmem:[#allocation3 + $0xc0] sm:$0xf] }
 0x3fb   : > { %v7005_v43 = vrot.slane %v7003_v47, 4  ;;  %v7008_v21 = vrot.slane %v7006_v38, 5  ;;  %v7014_v50 = vrot.slane %v7012_v0, 5  ;;  %v6275_v31 = vmax.f32 %v6243_v54, 0.0  ;;  %v17045_v61 = vld [vmem:[#allocation3 + $0x58] sm:$0xf] }
 0x3fc   : > { %v7018_v2 = vrot.slane %v7016_v30, 4  ;;  %v7024_v26 = vrot.slane %v7022_v35, 5  ;;  %v7001_v33 = vsel %vm14684_vm15, %v6996_v20, %v7000_v40  ;;  %v6244_v37 = vadd.f32 %v14164_v16, %v16916_v53  ;;  %v6794_v8 = vld [vmem:[#allocation3 + $0xb4] sm:$0xf]  ;;  %v6805_v40 = vld [vmem:[#allocation3 + $0xc8] sm:$0x1] }
 0x3fd   : > { %v12120_v60 = vcombine.low %v6991_v28, %v7001_v33  ;;  %v7009_v48 = vor.u32 %v7008_v21, %v7005_v43  ;;  %v6242_v17 = vadd.f32 %v14164_v16, %v16920_v51  ;;  %v12574_v14 = vpack.c.bf16 %v6275_v31, %v6275_v31  ;;  %v6798_v43 = vld [vmem:[#allocation3 + $0xbc] sm:$0x1]  ;;  %v17052_v33 = vld [vmem:[#allocation3 + $0x60] sm:$0xf] }
 0x3fe   : > { %v7019_v18 = vor.u32 %v7018_v2, %v7014_v50  ;;  %v6273_v9 = vmax.f32 %v6241_v1, 0.0  ;;  %v6276_v15 = vmax.f32 %v6244_v37, 0.0  ;;  %v7027_v57 = vshrl.u32 %v17031_v52, 16 }
 0x3ff   : > { %13231 = vmatmul.mubr.msk.bf16.gmra.mrb[8].mxu1 %vm7299_vm11, %v12120_v60  ;;  %v7010_v3 = vrot.slane %v7009_v48, 4  ;;  %v6274_v62 = vmax.f32 %v6242_v17, 0.0  ;;  %v7030_v55 = vshll.u32 %v17031_v52, 16  ;;  %v6629_v13 = vshrl.u32 %v12574_v14, 16 }
 0x400   : > { %v7020_v5 = vrot.slane %v7019_v18, 4  ;;  %v6632_v49 = vshll.u32 %v12574_v14, 16  ;;  %v12572_v53 = vpack.c.bf16 %v6273_v9, %v6273_v9  ;;  %v12575_v6 = vpack.c.bf16 %v6276_v15, %v6276_v15  ;;  %v17056_v9 = vld [vmem:[#allocation3 + $0x64] sm:$0xf] }
 0x401   : > { %v7015_v23 = vsel %vm14684_vm15, %v7010_v3, %v7014_v50  ;;  %v12573_v46 = vpack.c.bf16 %v6274_v62, %v6274_v62  ;;  %v7029_v56 = vrot.slane %v7027_v57, 4  ;;  %v6631_v12 = vrot.slane %v6629_v13, 7  ;;  %v17048_v50 = vld [vmem:[#allocation3 + $0x5c] sm:$0x1]  ;;  %v17060_v62 = vld [vmem:[#allocation3 + $0x68] sm:$0x1] }
 0x402   : > { %v7025_v51 = vsel %vm14684_vm15, %v7020_v5, %v7024_v26  ;;  %v6612_v63 = vshrl.u32 %v12572_v53, 16  ;;  %v6615_v28 = vshll.u32 %v12572_v53, 16  ;;  %v6637_v34 = vshrl.u32 %v12575_v6, 16 }
 0x403   : > { %v12121_v19 = vcombine.low %v7015_v23, %v7025_v51  ;;  %v6640_v47 = vshll.u32 %v12575_v6, 16  ;;  %v6620_v38 = vshrl.u32 %v12573_v46, 16  ;;  %v6623_v0 = vshll.u32 %v12573_v46, 16 }
 0x404   : > { %v6634_v30 = vor.u32 %v6632_v49, %v6631_v12  ;;  %v6635_v35 = vrot.slane %v6631_v12, 4  ;;  %v6614_v20 = vrot.slane %v6612_v63, 7  ;;  %v7032_v16 = vrot.slane %v7030_v55, 5  ;;  %v17082_v12 = vld [vmem:[#allocation3 + $0x70] sm:$0xf] }
 0x405   : > { %13234 = vmatprep.mubr.msk.bf16.mxu1 %vm7299_vm11, %v12121_v19  ;;  %v6639_v54 = vrot.slane %v6637_v34, 7  ;;  %v6622_v21 = vrot.slane %v6620_v38, 7  ;;  %v7036_v2 = vshll.u32 %v17045_v61, 16  ;;  %v7040_v26 = vshrl.u32 %v17045_v61, 16 }
 0x406   : > { %v6802_v31 = vsel %vm16791_vm0, %v6634_v30, %v6801_v22  ;;  %v6617_v1 = vor.u32 %v6615_v28, %v6614_v20  ;;  %v6618_v37 = vrot.slane %v6614_v20, 4  ;;  %v7033_v60 = vor.u32 %v7032_v16, %v7029_v56  ;;  %v17087_v20 = vld [vmem:[#allocation3 + $0x74] sm:$0x1] }
 0x407   : > { %6803 = vst [vmem:[#allocation3 + $0xc0] sm:$0xf] %v6802_v31  ;;  %v6642_v48 = vor.u32 %v6640_v47, %v6639_v54  ;;  %v6644_v18 = vrot.slane %v6639_v54, 4  ;;  %v6625_v17 = vor.u32 %v6623_v0, %v6622_v21  ;;  %v6627_v14 = vrot.slane %v6622_v21, 4  ;;  %v17085_v47 = vld [vmem:[#allocation3 + $0x78] sm:$0xf] }
 0x408   : > { %v6795_v15 = vsel %vm16791_vm0, %v6617_v1, %v6794_v8  ;;  %v7034_v57 = vrot.slane %v7033_v60, 4  ;;  %v7038_v3 = vrot.slane %v7036_v2, 5  ;;  %v7042_v5 = vrot.slane %v7040_v26, 4  ;;  %v17094_v1 = vld [vmem:[#allocation3 + $0x7c] sm:$0xf] }
 0x409   : > { %6796 = vst [vmem:[#allocation3 + $0xb4] sm:$0xf] %v6795_v15  ;;  %v6643_v55 = vsel %vm14293_vm7, %v6635_v35, %v6642_v48  ;;  %v6806_v13 = vsel %vm16486_vm9, %v6644_v18, %v6805_v40  ;;  %v6626_v49 = vsel %vm14293_vm7, %v6618_v37, %v6625_v17  ;;  %v6799_v53 = vsel %vm16486_vm9, %v6627_v14, %v6798_v43  ;;  %v17097_v18 = vld [vmem:[#allocation3 + $0x80] sm:$0x1] }
 0x40a   : > { %6804 = vst.msk [vmem:[#allocation3 + $0xc4] sm:$0xf] %vm395_vm3, %v6643_v55  ;;  %6807 = vst [vmem:[#allocation3 + $0xc8] sm:$0x1] %v6806_v13  ;;  %v7039_v6 = vsel %vm14684_vm15, %v7034_v57, %v7038_v3  ;;  %v7043_v23 = vor.u32 %v7042_v5, %v7038_v3  ;;  %v7046_v51 = vshll.u32 %v17048_v50, 16  ;;  %v7051_v32 = vshrl.u32 %v17052_v33, 16 }
 0x40b   : > { %6797 = vst.msk [vmem:[#allocation3 + $0xb8] sm:$0xf] %vm395_vm3, %v6626_v49  ;;  %6800 = vst [vmem:[#allocation3 + $0xbc] sm:$0x1] %v6799_v53  ;;  %v7054_v22 = vshll.u32 %v17052_v33, 16  ;;  %v7060_v46 = vshll.u32 %v17056_v9, 16 }
 0x40c   : > { %v7064_v56 = vshrl.u32 %v17056_v9, 16  ;;  %v7070_v19 = vshll.u32 %v17060_v62, 16  ;;  %v7044_v63 = vrot.slane %v7043_v23, 4  ;;  %v7048_v28 = vrot.slane %v7046_v51, 5  ;;  %v17102_v5 = vld [vmem:[#allocation3 + $0x84] sm:$0xf] }
 0x40d   : > { %v7053_v8 = vrot.slane %v7051_v32, 4  ;;  %v7075_v34 = vshrl.u32 %v17070_v11, 16  ;;  %v7056_v38 = vrot.slane %v7054_v22, 5  ;;  %v7062_v0 = vrot.slane %v7060_v46, 5 }
 0x40e   : > { %v7066_v30 = vrot.slane %v7064_v56, 4  ;;  %v7072_v35 = vrot.slane %v7070_v19, 5  ;;  %v7049_v40 = vsel %vm14684_vm15, %v7044_v63, %v7048_v28  ;;  %v7078_v16 = vshll.u32 %v17070_v11, 16  ;;  %v17112_v28 = vld [vmem:[#allocation3 + $0x8c] sm:$0x1] }
 0x40f   : > { %v7077_v43 = vrot.slane %v7075_v34, 4  ;;  %v7084_v54 = vshll.u32 %v17082_v12, 16  ;;  %v12122_v21 = vcombine.low %v7039_v6, %v7049_v40  ;;  %v7057_v2 = vor.u32 %v7056_v38, %v7053_v8  ;;  %v17105_v6 = vld [vmem:[#allocation3 + $0x88] sm:$0xf]  ;;  %v17114_v8 = vld [vmem:[#allocation3 + $0x90] sm:$0xf] }
 0x410   : > { %v7067_v26 = vor.u32 %v7066_v30, %v7062_v0  ;;  %v7088_v31 = vshrl.u32 %v17082_v12, 16  ;;  %v7080_v37 = vrot.slane %v7078_v16, 5  ;;  %v7094_v48 = vshll.u32 %v17087_v20, 16  ;;  %v17118_v40 = vld [vmem:[#allocation3 + $0x94] sm:$0xf] }
 0x411   : > { %v7086_v60 = vrot.slane %v7084_v54, 5  ;;  %v7099_v17 = vshrl.u32 %v17085_v47, 16  ;;  %13235 = vmatmul.mubr.msk.bf16.gmra.mrb[12].mxu1 %vm7299_vm11, %v12122_v21  ;;  %v7058_v14 = vrot.slane %v7057_v2, 4  ;;  %v7102_v3 = vshll.u32 %v17085_v47, 16 }
 0x412   : > { %v7068_v15 = vrot.slane %v7067_v26, 4  ;;  %v7090_v57 = vrot.slane %v7088_v31, 4  ;;  %v7081_v55 = vor.u32 %v7080_v37, %v7077_v43  ;;  %v7096_v13 = vrot.slane %v7094_v48, 5 }
 0x413   : > { %v7101_v49 = vrot.slane %v7099_v17, 4  ;;  %v7108_v53 = vshll.u32 %v17094_v1, 16  ;;  %v7063_v23 = vsel %vm14684_vm15, %v7058_v14, %v7062_v0  ;;  %v7104_v22 = vrot.slane %v7102_v3, 5 }
 0x414   : > { %v7073_v51 = vsel %vm14684_vm15, %v7068_v15, %v7072_v35  ;;  %v7091_v32 = vor.u32 %v7090_v57, %v7086_v60  ;;  %v7082_v56 = vrot.slane %v7081_v55, 4  ;;  %v7112_v63 = vshrl.u32 %v17094_v1, 16 }
 0x415   : > { %v12123_v46 = vcombine.low %v7063_v23, %v7073_v51  ;;  %v7110_v19 = vrot.slane %v7108_v53, 5  ;;  %v7105_v38 = vor.u32 %v7104_v22, %v7101_v49  ;;  %v7118_v30 = vshll.u32 %v17097_v18, 16  ;;  %v17133_v49 = vld [vmem:[#allocation3 + $0x98] sm:$0x1] }
 0x416   : > { %v7092_v34 = vrot.slane %v7091_v32, 4  ;;  %v7123_v0 = vshrl.u32 %v17102_v5, 16  ;;  %v7087_v35 = vsel %vm14684_vm15, %v7082_v56, %v7086_v60  ;;  %v7114_v43 = vrot.slane %v7112_v63, 4  ;;  %v17138_v56 = vld [vmem:[#allocation3 + $0x9c] sm:$0xf] }
 0x417   : > { %13238 = vmatprep.mubr.msk.bf16.mxu1 %vm7299_vm11, %v12123_v46  ;;  %v7126_v16 = vshll.u32 %v17102_v5, 16  ;;  %v7132_v54 = vshll.u32 %v17105_v6, 16  ;;  %v7106_v2 = vrot.slane %v7105_v38, 4  ;;  %v7120_v26 = vrot.slane %v7118_v30, 5  ;;  %v17142_v30 = vld [vmem:[#allocation3 + $0xa0] sm:$0xf] }
 0x418   : > { %v7097_v21 = vsel %vm14684_vm15, %v7092_v34, %v7096_v13  ;;  %v7125_v31 = vrot.slane %v7123_v0, 4  ;;  %v7115_v48 = vor.u32 %v7114_v43, %v7110_v19  ;;  %v7136_v60 = vshrl.u32 %v17105_v6, 16 }
 0x419   : > { %v12124_v37 = vcombine.low %v7087_v35, %v7097_v21  ;;  %v7128_v17 = vrot.slane %v7126_v16, 5  ;;  %v7134_v14 = vrot.slane %v7132_v54, 5  ;;  %v7111_v15 = vsel %vm14684_vm15, %v7106_v2, %v7110_v19  ;;  %v17147_v2 = vld [vmem:[#allocation3 + $0xa4] sm:$0x1] }
 0x41a   : > { %v7142_v57 = vshll.u32 %v17112_v28, 16  ;;  %v7147_v3 = vshrl.u32 %v17114_v8, 16  ;;  %v7116_v55 = vrot.slane %v7115_v48, 4  ;;  %v7150_v53 = vshll.u32 %v17114_v8, 16 }
 0x41b   : > { %13239 = vmatmul.mubr.msk.bf16.gmra.mrb[16].mxu1 %vm7299_vm11, %v12124_v37  ;;  %v7129_v13 = vor.u32 %v7128_v17, %v7125_v31  ;;  %v7156_v23 = vshll.u32 %v17118_v40, 16  ;;  %v7138_v51 = vrot.slane %v7136_v60, 4  ;;  %v7160_v46 = vshrl.u32 %v17118_v40, 16 }
 0x41c   : > { %v7144_v32 = vrot.slane %v7142_v57, 5  ;;  %v7149_v22 = vrot.slane %v7147_v3, 4  ;;  %v7121_v19 = vsel %vm14684_vm15, %v7116_v55, %v7120_v26  ;;  %v7152_v34 = vrot.slane %v7150_v53, 5 }
 0x41d   : > { %v7130_v63 = vrot.slane %v7129_v13, 4  ;;  %v7158_v38 = vrot.slane %v7156_v23, 5  ;;  %v12125_v0 = vcombine.low %v7111_v15, %v7121_v19  ;;  %v7139_v35 = vor.u32 %v7138_v51, %v7134_v14 }
 0x41e   : > { %v7162_v43 = vrot.slane %v7160_v46, 4  ;;  %v7166_v16 = vshll.u32 %v17133_v49, 16  ;;  %v7153_v21 = vor.u32 %v7152_v34, %v7149_v22  ;;  %v7171_v31 = vshrl.u32 %v17138_v56, 16  ;;  %v17159_v22 = vld [vmem:[#allocation3 + $0xac] sm:$0xf] }
 0x41f   : > { %v7135_v54 = vsel %vm14684_vm15, %v7130_v63, %v7134_v14  ;;  %v7174_v26 = vshll.u32 %v17138_v56, 16  ;;  %13242 = vmatprep.mubr.msk.bf16.mxu1 %vm7299_vm11, %v12125_v0  ;;  %v7140_v37 = vrot.slane %v7139_v35, 4  ;;  %v7180_v15 = vshll.u32 %v17142_v30, 16  ;;  %v17154_v14 = vld [vmem:[#allocation3 + $0xa8] sm:$0xf] }
 0x420   : > { %v7163_v48 = vor.u32 %v7162_v43, %v7158_v38  ;;  %v7168_v17 = vrot.slane %v7166_v16, 5  ;;  %v7154_v60 = vrot.slane %v7153_v21, 4  ;;  %v7173_v57 = vrot.slane %v7171_v31, 4  ;;  %v17165_v35 = vld [vmem:[#allocation3 + $0xb0] sm:$0x1] }
 0x421   : > { %v7176_v3 = vrot.slane %v7174_v26, 5  ;;  %v7184_v55 = vshrl.u32 %v17142_v30, 16  ;;  %v7145_v13 = vsel %vm14684_vm15, %v7140_v37, %v7144_v32  ;;  %v7182_v23 = vrot.slane %v7180_v15, 5  ;;  %v17169_v16 = vld [vmem:[#allocation3 + $0xb4] sm:$0xf] }
 0x422   : > { %v7164_v53 = vrot.slane %v7163_v48, 4  ;;  %v7190_v51 = vshll.u32 %v17147_v2, 16  ;;  %v12126_v46 = vcombine.low %v7135_v54, %v7145_v13  ;;  %v7159_v34 = vsel %vm14684_vm15, %v7154_v60, %v7158_v38  ;;  %v17174_v15 = vld [vmem:[#allocation3 + $0xb8] sm:$0xf] }
 0x423   : > { %v7177_v19 = vor.u32 %v7176_v3, %v7173_v57  ;;  %v7186_v63 = vrot.slane %v7184_v55, 4  ;;  %v7195_v43 = vshrl.u32 %v17154_v14, 16  ;;  %v7198_v32 = vshll.u32 %v17154_v14, 16 }
 0x424   : > { %v7169_v0 = vsel %vm14684_vm15, %v7164_v53, %v7168_v17  ;;  %13243 = vmatmul.mubr.msk.bf16.gmra.mrb[20].mxu1 %vm7299_vm11, %v12126_v46  ;;  %v7204_v26 = vshll.u32 %v17159_v22, 16  ;;  %v7192_v37 = vrot.slane %v7190_v51, 5  ;;  %v7208_v17 = vshrl.u32 %v17159_v22, 16  ;;  %v17181_v51 = vld [vmem:[#allocation3 + $0xbc] sm:$0x1] }
 0x425   : > { %v12127_v21 = vcombine.low %v7159_v34, %v7169_v0  ;;  %v7178_v54 = vrot.slane %v7177_v19, 4  ;;  %v7187_v31 = vor.u32 %v7186_v63, %v7182_v23  ;;  %v7197_v38 = vrot.slane %v7195_v43, 4 }
 0x426   : > { %v7200_v48 = vrot.slane %v7198_v32, 5  ;;  %v7206_v57 = vrot.slane %v7204_v26, 5  ;;  %v7214_v3 = vshll.u32 %v17165_v35, 16  ;;  %v7219_v55 = vshrl.u32 %v17169_v16, 16 }
 0x427   : > { %13246 = vmatprep.mubr.msk.bf16.mxu1 %vm7299_vm11, %v12127_v21  ;;  %v7188_v60 = vrot.slane %v7187_v31, 4  ;;  %v7183_v13 = vsel %vm14684_vm15, %v7178_v54, %v7182_v23  ;;  %v7210_v46 = vrot.slane %v7208_v17, 4  ;;  %v7222_v19 = vshll.u32 %v17169_v16, 16 }
 0x428   : > { %v7201_v53 = vor.u32 %v7200_v48, %v7197_v38  ;;  %v7221_v34 = vrot.slane %v7219_v55, 4  ;;  %v7228_v0 = vshll.u32 %v17174_v15, 16  ;;  %v7232_v43 = vshrl.u32 %v17174_v15, 16 }
 0x429   : > { %v7193_v63 = vsel %vm14684_vm15, %v7188_v60, %v7192_v37  ;;  %v7211_v31 = vor.u32 %v7210_v46, %v7206_v57  ;;  %v7224_v26 = vrot.slane %v7222_v19, 5  ;;  %v7238_v54 = vshll.u32 %v17181_v51, 16 }
 0x42a   : > { %v12128_v32 = vcombine.low %v7183_v13, %v7193_v63  ;;  %v7202_v21 = vrot.slane %v7201_v53, 4  ;;  %v7230_v42 = vrot.slane %v7228_v0, 5  ;;  %v7234_v23 = vrot.slane %v7232_v43, 4  ;;  %v7817_v0 = vld [vmem:[#allocation3 + $0x9c] sm:$0xe] }
 0x42b   : > { %v7212_v38 = vrot.slane %v7211_v31, 4  ;;  %v7216_v48 = vrot.slane %v7214_v3, 5  ;;  %v7225_v17 = vor.u32 %v7224_v26, %v7221_v34  ;;  %v7240_v46 = vrot.slane %v7238_v54, 5  ;;  %v14166_v31 = vld [vmem:[#allocation3] sm:$0xf] }
 0x42c   : > { %13247 = vmatmul.mubr.msk.bf16.gmra.mrb[24].mxu1 %vm7299_vm11, %v12128_v32  ;;  %v7235_v59 = vor.u32 %v7234_v23, %v7230_v42  ;;  %v7207_v37 = vsel %vm14684_vm15, %v7202_v21, %v7206_v57  ;;  %v12155_v19 = vcombine.low %v17031_v52, %v17045_v61  ;;  %v12156_v63 = vcombine.low %v17052_v33, %v17056_v9  ;;  %v17213_v21 = vld [vmem:[#allocation3 + $0x4] sm:$0xf] }
 0x42d   : > { %v7217_v60 = vsel %vm14684_vm15, %v7212_v38, %v7216_v48  ;;  %v7226_v55 = vrot.slane %v7225_v17, 4  ;;  %v12148_v26 = vcombine.low %v14166_v31, %v17213_v21  ;;  %v14167_v38 = vld [vmem:[#allocation3 + $0xc] sm:$0xf]  ;;  %v17222_v48 = vld [vmem:[#allocation3 + $0x10] sm:$0xf]  ;;  %v12153_v54 = vcombine.low %v16975_v25, %v16992_v45 }
 0x42e   : > { %v12129_v13 = vcombine.low %v7207_v37, %v7217_v60  ;;  %v7236_v53 = vrot.slane %v7235_v59, 4  ;;  %v12149_v17 = vcombine.low %v14167_v38, %v17222_v48  ;;  %v17228_v37 = vld [vmem:[%s18688_s4 + $0x18] sm:$0xff]   ;;  %v7811_v60 = vld [vmem:[#allocation3 + $0x54] sm:$0xe]  ;;  %v7906_v38 = vrot.slane %v17048_v50, 5 }
 0x42f   : > { %v7231_v3 = vsel %vm14684_vm15, %v7226_v55, %v7230_v42  ;;  %v14169_v55 = vld [vmem:[#allocation3 + $0x18] sm:$0xf]  ;;  %v12188_v31 = vrot.slane %v7811_v60, 9  ;;  %v7917_v50 = vrot.slane %v17082_v12, 5  ;;  %v7913_v23 = vrot.slane %v17060_v62, 5 }
 0x430   : > { %13250 = vmatprep.mubr.msk.bf16.mxu1 %vm7299_vm11, %v12129_v13  ;;  %v7241_v59 = vsel %vm14684_vm15, %v7236_v53, %v7240_v46  ;;  %v17230_v13 = vld [vmem:[#allocation3 + $0x1c] sm:$0xf]  ;;  %v7903_v46 = vrot.slane %v17045_v61, 5  ;;  %v7816_v42 = vld [vmem:[#allocation3 + $0x90] sm:$0xe]  ;;  %v7948_v62 = vrot.slane %v17147_v2, 5  ;;  %v19136_v52 = vcombine.low %v17102_v5, %v17105_v6 }
 0x431   : > { %v12130_v32 = vcombine.low %v7231_v3, %v7241_v59  ;;  %v12150_v53 = vcombine.low %v14169_v55, %v17230_v13  ;;  %v7812_v3 = vld [vmem:[#allocation3 + $0x60] sm:$0xe]  ;;  %v7813_v59 = vld [vmem:[#allocation3 + $0x6c] sm:$0xe]  ;;  %v12152_v55 = vcombine.low %v16948_v58, %v16951_v27  ;;  %v7814_v58 = vld [vmem:[#allocation3 + $0x78] sm:$0xe]  ;;  %v19137_v61 = vcombine.low %v17114_v8, %v17118_v40 }
 0x432   : > { %v12191_v43 = vrot.slane %v7814_v58, 9  ;;  %v7955_v57 = vrot.slane %v17165_v35, 5  ;;  %v7854_v33 = vrot.slane %v17213_v21, 5  ;;  %v7861_v8 = vrot.slane %v17222_v48, 5  ;;  %v9367_v35 = vld [vmem:[#allocation3 + $0xa8] sm:$0xe] }
 0x434   : > { %13251 = vmatmul.mubr.msk.bf16.gmra.mrb[28].mxu1 %vm7299_vm11, %v12130_v32  ;;  %v12151_v32 = vcombine.low %v16904_v10, %v16935_v39  ;;  %v12190_v39 = vrot.slane %v7813_v59, 9  ;;  %v7920_v59 = vrot.slane %v17087_v20, 5 }
 0x435   : > { %13256 = vmatprep.mubr.msk.bf16.mxu1 %vm7299_vm11, %v12148_v26  ;;  %v7905_v26 = vrot.slane %v7903_v46, 4 }
 0x437   : > { %v17252_v10 = vsel %vm14934_vm1, %v7905_v26, %v7906_v38  ;;  %v7919_v26 = vrot.slane %v7917_v50, 4  ;;  %v7924_v38 = vrot.slane %v17094_v1, 5 }
 0x43c   : > { %13257 = vmatmul.mubr.msk.bf16.vlgmr.msra.gmra.mrb[0].mxu1 %vm7299_vm11, %v12149_v17  ;;  %v12189_v17 = vrot.slane %v7812_v3, 9 }
 0x43d   : > { %13289 = vmatpush3.bf16.msra.mxu1 %v16925_v24  ;;  %13260 = vmatprep.mubr.msk.bf16.mxu1 %vm7299_vm11, %v12150_v53  ;;  %v7910_v24 = vrot.slane %v17056_v9, 5  ;;  %v17248_v53 = vsel %vm14934_vm1, %v12188_v31, %v7903_v46  ;;  %v7815_v46 = vld [vmem:[#allocation3 + $0x84] sm:$0xe]  ;;  %v17264_v31 = vsel %vm14934_vm1, %v12190_v39, %v7917_v50  ;;  %v17278_v39 = vsel %vm14934_vm1, %v7919_v26, %v7920_v59  ;;  %v7804_v9 = vld [vmem:[#allocation3] sm:$0xe] }
 0x43e   : > { %13322 = vmatprep.subr.bf16.mxu1 %v17228_v37  ;;  %v7926_v50 = vrot.slane %v7924_v38, 4  ;;  %v12192_v20 = vrot.slane %v7815_v46, 9  ;;  %v17289_v26 = vsel %vm14934_vm1, %v12191_v43, %v7924_v38  ;;  %v12193_v59 = vrot.slane %v7816_v42, 9  ;;  %v7818_v38 = vld [vmem:[#allocation3 + $0xa8] sm:$0xe] }
 0x43f   : > { %v17259_v60 = vsel %vm14934_vm1, %v12189_v17, %v7910_v24  ;;  %v7912_v3 = vrot.slane %v7910_v24, 4  ;;  %v7927_v17 = vrot.slane %v17097_v18, 5  ;;  %v7931_v24 = vrot.slane %v17105_v6, 5  ;;  %v7819_v42 = vld [vmem:[#allocation3 + $0xb4] sm:$0xe] }
 0x440   : > { %v7945_v43 = vrot.slane %v17142_v30, 5 }
 0x441   : > { %v17270_v27 = vsel %vm14934_vm1, %v7912_v3, %v7913_v23  ;;  %v12154_v23 = vcombine.low %v16997_v36, %v17003_v29  ;;  %v7933_v58 = vrot.slane %v7931_v24, 4  ;;  %v7934_v3 = vrot.slane %v17112_v28, 5 }
 0x442   : > { %v17293_v46 = vsel %vm14934_vm1, %v7926_v50, %v7927_v17  ;;  %v17297_v36 = vsel %vm14934_vm1, %v12192_v20, %v7931_v24  ;;  %v7941_v24 = vrot.slane %v17133_v49, 5  ;;  %v12194_v20 = vrot.slane %v7817_v0, 9 }
 0x443   : > { %v7947_v28 = vrot.slane %v7945_v43, 4  ;;  %v12195_v49 = vrot.slane %v7818_v38, 9  ;;  %v7959_v0 = vrot.slane %v17174_v15, 5 }
 0x444   : > { %13261 = vmatmul.mubr.msk.bf16.gmra.mrb[4].mxu1 %vm7299_vm11, %v12151_v32  ;;  %v7938_v32 = vrot.slane %v17118_v40, 5  ;;  %v17322_v17 = vsel %vm14934_vm1, %v12194_v20, %v7945_v43  ;;  %v7962_v43 = vrot.slane %v17181_v51, 5  ;;  %v7868_v40 = vrot.slane %v17230_v13, 5  ;;  %v7806_v20 = vld [vmem:[#allocation3 + $0x18] sm:$0xe] }
 0x445   : > { %13264 = vmatprep.mubr.msk.bf16.mxu1 %vm7299_vm11, %v12152_v55  ;;  %v17304_v55 = vsel %vm14934_vm1, %v7933_v58, %v7934_v3  ;;  %v7952_v58 = vrot.slane %v17159_v22, 5  ;;  %v17329_v2 = vsel %vm14934_vm1, %v7947_v28, %v7948_v62  ;;  %v7961_v34 = vrot.slane %v7959_v0, 4  ;;  %v14174_v13 = vld [vmem:[#allocation3 + $0x28] sm:$0xf] }
 0x446   : > { %v7940_v50 = vrot.slane %v7938_v32, 4  ;;  %v17312_v18 = vsel %vm14934_vm1, %v12193_v59, %v7938_v32 }
 0x447   : > { %v7954_v59 = vrot.slane %v7952_v58, 4  ;;  %v17341_v38 = vsel %vm14934_vm1, %v12195_v49, %v7952_v58  ;;  %v17356_v25 = vsel %vm14934_vm1, %v7961_v34, %v7962_v43  ;;  %v19135_v34 = vcombine.low %v17085_v47, %v17094_v1  ;;  %v14173_v58 = vld [vmem:[#allocation3 + $0x20] sm:$0x1] }
 0x448   : > { %v17318_v3 = vsel %vm14934_vm1, %v7940_v50, %v7941_v24  ;;  %v12196_v24 = vrot.slane %v7819_v42, 9  ;;  %v19138_v47 = vcombine.low %v17138_v56, %v17142_v30  ;;  %v19139_v1 = vcombine.low %v17154_v14, %v17159_v22  ;;  %v7805_v30 = vld [vmem:[#allocation3 + $0xc] sm:$0xe]  ;;  %v14172_v22 = vld [vmem:[#allocation3 + $0x14] sm:$0x1] }
 0x449   : > { %v17345_v62 = vsel %vm14934_vm1, %v7954_v59, %v7955_v57  ;;  %v19134_v57 = vcombine.low %v17070_v11, %v17082_v12  ;;  %v14171_v11 = vld [vmem:[#allocation3 + $0x8] sm:$0x1]  ;;  %v19140_v56 = vcombine.low %v17169_v16, %v17174_v15  ;;  %v7870_v14 = vrot.slane %v7868_v40, 4  ;;  %v14175_v15 = vld [vmem:[#allocation3 + $0x34] sm:$0xf] }
 0x44a   : > { %v17352_v51 = vsel %vm14934_vm1, %v12196_v24, %v7959_v0  ;;  %v7857_v12 = vrot.slane %v14171_v11, 5  ;;  %v7864_v28 = vrot.slane %v14172_v22, 5  ;;  %v7871_v42 = vrot.slane %v14173_v58, 5  ;;  %v7810_v58 = vld [vmem:[#allocation3 + $0x48] sm:$0xe] }
 0x44b   : > { %v12182_v49 = vrot.slane %v7805_v30, 9  ;;  %v7875_v0 = vrot.slane %v14174_v13, 5  ;;  %v12183_v59 = vrot.slane %v7806_v20, 9  ;;  %v7882_v24 = vrot.slane %v14175_v15, 5  ;;  %v17594_v50 = vld [vmem:[#allocation3 + $0xac] sm:$0xf] }
 0x44c   : > { %13265 = vmatmul.mubr.msk.bf16.gmra.mrb[8].mxu1 %vm7299_vm11, %v12153_v54  ;;  %v7872_v16 = vsel %vm14934_vm1, %v7870_v14, %v7871_v42 }
 0x44d   : > { %13268 = vmatprep.mubr.msk.bf16.mxu1 %vm7299_vm11, %v12154_v23  ;;  %v7863_v23 = vrot.slane %v7861_v8, 4  ;;  %v7862_v43 = vsel %vm14934_vm1, %v12182_v49, %v7861_v8  ;;  %v7884_v11 = vrot.slane %v7882_v24, 4  ;;  %v7889_v8 = vrot.slane %v16992_v45, 5 }
 0x44e   : > { %v7892_v45 = vrot.slane %v17001_v41, 5  ;;  %v17445_v41 = vld [vmem:[#allocation3 + $0x28] sm:$0xf] }
 0x44f   : > { %v7865_v48 = vsel %vm14934_vm1, %v7863_v23, %v7864_v28  ;;  %v7891_v22 = vrot.slane %v7889_v8, 4  ;;  %v7809_v28 = vld [vmem:[#allocation3 + $0x3c] sm:$0xe] }
 0x450   : > { %v12186_v42 = vrot.slane %v7809_v28, 9 }
 0x451   : > { %v7893_v49 = vsel %vm14934_vm1, %v7891_v22, %v7892_v45  ;;  %v17490_v22 = vld [vmem:[#allocation3 + $0x5c] sm:$0x1] }
 0x454   : > { %13269 = vmatmul.mubr.msk.bf16.gmra.mrb[12].mxu1 %vm7299_vm11, %v12155_v19  ;;  %v12181_v19 = vrot.slane %v7804_v9, 9  ;;  %v7807_v9 = vld [vmem:[#allocation3 + $0x24] sm:$0xe] }
 0x455   : > { %13272 = vmatprep.mubr.msk.bf16.mxu1 %vm7299_vm11, %v12156_v63  ;;  %v7856_v63 = vrot.slane %v7854_v33, 4 }
 0x456   : > { %v7855_v5 = vsel %vm14934_vm1, %v12181_v19, %v7854_v33  ;;  %v7877_v33 = vrot.slane %v7875_v0, 4 }
 0x457   : > { %v7858_v6 = vsel %vm14934_vm1, %v7856_v63, %v7857_v12  ;;  %v14176_v12 = vld [vmem:[#allocation3 + $0x2c] sm:$0x1]  ;;  %v7808_v63 = vld [vmem:[#allocation3 + $0x30] sm:$0xe] }
 0x458   : > { %v12199_v21 = vcombine.low %v7855_v5, %v7858_v6  ;;  %v7878_v19 = vrot.slane %v14176_v12, 5  ;;  %v12184_v5 = vrot.slane %v7807_v9, 9  ;;  %v19141_v9 = vcombine.low %v17248_v53, %v17252_v10  ;;  %v17468_v53 = vld [vmem:[#allocation3 + $0x44] sm:$0x1]  ;;  %v17470_v10 = vld [vmem:[#allocation3 + $0x50] sm:$0x1] }
 0x45a   : > { %v7879_v6 = vsel %vm14934_vm1, %v7877_v33, %v7878_v19  ;;  %v7876_v23 = vsel %vm14934_vm1, %v12184_v5, %v7875_v0  ;;  %v7890_v0 = vsel %vm14934_vm1, %v12186_v42, %v7889_v8  ;;  %v9359_v33 = vld [vmem:[#allocation3 + $0x48] sm:$0xe]  ;;  %v17499_v42 = vld [vmem:[#allocation3 + $0x68] sm:$0x1] }
 0x45b   : > { %v12307_v45 = vrot.slane %v9359_v33, 9  ;;  %v17514_v33 = vld [vmem:[#allocation3 + $0x70] sm:$0xf] }
 0x45c   : > { %13273 = vmatmul.mubr.msk.bf16.gmra.mrb[16].mxu1 %vm7299_vm11, %v19134_v57  ;;  %v12200_v57 = vcombine.low %v7862_v43, %v7865_v48  ;;  %v12187_v48 = vrot.slane %v7810_v58, 9  ;;  %v17449_v43 = vld [vmem:[#allocation3 + $0x2c] sm:$0x1] }
 0x45d   : > { %13276 = vmatprep.mubr.msk.bf16.mxu1 %vm7299_vm11, %v19135_v34  ;;  %v7869_v34 = vsel %vm14934_vm1, %v12183_v59, %v7868_v40  ;;  %v12185_v40 = vrot.slane %v7808_v63, 9  ;;  %v12204_v59 = vcombine.low %v7890_v0, %v7893_v49  ;;  %v9358_v63 = vld [vmem:[#allocation3 + $0x3c] sm:$0xe]  ;;  %v9451_v0 = vrot.slane %v17468_v53, 5 }
 0x45f   : > { %v7883_v30 = vsel %vm14934_vm1, %v12185_v40, %v7882_v24  ;;  %v9356_v24 = vld [vmem:[#allocation3 + $0x24] sm:$0xe] }
 0x460   : > { %v12304_v12 = vrot.slane %v9356_v24, 9  ;;  %v9458_v24 = vrot.slane %v17470_v10, 5 }
 0x464   : > { %13277 = vmatmul.mubr.msk.bf16.gmra.mrb[20].mxu1 %vm7299_vm11, %v19136_v52  ;;  %v17415_v52 = vld [vmem:[%s18688_s4 + $0x20] sm:$0xff]  }
 0x465   : > { %13280 = vmatprep.mubr.msk.bf16.mxu1 %vm7299_vm11, %v19137_v61  ;;  %v12201_v61 = vcombine.low %v7869_v34, %v7872_v16  ;;  %v17451_v34 = vld [vmem:[#allocation3 + $0x38] sm:$0x1] }
 0x46c   : > { %13281 = vmatmul.mubr.msk.bf16.gmra.mrb[24].mxu1 %vm7299_vm11, %v19138_v47  ;;  %v14177_v47 = vld [vmem:[#allocation3 + $0x38] sm:$0x1] }
 0x46d   : > { %13284 = vmatprep.mubr.msk.bf16.mxu1 %vm7299_vm11, %v19139_v1  ;;  %v7885_v1 = vrot.slane %v14177_v47, 5  ;;  %v19142_v47 = vcombine.low %v17259_v60, %v17270_v27  ;;  %v17477_v27 = vld [vmem:[#allocation3 + $0x58] sm:$0xf]  ;;  %v17479_v60 = vld [vmem:[#allocation3 + $0x64] sm:$0xf] }
 0x474   : > { %13285 = vmatmul.mubr.msk.bf16.gmra.mrb[28].mxu1 %vm7299_vm11, %v19140_v56  ;;  %v12202_v56 = vcombine.low %v7876_v23, %v7879_v6  ;;  %v9437_v6 = vrot.slane %v17449_v43, 5 }
 0x475   : > { %13290 = vmatprep.mubr.msk.bf16.mxu1 %vm7299_vm11, %v12199_v21  ;;  %v7886_v21 = vsel %vm14934_vm1, %v7884_v11, %v7885_v1  ;;  %v17458_v11 = vld [vmem:[#allocation3 + $0x40] sm:$0xf]  ;;  %v17465_v1 = vld [vmem:[#allocation3 + $0x4c] sm:$0xf] }
 0x476   : > { %v12203_v14 = vcombine.low %v7883_v30, %v7886_v21  ;;  %v12306_v30 = vrot.slane %v9358_v63, 9  ;;  %v9455_v58 = vrot.slane %v17465_v1, 5  ;;  %v9469_v63 = vrot.slane %v17479_v60, 5 }
 0x47c   : > { %13291 = vmatmul.mubr.msk.bf16.vlgmr.msra.gmra.mrb[0].mxu1 %vm7299_vm11, %v12200_v57  ;;  %v9357_v57 = vld [vmem:[#allocation3 + $0x30] sm:$0xe] }
 0x47d   : > { %13323 = vmatpush3.bf16.msra.mxu1 %v17228_v37  ;;  %13294 = vmatprep.mubr.msk.bf16.mxu1 %vm7299_vm11, %v12201_v61  ;;  %v7896_v37 = vrot.slane %v17003_v29, 5  ;;  %v7899_v29 = vrot.slane %v17005_v7, 5  ;;  %v17447_v7 = vld [vmem:[#allocation3 + $0x34] sm:$0xf]  ;;  %v9434_v61 = vrot.slane %v17445_v41, 5  ;;  %v12305_v8 = vrot.slane %v9357_v57, 9 }
 0x47e   : > { %13356 = vmatprep.subr.bf16.mxu1 %v17415_v52  ;;  %v9441_v19 = vrot.slane %v17447_v7, 5  ;;  %v9462_v57 = vrot.slane %v17477_v27, 5 }
 0x47f   : > { %v7898_v20 = vrot.slane %v7896_v37, 4  ;;  %v7897_v16 = vsel %vm14934_vm1, %v12187_v48, %v7896_v37  ;;  %v9436_v5 = vrot.slane %v9434_v61, 4  ;;  %v17474_v40 = vsel %vm14934_vm1, %v12304_v12, %v9434_v61  ;;  %v9362_v61 = vld [vmem:[#allocation3 + $0x6c] sm:$0xe] }
 0x480   : > { %19143 = vst [vmem:[#allocation63_spill] sm:$0xff] %v17474_v40  ;;  %v9443_v21 = vrot.slane %v9441_v19, 4  ;;  %v9444_v37 = vrot.slane %v17451_v34, 5 }
 0x481   : > { %v7900_v13 = vsel %vm14934_vm1, %v7898_v20, %v7899_v29  ;;  %v17483_v23 = vsel %vm14934_vm1, %v9436_v5, %v9437_v6  ;;  %v9360_v29 = vld [vmem:[#allocation3 + $0x54] sm:$0xe]  ;;  %v17526_v5 = vld [vmem:[#allocation3 + $0x7c] sm:$0xf]  ;;  %v9365_v6 = vld [vmem:[#allocation3 + $0x90] sm:$0xe] }
 0x482   : > { %v12205_v15 = vcombine.low %v7897_v16, %v7900_v13  ;;  %19144 = vst [vmem:[#allocation26_spill] sm:$0xff] %v17483_v23  ;;  %v17496_v20 = vsel %vm14934_vm1, %v9443_v21, %v9444_v37  ;;  %v17510_v16 = vsel %vm14934_vm1, %v12307_v45, %v9455_v58  ;;  %v12308_v12 = vrot.slane %v9360_v29, 9 }
 0x483   : > { %19146 = vst [vmem:[#allocation36_spill] sm:$0xff] %v17496_v20  ;;  %19148 = vst [vmem:[#allocation5_spill] sm:$0xff] %v17510_v16  ;;  %v9464_v21 = vrot.slane %v9462_v57, 4  ;;  %v9471_v29 = vrot.slane %v9469_v63, 4  ;;  %v14115_v16 = vld [vmem:[#allocation3 + $0x6c] sm:$0xff]  }
 0x484   : > { %13295 = vmatmul.mubr.msk.bf16.gmra.mrb[4].mxu1 %vm7299_vm11, %v12202_v56  ;;  %v17487_v56 = vsel %vm14934_vm1, %v12305_v8, %v9441_v19  ;;  %v9465_v19 = vrot.slane %v17490_v22, 5 }
 0x485   : > { %13298 = vmatprep.mubr.msk.bf16.mxu1 %vm7299_vm11, %v12203_v14  ;;  %19145 = vst [vmem:[#allocation61_spill] sm:$0xff] %v17487_v56  ;;  %v9448_v14 = vrot.slane %v17458_v11, 5 }
 0x487   : > { %v17505_v48 = vsel %vm14934_vm1, %v12306_v30, %v9448_v14  ;;  %v9450_v13 = vrot.slane %v9448_v14, 4  ;;  %v9363_v30 = vld [vmem:[#allocation3 + $0x78] sm:$0xe]  ;;  %v19152_v14 = vcombine.low %v17289_v26, %v17293_v46  ;;  %v17555_v26 = vsel %vm14934_vm1, %v9464_v21, %v9465_v19  ;;  %v9364_v21 = vld [vmem:[#allocation3 + $0x84] sm:$0xe] }
 0x488   : > { %19147 = vst [vmem:[#allocation38_spill] sm:$0xff] %v17505_v48  ;;  %19154 = vst [vmem:[#allocation14_spill] sm:$0xff] %v17555_v26  ;;  %v9483_v19 = vrot.slane %v17526_v5, 5 }
 0x48c   : > { %13299 = vmatmul.mubr.msk.bf16.gmra.mrb[8].mxu1 %vm7299_vm11, %v12204_v59  ;;  %v9361_v59 = vld [vmem:[#allocation3 + $0x60] sm:$0xe] }
 0x48d   : > { %13302 = vmatprep.mubr.msk.bf16.mxu1 %vm7299_vm11, %v12205_v15  ;;  %v9457_v15 = vrot.slane %v9455_v58, 4  ;;  %v12309_v37 = vrot.slane %v9361_v59, 9  ;;  %v17546_v58 = vsel %vm14934_vm1, %v12308_v12, %v9462_v57  ;;  %v17551_v59 = vld [vmem:[#allocation3 + $0x94] sm:$0xf]  ;;  %v17562_v57 = vld [vmem:[#allocation3 + $0x8c] sm:$0x1] }
 0x48e   : > { %19153 = vst [vmem:[#allocation13_spill] sm:$0xff] %v17546_v58  ;;  %v17578_v12 = vld [vmem:[#allocation3 + $0x98] sm:$0x1]  ;;  %v9493_v28 = vrot.slane %v17562_v57, 5  ;;  %v9497_v54 = vrot.slane %v17551_v59, 5 }
 0x48f   : > { %v17532_v8 = vsel %vm14934_vm1, %v9457_v15, %v9458_v24  ;;  %v17559_v46 = vsel %vm14934_vm1, %v12309_v37, %v9469_v63  ;;  %v12310_v15 = vrot.slane %v9362_v61, 9  ;;  %v9476_v24 = vrot.slane %v17514_v33, 5  ;;  %v17586_v63 = vld [vmem:[#allocation3 + $0xa0] sm:$0xf] }
 0x490   : > { %19151 = vst [vmem:[#allocation39_spill] sm:$0xff] %v17532_v8  ;;  %19155 = vst [vmem:[#allocation15_spill] sm:$0xff] %v17559_v46  ;;  %v9366_v46 = vld [vmem:[#allocation3 + $0x9c] sm:$0xe] }
 0x491   : > { %v17575_v61 = vsel %vm14934_vm1, %v12310_v15, %v9476_v24  ;;  %v9478_v37 = vrot.slane %v9476_v24, 4  ;;  %v12312_v24 = vrot.slane %v9364_v21, 9  ;;  %v17606_v21 = vld [vmem:[#allocation3 + $0xa4] sm:$0x1] }
 0x492   : > { %19157 = vst [vmem:[#allocation18_spill] sm:$0xff] %v17575_v61 }
 0x494   : > { %13303 = vmatmul.mubr.msk.bf16.gmra.mrb[12].mxu1 %vm7299_vm11, %v19141_v9  ;;  %v17518_v9 = vsel %vm14934_vm1, %v9450_v13, %v9451_v0  ;;  %v9472_v13 = vrot.slane %v17499_v42, 5  ;;  %v17549_v0 = vld [vmem:[#allocation3 + $0x88] sm:$0xf] }
 0x495   : > { %13306 = vmatprep.mubr.msk.bf16.mxu1 %vm7299_vm11, %v19142_v47  ;;  %19149 = vst [vmem:[#allocation37_spill] sm:$0xff] %v17518_v9  ;;  %v19150_v47 = vcombine.low %v17264_v31, %v17278_v39  ;;  %v17538_v31 = vld [vmem:[#allocation3 + $0x74] sm:$0x1]  ;;  %v17540_v39 = vld [vmem:[#allocation3 + $0x80] sm:$0x1]  ;;  %v9490_v49 = vrot.slane %v17549_v0, 5 }
 0x496   : > { %v9479_v45 = vrot.slane %v17538_v31, 5 }
 0x497   : > { %v9492_v32 = vrot.slane %v9490_v49, 4 }
 0x498   : > { %v17590_v15 = vsel %vm14934_vm1, %v9478_v37, %v9479_v45  ;;  %v19161_v45 = vcombine.low %v17297_v36, %v17304_v55  ;;  %v17608_v37 = vld [vmem:[#allocation3 + $0xb0] sm:$0x1]  ;;  %v17619_v36 = vld [vmem:[#allocation3 + $0xc4] sm:$0xf]  ;;  %v17623_v55 = vsel %vm14934_vm1, %v12312_v24, %v9490_v49  ;;  %v12314_v49 = vrot.slane %v9366_v46, 9 }
 0x499   : > { %19159 = vst [vmem:[#allocation22_spill] sm:$0xff] %v17590_v15  ;;  %v9500_v15 = vrot.slane %v17578_v12, 5  ;;  %19163 = vst [vmem:[#allocation7_spill] sm:$0xff] %v17623_v55  ;;  %v9511_v24 = vrot.slane %v17594_v50, 5 }
 0x49c   : > { %13307 = vmatmul.mubr.msk.bf16.gmra.mrb[16].mxu1 %vm7299_vm11, %v19150_v47  ;;  %v17568_v47 = vsel %vm14934_vm1, %v9471_v29, %v9472_v13  ;;  %v9486_v13 = vrot.slane %v17540_v39, 5 }
 0x49d   : > { %13310 = vmatprep.mubr.msk.bf16.mxu1 %vm7299_vm11, %v19152_v14  ;;  %19156 = vst [vmem:[#allocation8_spill] sm:$0xff] %v17568_v47  ;;  %v12311_v14 = vrot.slane %v9363_v30, 9  ;;  %v9485_v30 = vrot.slane %v9483_v19, 4  ;;  %v12313_v47 = vrot.slane %v9365_v6, 9  ;;  %v17617_v6 = vld [vmem:[#allocation3 + $0xb8] sm:$0xf] }
 0x49e   : > { %v9518_v46 = vrot.slane %v17617_v6, 5 }
 0x49f   : > { %v17582_v29 = vsel %vm14934_vm1, %v12311_v14, %v9483_v19  ;;  %v17600_v19 = vsel %vm14934_vm1, %v9485_v30, %v9486_v13  ;;  %v9499_v14 = vrot.slane %v9497_v54, 4  ;;  %v19162_v30 = vcombine.low %v17312_v18, %v17318_v3  ;;  %v8671_v3 = vld [vmem:[#allocation3 + $0xc8] sm:$0x1] }
 0x4a0   : > { %19158 = vst [vmem:[#allocation20_spill] sm:$0xff] %v17582_v29  ;;  %19160 = vst [vmem:[#allocation10_spill] sm:$0xff] %v17600_v19  ;;  %v17627_v13 = vsel %vm14934_vm1, %v9492_v32, %v9493_v28  ;;  %v9504_v18 = vrot.slane %v17586_v63, 5  ;;  %v9368_v19 = vld [vmem:[#allocation3 + $0xb4] sm:$0xe]  ;;  %v12315_v29 = vrot.slane %v9367_v35, 9 }
 0x4a1   : > { %19164 = vst [vmem:[#allocation23_spill] sm:$0xff] %v17627_v13  ;;  %v17638_v26 = vsel %vm14934_vm1, %v9499_v14, %v9500_v15  ;;  %v17641_v32 = vld [vmem:[#allocation3 + $0xbc] sm:$0x1]  ;;  %v9513_v13 = vrot.slane %v9511_v24, 4  ;;  %v9514_v15 = vrot.slane %v17608_v37, 5  ;;  %v9525_v35 = vrot.slane %v17619_v36, 5 }
 0x4a2   : > { %19166 = vst [vmem:[#allocation9_spill] sm:$0xff] %v17638_v26  ;;  %v9506_v28 = vrot.slane %v9504_v18, 4  ;;  %v9369_v14 = vld [vmem:[#allocation3 + $0xc0] sm:$0xe]  ;;  %v12316_v26 = vrot.slane %v9368_v19, 9  ;;  %v9521_v61 = vrot.slane %v17641_v32, 5  ;;  %v19171_v19 = vcombine.low %v17322_v17, %v17329_v2 }
 0x4a3   : > { %v9527_v58 = vrot.slane %v9525_v35, 4 }
 0x4a4   : > { %13311 = vmatmul.mubr.msk.bf16.gmra.mrb[20].mxu1 %vm7299_vm11, %v19161_v45  ;;  %v17631_v45 = vsel %vm14934_vm1, %v12313_v47, %v9497_v54  ;;  %v9507_v47 = vrot.slane %v17606_v21, 5  ;;  %v17658_v54 = vsel %vm14934_vm1, %v12315_v29, %v9511_v24  ;;  %v9528_v29 = vrot.slane %v8671_v3, 5 }
 0x4a5   : > { %13314 = vmatprep.mubr.msk.bf16.mxu1 %vm7299_vm11, %v19162_v30  ;;  %19165 = vst [vmem:[#allocation11_spill] sm:$0xff] %v17631_v45  ;;  %v17648_v30 = vsel %vm14934_vm1, %v12314_v49, %v9504_v18  ;;  %19169 = vst [vmem:[#allocation19_spill] sm:$0xff] %v17658_v54  ;;  %v17665_v49 = vsel %vm14934_vm1, %v9513_v13, %v9514_v15  ;;  %v9520_v45 = vrot.slane %v9518_v46, 4 }
 0x4a6   : > { %19167 = vst [vmem:[#allocation12_spill] sm:$0xff] %v17648_v30  ;;  %v17654_v55 = vsel %vm14934_vm1, %v9506_v28, %v9507_v47  ;;  %19170 = vst [vmem:[#allocation24_spill] sm:$0xff] %v17665_v49  ;;  %v12317_v47 = vrot.slane %v9369_v14, 9  ;;  %v17676_v24 = vsel %vm14934_vm1, %v12316_v26, %v9518_v46  ;;  %v19174_v15 = vcombine.low %v17341_v38, %v17345_v62  ;;  %v14108_v62 = vld [vmem:[#allocation3 + $0x18] sm:$0xff]   ;;  %v14109_v46 = vld [vmem:[#allocation3 + $0x24] sm:$0xff]  }
 0x4a7   : > { %19168 = vst [vmem:[#allocation16_spill] sm:$0xff] %v17654_v55  ;;  %19172 = vst [vmem:[#allocation21_spill] sm:$0xff] %v17676_v24  ;;  %v17680_v13 = vsel %vm14934_vm1, %v9520_v45, %v9521_v61  ;;  %v17694_v2 = vsel %vm14934_vm1, %v9527_v58, %v9528_v29  ;;  %v14106_v61 = vld [vmem:[#allocation3 + $0xc] sm:$0xff]   ;;  %v19177_v38 = vcombine.low %v17352_v51, %v17356_v25  ;;  %v17716_v29 = vld [vmem:[#allocation3 + $0x1c] sm:$0xf] }
 0x4a8   : > { %19173 = vst [vmem:[#allocation27_spill] sm:$0xff] %v17680_v13  ;;  %v17690_v17 = vsel %vm14934_vm1, %v12317_v47, %v9525_v35  ;;  %19176 = vst [vmem:[#allocation30_spill] sm:$0xff] %v17694_v2  ;;  %v17706_v45 = vld [vmem:[%s18688_s4 + $0x28] sm:$0xff]   ;;  %v8624_v51 = vld [vmem:[#allocation3 + $0xc] sm:$0xf]  ;;  %v8706_v26 = vshll.u32 %v17716_v29, 16 }
 0x4a9   : > { %19175 = vst [vmem:[#allocation28_spill] sm:$0xff] %v17690_v17  ;;  %v17711_v58 = vld [vmem:[#allocation3 + $0x10] sm:$0xf]  ;;  %v8627_v35 = vld [vmem:[#allocation3 + $0x18] sm:$0xf]  ;;  %19178 = vst [vmem:[#allocation29_spill] sm:$0xff] %v17716_v29 }
 0x4aa   : > { %v8682_v25 = vshll.u32 %v17711_v58, 16  ;;  %v8686_v14 = vshrl.u32 %v17711_v58, 16  ;;  %v14110_v47 = vld [vmem:[#allocation3 + $0x30] sm:$0xff]   ;;  %v8710_v3 = vshrl.u32 %v17716_v29, 16  ;;  %v8630_v2 = vld [vmem:[#allocation3 + $0x24] sm:$0xf] }
 0x4ab   : > { %v17722_v17 = vld [vmem:[#allocation3 + $0x14] sm:$0x1]  ;;  %v17724_v49 = vrot.slane %v8706_v26, 5  ;;  %v8721_v54 = vshrl.u32 %v8630_v2, 16  ;;  %v17908_v29 = vld [vmem:[#allocation3 + $0x5c] sm:$0x1] }
 0x4ac   : > { %13315 = vmatmul.mubr.msk.bf16.gmra.mrb[24].mxu1 %vm7299_vm11, %v19171_v19  ;;  %v14111_v19 = vld [vmem:[#allocation3 + $0x3c] sm:$0xff]   ;;  %19179 = vst [vmem:[#allocation31_spill] sm:$0xff] %v17722_v17  ;;  %v8692_v55 = vshll.u32 %v17722_v17, 16  ;;  %19196 = vst [vmem:[#allocation51_spill] sm:$0xff] %v17908_v29  ;;  %v17922_v17 = vld [vmem:[#allocation3 + $0x68] sm:$0x1] }
 0x4ad   : > { %13318 = vmatprep.mubr.msk.bf16.mxu1 %vm7299_vm11, %v19174_v15  ;;  %v8673_v15 = vshrl.u32 %v8624_v51, 16  ;;  %v8723_v26 = vrot.slane %v8721_v54, 4  ;;  %19199 = vst [vmem:[#allocation54_spill] sm:$0xff] %v17922_v17 }
 0x4af   : > { %v8675_v28 = vrot.slane %v8673_v15, 4  ;;  %v17728_v15 = vld [vmem:[#allocation3 + $0x20] sm:$0x1] }
 0x4b0   : > { %19180 = vst [vmem:[#allocation32_spill] sm:$0xff] %v17728_v15 }
 0x4b4   : > { %13319 = vmatmul.mubr.msk.bf16.gmra.mrb[28].mxu1 %vm7299_vm11, %v19177_v38  ;;  %v8700_v38 = vshll.u32 %v8627_v35, 16 }
 0x4b5   : > { %13324 = vmatprep.mubr.msk.bf16.mxu1 %vm7299_vm11, %v14106_v61  ;;  %v8676_v61 = vshll.u32 %v8624_v51, 16 }
 0x4b6   : > { %v8702_v24 = vrot.slane %v8700_v38, 5 }
 0x4b7   : > { %v8678_v18 = vrot.slane %v8676_v61, 5 }
 0x4bc   : > { %13325 = vmatmul.mubr.msk.bf16.vlgmr.msra.gmra.mrb[0].mxu1 %vm7299_vm11, %v14108_v62  ;;  %v8684_v62 = vrot.slane %v8682_v25, 5  ;;  %v14113_v25 = vld [vmem:[#allocation3 + $0x54] sm:$0xff]  }
 0x4bd   : > { %13357 = vmatpush3.bf16.msra.mxu1 %v17415_v52  ;;  %13328 = vmatprep.mubr.msk.bf16.mxu1 %vm7299_vm11, %v14109_v46  ;;  %v8697_v52 = vshrl.u32 %v8627_v35, 16  ;;  %v8688_v46 = vrot.slane %v8686_v14, 4  ;;  %v14112_v35 = vld [vmem:[#allocation3 + $0x48] sm:$0xff]   ;;  %v8679_v14 = vor.u32 %v8678_v18, %v8675_v28  ;;  %v8694_v18 = vrot.slane %v8692_v55, 5 }
 0x4be   : > { %13390 = vmatprep.subr.bf16.mxu1 %v17706_v45  ;;  %v8716_v28 = vshll.u32 %v17728_v15, 16 }
 0x4bf   : > { %v8699_v13 = vrot.slane %v8697_v52, 4  ;;  %v8689_v51 = vor.u32 %v8688_v46, %v8684_v62  ;;  %v8680_v30 = vrot.slane %v8679_v14, 4 }
 0x4c0   : > { %v8718_v55 = vrot.slane %v8716_v28, 5  ;;  %v8642_v28 = vld [vmem:[#allocation3 + $0x54] sm:$0xf] }
 0x4c1   : > { %v8703_v61 = vor.u32 %v8702_v24, %v8699_v13  ;;  %v8690_v52 = vrot.slane %v8689_v51, 4  ;;  %v8740_v51 = vshll.u32 %v17449_v43, 16  ;;  %v8820_v20 = vshll.u32 %v8642_v28, 16 }
 0x4c3   : > { %v8704_v8 = vrot.slane %v8703_v61, 4  ;;  %v8695_v24 = vsel %vm14684_vm15, %v8690_v52, %v8694_v18  ;;  %v8754_v52 = vshll.u32 %v17447_v7, 16  ;;  %v8822_v15 = vrot.slane %v8820_v20, 5 }
 0x4c4   : > { %13329 = vmatmul.mubr.msk.bf16.gmra.mrb[4].mxu1 %vm7299_vm11, %v14110_v47  ;;  %v8712_v47 = vrot.slane %v8710_v3, 4  ;;  %v8730_v3 = vshll.u32 %v17445_v41, 16 }
 0x4c5   : > { %13332 = vmatprep.mubr.msk.bf16.mxu1 %vm7299_vm11, %v14111_v19  ;;  %v8724_v19 = vshll.u32 %v8630_v2, 16  ;;  %v8734_v2 = vshrl.u32 %v17445_v41, 16  ;;  %v8685_v41 = vsel %vm14684_vm15, %v8680_v30, %v8684_v62  ;;  %v8709_v43 = vsel %vm14684_vm15, %v8704_v8, %v17724_v49 }
 0x4c6   : > { %v8713_v38 = vor.u32 %v8712_v47, %v17724_v49  ;;  %v17738_v54 = vrot.slane %v8730_v3, 5  ;;  %v17743_v61 = vcombine.low %v8685_v41, %v8695_v24  ;;  %v17753_v62 = vrot.slane %v8740_v51, 5 }
 0x4c7   : > { %v8726_v46 = vrot.slane %v8724_v19, 5  ;;  %v8736_v19 = vrot.slane %v8734_v2, 4  ;;  %v8782_v3 = vshrl.u32 %v17458_v11, 16  ;;  %v8639_v2 = vld [vmem:[#allocation3 + $0x48] sm:$0xf]  ;;  %v8802_v49 = vshll.u32 %v17465_v1, 16 }
 0x4c8   : > { %v8714_v13 = vrot.slane %v8713_v38, 4  ;;  %v8758_v38 = vshrl.u32 %v17447_v7, 16  ;;  %v8806_v7 = vshrl.u32 %v17465_v1, 16  ;;  %v8793_v41 = vshrl.u32 %v8639_v2, 16 }
 0x4c9   : > { %v8727_v47 = vor.u32 %v8726_v46, %v8723_v26  ;;  %v8636_v26 = vld [vmem:[#allocation3 + $0x3c] sm:$0xf]  ;;  %v8778_v46 = vshll.u32 %v17458_v11, 16  ;;  %v8737_v8 = vor.u32 %v8736_v19, %v17738_v54  ;;  %v8784_v11 = vrot.slane %v8782_v3, 4 }
 0x4ca   : > { %v8719_v30 = vsel %vm14684_vm15, %v8714_v13, %v8718_v55  ;;  %v8769_v24 = vshrl.u32 %v8636_v26, 16  ;;  %v17760_v13 = vrot.slane %v8754_v52, 5  ;;  %v8760_v51 = vrot.slane %v8758_v38, 4  ;;  %v14116_v19 = vld [vmem:[#allocation3 + $0x78] sm:$0xff]  }
 0x4cb   : > { %v8728_v18 = vrot.slane %v8727_v47, 4  ;;  %v8796_v55 = vshll.u32 %v8639_v2, 16  ;;  %v17762_v48 = vrot.slane %v8778_v46, 5  ;;  %v8817_v47 = vshrl.u32 %v8642_v28, 16 }
 0x4cc   : > { %13333 = vmatmul.mubr.msk.bf16.gmra.mrb[8].mxu1 %vm7299_vm11, %v14112_v35  ;;  %v8633_v35 = vld [vmem:[#allocation3 + $0x30] sm:$0xf]  ;;  %v17764_v56 = vrot.slane %v8802_v49, 5  ;;  %v8808_v23 = vrot.slane %v8806_v7, 4  ;;  %v8826_v1 = vshll.u32 %v17477_v27, 16  ;;  %v8771_v40 = vrot.slane %v8769_v24, 4 }
 0x4cd   : > { %13336 = vmatprep.mubr.msk.bf16.mxu1 %vm7299_vm11, %v14113_v25  ;;  %v14114_v25 = vld [vmem:[#allocation3 + $0x60] sm:$0xff]   ;;  %v8745_v14 = vshrl.u32 %v8633_v35, 16  ;;  %v8748_v9 = vshll.u32 %v8633_v35, 16  ;;  %v8761_v46 = vor.u32 %v8760_v51, %v17760_v13  ;;  %v8764_v3 = vshll.u32 %v17451_v34, 16 }
 0x4ce   : > { %v8795_v2 = vrot.slane %v8793_v41, 4  ;;  %v8798_v28 = vrot.slane %v8796_v55, 5  ;;  %v17772_v49 = vcombine.low %v8709_v43, %v8719_v30  ;;  %v8785_v7 = vor.u32 %v8784_v11, %v17762_v48  ;;  %v8645_v34 = vld [vmem:[#allocation3 + $0x60] sm:$0xf] }
 0x4cf   : > { %v8747_v35 = vrot.slane %v8745_v14, 4  ;;  %v14117_v14 = vld [vmem:[#allocation3 + $0x84] sm:$0xff]   ;;  %v8788_v51 = vshll.u32 %v17468_v53, 16  ;;  %v8762_v41 = vrot.slane %v8761_v46, 4  ;;  %v8766_v20 = vrot.slane %v8764_v3, 5 }
 0x4d0   : > { %v8799_v55 = vor.u32 %v8798_v28, %v8795_v2  ;;  %v8812_v11 = vshll.u32 %v17470_v10, 16  ;;  %v8836_v3 = vshll.u32 %v17490_v22, 16  ;;  %v8648_v2 = vld [vmem:[#allocation3 + $0x6c] sm:$0xf] }
 0x4d2   : > { %v8814_v46 = vrot.slane %v8812_v11, 5  ;;  %v17830_v11 = vrot.slane %v8836_v3, 5  ;;  %v8898_v3 = vshll.u32 %v17526_v5, 16 }
 0x4d4   : > { %13337 = vmatmul.mubr.msk.bf16.gmra.mrb[12].mxu1 %vm7299_vm11, %v14114_v25  ;;  %v8772_v25 = vshll.u32 %v8636_v26, 16  ;;  %v8738_v26 = vrot.slane %v8737_v8, 4  ;;  %v8733_v8 = vsel %vm14684_vm15, %v8728_v18, %v17738_v54  ;;  %v8786_v54 = vrot.slane %v8785_v7, 4 }
 0x4d5   : > { %13340 = vmatprep.mubr.msk.bf16.mxu1 %vm7299_vm11, %v14115_v16  ;;  %v8750_v16 = vrot.slane %v8748_v9, 5  ;;  %v8830_v9 = vshrl.u32 %v17477_v27, 16  ;;  %v8819_v27 = vrot.slane %v8817_v47, 4  ;;  %v8844_v47 = vshll.u32 %v8645_v34, 16 }
 0x4d6   : > { %v8774_v38 = vrot.slane %v8772_v25, 5  ;;  %v8743_v25 = vsel %vm14684_vm15, %v8738_v26, %v17753_v62  ;;  %v8854_v62 = vshrl.u32 %v17479_v60, 16 }
 0x4d7   : > { %v8751_v52 = vor.u32 %v8750_v16, %v8747_v35  ;;  %v8809_v35 = vor.u32 %v8808_v23, %v17764_v56  ;;  %v17779_v16 = vrot.slane %v8826_v1, 5  ;;  %v8832_v24 = vrot.slane %v8830_v9, 4 }
 0x4d8   : > { %v8775_v30 = vor.u32 %v8774_v38, %v8771_v40  ;;  %v8823_v18 = vor.u32 %v8822_v15, %v8819_v27  ;;  %v8841_v23 = vshrl.u32 %v8645_v34, 16  ;;  %v14119_v40 = vld [vmem:[#allocation3 + $0x9c] sm:$0xff]   ;;  %v17789_v26 = vcombine.low %v8733_v8, %v8743_v25 }
 0x4d9   : > { %v8752_v43 = vrot.slane %v8751_v52, 4  ;;  %v8810_v1 = vrot.slane %v8809_v35, 4  ;;  %v8833_v9 = vor.u32 %v8832_v24, %v17779_v16  ;;  %v8790_v52 = vrot.slane %v8788_v51, 5  ;;  %v17815_v24 = vld [vmem:[#allocation3 + $0x1c] sm:$0xf] }
 0x4da   : > { %v8776_v10 = vrot.slane %v8775_v30, 4  ;;  %v8767_v15 = vsel %vm14684_vm15, %v8762_v41, %v8766_v20  ;;  %v8800_v38 = vrot.slane %v8799_v55, 4  ;;  %v17801_v28 = vrot.slane %v8823_v18, 4  ;;  %19181 = vst [vmem:[#allocation33_spill] sm:$0xff] %v17815_v24  ;;  %v17821_v51 = vld [vmem:[#allocation3 + $0x20] sm:$0x1] }
 0x4db   : > { %v8757_v53 = vsel %vm14684_vm15, %v8752_v43, %v17760_v13  ;;  %v17803_v13 = vrot.slane %v8841_v23, 4  ;;  %v17805_v7 = vrot.slane %v8844_v47, 5  ;;  %v8815_v27 = vsel %vm14684_vm15, %v8810_v1, %v8814_v46  ;;  %19182 = vst [vmem:[#allocation34_spill] sm:$0xff] %v17821_v51  ;;  %v10921_v18 = vld [vmem:[#allocation3 + $0x18] sm:$0xe] }
 0x4dc   : > { %13341 = vmatmul.mubr.msk.bf16.gmra.mrb[16].mxu1 %vm7299_vm11, %v14116_v19  ;;  %v14118_v19 = vld [vmem:[#allocation3 + $0x90] sm:$0xff]   ;;  %v17809_v8 = vrot.slane %v8833_v9, 4  ;;  %v17813_v22 = vrot.slane %v8854_v62, 4  ;;  %v8781_v34 = vsel %vm14684_vm15, %v8776_v10, %v17762_v48  ;;  %v8865_v25 = vshrl.u32 %v8648_v2, 16  ;;  %v17843_v1 = vld [vmem:[#allocation3 + $0x78] sm:$0xf] }
 0x4dd   : > { %13344 = vmatprep.mubr.msk.bf16.mxu1 %vm7299_vm11, %v14117_v14  ;;  %v8850_v14 = vshll.u32 %v17479_v60, 16  ;;  %v8791_v60 = vsel %vm14684_vm15, %v8786_v54, %v8790_v52  ;;  %v8868_v43 = vshll.u32 %v8648_v2, 16  ;;  %v8874_v30 = vshll.u32 %v17514_v33, 16  ;;  %v17832_v54 = vld [vmem:[#allocation3 + $0x28] sm:$0xf]  ;;  %v14121_v52 = vld [vmem:[#allocation3 + $0xb4] sm:$0xff]  }
 0x4de   : > { %v17823_v41 = vcombine.low %v8757_v53, %v8767_v15  ;;  %v17825_v20 = vcombine.low %v8781_v34, %v8791_v60  ;;  %v8805_v55 = vsel %vm14684_vm15, %v8800_v38, %v17764_v56  ;;  %19183 = vst [vmem:[#allocation35_spill] sm:$0xff] %v17832_v54  ;;  %v17845_v56 = vld [vmem:[#allocation3 + $0x2c] sm:$0x1]  ;;  %v17854_v53 = vld [vmem:[#allocation3 + $0x34] sm:$0xf]  ;;  %v10987_v10 = vrot.slane %v17815_v24, 5 }
 0x4df   : > { %v17811_v35 = vrot.slane %v8850_v14, 5  ;;  %v17834_v48 = vcombine.low %v8805_v55, %v8815_v27  ;;  %19184 = vst [vmem:[#allocation4_spill] sm:$0xff] %v17845_v56  ;;  %v14120_v9 = vld [vmem:[#allocation3 + $0xa8] sm:$0xff]   ;;  %19185 = vst [vmem:[#allocation40_spill] sm:$0xff] %v17854_v53  ;;  %v17857_v15 = vrot.slane %v8865_v25, 4  ;;  %v17859_v38 = vrot.slane %v8868_v43, 5 }
 0x4e0   : > { %v17861_v46 = vrot.slane %v8874_v30, 5  ;;  %v17865_v2 = vld [vmem:[#allocation3 + $0x38] sm:$0x1]  ;;  %v17867_v60 = vld [vmem:[#allocation3 + $0x40] sm:$0xf]  ;;  %v12423_v27 = vrot.slane %v10921_v18, 9 }
 0x4e1   : > { %19186 = vst [vmem:[#allocation42_spill] sm:$0xff] %v17865_v2  ;;  %19187 = vst [vmem:[#allocation41_spill] sm:$0xff] %v17867_v60  ;;  %v10989_v34 = vrot.slane %v10987_v10, 4  ;;  %v10990_v55 = vrot.slane %v17821_v51, 5  ;;  %v17876_v23 = vld [vmem:[#allocation3 + $0x44] sm:$0x1] }
 0x4e2   : > { %19188 = vst [vmem:[#allocation44_spill] sm:$0xff] %v17876_v23  ;;  %v10923_v14 = vld [vmem:[#allocation3 + $0x30] sm:$0xe]  ;;  %v17878_v62 = vld [vmem:[#allocation3 + $0x4c] sm:$0xf]  ;;  %v17882_v18 = vsel %vm14934_vm1, %v12423_v27, %v10987_v10  ;;  %v17889_v51 = vrot.slane %v8898_v3, 5 }
 0x4e3   : > { %19189 = vst [vmem:[#allocation43_spill] sm:$0xff] %v17878_v62  ;;  %19190 = vst [vmem:[#allocation45_spill] sm:$0xff] %v17882_v18  ;;  %v17886_v47 = vsel %vm14934_vm1, %v10989_v34, %v10990_v55  ;;  %v10924_v43 = vld [vmem:[#allocation3 + $0x3c] sm:$0xe]  ;;  %v11001_v10 = vrot.slane %v17854_v53, 5  ;;  %v12425_v3 = vrot.slane %v10923_v14, 9 }
 0x4e4   : > { %13345 = vmatmul.mubr.msk.bf16.gmra.mrb[20].mxu1 %vm7299_vm11, %v14118_v19  ;;  %v8878_v19 = vshrl.u32 %v17514_v33, 16  ;;  %v10922_v33 = vld [vmem:[#allocation3 + $0x24] sm:$0xe]  ;;  %19191 = vst [vmem:[#allocation46_spill] sm:$0xff] %v17886_v47  ;;  %v17897_v27 = vld [vmem:[#allocation3 + $0x58] sm:$0xf] }
 0x4e5   : > { %13348 = vmatprep.mubr.msk.bf16.mxu1 %vm7299_vm11, %v14119_v40  ;;  %v10994_v40 = vrot.slane %v17832_v54, 5  ;;  %19193 = vst [vmem:[#allocation50_spill] sm:$0xff] %v17897_v27  ;;  %v11008_v30 = vrot.slane %v17867_v60, 5  ;;  %v14122_v24 = vld [vmem:[#allocation3 + $0xc0] sm:$0xff]   ;;  %v11003_v47 = vrot.slane %v11001_v10, 4  ;;  %v11004_v18 = vrot.slane %v17865_v2, 5 }
 0x4e6   : > { %v17872_v25 = vrot.slane %v8878_v19, 4  ;;  %v12426_v53 = vrot.slane %v10924_v43, 9  ;;  %v17919_v14 = vsel %vm14934_vm1, %v12425_v3, %v11001_v10  ;;  %v10926_v60 = vld [vmem:[#allocation3 + $0x54] sm:$0xe]  ;;  %v17934_v10 = vld [vmem:[#allocation3 + $0x70] sm:$0xf] }
 0x4e7   : > { %v10996_v19 = vrot.slane %v10994_v40, 4  ;;  %19198 = vst [vmem:[#allocation53_spill] sm:$0xff] %v17919_v14  ;;  %v17926_v54 = vsel %vm14934_vm1, %v11003_v47, %v11004_v18  ;;  %19202 = vst [vmem:[#allocation56_spill] sm:$0xff] %v17934_v10  ;;  %v17936_v3 = vld [vmem:[#allocation3 + $0x74] sm:$0x1]  ;;  %v12428_v18 = vrot.slane %v10926_v60, 9 }
 0x4e8   : > { %19200 = vst [vmem:[#allocation55_spill] sm:$0xff] %v17926_v54  ;;  %v17930_v43 = vsel %vm14934_vm1, %v12426_v53, %v11008_v30  ;;  %19203 = vst [vmem:[#allocation59_spill] sm:$0xff] %v17936_v3  ;;  %v10928_v2 = vld [vmem:[#allocation3 + $0x6c] sm:$0xe] }
 0x4e9   : > { %19201 = vst [vmem:[#allocation58_spill] sm:$0xff] %v17930_v43  ;;  %v18001_v43 = vld [vmem:[#allocation3 + $0x98] sm:$0x1] }
 0x4ea   : > { %19212 = vst [vmem:[#allocation69_spill] sm:$0xff] %v18001_v43 }
 0x4ec   : > { %13349 = vmatmul.mubr.msk.bf16.gmra.mrb[24].mxu1 %vm7299_vm11, %v14120_v9  ;;  %v12424_v9 = vrot.slane %v10922_v33, 9  ;;  %v17892_v33 = vld [vmem:[#allocation3 + $0x50] sm:$0x1] }
 0x4ed   : > { %13352 = vmatprep.mubr.msk.bf16.mxu1 %vm7299_vm11, %v14121_v52  ;;  %v10997_v52 = vrot.slane %v17845_v56, 5  ;;  %19192 = vst [vmem:[#allocation47_spill] sm:$0xff] %v17892_v33  ;;  %v10925_v56 = vld [vmem:[#allocation3 + $0x48] sm:$0xe]  ;;  %v11018_v53 = vrot.slane %v17892_v33, 5 }
 0x4ee   : > { %v17901_v34 = vsel %vm14934_vm1, %v12424_v9, %v10994_v40  ;;  %v17915_v9 = vld [vmem:[#allocation3 + $0x64] sm:$0xf]  ;;  %v12427_v40 = vrot.slane %v10925_v56, 9  ;;  %v11022_v56 = vrot.slane %v17897_v27, 5  ;;  %v17958_v33 = vld [vmem:[#allocation3 + $0x80] sm:$0x1] }
 0x4ef   : > { %19194 = vst [vmem:[#allocation48_spill] sm:$0xff] %v17901_v34  ;;  %v17905_v55 = vsel %vm14934_vm1, %v10996_v19, %v10997_v52  ;;  %19197 = vst [vmem:[#allocation52_spill] sm:$0xff] %v17915_v9  ;;  %v11010_v19 = vrot.slane %v11008_v30, 4  ;;  %v11011_v52 = vrot.slane %v17876_v23, 5  ;;  %v10927_v34 = vld [vmem:[#allocation3 + $0x60] sm:$0xe] }
 0x4f0   : > { %19195 = vst [vmem:[#allocation49_spill] sm:$0xff] %v17905_v55  ;;  %v11015_v55 = vrot.slane %v17878_v62, 5  ;;  %v11025_v62 = vrot.slane %v17908_v29, 5  ;;  %v17951_v23 = vld [vmem:[#allocation3 + $0x7c] sm:$0xf]  ;;  %v12429_v54 = vrot.slane %v10927_v34, 9  ;;  %v17966_v60 = vsel %vm14934_vm1, %v12428_v18, %v11022_v56 }
 0x4f1   : > { %v17942_v47 = vsel %vm14934_vm1, %v11010_v19, %v11011_v52  ;;  %v11024_v52 = vrot.slane %v11022_v56, 4  ;;  %v11029_v14 = vrot.slane %v17915_v9, 5  ;;  %19207 = vst [vmem:[#allocation64_spill] sm:$0xff] %v17966_v60  ;;  %v10220_v34 = vld [vmem:[#allocation3 + $0x8c] sm:$0x1] }
 0x4f2   : > { %19204 = vst [vmem:[#allocation57_spill] sm:$0xff] %v17942_v47  ;;  %v11017_v30 = vrot.slane %v11015_v55, 4  ;;  %v17955_v19 = vsel %vm14934_vm1, %v12427_v40, %v11015_v55  ;;  %v11036_v47 = vrot.slane %v17934_v10, 5  ;;  %v10929_v55 = vld [vmem:[#allocation3 + $0x78] sm:$0xe]  ;;  %v11039_v10 = vrot.slane %v17936_v3, 5 }
 0x4f3   : > { %19205 = vst [vmem:[#allocation60_spill] sm:$0xff] %v17955_v19  ;;  %v17970_v40 = vld [vmem:[#allocation3 + $0x88] sm:$0xf]  ;;  %v17976_v29 = vsel %vm14934_vm1, %v11024_v52, %v11025_v62  ;;  %v17978_v9 = vld [vmem:[#allocation3 + $0x94] sm:$0xf]  ;;  %v17984_v18 = vsel %vm14934_vm1, %v12429_v54, %v11029_v14  ;;  %v17990_v62 = vld [vmem:[%s18688_s4 + $0x30] sm:$0xff]  }
 0x4f4   : > { %13353 = vmatmul.mubr.msk.bf16.gmra.mrb[28].mxu1 %vm7299_vm11, %v14122_v24  ;;  %v11032_v24 = vrot.slane %v17922_v17, 5  ;;  %19208 = vst [vmem:[#allocation65_spill] sm:$0xff] %v17976_v29  ;;  %19209 = vst [vmem:[#allocation67_spill] sm:$0xff] %v17984_v18  ;;  %v11038_v17 = vrot.slane %v11036_v47, 4  ;;  %v10930_v27 = vld [vmem:[#allocation3 + $0x84] sm:$0xe] }
 0x4f5   : > { %13358 = vmatprep.mubr.msk.bf16.mxu1 %vm7299_vm11, %v17743_v61  ;;  %v17962_v61 = vsel %vm14934_vm1, %v11017_v30, %v11018_v53  ;;  %v11031_v53 = vrot.slane %v11029_v14, 4  ;;  %v12430_v30 = vrot.slane %v10928_v2, 9  ;;  %v12431_v56 = vrot.slane %v10929_v55, 9  ;;  %v10931_v14 = vld [vmem:[#allocation3 + $0x90] sm:$0xe]  ;;  %v19305_v4 = vld [vmem:[#allocation58_spill] sm:$0xff] }
 0x4f6   : > { %19206 = vst [vmem:[#allocation62_spill] sm:$0xff] %v17962_v61  ;;  %v11043_v54 = vrot.slane %v17951_v23, 5  ;;  %v18003_v29 = vld [vmem:[#allocation3 + $0xa0] sm:$0xf]  ;;  %v18009_v61 = vsel %vm14934_vm1, %v11038_v17, %v11039_v10  ;;  %v11053_v19 = vrot.slane %v10220_v34, 5  ;;  %v11060_v34 = vrot.slane %v18001_v43, 5 }
 0x4f7   : > { %v17994_v2 = vsel %vm14934_vm1, %v11031_v53, %v11032_v24  ;;  %v17998_v52 = vsel %vm14934_vm1, %v12430_v30, %v11036_v47  ;;  %19213 = vst [vmem:[#allocation6_spill] sm:$0xff] %v18003_v29  ;;  %19214 = vst [vmem:[#allocation70_spill] sm:$0xff] %v18009_v61  ;;  %v11046_v24 = vrot.slane %v17958_v33, 5  ;;  %v11050_v47 = vrot.slane %v17970_v40, 5  ;;  %v10932_v3 = vld [vmem:[#allocation3 + $0x9c] sm:$0xe] }
 0x4f8   : > { %19210 = vst [vmem:[#allocation66_spill] sm:$0xff] %v17994_v2  ;;  %19211 = vst [vmem:[#allocation68_spill] sm:$0xff] %v17998_v52  ;;  %v11045_v53 = vrot.slane %v11043_v54, 4  ;;  %v12432_v30 = vrot.slane %v10930_v27, 9  ;;  %v18020_v17 = vld [vmem:[#allocation3 + $0xa4] sm:$0x1]  ;;  %v18024_v10 = vsel %vm14934_vm1, %v12431_v56, %v11043_v54 }
 0x4f9   : > { %19215 = vst [vmem:[#allocation71_spill] sm:$0xff] %v18024_v10  ;;  %v11052_v60 = vrot.slane %v11050_v47, 4  ;;  %v11057_v2 = vrot.slane %v17978_v9, 5  ;;  %v18028_v27 = vld [vmem:[#allocation3 + $0xac] sm:$0xf]  ;;  %v11064_v56 = vrot.slane %v18003_v29, 5 }
 0x4fa   : > { %v18040_v54 = vld [vmem:[#allocation3 + $0xb8] sm:$0xf]  ;;  %v11067_v43 = vrot.slane %v18020_v17, 5  ;;  %v10934_v29 = vld [vmem:[#allocation3 + $0xb4] sm:$0xe]  ;;  %v19221_v52 = vshrl.u32 %v17526_v5, 16 }
 0x4fb   : > { %v18046_v55 = vsel %vm14934_vm1, %v11052_v60, %v11053_v19  ;;  %v11059_v61 = vrot.slane %v11057_v2, 4  ;;  %v11066_v18 = vrot.slane %v11064_v56, 4  ;;  %v11071_v60 = vrot.slane %v18028_v27, 5  ;;  %v10235_v10 = vld [vmem:[#allocation3 + $0xc8] sm:$0x1] }
 0x4fc   : > { %13359 = vmatmul.mubr.msk.bf16.vlgmr.msra.gmra.mrb[0].mxu1 %vm7299_vm11, %v17772_v49  ;;  %v12433_v49 = vrot.slane %v10931_v14, 9  ;;  %19218 = vst [vmem:[#allocation74_spill] sm:$0xff] %v18046_v55  ;;  %v10232_v14 = vld [vmem:[#allocation3 + $0xbc] sm:$0x1] }
 0x4fd   : > { %13391 = vmatpush3.bf16.msra.mxu1 %v17706_v45  ;;  %13362 = vmatprep.mubr.msk.bf16.mxu1 %vm7299_vm11, %v17789_v26  ;;  %v18032_v45 = vsel %vm14934_vm1, %v11045_v53, %v11046_v24  ;;  %v18036_v26 = vsel %vm14934_vm1, %v12432_v30, %v11050_v47  ;;  %v12434_v24 = vrot.slane %v10932_v3, 9  ;;  %v10933_v53 = vld [vmem:[#allocation3 + $0xa8] sm:$0xe]  ;;  %v8881_v47 = vor.u32 %v17872_v25, %v17861_v46  ;;  %v18050_v30 = vld [vmem:[#allocation3 + $0xb0] sm:$0x1] }
 0x4fe   : > { %13424 = vmatprep.subr.bf16.mxu1 %v17990_v62  ;;  %19216 = vst [vmem:[#allocation72_spill] sm:$0xff] %v18032_v45  ;;  %19217 = vst [vmem:[#allocation73_spill] sm:$0xff] %v18036_v26  ;;  %v18055_v45 = vld [vmem:[#allocation3 + $0xc4] sm:$0xf]  ;;  %v18059_v19 = vsel %vm14934_vm1, %v12433_v49, %v11057_v2  ;;  %v18063_v3 = vsel %vm14934_vm1, %v11059_v61, %v11060_v34  ;;  %v18074_v55 = vsel %vm14934_vm1, %v11066_v18, %v11067_v43  ;;  %v10935_v49 = vld [vmem:[#allocation3 + $0xc0] sm:$0xe] }
 0x4ff   : > { %19219 = vst [vmem:[#allocation75_spill] sm:$0xff] %v18063_v3  ;;  %v18067_v25 = vsel %vm14934_vm1, %v12434_v24, %v11064_v56  ;;  %19220 = vst [vmem:[#allocation76_spill] sm:$0xff] %v18074_v55  ;;  %v12435_v26 = vrot.slane %v10933_v53, 9  ;;  %v11078_v2 = vrot.slane %v18040_v54, 5  ;;  %v11073_v34 = vrot.slane %v11071_v60, 4 }
 0x500   : > { %v11074_v56 = vrot.slane %v18050_v30, 5  ;;  %v12436_v24 = vrot.slane %v10934_v29, 9  ;;  %v8904_v3 = vrot.slane %v19221_v52, 4  ;;  %v11081_v18 = vrot.slane %v10232_v14, 5  ;;  %v8654_v52 = vld [vmem:[#allocation3 + $0x84] sm:$0xf] }
 0x501   : > { %v11080_v43 = vrot.slane %v11078_v2, 4  ;;  %v11085_v53 = vrot.slane %v18055_v45, 5  ;;  %v18089_v61 = vsel %vm14934_vm1, %v12435_v26, %v11071_v60  ;;  %v12437_v5 = vrot.slane %v10935_v49, 9 }
 0x502   : > { %v18093_v29 = vsel %vm14934_vm1, %v11073_v34, %v11074_v56  ;;  %v11088_v26 = vrot.slane %v10235_v10, 5  ;;  %v19223_v60 = vor.u32 %v17805_v7, %v17803_v13  ;;  %v8884_v56 = vshll.u32 %v17538_v31, 16 }
 0x503   : > { %19222 = vst [vmem:[#allocation77_spill] sm:$0xff] %v18093_v29  ;;  %v11087_v55 = vrot.slane %v11085_v53, 4  ;;  %v8922_v14 = vshll.u32 %v17549_v0, 16  ;;  %v8926_v29 = vshrl.u32 %v17549_v0, 16  ;;  %v19225_v31 = vshll.u32 %v17843_v1, 16 }
 0x504   : > { %13363 = vmatmul.mubr.msk.bf16.gmra.mrb[4].mxu1 %vm7299_vm11, %v17823_v41  ;;  %v18097_v41 = vsel %vm14934_vm1, %v12436_v24, %v11078_v2  ;;  %v8848_v34 = vrot.slane %v19223_v60, 4  ;;  %v19224_v2 = vshrl.u32 %v17843_v1, 16  ;;  %v8913_v10 = vshrl.u32 %v8654_v52, 16 }
 0x505   : > { %13366 = vmatprep.mubr.msk.bf16.mxu1 %vm7299_vm11, %v17825_v20  ;;  %v18103_v20 = vsel %vm14934_vm1, %v11080_v43, %v11081_v18  ;;  %v18117_v43 = vsel %vm14934_vm1, %v12437_v5, %v11085_v53  ;;  %v18121_v13 = vsel %vm14934_vm1, %v11087_v55, %v11088_v26  ;;  %v8894_v7 = vrot.slane %v19225_v31, 5 }
 0x506   : > { %v8891_v24 = vrot.slane %v19224_v2, 4  ;;  %v8916_v18 = vshll.u32 %v8654_v52, 16  ;;  %v12455_v60 = vcombine.low %v18117_v43, %v18121_v13  ;;  %v19226_v2 = vor.u32 %v17813_v22, %v17811_v35 }
 0x507   : > { %v19227_v53 = vor.u32 %v17859_v38, %v17857_v15  ;;  %v8882_v49 = vrot.slane %v8881_v47, 4  ;;  %v8905_v55 = vor.u32 %v8904_v3, %v17889_v51  ;;  %v19228_v1 = vsel %vm14684_vm15, %v17809_v8, %v17830_v11 }
 0x508   : > { %v8858_v0 = vrot.slane %v19226_v2, 4  ;;  %v19229_v52 = vsel %vm14684_vm15, %v17801_v28, %v17779_v16  ;;  %v19230_v22 = vshll.u32 %v17499_v42, 16  ;;  %v8886_v15 = vrot.slane %v8884_v56, 5  ;;  %v8657_v2 = vld [vmem:[#allocation3 + $0x90] sm:$0xf] }
 0x509   : > { %v8872_v5 = vrot.slane %v19227_v53, 4  ;;  %v12275_v26 = vcombine.low %v19229_v52, %v19228_v1  ;;  %v8908_v38 = vshll.u32 %v17540_v39, 16  ;;  %v18149_v47 = vrot.slane %v8922_v14, 5 }
 0x50a   : > { %v8862_v31 = vrot.slane %v19230_v22, 5  ;;  %v8928_v3 = vrot.slane %v8926_v29, 4  ;;  %v8853_v16 = vsel %vm14684_vm15, %v8848_v34, %v17811_v35  ;;  %v8895_v28 = vor.u32 %v8894_v7, %v8891_v24  ;;  %v8660_v34 = vld [vmem:[#allocation3 + $0x9c] sm:$0xf] }
 0x50b   : > { %v8915_v8 = vrot.slane %v8913_v10, 4  ;;  %v8918_v42 = vrot.slane %v8916_v18, 5  ;;  %v8877_v39 = vsel %vm14684_vm15, %v8872_v5, %v17861_v46  ;;  %v8906_v29 = vrot.slane %v8905_v55, 4 }
 0x50c   : > { %13367 = vmatmul.mubr.msk.bf16.gmra.mrb[8].mxu1 %vm7299_vm11, %v17834_v48  ;;  %v8863_v11 = vsel %vm14684_vm15, %v8858_v0, %v8862_v31  ;;  %v8887_v48 = vsel %vm14684_vm15, %v8882_v49, %v8886_v15  ;;  %v8937_v14 = vshrl.u32 %v8657_v2, 16  ;;  %v8940_v56 = vshll.u32 %v8657_v2, 16 }
 0x50d   : > { %13370 = vmatprep.mubr.msk.bf16.mxu1 %vm7299_vm11, %v12275_v26  ;;  %v8946_v53 = vshll.u32 %v17551_v59, 16  ;;  %v8950_v35 = vshrl.u32 %v17551_v59, 16  ;;  %v8910_v24 = vrot.slane %v8908_v38, 5  ;;  %v8929_v7 = vor.u32 %v8928_v3, %v18149_v47 }
 0x50e   : > { %v8970_v10 = vshll.u32 %v17586_v63, 16  ;;  %v8974_v18 = vshrl.u32 %v17586_v63, 16  ;;  %v12276_v0 = vcombine.low %v8853_v16, %v8863_v11  ;;  %v12277_v46 = vcombine.low %v8877_v39, %v8887_v48  ;;  %v8663_v11 = vld [vmem:[#allocation3 + $0xa8] sm:$0xf] }
 0x50f   : > { %v8896_v5 = vrot.slane %v8895_v28, 4  ;;  %v8919_v1 = vor.u32 %v8918_v42, %v8915_v8  ;;  %v8911_v49 = vsel %vm14684_vm15, %v8906_v29, %v8910_v24  ;;  %v8932_v55 = vshll.u32 %v17562_v57, 16 }
 0x510   : > { %v8961_v52 = vshrl.u32 %v8660_v34, 16  ;;  %v8964_v26 = vshll.u32 %v8660_v34, 16  ;;  %v8939_v59 = vrot.slane %v8937_v14, 4  ;;  %v8942_v22 = vrot.slane %v8940_v56, 5  ;;  %v8666_v56 = vld [vmem:[#allocation3 + $0xb4] sm:$0xf] }
 0x511   : > { %v8948_v31 = vrot.slane %v8946_v53, 5  ;;  %v8952_v15 = vrot.slane %v8950_v35, 4  ;;  %v8930_v38 = vrot.slane %v8929_v7, 4  ;;  %v8972_v3 = vrot.slane %v8970_v10, 5 }
 0x512   : > { %v8976_v63 = vrot.slane %v8974_v18, 4  ;;  %v8901_v2 = vsel %vm14684_vm15, %v8896_v5, %v17889_v51  ;;  %v8920_v16 = vrot.slane %v8919_v1, 4  ;;  %v8934_v57 = vrot.slane %v8932_v55, 5 }
 0x513   : > { %v12278_v28 = vcombine.low %v8901_v2, %v8911_v49  ;;  %v8963_v8 = vrot.slane %v8961_v52, 4  ;;  %v8966_v42 = vrot.slane %v8964_v26, 5  ;;  %v8943_v39 = vor.u32 %v8942_v22, %v8939_v59 }
 0x514   : > { %13371 = vmatmul.mubr.msk.bf16.gmra.mrb[12].mxu1 %vm7299_vm11, %v12276_v0  ;;  %v8953_v48 = vor.u32 %v8952_v15, %v8948_v31  ;;  %v8994_v29 = vshll.u32 %v17594_v50, 16  ;;  %v8998_v14 = vshrl.u32 %v17594_v50, 16  ;;  %v8935_v53 = vsel %vm14684_vm15, %v8930_v38, %v8934_v57 }
 0x515   : > { %13374 = vmatprep.mubr.msk.bf16.mxu1 %vm7299_vm11, %v12277_v46  ;;  %v8977_v35 = vor.u32 %v8976_v63, %v8972_v3  ;;  %v9018_v34 = vshll.u32 %v17617_v6, 16  ;;  %v9022_v51 = vshrl.u32 %v17617_v6, 16  ;;  %v8925_v24 = vsel %vm14684_vm15, %v8920_v16, %v18149_v47  ;;  %v8669_v16 = vld [vmem:[#allocation3 + $0xc0] sm:$0xf] }
 0x516   : > { %v8956_v7 = vshll.u32 %v17578_v12, 16  ;;  %v8985_v10 = vshrl.u32 %v8663_v11, 16  ;;  %v8988_v18 = vshll.u32 %v8663_v11, 16  ;;  %v8967_v0 = vor.u32 %v8966_v42, %v8963_v8 }
 0x517   : > { %v8980_v50 = vshll.u32 %v17606_v21, 16  ;;  %v9009_v46 = vshrl.u32 %v8666_v56, 16  ;;  %v9012_v5 = vshll.u32 %v8666_v56, 16  ;;  %v12279_v1 = vcombine.low %v8925_v24, %v8935_v53 }
 0x518   : > { %v8954_v49 = vrot.slane %v8953_v48, 4  ;;  %v8996_v55 = vrot.slane %v8994_v29, 5  ;;  %v9000_v52 = vrot.slane %v8998_v14, 4  ;;  %v8944_v6 = vrot.slane %v8943_v39, 4 }
 0x519   : > { %v8978_v26 = vrot.slane %v8977_v35, 4  ;;  %v9020_v59 = vrot.slane %v9018_v34, 5  ;;  %v9024_v22 = vrot.slane %v9022_v51, 4  ;;  %v8958_v12 = vrot.slane %v8956_v7, 5 }
 0x51a   : > { %v8987_v47 = vrot.slane %v8985_v10, 4  ;;  %v8990_v15 = vrot.slane %v8988_v18, 5  ;;  %v8968_v38 = vrot.slane %v8967_v0, 4  ;;  %v8982_v63 = vrot.slane %v8980_v50, 5 }
 0x51b   : > { %v9011_v21 = vrot.slane %v9009_v46, 4  ;;  %v9014_v2 = vrot.slane %v9012_v5, 5  ;;  %v8959_v57 = vsel %vm14684_vm15, %v8954_v49, %v8958_v12  ;;  %v9001_v8 = vor.u32 %v9000_v52, %v8996_v55 }
 0x51c   : > { %13375 = vmatmul.mubr.msk.bf16.gmra.mrb[16].mxu1 %vm7299_vm11, %v12278_v28  ;;  %v9042_v28 = vshll.u32 %v17619_v36, 16  ;;  %v9046_v42 = vshrl.u32 %v17619_v36, 16  ;;  %v8949_v11 = vsel %vm14684_vm15, %v8944_v6, %v8948_v31  ;;  %v8983_v39 = vsel %vm14684_vm15, %v8978_v26, %v8982_v63 }
 0x51d   : > { %13378 = vmatprep.mubr.msk.bf16.mxu1 %vm7299_vm11, %v12279_v1  ;;  %v9025_v48 = vor.u32 %v9024_v22, %v9020_v59  ;;  %v8991_v29 = vor.u32 %v8990_v15, %v8987_v47  ;;  %v9004_v14 = vshll.u32 %v17608_v37, 16  ;;  %v9033_v56 = vshrl.u32 %v8669_v16, 16  ;;  %v14178_v22 = vld [vmem:[#allocation3 + $0xc8] sm:$0x1] }
 0x51e   : > { %v9036_v53 = vshll.u32 %v8669_v16, 16  ;;  %v12280_v35 = vcombine.low %v8949_v11, %v8959_v57  ;;  %v8973_v34 = vsel %vm14684_vm15, %v8968_v38, %v8972_v3  ;;  %v9015_v51 = vor.u32 %v9014_v2, %v9011_v21  ;;  %v457_v57 = vld [vmem:[#allocation3 + $0xcc] sm:$0x1] }
 0x51f   : > { %v9028_v24 = vshll.u32 %v17641_v32, 16  ;;  %v12281_v36 = vcombine.low %v8973_v34, %v8983_v39  ;;  %v9002_v7 = vrot.slane %v9001_v8, 4  ;;  %v9044_v10 = vrot.slane %v9042_v28, 5  ;;  %v19231_v8 = vld [vmem:[#allocation31_spill] sm:$0xff] }
 0x520   : > { %v9048_v31 = vrot.slane %v9046_v42, 4  ;;  %v9026_v18 = vrot.slane %v9025_v48, 4  ;;  %v8992_v0 = vrot.slane %v8991_v29, 4  ;;  %v9006_v37 = vrot.slane %v9004_v14, 5  ;;  %v19260_v28 = vld [vmem:[#allocation23_spill] sm:$0xff] }
 0x521   : > { %v9035_v50 = vrot.slane %v9033_v56, 4  ;;  %v9038_v46 = vrot.slane %v9036_v53, 5  ;;  %v9016_v5 = vrot.slane %v9015_v51, 4  ;;  %v9030_v1 = vrot.slane %v9028_v24, 5  ;;  %v9355_v51 = vld [vmem:[#allocation3 + $0x18] sm:$0xe] }
 0x522   : > { %v9007_v3 = vsel %vm14684_vm15, %v9002_v7, %v9006_v37  ;;  %v9049_v49 = vor.u32 %v9048_v31, %v9044_v10  ;;  %v9420_v52 = vrot.slane %v17711_v58, 5  ;;  %v8997_v6 = vsel %vm14684_vm15, %v8992_v0, %v8996_v55  ;;  %v9354_v58 = vld [vmem:[#allocation3 + $0xc] sm:$0xe]  ;;  %v19234_v24 = vld [vmem:[#allocation32_spill] sm:$0xff]  ;;  %v14126_v0 = vld [vmem:[%s18688_s4 + $0x38] sm:$0xff]  }
 0x523   : > { %v9031_v32 = vsel %vm14684_vm15, %v9026_v18, %v9030_v1  ;;  %v9039_v26 = vor.u32 %v9038_v46, %v9035_v50  ;;  %v9052_v12 = vshll.u32 %v14178_v22, 16  ;;  %v12282_v47 = vcombine.low %v8997_v6, %v9007_v3  ;;  %v19235_v37 = vld [vmem:[#allocation63_spill] sm:$0xff]  ;;  %v19236_v50 = vld [vmem:[#allocation26_spill] sm:$0xff]  ;;  %v19239_v1 = vld [vmem:[#allocation36_spill] sm:$0xff] }
 0x524   : > { %13379 = vmatmul.mubr.msk.bf16.gmra.mrb[20].mxu1 %vm7299_vm11, %v12280_v35  ;;  %v9021_v15 = vsel %vm14684_vm15, %v9016_v5, %v9020_v59  ;;  %v9050_v63 = vrot.slane %v9049_v49, 4  ;;  %v9422_v21 = vrot.slane %v9420_v52, 4  ;;  %v9423_v55 = vrot.slane %v19231_v8, 5  ;;  %v19233_v59 = vld [vmem:[#allocation29_spill] sm:$0xff]  ;;  %v19241_v49 = vld [vmem:[#allocation38_spill] sm:$0xff] }
 0x525   : > { %13382 = vmatprep.mubr.msk.bf16.mxu1 %vm7299_vm11, %v12281_v36  ;;  %v12283_v38 = vcombine.low %v9021_v15, %v9031_v32  ;;  %v9040_v2 = vrot.slane %v9039_v26, 4  ;;  %v9054_v16 = vrot.slane %v9052_v12, 5  ;;  %v458_v42 = vsel %vm16486_vm9, 0, %v457_v57  ;;  %v19238_v5 = vld [vmem:[#allocation61_spill] sm:$0xff]  ;;  %v19245_v26 = vld [vmem:[#allocation39_spill] sm:$0xff]  ;;  %v19248_v12 = vld [vmem:[#allocation14_spill] sm:$0xff] }
 0x526   : > { %v9427_v39 = vrot.slane %v19233_v59, 5  ;;  %459 = vst [vmem:[#allocation3 + $0xcc] sm:$0x1] %v458_v42  ;;  %v12302_v48 = vrot.slane %v9354_v58, 9  ;;  %v9424_v29 = vsel %vm14934_vm1, %v9422_v21, %v9423_v55  ;;  %v9430_v36 = vrot.slane %v19234_v24, 5  ;;  %v19242_v32 = vld [vmem:[#allocation37_spill] sm:$0xff] }
 0x527   : > { %v9055_v11 = vsel %vm14684_vm15, %v9050_v63, %v9054_v16  ;;  %v9045_v14 = vsel %vm14684_vm15, %v9040_v2, %v9044_v10  ;;  %v12303_v7 = vrot.slane %v9355_v51, 9  ;;  %v19237_v46 = vcombine.low %v19235_v37, %v19236_v50  ;;  %v19244_v6 = vld [vmem:[#allocation5_spill] sm:$0xff]  ;;  %v19250_v15 = vld [vmem:[#allocation15_spill] sm:$0xff]  ;;  %v19253_v21 = vld [vmem:[#allocation18_spill] sm:$0xff] }
 0x528   : > { %v12284_v56 = vcombine.low %v9045_v14, %v9055_v11  ;;  %v9421_v53 = vsel %vm14934_vm1, %v12302_v48, %v9420_v52  ;;  %v9429_v34 = vrot.slane %v9427_v39, 4  ;;  %v19240_v3 = vcombine.low %v19238_v5, %v19239_v1  ;;  %v19254_v2 = vld [vmem:[#allocation22_spill] sm:$0xff]  ;;  %v19256_v58 = vld [vmem:[#allocation20_spill] sm:$0xff]  ;;  %v19259_v55 = vld [vmem:[#allocation7_spill] sm:$0xff] }
 0x529   : > { %v12320_v35 = vcombine.low %v9421_v53, %v9424_v29  ;;  %v9428_v10 = vsel %vm14934_vm1, %v12303_v7, %v9427_v39  ;;  %v19243_v52 = vcombine.low %v19241_v49, %v19242_v32  ;;  %v19246_v22 = vcombine.low %v19244_v6, %v19245_v26  ;;  %v19257_v57 = vld [vmem:[#allocation10_spill] sm:$0xff]  ;;  %v19262_v11 = vld [vmem:[#allocation11_spill] sm:$0xff]  ;;  %v19263_v59 = vld [vmem:[#allocation9_spill] sm:$0xff] }
 0x52a   : > { %v9431_v31 = vsel %vm14934_vm1, %v9429_v34, %v9430_v36  ;;  %v19255_v16 = vcombine.low %v19253_v21, %v19254_v2  ;;  %v19258_v8 = vcombine.low %v19256_v58, %v19257_v57  ;;  %v19261_v42 = vcombine.low %v19259_v55, %v19260_v28  ;;  %v19265_v48 = vld [vmem:[#allocation12_spill] sm:$0xff]  ;;  %v19271_v34 = vld [vmem:[#allocation21_spill] sm:$0xff]  ;;  %v19272_v51 = vld [vmem:[#allocation27_spill] sm:$0xff] }
 0x52b   : > { %v12321_v18 = vcombine.low %v9428_v10, %v9431_v31  ;;  %v19264_v39 = vcombine.low %v19262_v11, %v19263_v59  ;;  %v19266_v29 = vld [vmem:[#allocation16_spill] sm:$0xff]  ;;  %v19273_v24 = vcombine.low %v19271_v34, %v19272_v51  ;;  %v512_v36 = vld [vmem:[#allocation3 + $0xd4] sm:$0x1]  ;;  %v19276_v37 = vld [vmem:[#allocation30_spill] sm:$0xff] }
 0x52c   : > { %13383 = vmatmul.mubr.msk.bf16.gmra.mrb[24].mxu1 %vm7299_vm11, %v12282_v47  ;;  %v19267_v14 = vcombine.low %v19265_v48, %v19266_v29  ;;  %v19269_v53 = vld [vmem:[#allocation24_spill] sm:$0xff]  ;;  %v513_v31 = vsel %vm16697_vm10, 0, %v512_v36  ;;  %v18299_v5 = vld [vmem:[%s18688_s4 + $0x40] sm:$0xff]   ;;  %v14128_v1 = vld [vmem:[#allocation3 + $0x30] sm:$0xff]  }
 0x52d   : > { %13386 = vmatprep.mubr.msk.bf16.mxu1 %vm7299_vm11, %v12283_v38  ;;  %v19251_v38 = vld [vmem:[#allocation8_spill] sm:$0xff]  ;;  %514 = vst [vmem:[#allocation3 + $0xd4] sm:$0x1] %v513_v31  ;;  %v14130_v49 = vld [vmem:[#allocation3 + $0x48] sm:$0xff]   ;;  %v14136_v21 = vld [vmem:[#allocation3 + $0x90] sm:$0xff]  }
 0x52e   : > { %v19252_v63 = vcombine.low %v19250_v15, %v19251_v38  ;;  %v14125_v10 = vld [vmem:[#allocation3 + $0x18] sm:$0xff]   ;;  %v14133_v6 = vld [vmem:[#allocation3 + $0x6c] sm:$0xff]   ;;  %v14135_v15 = vld [vmem:[#allocation3 + $0x84] sm:$0xff]  }
 0x52f   : > { %v14131_v32 = vld [vmem:[#allocation3 + $0x54] sm:$0xff]   ;;  %v10197_v29 = vld [vmem:[#allocation3 + $0x30] sm:$0xf]  ;;  %v14138_v34 = vld [vmem:[#allocation3 + $0xa8] sm:$0xff]  }
 0x530   : > { %v14134_v26 = vld [vmem:[#allocation3 + $0x78] sm:$0xff]   ;;  %v19279_v28 = vld [vmem:[#allocation35_spill] sm:$0xff] }
 0x531   : > { %v10277_v48 = vshrl.u32 %v19279_v28, 16 }
 0x533   : > { %v10279_v31 = vrot.slane %v10277_v48, 4  ;;  %v19285_v48 = vld [vmem:[#allocation43_spill] sm:$0xff] }
 0x534   : > { %13387 = vmatmul.mubr.msk.bf16.gmra.mrb[28].mxu1 %vm7299_vm11, %v12284_v56  ;;  %v19268_v56 = vld [vmem:[#allocation19_spill] sm:$0xff] }
 0x535   : > { %13392 = vmatprep.mubr.msk.bf16.mxu1 %vm7299_vm11, %v12320_v35  ;;  %v19270_v35 = vcombine.low %v19268_v56, %v19269_v53  ;;  %v19280_v53 = vld [vmem:[#allocation34_spill] sm:$0xff] }
 0x53c   : > { %13393 = vmatmul.mubr.msk.bf16.vlgmr.msra.gmra.mrb[0].mxu1 %vm7299_vm11, %v12321_v18  ;;  %v19275_v18 = vld [vmem:[#allocation28_spill] sm:$0xff] }
 0x53d   : > { %13425 = vmatpush3.bf16.msra.mxu1 %v17990_v62  ;;  %13396 = vmatprep.mubr.msk.bf16.mxu1 %vm7299_vm11, %v19237_v46  ;;  %v19247_v62 = vld [vmem:[#allocation13_spill] sm:$0xff]  ;;  %v19277_v50 = vcombine.low %v19275_v18, %v19276_v37  ;;  %v19281_v18 = vld [vmem:[#allocation40_spill] sm:$0xff] }
 0x53e   : > { %13458 = vmatprep.subr.bf16.mxu1 %v14126_v0  ;;  %v19249_v47 = vcombine.low %v19247_v62, %v19248_v12  ;;  %v14127_v46 = vld [vmem:[#allocation3 + $0x24] sm:$0xff]   ;;  %v10297_v37 = vshll.u32 %v19281_v18, 16 }
 0x544   : > { %13397 = vmatmul.mubr.msk.bf16.gmra.mrb[4].mxu1 %vm7299_vm11, %v19240_v3  ;;  %v14129_v3 = vld [vmem:[#allocation3 + $0x3c] sm:$0xff]  }
 0x545   : > { %13400 = vmatprep.mubr.msk.bf16.mxu1 %vm7299_vm11, %v19243_v52  ;;  %v14132_v52 = vld [vmem:[#allocation3 + $0x60] sm:$0xff]  }
 0x54c   : > { %13401 = vmatmul.mubr.msk.bf16.gmra.mrb[8].mxu1 %vm7299_vm11, %v19246_v22  ;;  %v19278_v22 = vld [vmem:[#allocation33_spill] sm:$0xff] }
 0x54d   : > { %13404 = vmatprep.mubr.msk.bf16.mxu1 %vm7299_vm11, %v19249_v47  ;;  %v10249_v62 = vshll.u32 %v19278_v22, 16  ;;  %v10253_v12 = vshrl.u32 %v19278_v22, 16  ;;  %v10194_v47 = vld [vmem:[#allocation3 + $0x24] sm:$0xf] }
 0x54e   : > { %v10264_v58 = vshrl.u32 %v10194_v47, 16  ;;  %v10267_v57 = vshll.u32 %v10194_v47, 16  ;;  %v14139_v47 = vld [vmem:[#allocation3 + $0xb4] sm:$0xff]  }
 0x54f   : > { %v10251_v2 = vrot.slane %v10249_v62, 5  ;;  %v18329_v62 = vrot.slane %v10297_v37, 5 }
 0x550   : > { %v10266_v59 = vrot.slane %v10264_v58, 4  ;;  %v14140_v58 = vld [vmem:[#allocation3 + $0xc0] sm:$0xff]  }
 0x554   : > { %13405 = vmatmul.mubr.msk.bf16.gmra.mrb[12].mxu1 %vm7299_vm11, %v19252_v63 }
 0x555   : > { %13408 = vmatprep.mubr.msk.bf16.mxu1 %vm7299_vm11, %v19255_v16  ;;  %v10255_v16 = vrot.slane %v10253_v12, 4 }
 0x557   : > { %v10256_v11 = vor.u32 %v10255_v16, %v10251_v2 }
 0x559   : > { %v10257_v36 = vrot.slane %v10256_v11, 4  ;;  %v10203_v11 = vld [vmem:[#allocation3 + $0x48] sm:$0xf] }
 0x55c   : > { %13409 = vmatmul.mubr.msk.bf16.gmra.mrb[16].mxu1 %vm7299_vm11, %v19258_v8 }
 0x55d   : > { %13412 = vmatprep.mubr.msk.bf16.mxu1 %vm7299_vm11, %v19261_v42  ;;  %v10273_v42 = vshll.u32 %v19279_v28, 16 }
 0x55f   : > { %v18317_v51 = vrot.slane %v10273_v42, 5 }
 0x564   : > { %13413 = vmatmul.mubr.msk.bf16.gmra.mrb[20].mxu1 %vm7299_vm11, %v19264_v39  ;;  %v10269_v39 = vrot.slane %v10267_v57, 5 }
 0x565   : > { %13416 = vmatprep.mubr.msk.bf16.mxu1 %vm7299_vm11, %v19267_v14  ;;  %v14137_v14 = vld [vmem:[#allocation3 + $0x9c] sm:$0xff]  }
 0x566   : > { %v10270_v7 = vor.u32 %v10269_v39, %v10266_v59 }
 0x56c   : > { %13417 = vmatmul.mubr.msk.bf16.gmra.mrb[24].mxu1 %vm7299_vm11, %v19270_v35  ;;  %v10259_v35 = vshll.u32 %v19280_v53, 16 }
 0x56d   : > { %13420 = vmatprep.mubr.msk.bf16.mxu1 %vm7299_vm11, %v19273_v24  ;;  %v10288_v24 = vshrl.u32 %v10197_v29, 16 }
 0x574   : > { %13421 = vmatmul.mubr.msk.bf16.gmra.mrb[28].mxu1 %vm7299_vm11, %v19277_v50  ;;  %v10301_v50 = vshrl.u32 %v19281_v18, 16 }
 0x575   : > { %13426 = vmatprep.mubr.msk.bf16.mxu1 %vm7299_vm11, %v14125_v10  ;;  %v10291_v10 = vshll.u32 %v10197_v29, 16  ;;  %v10345_v29 = vshll.u32 %v19285_v48, 16 }
 0x576   : > { %v10303_v12 = vrot.slane %v10301_v50, 4 }
 0x577   : > { %v10293_v22 = vrot.slane %v10291_v10, 5 }
 0x578   : > { %v10304_v53 = vor.u32 %v10303_v12, %v18329_v62 }
 0x57c   : > { %13427 = vmatmul.mubr.msk.bf16.vlgmr.msra.gmra.mrb[0].mxu1 %vm7299_vm11, %v14127_v46 }
 0x57d   : > { %13459 = vmatpush3.bf16.msra.mxu1 %v14126_v0  ;;  %13430 = vmatprep.mubr.msk.bf16.mxu1 %vm7299_vm11, %v14128_v1  ;;  %v10191_v0 = vld [vmem:[#allocation3 + $0x18] sm:$0xf]  ;;  %v10261_v1 = vrot.slane %v10259_v35, 5  ;;  %v10349_v35 = vshrl.u32 %v19285_v48, 16 }
 0x57e   : > { %13492 = vmatprep.subr.bf16.mxu1 %v18299_v5  ;;  %v10240_v38 = vshrl.u32 %v10191_v0, 16  ;;  %v10243_v63 = vshll.u32 %v10191_v0, 16  ;;  %v10280_v0 = vor.u32 %v10279_v31, %v18317_v51  ;;  %v19286_v31 = vld [vmem:[#allocation50_spill] sm:$0xff] }
 0x57f   : > { %v10369_v10 = vshll.u32 %v19286_v31, 16  ;;  %v10373_v18 = vshrl.u32 %v19286_v31, 16 }
 0x580   : > { %v10242_v8 = vrot.slane %v10240_v38, 4  ;;  %v10245_v55 = vrot.slane %v10243_v63, 5  ;;  %v19283_v63 = vld [vmem:[#allocation42_spill] sm:$0xff]  ;;  %v10281_v59 = vrot.slane %v10280_v0, 4  ;;  %v10351_v0 = vrot.slane %v10349_v35, 4 }
 0x582   : > { %v10246_v56 = vor.u32 %v10245_v55, %v10242_v8  ;;  %v19284_v55 = vld [vmem:[#allocation41_spill] sm:$0xff] }
 0x583   : > { %v10321_v28 = vshll.u32 %v19284_v55, 16  ;;  %v10325_v42 = vshrl.u32 %v19284_v55, 16 }
 0x584   : > { %13431 = vmatmul.mubr.msk.bf16.gmra.mrb[4].mxu1 %vm7299_vm11, %v14129_v3  ;;  %v10247_v46 = vrot.slane %v10246_v56, 4  ;;  %v19282_v3 = vld [vmem:[#allocation4_spill] sm:$0xff]  ;;  %v18346_v56 = vld [vmem:[#allocation3 + $0xd4] sm:$0x1] }
 0x585   : > { %13434 = vmatprep.mubr.msk.bf16.mxu1 %vm7299_vm11, %v14130_v49  ;;  %v10283_v49 = vshll.u32 %v19282_v3, 16 }
 0x587   : > { %v18333_v38 = vrot.slane %v10283_v49, 5  ;;  %v14141_v49 = vld [vmem:[#allocation3 + $0xcc] sm:$0xff]  }
 0x589   : > { %v10286_v55 = vsel %vm14684_vm15, %v10281_v59, %v18333_v38 }
 0x58c   : > { %13435 = vmatmul.mubr.msk.bf16.gmra.mrb[8].mxu1 %vm7299_vm11, %v14131_v32  ;;  %v10290_v32 = vrot.slane %v10288_v24, 4 }
 0x58d   : > { %13438 = vmatprep.mubr.msk.bf16.mxu1 %vm7299_vm11, %v14132_v52  ;;  %v10200_v52 = vld [vmem:[#allocation3 + $0x3c] sm:$0xf] }
 0x58e   : > { %v10312_v16 = vshrl.u32 %v10200_v52, 16  ;;  %v10315_v8 = vshll.u32 %v10200_v52, 16  ;;  %v10294_v39 = vor.u32 %v10293_v22, %v10290_v32  ;;  %v10336_v32 = vshrl.u32 %v10203_v11, 16 }
 0x58f   : > { %v10339_v52 = vshll.u32 %v10203_v11, 16  ;;  %v19287_v11 = vld [vmem:[#allocation44_spill] sm:$0xff] }
 0x590   : > { %v10317_v50 = vrot.slane %v10315_v8, 5  ;;  %v10331_v48 = vshll.u32 %v19287_v11, 16 }
 0x591   : > { %v10341_v35 = vrot.slane %v10339_v52, 5 }
 0x594   : > { %13439 = vmatmul.mubr.msk.bf16.gmra.mrb[12].mxu1 %vm7299_vm11, %v14133_v6  ;;  %v10262_v6 = vsel %vm14684_vm15, %v10257_v36, %v10261_v1  ;;  %v11095_v36 = vrot.slane %v18346_v56, 5  ;;  %v10327_v1 = vrot.slane %v10325_v42, 4  ;;  %v10305_v42 = vrot.slane %v10304_v53, 4 }
 0x595   : > { %13442 = vmatprep.mubr.msk.bf16.mxu1 %vm7299_vm11, %v14134_v26  ;;  %v18326_v26 = vrot.slane %v10270_v7, 4  ;;  %v10206_v7 = vld [vmem:[#allocation3 + $0x54] sm:$0xf] }
 0x596   : > { %v10360_v22 = vshrl.u32 %v10206_v7, 16  ;;  %v10363_v12 = vshll.u32 %v10206_v7, 16 }
 0x59c   : > { %13443 = vmatmul.mubr.msk.bf16.gmra.mrb[16].mxu1 %vm7299_vm11, %v14135_v15  ;;  %v10252_v15 = vsel %vm14684_vm15, %v10247_v46, %v10251_v2  ;;  %v10276_v2 = vsel %vm14684_vm15, %v18326_v26, %v18317_v51  ;;  %v10314_v51 = vrot.slane %v10312_v16, 4  ;;  %v18355_v46 = vrot.slane %v10321_v28, 5 }
 0x59d   : > { %13446 = vmatprep.mubr.msk.bf16.mxu1 %vm7299_vm11, %v14136_v21  ;;  %v10307_v21 = vshll.u32 %v19283_v63, 16  ;;  %v12390_v57 = vcombine.low %v10252_v15, %v10262_v6  ;;  %v18357_v6 = vrot.slane %v10345_v29, 5  ;;  %v18367_v63 = vrot.slane %v10369_v10, 5 }
 0x59e   : > { %v10375_v16 = vrot.slane %v10373_v18, 4  ;;  %v10295_v28 = vrot.slane %v10294_v39, 4  ;;  %v10318_v44 = vor.u32 %v10317_v50, %v10314_v51  ;;  %v10338_v29 = vrot.slane %v10336_v32, 4  ;;  %v19288_v39 = vld [vmem:[#allocation52_spill] sm:$0xff]  ;;  %v19289_v18 = vld [vmem:[#allocation47_spill] sm:$0xff] }
 0x59f   : > { %v10309_v15 = vrot.slane %v10307_v21, 5  ;;  %v10328_v21 = vor.u32 %v10327_v1, %v18355_v46  ;;  %v10393_v53 = vshll.u32 %v19288_v39, 16  ;;  %v10397_v31 = vshrl.u32 %v19288_v39, 16 }
 0x5a0   : > { %v10376_v38 = vor.u32 %v10375_v16, %v18367_v63  ;;  %v12391_v10 = vcombine.low %v10276_v2, %v10286_v55  ;;  %v10300_v51 = vsel %vm14684_vm15, %v10295_v28, %v18329_v62  ;;  %v10319_v50 = vrot.slane %v10318_v44, 4  ;;  %v10212_v16 = vld [vmem:[#allocation3 + $0x6c] sm:$0xf] }
 0x5a1   : > { %v10329_v1 = vrot.slane %v10328_v21, 4  ;;  %v10342_v52 = vor.u32 %v10341_v35, %v10338_v29  ;;  %v18389_v55 = vrot.slane %v10393_v53, 5  ;;  %v10399_v62 = vrot.slane %v10397_v31, 4  ;;  %v19292_v53 = vld [vmem:[#allocation54_spill] sm:$0xff] }
 0x5a2   : > { %v10377_v2 = vrot.slane %v10376_v38, 4  ;;  %v10408_v29 = vshrl.u32 %v10212_v16, 16  ;;  %v10411_v35 = vshll.u32 %v10212_v16, 16  ;;  %v10403_v31 = vshll.u32 %v19292_v53, 16  ;;  %v10218_v16 = vld [vmem:[#allocation3 + $0x84] sm:$0xf] }
 0x5a3   : > { %v10400_v39 = vor.u32 %v10399_v62, %v18389_v55 }
 0x5a4   : > { %13447 = vmatmul.mubr.msk.bf16.gmra.mrb[20].mxu1 %vm7299_vm11, %v14137_v14  ;;  %v18344_v14 = vld [vmem:[#allocation3 + $0xd0] sm:$0xf] }
 0x5a5   : > { %13450 = vmatprep.mubr.msk.bf16.mxu1 %vm7299_vm11, %v14138_v34  ;;  %v10936_v34 = vld [vmem:[#allocation3 + $0xcc] sm:$0xe]  ;;  %v11092_v24 = vrot.slane %v18344_v14, 5 }
 0x5a6   : > { %v12438_v37 = vrot.slane %v10936_v34, 9  ;;  %v10352_v34 = vor.u32 %v10351_v0, %v18357_v6 }
 0x5a7   : > { %v11094_v3 = vrot.slane %v11092_v24, 4 }
 0x5a8   : > { %v18361_v26 = vsel %vm14934_vm1, %v12438_v37, %v11092_v24  ;;  %v10362_v24 = vrot.slane %v10360_v22, 4  ;;  %v10355_v37 = vshll.u32 %v19289_v18, 16  ;;  %v10353_v0 = vrot.slane %v10352_v34, 4  ;;  %v10215_v34 = vld [vmem:[#allocation3 + $0x78] sm:$0xf] }
 0x5a9   : > { %v10410_v18 = vrot.slane %v10408_v29, 4  ;;  %v10469_v29 = vshrl.u32 %v17970_v40, 16 }
 0x5aa   : > { %v10357_v11 = vrot.slane %v10355_v37, 5  ;;  %v10413_v37 = vrot.slane %v10411_v35, 5 }
 0x5ac   : > { %13451 = vmatmul.mubr.msk.bf16.gmra.mrb[24].mxu1 %vm7299_vm11, %v14139_v47  ;;  %v18365_v47 = vsel %vm14934_vm1, %v11094_v3, %v11095_v36  ;;  %v10365_v36 = vrot.slane %v10363_v12, 5  ;;  %v10333_v3 = vrot.slane %v10331_v48, 5  ;;  %v10324_v48 = vsel %vm14684_vm15, %v10319_v50, %v18355_v46 }
 0x5ad   : > { %13454 = vmatprep.mubr.msk.bf16.mxu1 %vm7299_vm11, %v14140_v58  ;;  %v10209_v58 = vld [vmem:[#allocation3 + $0x60] sm:$0xf]  ;;  %v12456_v8 = vcombine.low %v18361_v26, %v18365_v47  ;;  %v10441_v50 = vshll.u32 %v17951_v23, 16 }
 0x5ae   : > { %v10384_v7 = vshrl.u32 %v10209_v58, 16  ;;  %v10387_v59 = vshll.u32 %v10209_v58, 16  ;;  %v10366_v22 = vor.u32 %v10365_v36, %v10362_v24  ;;  %v10334_v24 = vsel %vm14684_vm15, %v10329_v1, %v10333_v3 }
 0x5af   : > { %v10343_v36 = vrot.slane %v10342_v52, 4  ;;  %v10445_v1 = vshrl.u32 %v17951_v23, 16  ;;  %v12393_v3 = vcombine.low %v10324_v48, %v10334_v24  ;;  %v10221_v23 = vld [vmem:[#allocation3 + $0x90] sm:$0xf]  ;;  %v10459_v48 = vshll.u32 %v10218_v16, 16 }
 0x5b0   : > { %v10386_v12 = vrot.slane %v10384_v7, 4  ;;  %v10389_v58 = vrot.slane %v10387_v59, 5  ;;  %v10358_v7 = vsel %vm14684_vm15, %v10353_v0, %v10357_v11  ;;  %v10367_v38 = vrot.slane %v10366_v22, 4 }
 0x5b1   : > { %v10414_v11 = vor.u32 %v10413_v37, %v10410_v18  ;;  %v10480_v35 = vshrl.u32 %v10221_v23, 16  ;;  %v10489_v24 = vshll.u32 %v17978_v9, 16  ;;  %v10471_v18 = vrot.slane %v10469_v29, 4 }
 0x5b2   : > { %v10390_v46 = vor.u32 %v10389_v58, %v10386_v12  ;;  %v10405_v12 = vrot.slane %v10403_v31, 5 }
 0x5b4   : > { %13455 = vmatmul.mubr.msk.bf16.gmra.mrb[28].mxu1 %vm7299_vm11, %v14141_v49  ;;  %v19290_v49 = vld [vmem:[#allocation51_spill] sm:$0xff]  ;;  %v10391_v22 = vrot.slane %v10390_v46, 4 }
 0x5b5   : > { %13460 = vmatprep.mubr.msk.bf16.mxu1 %vm7299_vm11, %v12390_v57  ;;  %v10310_v57 = vsel %vm14684_vm15, %v10305_v42, %v10309_v15  ;;  %v10379_v32 = vshll.u32 %v19290_v49, 16  ;;  %v19291_v15 = vld [vmem:[#allocation56_spill] sm:$0xff]  ;;  %v10348_v49 = vsel %vm14684_vm15, %v10343_v36, %v18357_v6  ;;  %v10493_v36 = vshrl.u32 %v17978_v9, 16 }
 0x5b6   : > { %v12392_v28 = vcombine.low %v10300_v51, %v10310_v57  ;;  %v10417_v42 = vshll.u32 %v19291_v15, 16  ;;  %v10421_v44 = vshrl.u32 %v19291_v15, 16  ;;  %v10432_v51 = vshrl.u32 %v10215_v34, 16  ;;  %v19293_v15 = vld [vmem:[#allocation59_spill] sm:$0xff] }
 0x5b7   : > { %v10381_v21 = vrot.slane %v10379_v32, 5  ;;  %v10435_v57 = vshll.u32 %v10215_v34, 16  ;;  %v10372_v32 = vsel %vm14684_vm15, %v10367_v38, %v18367_v63  ;;  %v12394_v52 = vcombine.low %v10348_v49, %v10358_v7 }
 0x5b8   : > { %v10434_v62 = vrot.slane %v10432_v51, 4  ;;  %v10427_v6 = vshll.u32 %v19293_v15, 16  ;;  %v10456_v63 = vshrl.u32 %v10218_v16, 16  ;;  %v10483_v34 = vshll.u32 %v10221_v23, 16 }
 0x5b9   : > { %v10382_v59 = vsel %vm14684_vm15, %v10377_v2, %v10381_v21  ;;  %v10401_v2 = vrot.slane %v10400_v39, 4  ;;  %v10465_v21 = vshll.u32 %v17970_v40, 16  ;;  %v10396_v7 = vsel %vm14684_vm15, %v10391_v22, %v18389_v55 }
 0x5ba   : > { %v12395_v0 = vcombine.low %v10372_v32, %v10382_v59  ;;  %v10415_v39 = vrot.slane %v10414_v11, 4  ;;  %v10429_v53 = vrot.slane %v10427_v6, 5  ;;  %v10451_v40 = vshll.u32 %v17958_v33, 16  ;;  %v14179_v11 = vld [vmem:[#allocation3 + $0x8c] sm:$0x1] }
 0x5bb   : > { %v10406_v38 = vsel %vm14684_vm15, %v10401_v2, %v10405_v12  ;;  %v10461_v51 = vrot.slane %v10459_v48, 5  ;;  %v10482_v9 = vrot.slane %v10480_v35, 4  ;;  %v10485_v37 = vrot.slane %v10483_v34, 5  ;;  %v19294_v6 = vld [vmem:[#allocation6_spill] sm:$0xff] }
 0x5bc   : > { %13461 = vmatmul.mubr.msk.bf16.vlgmr.msra.gmra.mrb[0].mxu1 %vm7299_vm11, %v12391_v10  ;;  %v18407_v10 = vrot.slane %v10417_v42, 5  ;;  %v10443_v42 = vrot.slane %v10441_v50, 5  ;;  %v18433_v50 = vrot.slane %v10489_v24, 5  ;;  %v10495_v55 = vrot.slane %v10493_v36, 4 }
 0x5bd   : > { %13493 = vmatpush3.bf16.msra.mxu1 %v18299_v5  ;;  %13464 = vmatprep.mubr.msk.bf16.mxu1 %vm7299_vm11, %v12392_v28  ;;  %v10423_v5 = vrot.slane %v10421_v44, 4  ;;  %v10437_v28 = vrot.slane %v10435_v57, 5  ;;  %v10447_v44 = vrot.slane %v10445_v1, 4  ;;  %v18431_v57 = vrot.slane %v10465_v21, 5  ;;  %v10224_v1 = vld [vmem:[#allocation3 + $0x9c] sm:$0xf] }
 0x5be   : > { %v10420_v33 = vsel %vm14684_vm15, %v10415_v39, %v18407_v10  ;;  %v10504_v16 = vshrl.u32 %v10224_v1, 16  ;;  %v10507_v2 = vshll.u32 %v10224_v1, 16  ;;  %v10496_v23 = vor.u32 %v10495_v55, %v18433_v50  ;;  %v19295_v21 = vld [vmem:[#allocation69_spill] sm:$0xff] }
 0x5bf   : > { %v10424_v58 = vor.u32 %v10423_v5, %v18407_v10  ;;  %v10438_v46 = vor.u32 %v10437_v28, %v10434_v62  ;;  %v10448_v31 = vor.u32 %v10447_v44, %v10443_v42  ;;  %v10458_v5 = vrot.slane %v10456_v63, 4  ;;  %v10227_v63 = vld [vmem:[#allocation3 + $0xa8] sm:$0xf] }
 0x5c0   : > { %v10472_v12 = vor.u32 %v10471_v18, %v18431_v57  ;;  %v10453_v62 = vrot.slane %v10451_v40, 5  ;;  %v10486_v28 = vor.u32 %v10485_v37, %v10482_v9  ;;  %v10475_v15 = vshll.u32 %v14179_v11, 16 }
 0x5c1   : > { %v10425_v59 = vrot.slane %v10424_v58, 4  ;;  %v10439_v32 = vrot.slane %v10438_v46, 4  ;;  %v10462_v22 = vor.u32 %v10461_v51, %v10458_v5  ;;  %v10513_v10 = vshll.u32 %v19294_v6, 16 }
 0x5c2   : > { %v10517_v44 = vshrl.u32 %v19294_v6, 16  ;;  %v10499_v29 = vshll.u32 %v19295_v21, 16  ;;  %v10537_v35 = vshll.u32 %v18028_v27, 16  ;;  %v10541_v34 = vshrl.u32 %v18028_v27, 16  ;;  %v10230_v27 = vld [vmem:[#allocation3 + $0xb4] sm:$0xf] }
 0x5c3   : > { %v10430_v49 = vsel %vm14684_vm15, %v10425_v59, %v10429_v53  ;;  %v10463_v24 = vrot.slane %v10462_v22, 4  ;;  %v10473_v36 = vrot.slane %v10472_v12, 4  ;;  %v10497_v59 = vrot.slane %v10496_v23, 4 }
 0x5c4   : > { %13465 = vmatmul.mubr.msk.bf16.gmra.mrb[4].mxu1 %vm7299_vm11, %v12393_v3  ;;  %v12396_v3 = vcombine.low %v10396_v7, %v10406_v38  ;;  %v12397_v58 = vcombine.low %v10420_v33, %v10430_v49  ;;  %v10506_v7 = vrot.slane %v10504_v16, 4  ;;  %v10487_v38 = vrot.slane %v10486_v28, 4 }
 0x5c5   : > { %13468 = vmatprep.mubr.msk.bf16.mxu1 %vm7299_vm11, %v12394_v52  ;;  %v10449_v52 = vrot.slane %v10448_v31, 4  ;;  %v10528_v46 = vshrl.u32 %v10227_v63, 16  ;;  %v10531_v39 = vshll.u32 %v10227_v63, 16  ;;  %v10477_v31 = vrot.slane %v10475_v15, 5  ;;  %v10236_v63 = vld [vmem:[#allocation3 + $0xcc] sm:$0xf] }
 0x5c6   : > { %v18453_v40 = vrot.slane %v10513_v10, 5  ;;  %v10519_v5 = vrot.slane %v10517_v44, 4  ;;  %v10501_v51 = vrot.slane %v10499_v29, 5  ;;  %v18456_v18 = vrot.slane %v10537_v35, 5 }
 0x5c7   : > { %v10454_v48 = vsel %vm14684_vm15, %v10449_v52, %v10453_v62  ;;  %v10543_v9 = vrot.slane %v10541_v34, 4  ;;  %v10468_v37 = vsel %vm14684_vm15, %v10463_v24, %v18431_v57  ;;  %v10478_v55 = vsel %vm14684_vm15, %v10473_v36, %v10477_v31 }
 0x5c8   : > { %v10492_v49 = vsel %vm14684_vm15, %v10487_v38, %v18433_v50  ;;  %v10530_v33 = vrot.slane %v10528_v46, 4  ;;  %v10533_v52 = vrot.slane %v10531_v39, 5  ;;  %v10520_v22 = vor.u32 %v10519_v5, %v18453_v40 }
 0x5c9   : > { %v10552_v12 = vshrl.u32 %v10230_v27, 16  ;;  %v10561_v57 = vshll.u32 %v18040_v54, 16  ;;  %v10565_v16 = vshrl.u32 %v18040_v54, 16  ;;  %v10585_v62 = vshll.u32 %v18055_v45, 16 }
 0x5ca   : > { %v10589_v50 = vshrl.u32 %v18055_v45, 16  ;;  %v12399_v28 = vcombine.low %v10468_v37, %v10478_v55  ;;  %v10534_v15 = vor.u32 %v10533_v52, %v10530_v33  ;;  %v10547_v6 = vshll.u32 %v18050_v30, 16  ;;  %v14181_v52 = vld [vmem:[#allocation3 + $0xc8] sm:$0x1] }
 0x5cb   : > { %v10554_v54 = vrot.slane %v10552_v12, 4  ;;  %v10563_v21 = vrot.slane %v10561_v57, 5  ;;  %v10567_v29 = vrot.slane %v10565_v16, 4  ;;  %v10587_v24 = vrot.slane %v10585_v62, 5 }
 0x5cc   : > { %13469 = vmatmul.mubr.msk.bf16.gmra.mrb[8].mxu1 %vm7299_vm11, %v12395_v0  ;;  %v10444_v0 = vsel %vm14684_vm15, %v10439_v32, %v10443_v42  ;;  %v10509_v42 = vrot.slane %v10507_v2, 5  ;;  %v10502_v32 = vsel %vm14684_vm15, %v10497_v59, %v10501_v51  ;;  %v10233_v2 = vld [vmem:[#allocation3 + $0xc0] sm:$0xf]  ;;  %v10591_v45 = vrot.slane %v10589_v50, 4 }
 0x5cd   : > { %13472 = vmatprep.mubr.msk.bf16.mxu1 %vm7299_vm11, %v12396_v3  ;;  %v12398_v53 = vcombine.low %v10444_v0, %v10454_v48  ;;  %v10523_v3 = vshll.u32 %v18020_v17, 16  ;;  %v10555_v17 = vshll.u32 %v10230_v27, 16  ;;  %v12400_v23 = vcombine.low %v10492_v49, %v10502_v32  ;;  %v14180_v27 = vld [vmem:[#allocation3 + $0xbc] sm:$0x1] }
 0x5ce   : > { %v10510_v1 = vor.u32 %v10509_v42, %v10506_v7  ;;  %v10576_v10 = vshrl.u32 %v10233_v2, 16  ;;  %v10579_v44 = vshll.u32 %v10233_v2, 16  ;;  %v10521_v48 = vrot.slane %v10520_v22, 4 }
 0x5cf   : > { %v10525_v11 = vrot.slane %v10523_v3, 5  ;;  %v10557_v34 = vrot.slane %v10555_v17, 5  ;;  %v10600_v36 = vshrl.u32 %v10236_v63, 16  ;;  %v10603_v7 = vshll.u32 %v10236_v63, 16 }
 0x5d0   : > { %v10511_v0 = vrot.slane %v10510_v1, 4  ;;  %v10609_v42 = vshll.u32 %v18344_v14, 16  ;;  %v10613_v30 = vshrl.u32 %v18344_v14, 16  ;;  %v10535_v38 = vrot.slane %v10534_v15, 4 }
 0x5d1   : > { %v10549_v59 = vrot.slane %v10547_v6, 5  ;;  %v10578_v46 = vrot.slane %v10576_v10, 4  ;;  %v10581_v39 = vrot.slane %v10579_v44, 5  ;;  %v10526_v31 = vsel %vm14684_vm15, %v10521_v48, %v10525_v11 }
 0x5d2   : > { %v10568_v5 = vor.u32 %v10567_v29, %v10563_v21  ;;  %v10571_v37 = vshll.u32 %v14180_v27, 16  ;;  %v10592_v55 = vor.u32 %v10591_v45, %v10587_v24  ;;  %v10602_v14 = vrot.slane %v10600_v36, 4  ;;  %v19300_v45 = vld [vmem:[#allocation49_spill] sm:$0xff]  ;;  %v19315_v27 = vld [vmem:[#allocation66_spill] sm:$0xff] }
 0x5d3   : > { %v10605_v1 = vrot.slane %v10603_v7, 5  ;;  %v10611_v3 = vrot.slane %v10609_v42, 5  ;;  %v10615_v49 = vrot.slane %v10613_v30, 4  ;;  %v10582_v33 = vor.u32 %v10581_v39, %v10578_v46  ;;  %v19302_v7 = vld [vmem:[#allocation53_spill] sm:$0xff]  ;;  %v19303_v42 = vld [vmem:[#allocation55_spill] sm:$0xff]  ;;  %v19308_v46 = vld [vmem:[#allocation60_spill] sm:$0xff] }
 0x5d4   : > { %13473 = vmatmul.mubr.msk.bf16.gmra.mrb[12].mxu1 %vm7299_vm11, %v12397_v58  ;;  %v10544_v58 = vor.u32 %v10543_v9, %v18456_v18  ;;  %v10558_v9 = vor.u32 %v10557_v34, %v10554_v54  ;;  %v10595_v22 = vshll.u32 %v14181_v52, 16  ;;  %v10569_v57 = vrot.slane %v10568_v5, 4  ;;  %v19309_v39 = vld [vmem:[#allocation62_spill] sm:$0xff]  ;;  %v19312_v5 = vld [vmem:[#allocation65_spill] sm:$0xff] }
 0x5d5   : > { %13476 = vmatprep.mubr.msk.bf16.mxu1 %vm7299_vm11, %v12398_v53  ;;  %v10516_v53 = vsel %vm14684_vm15, %v10511_v0, %v18453_v40  ;;  %v10540_v40 = vsel %vm14684_vm15, %v10535_v38, %v18456_v18  ;;  %v10573_v16 = vrot.slane %v10571_v37, 5  ;;  %v10593_v2 = vrot.slane %v10592_v55, 4  ;;  %v19306_v38 = vld [vmem:[#allocation57_spill] sm:$0xff]  ;;  %v19317_v55 = vld [vmem:[#allocation68_spill] sm:$0xff] }
 0x5d6   : > { %v10545_v35 = vrot.slane %v10544_v58, 4  ;;  %v12401_v32 = vcombine.low %v10516_v53, %v10526_v31  ;;  %v10559_v58 = vrot.slane %v10558_v9, 4  ;;  %v10606_v17 = vor.u32 %v10605_v1, %v10602_v14  ;;  %v19311_v31 = vld [vmem:[#allocation64_spill] sm:$0xff]  ;;  %v19314_v9 = vld [vmem:[#allocation67_spill] sm:$0xff]  ;;  %v19318_v14 = vld [vmem:[#allocation70_spill] sm:$0xff] }
 0x5d7   : > { %v10616_v62 = vor.u32 %v10615_v49, %v10611_v3  ;;  %v10619_v50 = vshll.u32 %v18346_v56, 16  ;;  %v10574_v18 = vsel %vm14684_vm15, %v10569_v57, %v10573_v16  ;;  %v19304_v30 = vcombine.low %v19302_v7, %v19303_v42  ;;  %v19321_v49 = vld [vmem:[#allocation72_spill] sm:$0xff] }
 0x5d8   : > { %v10550_v51 = vsel %vm14684_vm15, %v10545_v35, %v10549_v59  ;;  %v10564_v11 = vsel %vm14684_vm15, %v10559_v58, %v10563_v21  ;;  %v10607_v15 = vrot.slane %v10606_v17, 4  ;;  %v19296_v21 = vld [vmem:[#allocation45_spill] sm:$0xff]  ;;  %v19297_v35 = vld [vmem:[#allocation46_spill] sm:$0xff]  ;;  %v19307_v59 = vcombine.low %v19305_v4, %v19306_v38  ;;  %v19328_v57 = vld [vmem:[#allocation76_spill] sm:$0xff] }
 0x5d9   : > { %v12402_v12 = vcombine.low %v10540_v40, %v10550_v51  ;;  %v10617_v6 = vrot.slane %v10616_v62, 4  ;;  %v10621_v10 = vrot.slane %v10619_v50, 5  ;;  %v12403_v44 = vcombine.low %v10564_v11, %v10574_v18  ;;  %v19323_v40 = vld [vmem:[#allocation73_spill] sm:$0xff] }
 0x5da   : > { %v10612_v56 = vsel %vm14684_vm15, %v10607_v15, %v10611_v3  ;;  %v19298_v34 = vcombine.low %v19296_v21, %v19297_v35  ;;  %v19310_v53 = vcombine.low %v19308_v46, %v19309_v39  ;;  %v19313_v51 = vcombine.low %v19311_v31, %v19312_v5  ;;  %v19320_v3 = vld [vmem:[#allocation71_spill] sm:$0xff] }
 0x5db   : > { %v10622_v54 = vsel %vm14684_vm15, %v10617_v6, %v10621_v10  ;;  %v19316_v37 = vcombine.low %v19314_v9, %v19315_v27  ;;  %v19319_v1 = vcombine.low %v19317_v55, %v19318_v14  ;;  %v19329_v16 = vcombine.low %v18067_v25, %v19328_v57 }
 0x5dc   : > { %13477 = vmatmul.mubr.msk.bf16.gmra.mrb[16].mxu1 %vm7299_vm11, %v12399_v28  ;;  %v10583_v28 = vrot.slane %v10582_v33, 4  ;;  %v12405_v29 = vcombine.low %v10612_v56, %v10622_v54  ;;  %v19324_v33 = vld [vmem:[#allocation74_spill] sm:$0xff]  ;;  %v19332_v17 = vcombine.low %v18097_v41, %v18103_v20 }
 0x5dd   : > { %13480 = vmatprep.mubr.msk.bf16.mxu1 %vm7299_vm11, %v12400_v23  ;;  %v10597_v23 = vrot.slane %v10595_v22, 5  ;;  %v19325_v52 = vcombine.low %v19323_v40, %v19324_v33  ;;  %v19326_v22 = vld [vmem:[#allocation75_spill] sm:$0xff] }
 0x5de   : > { %v10588_v63 = vsel %vm14684_vm15, %v10583_v28, %v10587_v24  ;;  %v19299_v24 = vld [vmem:[#allocation48_spill] sm:$0xff] }
 0x5df   : > { %v10598_v0 = vsel %vm14684_vm15, %v10593_v2, %v10597_v23  ;;  %v19301_v36 = vcombine.low %v19299_v24, %v19300_v45  ;;  %v19330_v2 = vld [vmem:[#allocation77_spill] sm:$0xff] }
 0x5e0   : > { %v12404_v48 = vcombine.low %v10588_v63, %v10598_v0  ;;  %v19331_v58 = vcombine.low %v18089_v61, %v19330_v2 }
 0x5e4   : > { %13481 = vmatmul.mubr.msk.bf16.gmra.mrb[20].mxu1 %vm7299_vm11, %v12401_v32  ;;  %v19322_v32 = vcombine.low %v19320_v3, %v19321_v49 }
 0x5e5   : > { %13484 = vmatprep.mubr.msk.bf16.mxu1 %vm7299_vm11, %v12402_v12  ;;  %v19327_v12 = vcombine.low %v18059_v19, %v19326_v22  ;;  %v18576_v19 = vld [vmem:[%s18689_s5] ss:$0 sm:$0xff] }
 0x5ec   : > { %13485 = vmatmul.mubr.msk.bf16.gmra.mrb[24].mxu1 %vm7299_vm11, %v12403_v44 }
 0x5ed   : > { %13488 = vmatprep.mubr.msk.bf16.mxu1 %vm7299_vm11, %v12404_v48 }
 0x5f4   : > { %13489 = vmatmul.mubr.msk.bf16.gmra.mrb[28].mxu1 %vm7299_vm11, %v12405_v29 }
 0x5f5   : > { %13494 = vmatprep.mubr.msk.bf16.mxu1 %vm7299_vm11, %v19298_v34 }
 0x5fc   : > { %13495 = vmatmul.mubr.msk.bf16.vlgmr.msra.gmra.mrb[0].mxu1 %vm7299_vm11, %v19301_v36 }
 0x5fd   : > { %13498 = vmatprep.mubr.msk.bf16.mxu1 %vm7299_vm11, %v19304_v30 }
 0x604   : > { %13499 = vmatmul.mubr.msk.bf16.gmra.mrb[4].mxu1 %vm7299_vm11, %v19307_v59 }
 0x605   : > { %13502 = vmatprep.mubr.msk.bf16.mxu1 %vm7299_vm11, %v19310_v53 }
 0x60c   : > { %13503 = vmatmul.mubr.msk.bf16.gmra.mrb[8].mxu1 %vm7299_vm11, %v19313_v51 }
 0x60d   : > { %13506 = vmatprep.mubr.msk.bf16.mxu1 %vm7299_vm11, %v19316_v37 }
 0x614   : > { %13507 = vmatmul.mubr.msk.bf16.gmra.mrb[12].mxu1 %vm7299_vm11, %v19319_v1 }
 0x615   : > { %13510 = vmatprep.mubr.msk.bf16.mxu1 %vm7299_vm11, %v19322_v32 }
 0x61c   : > { %13511 = vmatmul.mubr.msk.bf16.gmra.mrb[16].mxu1 %vm7299_vm11, %v19325_v52 }
 0x61d   : > { %13514 = vmatprep.mubr.msk.bf16.mxu1 %vm7299_vm11, %v19327_v12 }
 0x624   : > { %13515 = vmatmul.mubr.msk.bf16.gmra.mrb[20].mxu1 %vm7299_vm11, %v19329_v16 }
 0x625   : > { %13518 = vmatprep.mubr.msk.bf16.mxu1 %vm7299_vm11, %v19331_v58 }
 0x62c   : > { %13519 = vmatmul.mubr.msk.bf16.gmra.mrb[24].mxu1 %vm7299_vm11, %v19332_v17 }
 0x62d   : > { %13522 = vmatprep.mubr.msk.bf16.mxu1 %vm7299_vm11, %v12455_v60 }
 0x634   : > { %13523 = vmatmul.mubr.msk.bf16.gmra.mrb[28].mxu1 %vm7299_vm11, %v12456_v8 }
 0x6cf   : > { %v13496_v25 = vpop.f32.mrb[0].mxu1 }
 0x6d0   : > { %v11404_v61 = vadd.f32 %v13496_v25, %v18576_v19  ;;  %v11236_v41 = vpop.f32.mrb[1].mxu1 }
 0x6d1   : > { %v11402_v20 = vadd.f32 %v18576_v19, %v11236_v41  ;;  %v13497_v62 = vpop.f32.mrb[2].mxu1 }
 0x6d2   : > { %v11436_v43 = vmax.f32 %v11404_v61, 0.0  ;;  %v11405_v13 = vadd.f32 %v13497_v62, %v18576_v19  ;;  %v11239_v60 = vpop.f32.mrb[3].mxu1 }
 0x6d3   : > { %v11434_v26 = vmax.f32 %v11402_v20, 0.0  ;;  %v11403_v47 = vadd.f32 %v18576_v19, %v11239_v60 }
 0x6d4   : > { %v12578_v8 = vpack.c.bf16 %v11436_v43, %v11436_v43  ;;  %v11437_v50 = vmax.f32 %v11405_v13, 0.0 }
 0x6d5   : > { %v12576_v28 = vpack.c.bf16 %v11434_v26, %v11434_v26  ;;  %v11435_v23 = vmax.f32 %v11403_v47, 0.0 }
 0x6d6   : > { %11596 = vst.msk [vmem:[%s18586_s10 + $0x8] sm:$0xf] %vm395_vm3, %v12578_v8  ;;  %v12579_v18 = vpack.c.bf16 %v11437_v50, %v11437_v50 }
 0x6d7   : > { %11594 = vst.msk [vmem:[%s18586_s10] sm:$0xf] %vm395_vm3, %v12576_v28  ;;  %v12577_v0 = vpack.c.bf16 %v11435_v23, %v11435_v23  ;;  %v13500_v11 = vpop.f32.mrb[4].mxu1 }
 0x6d8   : > { %11597 = vst.msk [vmem:[%s18586_s10 + $0xc] sm:$0xf] %vm395_vm3, %v12579_v18  ;;  %v11408_v15 = vadd.f32 %v13500_v11, %v18576_v19  ;;  %v11252_v6 = vpop.f32.mrb[5].mxu1 }
 0x6d9   : > { %11595 = vst.msk [vmem:[%s18586_s10 + $0x4] sm:$0xf] %vm395_vm3, %v12577_v0  ;;  %v11406_v10 = vadd.f32 %v18576_v19, %v11252_v6  ;;  %v13501_v44 = vpop.f32.mrb[6].mxu1 }
 0x6da   : > { %v11440_v63 = vmax.f32 %v11408_v15, 0.0  ;;  %v11409_v48 = vadd.f32 %v13501_v44, %v18576_v19  ;;  %v11255_v56 = vpop.f32.mrb[7].mxu1 }
 0x6db   : > { %v11438_v54 = vmax.f32 %v11406_v10, 0.0  ;;  %v11407_v29 = vadd.f32 %v18576_v19, %v11255_v56 }
 0x6dc   : > { %v12582_v21 = vpack.c.bf16 %v11440_v63, %v11440_v63  ;;  %v11441_v35 = vmax.f32 %v11409_v48, 0.0 }
 0x6dd   : > { %v12580_v34 = vpack.c.bf16 %v11438_v54, %v11438_v54  ;;  %v11439_v24 = vmax.f32 %v11407_v29, 0.0 }
 0x6de   : > { %11600 = vst.msk [vmem:[%s18586_s10 + $0x18] sm:$0xf] %vm395_vm3, %v12582_v21  ;;  %v12583_v45 = vpack.c.bf16 %v11441_v35, %v11441_v35 }
 0x6df   : > { %11598 = vst.msk [vmem:[%s18586_s10 + $0x10] sm:$0xf] %vm395_vm3, %v12580_v34  ;;  %v12581_v36 = vpack.c.bf16 %v11439_v24, %v11439_v24  ;;  %v13504_v7 = vpop.f32.mrb[8].mxu1 }
 0x6e0   : > { %11601 = vst.msk [vmem:[%s18586_s10 + $0x1c] sm:$0xf] %vm395_vm3, %v12583_v45  ;;  %v11412_v42 = vadd.f32 %v13504_v7, %v18576_v19  ;;  %v11268_v30 = vpop.f32.mrb[9].mxu1 }
 0x6e1   : > { %11599 = vst.msk [vmem:[%s18586_s10 + $0x14] sm:$0xf] %vm395_vm3, %v12581_v36  ;;  %v11410_v4 = vadd.f32 %v18576_v19, %v11268_v30  ;;  %v13505_v38 = vpop.f32.mrb[10].mxu1 }
 0x6e2   : > { %v11444_v59 = vmax.f32 %v11412_v42, 0.0  ;;  %v11413_v46 = vadd.f32 %v13505_v38, %v18576_v19  ;;  %v11271_v39 = vpop.f32.mrb[11].mxu1 }
 0x6e3   : > { %v11442_v53 = vmax.f32 %v11410_v4, 0.0  ;;  %v11411_v31 = vadd.f32 %v18576_v19, %v11271_v39 }
 0x6e4   : > { %v12586_v5 = vpack.c.bf16 %v11444_v59, %v11444_v59  ;;  %v11445_v51 = vmax.f32 %v11413_v46, 0.0 }
 0x6e5   : > { %v12584_v9 = vpack.c.bf16 %v11442_v53, %v11442_v53  ;;  %v11443_v27 = vmax.f32 %v11411_v31, 0.0 }
 0x6e6   : > { %11604 = vst.msk [vmem:[%s18586_s10 + $0x28] sm:$0xf] %vm395_vm3, %v12586_v5  ;;  %v12587_v37 = vpack.c.bf16 %v11445_v51, %v11445_v51 }
 0x6e7   : > { %11602 = vst.msk [vmem:[%s18586_s10 + $0x20] sm:$0xf] %vm395_vm3, %v12584_v9  ;;  %v12585_v55 = vpack.c.bf16 %v11443_v27, %v11443_v27  ;;  %v13508_v14 = vpop.f32.mrb[12].mxu1 }
 0x6e8   : > { %11605 = vst.msk [vmem:[%s18586_s10 + $0x2c] sm:$0xf] %vm395_vm3, %v12587_v37  ;;  %v11416_v1 = vadd.f32 %v13508_v14, %v18576_v19  ;;  %v11284_v3 = vpop.f32.mrb[13].mxu1 }
 0x6e9   : > { %11603 = vst.msk [vmem:[%s18586_s10 + $0x24] sm:$0xf] %vm395_vm3, %v12585_v55  ;;  %v11414_v49 = vadd.f32 %v18576_v19, %v11284_v3  ;;  %v13509_v32 = vpop.f32.mrb[14].mxu1 }
 0x6ea   : > { %v11448_v40 = vmax.f32 %v11416_v1, 0.0  ;;  %v11417_v33 = vadd.f32 %v13509_v32, %v18576_v19  ;;  %v11287_v52 = vpop.f32.mrb[15].mxu1 }
 0x6eb   : > { %v11446_v22 = vmax.f32 %v11414_v49, 0.0  ;;  %v11415_v12 = vadd.f32 %v18576_v19, %v11287_v52 }
 0x6ec   : > { %v12590_v57 = vpack.c.bf16 %v11448_v40, %v11448_v40  ;;  %v11449_v16 = vmax.f32 %v11417_v33, 0.0 }
 0x6ed   : > { %v12588_v2 = vpack.c.bf16 %v11446_v22, %v11446_v22  ;;  %v11447_v58 = vmax.f32 %v11415_v12, 0.0 }
 0x6ee   : > { %11608 = vst.msk [vmem:[%s18586_s10 + $0x38] sm:$0xf] %vm395_vm3, %v12590_v57  ;;  %v12591_v17 = vpack.c.bf16 %v11449_v16, %v11449_v16 }
 0x6ef   : > { %11606 = vst.msk [vmem:[%s18586_s10 + $0x30] sm:$0xf] %vm395_vm3, %v12588_v2  ;;  %v12589_v25 = vpack.c.bf16 %v11447_v58, %v11447_v58  ;;  %v13512_v61 = vpop.f32.mrb[16].mxu1 }
 0x6f0   : > { %11609 = vst.msk [vmem:[%s18586_s10 + $0x3c] sm:$0xf] %vm395_vm3, %v12591_v17  ;;  %v11420_v41 = vadd.f32 %v13512_v61, %v18576_v19  ;;  %v11300_v20 = vpop.f32.mrb[17].mxu1 }
 0x6f1   : > { %11607 = vst.msk [vmem:[%s18586_s10 + $0x34] sm:$0xf] %vm395_vm3, %v12589_v25  ;;  %v11418_v62 = vadd.f32 %v18576_v19, %v11300_v20  ;;  %v13513_v43 = vpop.f32.mrb[18].mxu1 }
 0x6f2   : > { %v11452_v13 = vmax.f32 %v11420_v41, 0.0  ;;  %v11421_v60 = vadd.f32 %v13513_v43, %v18576_v19  ;;  %v11303_v26 = vpop.f32.mrb[19].mxu1 }
 0x6f3   : > { %v11450_v47 = vmax.f32 %v11418_v62, 0.0  ;;  %v11419_v8 = vadd.f32 %v18576_v19, %v11303_v26 }
 0x6f4   : > { %v12594_v50 = vpack.c.bf16 %v11452_v13, %v11452_v13  ;;  %v11453_v28 = vmax.f32 %v11421_v60, 0.0 }
 0x6f5   : > { %v12592_v23 = vpack.c.bf16 %v11450_v47, %v11450_v47  ;;  %v11451_v18 = vmax.f32 %v11419_v8, 0.0 }
 0x6f6   : > { %11612 = vst.msk [vmem:[%s18586_s10 + $0x48] sm:$0xf] %vm395_vm3, %v12594_v50  ;;  %v12595_v0 = vpack.c.bf16 %v11453_v28, %v11453_v28 }
 0x6f7   : > { %11610 = vst.msk [vmem:[%s18586_s10 + $0x40] sm:$0xf] %vm395_vm3, %v12592_v23  ;;  %v12593_v11 = vpack.c.bf16 %v11451_v18, %v11451_v18  ;;  %v13516_v15 = vpop.f32.mrb[20].mxu1 }
 0x6f8   : > { %11613 = vst.msk [vmem:[%s18586_s10 + $0x4c] sm:$0xf] %vm395_vm3, %v12595_v0  ;;  %v11424_v6 = vadd.f32 %v13516_v15, %v18576_v19  ;;  %v11316_v10 = vpop.f32.mrb[21].mxu1 }
 0x6f9   : > { %11611 = vst.msk [vmem:[%s18586_s10 + $0x44] sm:$0xf] %vm395_vm3, %v12593_v11  ;;  %v11422_v44 = vadd.f32 %v18576_v19, %v11316_v10  ;;  %v13517_v63 = vpop.f32.mrb[22].mxu1 }
 0x6fa   : > { %v11456_v48 = vmax.f32 %v11424_v6, 0.0  ;;  %v11425_v56 = vadd.f32 %v13517_v63, %v18576_v19  ;;  %v11319_v54 = vpop.f32.mrb[23].mxu1 }
 0x6fb   : > { %v11454_v29 = vmax.f32 %v11422_v44, 0.0  ;;  %v11423_v21 = vadd.f32 %v18576_v19, %v11319_v54 }
 0x6fc   : > { %v12598_v35 = vpack.c.bf16 %v11456_v48, %v11456_v48  ;;  %v11457_v34 = vmax.f32 %v11425_v56, 0.0 }
 0x6fd   : > { %v12596_v24 = vpack.c.bf16 %v11454_v29, %v11454_v29  ;;  %v11455_v45 = vmax.f32 %v11423_v21, 0.0 }
 0x6fe   : > { %11616 = vst.msk [vmem:[%s18586_s10 + $0x58] sm:$0xf] %vm395_vm3, %v12598_v35  ;;  %v12599_v36 = vpack.c.bf16 %v11457_v34, %v11457_v34 }
 0x6ff   : > { %11614 = vst.msk [vmem:[%s18586_s10 + $0x50] sm:$0xf] %vm395_vm3, %v12596_v24  ;;  %v12597_v7 = vpack.c.bf16 %v11455_v45, %v11455_v45  ;;  %v13520_v42 = vpop.f32.mrb[24].mxu1 }
 0x700   : > { %11617 = vst.msk [vmem:[%s18586_s10 + $0x5c] sm:$0xf] %vm395_vm3, %v12599_v36  ;;  %v11428_v30 = vadd.f32 %v13520_v42, %v18576_v19  ;;  %v11332_v4 = vpop.f32.mrb[25].mxu1 }
 0x701   : > { %11615 = vst.msk [vmem:[%s18586_s10 + $0x54] sm:$0xf] %vm395_vm3, %v12597_v7  ;;  %v11426_v38 = vadd.f32 %v18576_v19, %v11332_v4  ;;  %v13521_v59 = vpop.f32.mrb[26].mxu1 }
 0x702   : > { %v11460_v46 = vmax.f32 %v11428_v30, 0.0  ;;  %v11429_v39 = vadd.f32 %v13521_v59, %v18576_v19  ;;  %v11335_v53 = vpop.f32.mrb[27].mxu1 }
 0x703   : > { %v11458_v31 = vmax.f32 %v11426_v38, 0.0  ;;  %v11427_v5 = vadd.f32 %v18576_v19, %v11335_v53 }
 0x704   : > { %v12602_v51 = vpack.c.bf16 %v11460_v46, %v11460_v46  ;;  %v11461_v9 = vmax.f32 %v11429_v39, 0.0 }
 0x705   : > { %v12600_v27 = vpack.c.bf16 %v11458_v31, %v11458_v31  ;;  %v11459_v37 = vmax.f32 %v11427_v5, 0.0 }
 0x706   : > { %11620 = vst.msk [vmem:[%s18586_s10 + $0x68] sm:$0xf] %vm395_vm3, %v12602_v51  ;;  %v12603_v55 = vpack.c.bf16 %v11461_v9, %v11461_v9 }
 0x707   : > { %11618 = vst.msk [vmem:[%s18586_s10 + $0x60] sm:$0xf] %vm395_vm3, %v12600_v27  ;;  %v12601_v14 = vpack.c.bf16 %v11459_v37, %v11459_v37  ;;  %v13524_v1 = vpop.f32.mrb[28].mxu1 }
 0x708   : > { %11621 = vst.msk [vmem:[%s18586_s10 + $0x6c] sm:$0xf] %vm395_vm3, %v12603_v55  ;;  %v11432_v3 = vadd.f32 %v13524_v1, %v18576_v19  ;;  %v11348_v49 = vpop.f32.mrb[29].mxu1 }
 0x709   : > { %11619 = vst.msk [vmem:[%s18586_s10 + $0x64] sm:$0xf] %vm395_vm3, %v12601_v14  ;;  %v11430_v32 = vadd.f32 %v18576_v19, %v11348_v49  ;;  %v13525_v40 = vpop.f32.mrb[30].mxu1 }
 0x70a   : > { %v11464_v33 = vmax.f32 %v11432_v3, 0.0  ;;  %v11433_v52 = vadd.f32 %v13525_v40, %v18576_v19  ;;  %v11351_v22 = vpop.f32.mrb[31].mxu1 }
 0x70b   : > { %v11462_v12 = vmax.f32 %v11430_v32, 0.0  ;;  %v11431_v57 = vadd.f32 %v18576_v19, %v11351_v22 }
 0x70c   : > { %v12606_v16 = vpack.c.bf16 %v11464_v33, %v11464_v33  ;;  %v11465_v2 = vmax.f32 %v11433_v52, 0.0 }
 0x70d   : > { %v12604_v58 = vpack.c.bf16 %v11462_v12, %v11462_v12  ;;  %v11463_v17 = vmax.f32 %v11431_v57, 0.0 }
 0x70e   : > { %11624 = vst.msk [vmem:[%s18586_s10 + $0x78] sm:$0xf] %vm395_vm3, %v12606_v16  ;;  %v12607_v25 = vpack.c.bf16 %v11465_v2, %v11465_v2 }
 0x70f   : > { %11622 = vst.msk [vmem:[%s18586_s10 + $0x70] sm:$0xf] %vm395_vm3, %v12604_v58  ;;  %v12605_v61 = vpack.c.bf16 %v11463_v17, %v11463_v17 }
 0x710   : > { %11625 = vst.msk [vmem:[%s18586_s10 + $0x7c] sm:$0xf] %vm395_vm3, %v12607_v25 }
 0x711   : > { %11623 = vst.msk [vmem:[%s18586_s10 + $0x74] sm:$0xf] %vm395_vm3, %v12605_v61 }
 0x712 PF: > { %s16_s21 = sadd.s32 1, %s14188_s21  }
 0x713   : > { %p13_p4 = scmp.ge.s32.totalorder %s16_s21, 4  }
 0x715   :  { %15 = sbr.rel (!%p13_p4) target bundleno = 1 (0x1), region = 99 }

</bundles_post_ra>
